<compile_context>
chip_gen: v7x
topology: tpu7x:2x2x1
jax: 0.10.0
libtpu: 0.0.40
codegen_flags: <defaults>
</compile_context>

<pallas_src>
import jax
import jax.numpy as jnp
from jax.experimental import pallas as pl
from jax.experimental.pallas import tpu as pltpu

_K = 5  # conv kernel size


# ----------------------------- in-kernel helpers ------------------------------

def _conv_bn_relu(act, col_ref, w_ref, sc_ref, sh_ref):
    """5x5 'same' conv + folded BN + relu on HWC activations.

    act    : (H, W, Cin) value
    col_ref: (H+4, W, K*Cin) VMEM scratch; col[h, w, kw*Cin+ci] = xpad[h, w+kw, ci]
             (xpad = zero-padded input, pad=2 on both spatial dims)
    w_ref  : (K, K*Cin, Cout) ref; w[kh, kw*Cin+ci, co] = w_hwio[kh, kw, ci, co]
    sc_ref, sh_ref : (1, Cout) folded BatchNorm scale / shift (conv bias folded in)
    returns (H*W, Cout) value with relu applied.
    """
    H, W, Cin = act.shape
    Cout = w_ref.shape[2]

    # Build the width-im2col buffer once: 5 zero-padded, kw-shifted copies of the
    # input stacked along the channel (lane) axis.
    col_ref[...] = jnp.zeros_like(col_ref)
    for kw in range(_K):
        lo = max(0, 2 - kw)          # dest col w holds source col w + kw - 2
        hi = min(W, W + 2 - kw)
        col_ref[2:2 + H, lo:hi, kw * Cin:(kw + 1) * Cin] = (
            act[:, lo + kw - 2:hi + kw - 2, :])

    # 5 MXU matmuls with contraction depth K*Cin (instead of 25 of depth Cin).
    acc = jnp.zeros((H * W, Cout), jnp.float32)
    for kh in range(_K):
        patch = col_ref[kh:kh + H, :, :].reshape(H * W, _K * Cin)
        acc = acc + jnp.dot(patch, w_ref[kh], preferred_element_type=jnp.float32)

    return jnp.maximum(acc * sc_ref[...] + sh_ref[...], 0.0)


def _maxpool_4s2p1(y, pp_ref):
    """max_pool2d(kernel=4, stride=2, padding=1); input is post-relu (>=0) so
    zero padding is exactly equivalent to -inf padding.

    y: (H*W, C) value; pp_ref: (H+2, W+2, C) VMEM scratch.
    returns (H//2, W//2, C) value.
    """
    Hp, Wp, C = pp_ref.shape
    H, W = Hp - 2, Wp - 2
    pp_ref[...] = jnp.zeros_like(pp_ref)
    pp_ref[1:1 + H, 1:1 + W, :] = y.reshape(H, W, C)
    xp = pp_ref[...]
    # 4-wide / stride-2 window == max of adjacent stride-2 pair maxes (rows, then cols)
    mr = jnp.max(xp.reshape(Hp // 2, 2, Wp, C), axis=1)          # (H/2+1, Wp, C)
    rowm = jnp.maximum(mr[:-1], mr[1:])                          # (H/2,   Wp, C)
    mc = jnp.max(rowm.reshape(H // 2, Wp // 2, 2, C), axis=2)    # (H/2, W/2+1, C)
    return jnp.maximum(mc[:, :-1, :], mc[:, 1:, :])              # (H/2, W/2,   C)


# ----------------------------- kernels ----------------------------------------

def _conv_stack_kernel(x_ref, w1_ref, sc1_ref, sh1_ref, w2_ref, sc2_ref, sh2_ref,
                       w3_ref, sc3_ref, sh3_ref, fconv3_ref,
                       col1, pp1, col2, pp2, col3, pp3):
    # One batch element per grid step; every intermediate stays in VMEM/vregs.
    act = x_ref[0]                                               # (H, W, C0)
    y = _conv_bn_relu(act, col1, w1_ref, sc1_ref, sh1_ref)       # (H*W, 16)
    act = _maxpool_4s2p1(y, pp1)                                 # (H/2, W/2, 16)
    y = _conv_bn_relu(act, col2, w2_ref, sc2_ref, sh2_ref)       # (H2*W2, 32)
    act = _maxpool_4s2p1(y, pp2)                                 # (H3, W3, 32)
    y = _conv_bn_relu(act, col3, w3_ref, sc3_ref, sh3_ref)       # (H3*W3, 64)
    act = _maxpool_4s2p1(y, pp3)                                 # (H4, W4, 64)
    H4, W4, C3 = act.shape
    # Store spatial-major (HW, C); the tiny NCHW reorder happens on the host
    # (f_conv3 is a required HBM output either way).
    fconv3_ref[...] = act.reshape(1, H4 * W4, C3)


def _fc_kernel(x_ref, w1_ref, sc1_ref, sh1_ref, w2_ref, sc2_ref, sh2_ref,
               f1_ref, f2_ref):
    # fc1 + BN + relu, then (eval-mode dropout == identity) fc2 + BN + relu.
    # Whole batch in a single MXU matmul per layer.
    z1 = jnp.dot(x_ref[...], w1_ref[...], preferred_element_type=jnp.float32)
    f1 = jnp.maximum(z1 * sc1_ref[...] + sh1_ref[...], 0.0)
    f1_ref[...] = f1
    z2 = jnp.dot(f1, w2_ref[...], preferred_element_type=jnp.float32)
    f2_ref[...] = jnp.maximum(z2 * sc2_ref[...] + sh2_ref[...], 0.0)


# ----------------------------- wrappers ----------------------------------------

def _rep(shape):
    zeros = (0,) * len(shape)
    return pl.BlockSpec(shape, lambda *_: zeros)


def conv_stack(x_nhwc, w1, sc1, sh1, w2, sc2, sh2, w3, sc3, sh3):
    N, H, W, C0 = x_nhwc.shape
    C1, C2, C3 = w1.shape[2], w2.shape[2], w3.shape[2]
    H2, W2 = H // 2, W // 2
    H3, W3 = H2 // 2, W2 // 2
    H4, W4 = H3 // 2, W3 // 2
    f32 = jnp.float32
    return pl.pallas_call(
        _conv_stack_kernel,
        out_shape=jax.ShapeDtypeStruct((N, H4 * W4, C3), f32),
        grid=(N,),
        in_specs=[
            pl.BlockSpec((1, H, W, C0), lambda b: (b, 0, 0, 0)),
            _rep(w1.shape), _rep(sc1.shape), _rep(sh1.shape),
            _rep(w2.shape), _rep(sc2.shape), _rep(sh2.shape),
            _rep(w3.shape), _rep(sc3.shape), _rep(sh3.shape),
        ],
        out_specs=pl.BlockSpec((1, H4 * W4, C3), lambda b: (b, 0, 0)),
        scratch_shapes=[
            pltpu.VMEM((H + 4, W, _K * C0), f32),     # col1 (width-im2col, stage 1)
            pltpu.VMEM((H + 2, W + 2, C1), f32),      # pp1  (padded pool input)
            pltpu.VMEM((H2 + 4, W2, _K * C1), f32),   # col2
            pltpu.VMEM((H2 + 2, W2 + 2, C2), f32),    # pp2
            pltpu.VMEM((H3 + 4, W3, _K * C2), f32),   # col3
            pltpu.VMEM((H3 + 2, W3 + 2, C3), f32),    # pp3
        ],
        compiler_params=pltpu.CompilerParams(
            dimension_semantics=("parallel",)),       # v7x: 2 TCs split the batch
    )(x_nhwc, w1, sc1, sh1, w2, sc2, sh2, w3, sc3, sh3)


def fc_stack(x, w1, sc1, sh1, w2, sc2, sh2):
    # NOTE: at real model scale (fc1 weight 48000x3072 ~ 0.6 GiB) the fc1 weight must be
    # K-tiled via a reduction grid axis + VMEM accumulator (and ideally bf16) instead of
    # a single full block; at the scaled-down shapes one block per weight is optimal.
    N, Din = x.shape
    D1, D2 = w1.shape[1], w2.shape[1]
    f32 = jnp.float32
    return pl.pallas_call(
        _fc_kernel,
        out_shape=(jax.ShapeDtypeStruct((N, D1), f32),
                   jax.ShapeDtypeStruct((N, D2), f32)),
        grid=(1,),
        in_specs=[_rep(x.shape), _rep(w1.shape), _rep(sc1.shape), _rep(sh1.shape),
                  _rep(w2.shape), _rep(sc2.shape), _rep(sh2.shape)],
        out_specs=(_rep((N, D1)), _rep((N, D2))),
    )(x, w1, sc1, sh1, w2, sc2, sh2)


# ----------------------------- parameters --------------------------------------

def _fold_bn(bias, gamma, beta, mean, var, eps=1e-5):
    # BN(conv(x)+b) = conv(x)*s + ((b - mean)*s + beta),  s = gamma / sqrt(var+eps)
    s = gamma / jnp.sqrt(var + eps)
    t = (bias - mean) * s + beta
    return s.astype(jnp.float32), t.astype(jnp.float32)


def init_params(key, c_in=1, d_fc1_in=256, d_fc1=128, d_fc2=64):
    ks = iter(jax.random.split(key, 32))

    def conv_block(cin, cout):
        w = 0.1 * jax.random.normal(next(ks), (5, 5, cin, cout), jnp.float32)  # HWIO
        b = 0.1 * jax.random.normal(next(ks), (cout,), jnp.float32)
        gamma = 1.0 + 0.1 * jax.random.normal(next(ks), (cout,), jnp.float32)
        beta = 0.1 * jax.random.normal(next(ks), (cout,), jnp.float32)
        mean = 0.1 * jax.random.normal(next(ks), (cout,), jnp.float32)
        var = 0.5 + jnp.abs(jax.random.normal(next(ks), (cout,), jnp.float32))
        sc, sh = _fold_bn(b, gamma, beta, mean, var)
        return w, sc, sh

    def fc_block(din, dout):
        w = 0.05 * jax.random.normal(next(ks), (din, dout), jnp.float32)  # (in, out)
        b = 0.05 * jax.random.normal(next(ks), (dout,), jnp.float32)
        gamma = 1.0 + 0.1 * jax.random.normal(next(ks), (dout,), jnp.float32)
        beta = 0.1 * jax.random.normal(next(ks), (dout,), jnp.float32)
        mean = 0.1 * jax.random.normal(next(ks), (dout,), jnp.float32)
        var = 0.5 + jnp.abs(jax.random.normal(next(ks), (dout,), jnp.float32))
        sc, sh = _fold_bn(b, gamma, beta, mean, var)
        return w, sc, sh

    return {
        "conv1": conv_block(c_in, 16),
        "conv2": conv_block(16, 32),
        "conv3": conv_block(32, 64),
        "fc1": fc_block(d_fc1_in, d_fc1),
        "fc2": fc_block(d_fc1, d_fc2),
    }


def pack_params(params):
    """Repack raw (torch-equivalent) params into the kernel layouts (done once, outside jit)."""
    def pack_conv(w_hwio, sc, sh):
        K, _, Cin, Cout = w_hwio.shape
        # w_pk[kh, kw*Cin+ci, co] = w_hwio[kh, kw, ci, co]
        return w_hwio.reshape(K, K * Cin, Cout), sc.reshape(1, Cout), sh.reshape(1, Cout)

    def pack_fc(w_io, sc, sh):
        Dout = w_io.shape[1]
        return w_io, sc.reshape(1, Dout), sh.reshape(1, Dout)

    return {
        "conv1": pack_conv(*params["conv1"]),
        "conv2": pack_conv(*params["conv2"]),
        "conv3": pack_conv(*params["conv3"]),
        "fc1": pack_fc(*params["fc1"]),
        "fc2": pack_fc(*params["fc2"]),
    }


# ----------------------------- forward ------------------------------------------

def feature_forward(x_nchw, kparams):
    x = jnp.transpose(x_nchw, (0, 2, 3, 1)).astype(jnp.float32)   # NCHW -> NHWC (tiny)
    N = x.shape[0]
    w1, sc1, sh1 = kparams["conv1"]
    w2, sc2, sh2 = kparams["conv2"]
    w3, sc3, sh3 = kparams["conv3"]
    fw1, scf1, shf1 = kparams["fc1"]
    fw2, scf2, shf2 = kparams["fc2"]

    # One fused kernel for the whole conv trunk.
    fmap = conv_stack(x, w1, sc1, sh1, w2, sc2, sh2, w3, sc3, sh3)  # (N, H4*W4, C3)
    # torch .view flattens NCHW; kernel emits (N, HW, C) -> tiny reorder on host.
    f_conv3 = jnp.transpose(fmap, (0, 2, 1)).reshape(N, -1)

    # One fused kernel for fc1+BN+relu -> (dropout=id) -> fc2+BN+relu.
    f_fc1, f_fc2 = fc_stack(f_conv3, fw1, scf1, shf1, fw2, scf2, shf2)
    return {"f_conv3": f_conv3, "f_fc1": f_fc1, "f_fc2": f_fc2}


# ----------------------------- reference (pure JAX) ------------------------------

def reference_forward(x, params):
    x = x.astype(jnp.float32)
    hi = jax.lax.Precision.HIGHEST

    def conv_bn_relu_ref(h, w_hwio, sc, sh):
        y = jax.lax.conv_general_dilated(
            h, w_hwio, window_strides=(1, 1), padding=((2, 2), (2, 2)),
            dimension_numbers=("NCHW", "HWIO", "NCHW"), precision=hi)
        return jnp.maximum(y * sc.reshape(1, -1, 1, 1) + sh.reshape(1, -1, 1, 1), 0.0)

    def pool_ref(h):
        return jax.lax.reduce_window(
            h, -jnp.inf, jax.lax.max, (1, 1, 4, 4), (1, 1, 2, 2),
            ((0, 0), (0, 0), (1, 1), (1, 1)))

    h = pool_ref(conv_bn_relu_ref(x, *params["conv1"]))
    h = pool_ref(conv_bn_relu_ref(h, *params["conv2"]))
    h = pool_ref(conv_bn_relu_ref(h, *params["conv3"]))
    f_conv3 = h.reshape(h.shape[0], -1)
    w, sc, sh = params["fc1"]
    f_fc1 = jnp.maximum(jnp.dot(f_conv3, w, precision=hi) * sc + sh, 0.0)
    w, sc, sh = params["fc2"]
    f_fc2 = jnp.maximum(jnp.dot(f_fc1, w, precision=hi) * sc + sh, 0.0)
    return {"f_conv3": f_conv3, "f_fc1": f_fc1, "f_fc2": f_fc2}


# ----------------------------- main ----------------------------------------------

if __name__ == "__main__":
    B, C, H, W = 2, 1, 16, 16          # scaled-down MNIST-like input (NCHW)
    x = jax.random.normal(jax.random.PRNGKey(0), (B, C, H, W), jnp.float32)

    d_flat = 64 * (H // 8) * (W // 8)  # 64 * 2 * 2 = 256 (stands in for 48000)
    params = init_params(jax.random.PRNGKey(1), c_in=C,
                         d_fc1_in=d_flat, d_fc1=128, d_fc2=64)
    kparams = pack_params(params)

    out = jax.jit(feature_forward)(x, kparams)
    jax.block_until_ready(out)

    assert out["f_conv3"].shape == (B, d_flat)
    assert out["f_fc1"].shape == (B, 128)
    assert out["f_fc2"].shape == (B, 64)

    ref = reference_forward(x, params)
    for k in ("f_conv3", "f_fc1", "f_fc2"):
        assert jnp.allclose(out[k], ref[k], rtol=2e-2, atol=2e-2), (
            k, float(jnp.max(jnp.abs(out[k] - ref[k]))))

    print("KERNEL_OK")
</pallas_src>

<mosaic_0001>
module attributes {stable_mosaic.version = 11 : i64} {
  func.func @_conv_stack_kernel(%arg0: i32, %arg1: memref<1x16x16x1xf32, #tpu.memory_space<vmem>>, %arg2: memref<5x5x16xf32, #tpu.memory_space<vmem>>, %arg3: memref<1x16xf32, #tpu.memory_space<vmem>>, %arg4: memref<1x16xf32, #tpu.memory_space<vmem>>, %arg5: memref<5x80x32xf32, #tpu.memory_space<vmem>>, %arg6: memref<1x32xf32, #tpu.memory_space<vmem>>, %arg7: memref<1x32xf32, #tpu.memory_space<vmem>>, %arg8: memref<5x160x64xf32, #tpu.memory_space<vmem>>, %arg9: memref<1x64xf32, #tpu.memory_space<vmem>>, %arg10: memref<1x64xf32, #tpu.memory_space<vmem>>, %arg11: memref<1x4x64xf32, #tpu.memory_space<vmem>>, %arg12: memref<20x16x5xf32, #tpu.memory_space<vmem>>, %arg13: memref<18x18x16xf32, #tpu.memory_space<vmem>>, %arg14: memref<12x8x80xf32, #tpu.memory_space<vmem>>, %arg15: memref<10x10x32xf32, #tpu.memory_space<vmem>>, %arg16: memref<8x4x160xf32, #tpu.memory_space<vmem>>, %arg17: memref<6x6x64xf32, #tpu.memory_space<vmem>>) attributes {dimension_semantics = [#tpu.dimension_semantics<parallel>], iteration_bounds = array<i64: 2>, scalar_prefetch = 0 : i64, scratch_operands = 6 : i64, tpu.core_type = #tpu.core_type<tc>, window_params = [{transform_indices = @transform_0, window_bounds = array<i64: 1, 16, 16, 1>}, {pipeline_mode = #tpu.pipeline_mode<synchronous>, transform_indices = @transform_1, window_bounds = array<i64: 5, 5, 16>}, {pipeline_mode = #tpu.pipeline_mode<synchronous>, transform_indices = @transform_2, window_bounds = array<i64: 1, 16>}, {pipeline_mode = #tpu.pipeline_mode<synchronous>, transform_indices = @transform_3, window_bounds = array<i64: 1, 16>}, {pipeline_mode = #tpu.pipeline_mode<synchronous>, transform_indices = @transform_4, window_bounds = array<i64: 5, 80, 32>}, {pipeline_mode = #tpu.pipeline_mode<synchronous>, transform_indices = @transform_5, window_bounds = array<i64: 1, 32>}, {pipeline_mode = #tpu.pipeline_mode<synchronous>, transform_indices = @transform_6, window_bounds = array<i64: 1, 32>}, {pipeline_mode = #tpu.pipeline_mode<synchronous>, transform_indices = @transform_7, window_bounds = array<i64: 5, 160, 64>}, {pipeline_mode = #tpu.pipeline_mode<synchronous>, transform_indices = @transform_8, window_bounds = array<i64: 1, 64>}, {pipeline_mode = #tpu.pipeline_mode<synchronous>, transform_indices = @transform_9, window_bounds = array<i64: 1, 64>}, {transform_indices = @transform_10, window_bounds = array<i64: 1, 4, 64>}]} {
    %c0 = arith.constant 0 : index
    %c0_0 = arith.constant 0 : index
    %c0_1 = arith.constant 0 : index
    %c0_2 = arith.constant 0 : index
    %0 = vector.load %arg1[%c0, %c0_0, %c0_1, %c0_2] : memref<1x16x16x1xf32, #tpu.memory_space<vmem>>, vector<1x16x16x1xf32>
    %1 = vector.shape_cast %0 : vector<1x16x16x1xf32> to vector<16x16x1xf32>
    %cst = arith.constant 0.000000e+00 : f32
    %2 = vector.broadcast %cst : f32 to vector<20x16x5xf32>
    %c0_3 = arith.constant 0 : index
    %c0_4 = arith.constant 0 : index
    %c0_5 = arith.constant 0 : index
    %3 = vector.load %arg12[%c0_3, %c0_4, %c0_5] : memref<20x16x5xf32, #tpu.memory_space<vmem>>, vector<20x16x5xf32>
    tpu.vector_store %arg12[%c0_3, %c0_4, %c0_5], %2 {strides = array<i32>} : memref<20x16x5xf32, #tpu.memory_space<vmem>>, vector<20x16x5xf32>,
    %4 = vector.extract_strided_slice %1 {offsets = [0, 0, 0], sizes = [16, 14, 1], strides = [1, 1, 1]} : vector<16x16x1xf32> to vector<16x14x1xf32>
    %c2 = arith.constant 2 : index
    %c2_6 = arith.constant 2 : index
    %c0_7 = arith.constant 0 : index
    %5 = vector.load %arg12[%c2, %c2_6, %c0_7] : memref<20x16x5xf32, #tpu.memory_space<vmem>>, vector<16x14x1xf32>
    tpu.vector_store %arg12[%c2, %c2_6, %c0_7], %4 {strides = array<i32>} : memref<20x16x5xf32, #tpu.memory_space<vmem>>, vector<16x14x1xf32>,
    %6 = vector.extract_strided_slice %1 {offsets = [0, 0, 0], sizes = [16, 15, 1], strides = [1, 1, 1]} : vector<16x16x1xf32> to vector<16x15x1xf32>
    %c2_8 = arith.constant 2 : index
    %c1 = arith.constant 1 : index
    %c1_9 = arith.constant 1 : index
    %7 = vector.load %arg12[%c2_8, %c1, %c1_9] : memref<20x16x5xf32, #tpu.memory_space<vmem>>, vector<16x15x1xf32>
    tpu.vector_store %arg12[%c2_8, %c1, %c1_9], %6 {strides = array<i32>} : memref<20x16x5xf32, #tpu.memory_space<vmem>>, vector<16x15x1xf32>,
    %c2_10 = arith.constant 2 : index
    %c0_11 = arith.constant 0 : index
    %c2_12 = arith.constant 2 : index
    %8 = vector.load %arg12[%c2_10, %c0_11, %c2_12] : memref<20x16x5xf32, #tpu.memory_space<vmem>>, vector<16x16x1xf32>
    tpu.vector_store %arg12[%c2_10, %c0_11, %c2_12], %1 {strides = array<i32>} : memref<20x16x5xf32, #tpu.memory_space<vmem>>, vector<16x16x1xf32>,
    %9 = vector.extract_strided_slice %1 {offsets = [0, 1, 0], sizes = [16, 15, 1], strides = [1, 1, 1]} : vector<16x16x1xf32> to vector<16x15x1xf32>
    %c2_13 = arith.constant 2 : index
    %c0_14 = arith.constant 0 : index
    %c3 = arith.constant 3 : index
    %10 = vector.load %arg12[%c2_13, %c0_14, %c3] : memref<20x16x5xf32, #tpu.memory_space<vmem>>, vector<16x15x1xf32>
    tpu.vector_store %arg12[%c2_13, %c0_14, %c3], %9 {strides = array<i32>} : memref<20x16x5xf32, #tpu.memory_space<vmem>>, vector<16x15x1xf32>,
    %11 = vector.extract_strided_slice %1 {offsets = [0, 2, 0], sizes = [16, 14, 1], strides = [1, 1, 1]} : vector<16x16x1xf32> to vector<16x14x1xf32>
    %c2_15 = arith.constant 2 : index
    %c0_16 = arith.constant 0 : index
    %c4 = arith.constant 4 : index
    %12 = vector.load %arg12[%c2_15, %c0_16, %c4] : memref<20x16x5xf32, #tpu.memory_space<vmem>>, vector<16x14x1xf32>
    tpu.vector_store %arg12[%c2_15, %c0_16, %c4], %11 {strides = array<i32>} : memref<20x16x5xf32, #tpu.memory_space<vmem>>, vector<16x14x1xf32>,
    %cst_17 = arith.constant 0.000000e+00 : f32
    %13 = vector.broadcast %cst_17 : f32 to vector<256x16xf32>
    %c0_18 = arith.constant 0 : index
    %c0_19 = arith.constant 0 : index
    %c0_20 = arith.constant 0 : index
    %14 = vector.load %arg12[%c0_18, %c0_19, %c0_20] : memref<20x16x5xf32, #tpu.memory_space<vmem>>, vector<16x16x5xf32>
    %15 = vector.shape_cast %14 : vector<16x16x5xf32> to vector<256x5xf32>
    %c0_21 = arith.constant 0 : index
    %c0_22 = arith.constant 0 : index
    %c0_23 = arith.constant 0 : index
    %16 = vector.load %arg2[%c0_21, %c0_22, %c0_23] : memref<5x5x16xf32, #tpu.memory_space<vmem>>, vector<1x5x16xf32>
    %17 = vector.shape_cast %16 : vector<1x5x16xf32> to vector<5x16xf32>
    %cst_24 = arith.constant dense<0.000000e+00> : vector<256x16xf32>
    %18 = tpu.matmul %15, %17, %cst_24 {dimension_numbers = #tpu.dot_dimension_numbers<[1], [0], [0], [1], [0, 0, 1, 1], [], []>} : vector<256x5xf32>, vector<5x16xf32>, vector<256x16xf32> -> vector<256x16xf32>
    %19 = arith.addf %13, %18 : vector<256x16xf32>
    %c1_25 = arith.constant 1 : index
    %c0_26 = arith.constant 0 : index
    %c0_27 = arith.constant 0 : index
    %20 = vector.load %arg12[%c1_25, %c0_26, %c0_27] : memref<20x16x5xf32, #tpu.memory_space<vmem>>, vector<16x16x5xf32>
    %21 = vector.shape_cast %20 : vector<16x16x5xf32> to vector<256x5xf32>
    %c1_28 = arith.constant 1 : index
    %c0_29 = arith.constant 0 : index
    %c0_30 = arith.constant 0 : index
    %22 = vector.load %arg2[%c1_28, %c0_29, %c0_30] : memref<5x5x16xf32, #tpu.memory_space<vmem>>, vector<1x5x16xf32>
    %23 = vector.shape_cast %22 : vector<1x5x16xf32> to vector<5x16xf32>
    %cst_31 = arith.constant dense<0.000000e+00> : vector<256x16xf32>
    %24 = tpu.matmul %21, %23, %cst_31 {dimension_numbers = #tpu.dot_dimension_numbers<[1], [0], [0], [1], [0, 0, 1, 1], [], []>} : vector<256x5xf32>, vector<5x16xf32>, vector<256x16xf32> -> vector<256x16xf32>
    %25 = arith.addf %19, %24 : vector<256x16xf32>
    %c2_32 = arith.constant 2 : index
    %c0_33 = arith.constant 0 : index
    %c0_34 = arith.constant 0 : index
    %26 = vector.load %arg12[%c2_32, %c0_33, %c0_34] : memref<20x16x5xf32, #tpu.memory_space<vmem>>, vector<16x16x5xf32>
    %27 = vector.shape_cast %26 : vector<16x16x5xf32> to vector<256x5xf32>
    %c2_35 = arith.constant 2 : index
    %c0_36 = arith.constant 0 : index
    %c0_37 = arith.constant 0 : index
    %28 = vector.load %arg2[%c2_35, %c0_36, %c0_37] : memref<5x5x16xf32, #tpu.memory_space<vmem>>, vector<1x5x16xf32>
    %29 = vector.shape_cast %28 : vector<1x5x16xf32> to vector<5x16xf32>
    %cst_38 = arith.constant dense<0.000000e+00> : vector<256x16xf32>
    %30 = tpu.matmul %27, %29, %cst_38 {dimension_numbers = #tpu.dot_dimension_numbers<[1], [0], [0], [1], [0, 0, 1, 1], [], []>} : vector<256x5xf32>, vector<5x16xf32>, vector<256x16xf32> -> vector<256x16xf32>
    %31 = arith.addf %25, %30 : vector<256x16xf32>
    %c3_39 = arith.constant 3 : index
    %c0_40 = arith.constant 0 : index
    %c0_41 = arith.constant 0 : index
    %32 = vector.load %arg12[%c3_39, %c0_40, %c0_41] : memref<20x16x5xf32, #tpu.memory_space<vmem>>, vector<16x16x5xf32>
    %33 = vector.shape_cast %32 : vector<16x16x5xf32> to vector<256x5xf32>
    %c3_42 = arith.constant 3 : index
    %c0_43 = arith.constant 0 : index
    %c0_44 = arith.constant 0 : index
    %34 = vector.load %arg2[%c3_42, %c0_43, %c0_44] : memref<5x5x16xf32, #tpu.memory_space<vmem>>, vector<1x5x16xf32>
    %35 = vector.shape_cast %34 : vector<1x5x16xf32> to vector<5x16xf32>
    %cst_45 = arith.constant dense<0.000000e+00> : vector<256x16xf32>
    %36 = tpu.matmul %33, %35, %cst_45 {dimension_numbers = #tpu.dot_dimension_numbers<[1], [0], [0], [1], [0, 0, 1, 1], [], []>} : vector<256x5xf32>, vector<5x16xf32>, vector<256x16xf32> -> vector<256x16xf32>
    %37 = arith.addf %31, %36 : vector<256x16xf32>
    %c4_46 = arith.constant 4 : index
    %c0_47 = arith.constant 0 : index
    %c0_48 = arith.constant 0 : index
    %38 = vector.load %arg12[%c4_46, %c0_47, %c0_48] : memref<20x16x5xf32, #tpu.memory_space<vmem>>, vector<16x16x5xf32>
    %39 = vector.shape_cast %38 : vector<16x16x5xf32> to vector<256x5xf32>
    %c4_49 = arith.constant 4 : index
    %c0_50 = arith.constant 0 : index
    %c0_51 = arith.constant 0 : index
    %40 = vector.load %arg2[%c4_49, %c0_50, %c0_51] : memref<5x5x16xf32, #tpu.memory_space<vmem>>, vector<1x5x16xf32>
    %41 = vector.shape_cast %40 : vector<1x5x16xf32> to vector<5x16xf32>
    %cst_52 = arith.constant dense<0.000000e+00> : vector<256x16xf32>
    %42 = tpu.matmul %39, %41, %cst_52 {dimension_numbers = #tpu.dot_dimension_numbers<[1], [0], [0], [1], [0, 0, 1, 1], [], []>} : vector<256x5xf32>, vector<5x16xf32>, vector<256x16xf32> -> vector<256x16xf32>
    %43 = arith.addf %37, %42 : vector<256x16xf32>
    %c0_53 = arith.constant 0 : index
    %c0_54 = arith.constant 0 : index
    %44 = vector.load %arg3[%c0_53, %c0_54] : memref<1x16xf32, #tpu.memory_space<vmem>>, vector<1x16xf32>
    %45 = vector.broadcast %44 : vector<1x16xf32> to vector<256x16xf32>
    %46 = arith.mulf %43, %45 : vector<256x16xf32>
    %c0_55 = arith.constant 0 : index
    %c0_56 = arith.constant 0 : index
    %47 = vector.load %arg4[%c0_55, %c0_56] : memref<1x16xf32, #tpu.memory_space<vmem>>, vector<1x16xf32>
    %48 = vector.broadcast %47 : vector<1x16xf32> to vector<256x16xf32>
    %49 = arith.addf %46, %48 : vector<256x16xf32>
    %cst_57 = arith.constant 0.000000e+00 : f32
    %50 = vector.broadcast %cst_57 : f32 to vector<256x16xf32>
    %51 = arith.maximumf %49, %50 : vector<256x16xf32>
    %cst_58 = arith.constant 0.000000e+00 : f32
    %52 = vector.broadcast %cst_58 : f32 to vector<18x18x16xf32>
    %c0_59 = arith.constant 0 : index
    %c0_60 = arith.constant 0 : index
    %c0_61 = arith.constant 0 : index
    %53 = vector.load %arg13[%c0_59, %c0_60, %c0_61] : memref<18x18x16xf32, #tpu.memory_space<vmem>>, vector<18x18x16xf32>
    tpu.vector_store %arg13[%c0_59, %c0_60, %c0_61], %52 {strides = array<i32>} : memref<18x18x16xf32, #tpu.memory_space<vmem>>, vector<18x18x16xf32>,
    %54 = vector.shape_cast %51 : vector<256x16xf32> to vector<16x16x16xf32>
    %c1_62 = arith.constant 1 : index
    %c1_63 = arith.constant 1 : index
    %c0_64 = arith.constant 0 : index
    %55 = vector.load %arg13[%c1_62, %c1_63, %c0_64] : memref<18x18x16xf32, #tpu.memory_space<vmem>>, vector<16x16x16xf32>
    tpu.vector_store %arg13[%c1_62, %c1_63, %c0_64], %54 {strides = array<i32>} : memref<18x18x16xf32, #tpu.memory_space<vmem>>, vector<16x16x16xf32>,
    %c0_65 = arith.constant 0 : index
    %c0_66 = arith.constant 0 : index
    %c0_67 = arith.constant 0 : index
    %56 = vector.load %arg13[%c0_65, %c0_66, %c0_67] : memref<18x18x16xf32, #tpu.memory_space<vmem>>, vector<18x18x16xf32>
    %57 = vector.shape_cast %56 : vector<18x18x16xf32> to vector<9x2x18x16xf32>
    %cst_68 = arith.constant dense<0xFF800000> : vector<9x18x16xf32>
    %58 = vector.multi_reduction <maximumf>, %57, %cst_68 [1] : vector<9x2x18x16xf32> to vector<9x18x16xf32>
    %59 = vector.extract_strided_slice %58 {offsets = [0, 0, 0], sizes = [8, 18, 16], strides = [1, 1, 1]} : vector<9x18x16xf32> to vector<8x18x16xf32>
    %60 = vector.extract_strided_slice %58 {offsets = [1, 0, 0], sizes = [8, 18, 16], strides = [1, 1, 1]} : vector<9x18x16xf32> to vector<8x18x16xf32>
    %61 = arith.maximumf %59, %60 : vector<8x18x16xf32>
    %62 = vector.shape_cast %61 : vector<8x18x16xf32> to vector<8x9x2x16xf32>
    %cst_69 = arith.constant dense<0xFF800000> : vector<8x9x16xf32>
    %63 = vector.multi_reduction <maximumf>, %62, %cst_69 [2] : vector<8x9x2x16xf32> to vector<8x9x16xf32>
    %64 = vector.extract_strided_slice %63 {offsets = [0, 0, 0], sizes = [8, 8, 16], strides = [1, 1, 1]} : vector<8x9x16xf32> to vector<8x8x16xf32>
    %65 = vector.extract_strided_slice %63 {offsets = [0, 1, 0], sizes = [8, 8, 16], strides = [1, 1, 1]} : vector<8x9x16xf32> to vector<8x8x16xf32>
    %66 = arith.maximumf %64, %65 : vector<8x8x16xf32>
    %cst_70 = arith.constant 0.000000e+00 : f32
    %67 = vector.broadcast %cst_70 : f32 to vector<12x8x80xf32>
    %c0_71 = arith.constant 0 : index
    %c0_72 = arith.constant 0 : index
    %c0_73 = arith.constant 0 : index
    %68 = vector.load %arg14[%c0_71, %c0_72, %c0_73] : memref<12x8x80xf32, #tpu.memory_space<vmem>>, vector<12x8x80xf32>
    tpu.vector_store %arg14[%c0_71, %c0_72, %c0_73], %67 {strides = array<i32>} : memref<12x8x80xf32, #tpu.memory_space<vmem>>, vector<12x8x80xf32>,
    %69 = vector.extract_strided_slice %66 {offsets = [0, 0, 0], sizes = [8, 6, 16], strides = [1, 1, 1]} : vector<8x8x16xf32> to vector<8x6x16xf32>
    %c2_74 = arith.constant 2 : index
    %c2_75 = arith.constant 2 : index
    %c0_76 = arith.constant 0 : index
    %70 = vector.load %arg14[%c2_74, %c2_75, %c0_76] : memref<12x8x80xf32, #tpu.memory_space<vmem>>, vector<8x6x16xf32>
    tpu.vector_store %arg14[%c2_74, %c2_75, %c0_76], %69 {strides = array<i32>} : memref<12x8x80xf32, #tpu.memory_space<vmem>>, vector<8x6x16xf32>,
    %71 = vector.extract_strided_slice %66 {offsets = [0, 0, 0], sizes = [8, 7, 16], strides = [1, 1, 1]} : vector<8x8x16xf32> to vector<8x7x16xf32>
    %c2_77 = arith.constant 2 : index
    %c1_78 = arith.constant 1 : index
    %c16 = arith.constant 16 : index
    %72 = vector.load %arg14[%c2_77, %c1_78, %c16] : memref<12x8x80xf32, #tpu.memory_space<vmem>>, vector<8x7x16xf32>
    tpu.vector_store %arg14[%c2_77, %c1_78, %c16], %71 {strides = array<i32>} : memref<12x8x80xf32, #tpu.memory_space<vmem>>, vector<8x7x16xf32>,
    %c2_79 = arith.constant 2 : index
    %c0_80 = arith.constant 0 : index
    %c32 = arith.constant 32 : index
    %73 = vector.load %arg14[%c2_79, %c0_80, %c32] : memref<12x8x80xf32, #tpu.memory_space<vmem>>, vector<8x8x16xf32>
    tpu.vector_store %arg14[%c2_79, %c0_80, %c32], %66 {strides = array<i32>} : memref<12x8x80xf32, #tpu.memory_space<vmem>>, vector<8x8x16xf32>,
    %74 = vector.extract_strided_slice %66 {offsets = [0, 1, 0], sizes = [8, 7, 16], strides = [1, 1, 1]} : vector<8x8x16xf32> to vector<8x7x16xf32>
    %c2_81 = arith.constant 2 : index
    %c0_82 = arith.constant 0 : index
    %c48 = arith.constant 48 : index
    %75 = vector.load %arg14[%c2_81, %c0_82, %c48] : memref<12x8x80xf32, #tpu.memory_space<vmem>>, vector<8x7x16xf32>
    tpu.vector_store %arg14[%c2_81, %c0_82, %c48], %74 {strides = array<i32>} : memref<12x8x80xf32, #tpu.memory_space<vmem>>, vector<8x7x16xf32>,
    %76 = vector.extract_strided_slice %66 {offsets = [0, 2, 0], sizes = [8, 6, 16], strides = [1, 1, 1]} : vector<8x8x16xf32> to vector<8x6x16xf32>
    %c2_83 = arith.constant 2 : index
    %c0_84 = arith.constant 0 : index
    %c64 = arith.constant 64 : index
    %77 = vector.load %arg14[%c2_83, %c0_84, %c64] : memref<12x8x80xf32, #tpu.memory_space<vmem>>, vector<8x6x16xf32>
    tpu.vector_store %arg14[%c2_83, %c0_84, %c64], %76 {strides = array<i32>} : memref<12x8x80xf32, #tpu.memory_space<vmem>>, vector<8x6x16xf32>,
    %cst_85 = arith.constant 0.000000e+00 : f32
    %78 = vector.broadcast %cst_85 : f32 to vector<64x32xf32>
    %c0_86 = arith.constant 0 : index
    %c0_87 = arith.constant 0 : index
    %c0_88 = arith.constant 0 : index
    %79 = vector.load %arg14[%c0_86, %c0_87, %c0_88] : memref<12x8x80xf32, #tpu.memory_space<vmem>>, vector<8x8x80xf32>
    %80 = vector.shape_cast %79 : vector<8x8x80xf32> to vector<64x80xf32>
    %c0_89 = arith.constant 0 : index
    %c0_90 = arith.constant 0 : index
    %c0_91 = arith.constant 0 : index
    %81 = vector.load %arg5[%c0_89, %c0_90, %c0_91] : memref<5x80x32xf32, #tpu.memory_space<vmem>>, vector<1x80x32xf32>
    %82 = vector.shape_cast %81 : vector<1x80x32xf32> to vector<80x32xf32>
    %cst_92 = arith.constant dense<0.000000e+00> : vector<64x32xf32>
    %83 = tpu.matmul %80, %82, %cst_92 {dimension_numbers = #tpu.dot_dimension_numbers<[1], [0], [0], [1], [0, 0, 1, 1], [], []>} : vector<64x80xf32>, vector<80x32xf32>, vector<64x32xf32> -> vector<64x32xf32>
    %84 = arith.addf %78, %83 : vector<64x32xf32>
    %c1_93 = arith.constant 1 : index
    %c0_94 = arith.constant 0 : index
    %c0_95 = arith.constant 0 : index
    %85 = vector.load %arg14[%c1_93, %c0_94, %c0_95] : memref<12x8x80xf32, #tpu.memory_space<vmem>>, vector<8x8x80xf32>
    %86 = vector.shape_cast %85 : vector<8x8x80xf32> to vector<64x80xf32>
    %c1_96 = arith.constant 1 : index
    %c0_97 = arith.constant 0 : index
    %c0_98 = arith.constant 0 : index
    %87 = vector.load %arg5[%c1_96, %c0_97, %c0_98] : memref<5x80x32xf32, #tpu.memory_space<vmem>>, vector<1x80x32xf32>
    %88 = vector.shape_cast %87 : vector<1x80x32xf32> to vector<80x32xf32>
    %cst_99 = arith.constant dense<0.000000e+00> : vector<64x32xf32>
    %89 = tpu.matmul %86, %88, %cst_99 {dimension_numbers = #tpu.dot_dimension_numbers<[1], [0], [0], [1], [0, 0, 1, 1], [], []>} : vector<64x80xf32>, vector<80x32xf32>, vector<64x32xf32> -> vector<64x32xf32>
    %90 = arith.addf %84, %89 : vector<64x32xf32>
    %c2_100 = arith.constant 2 : index
    %c0_101 = arith.constant 0 : index
    %c0_102 = arith.constant 0 : index
    %91 = vector.load %arg14[%c2_100, %c0_101, %c0_102] : memref<12x8x80xf32, #tpu.memory_space<vmem>>, vector<8x8x80xf32>
    %92 = vector.shape_cast %91 : vector<8x8x80xf32> to vector<64x80xf32>
    %c2_103 = arith.constant 2 : index
    %c0_104 = arith.constant 0 : index
    %c0_105 = arith.constant 0 : index
    %93 = vector.load %arg5[%c2_103, %c0_104, %c0_105] : memref<5x80x32xf32, #tpu.memory_space<vmem>>, vector<1x80x32xf32>
    %94 = vector.shape_cast %93 : vector<1x80x32xf32> to vector<80x32xf32>
    %cst_106 = arith.constant dense<0.000000e+00> : vector<64x32xf32>
    %95 = tpu.matmul %92, %94, %cst_106 {dimension_numbers = #tpu.dot_dimension_numbers<[1], [0], [0], [1], [0, 0, 1, 1], [], []>} : vector<64x80xf32>, vector<80x32xf32>, vector<64x32xf32> -> vector<64x32xf32>
    %96 = arith.addf %90, %95 : vector<64x32xf32>
    %c3_107 = arith.constant 3 : index
    %c0_108 = arith.constant 0 : index
    %c0_109 = arith.constant 0 : index
    %97 = vector.load %arg14[%c3_107, %c0_108, %c0_109] : memref<12x8x80xf32, #tpu.memory_space<vmem>>, vector<8x8x80xf32>
    %98 = vector.shape_cast %97 : vector<8x8x80xf32> to vector<64x80xf32>
    %c3_110 = arith.constant 3 : index
    %c0_111 = arith.constant 0 : index
    %c0_112 = arith.constant 0 : index
    %99 = vector.load %arg5[%c3_110, %c0_111, %c0_112] : memref<5x80x32xf32, #tpu.memory_space<vmem>>, vector<1x80x32xf32>
    %100 = vector.shape_cast %99 : vector<1x80x32xf32> to vector<80x32xf32>
    %cst_113 = arith.constant dense<0.000000e+00> : vector<64x32xf32>
    %101 = tpu.matmul %98, %100, %cst_113 {dimension_numbers = #tpu.dot_dimension_numbers<[1], [0], [0], [1], [0, 0, 1, 1], [], []>} : vector<64x80xf32>, vector<80x32xf32>, vector<64x32xf32> -> vector<64x32xf32>
    %102 = arith.addf %96, %101 : vector<64x32xf32>
    %c4_114 = arith.constant 4 : index
    %c0_115 = arith.constant 0 : index
    %c0_116 = arith.constant 0 : index
    %103 = vector.load %arg14[%c4_114, %c0_115, %c0_116] : memref<12x8x80xf32, #tpu.memory_space<vmem>>, vector<8x8x80xf32>
    %104 = vector.shape_cast %103 : vector<8x8x80xf32> to vector<64x80xf32>
    %c4_117 = arith.constant 4 : index
    %c0_118 = arith.constant 0 : index
    %c0_119 = arith.constant 0 : index
    %105 = vector.load %arg5[%c4_117, %c0_118, %c0_119] : memref<5x80x32xf32, #tpu.memory_space<vmem>>, vector<1x80x32xf32>
    %106 = vector.shape_cast %105 : vector<1x80x32xf32> to vector<80x32xf32>
    %cst_120 = arith.constant dense<0.000000e+00> : vector<64x32xf32>
    %107 = tpu.matmul %104, %106, %cst_120 {dimension_numbers = #tpu.dot_dimension_numbers<[1], [0], [0], [1], [0, 0, 1, 1], [], []>} : vector<64x80xf32>, vector<80x32xf32>, vector<64x32xf32> -> vector<64x32xf32>
    %108 = arith.addf %102, %107 : vector<64x32xf32>
    %c0_121 = arith.constant 0 : index
    %c0_122 = arith.constant 0 : index
    %109 = vector.load %arg6[%c0_121, %c0_122] : memref<1x32xf32, #tpu.memory_space<vmem>>, vector<1x32xf32>
    %110 = vector.broadcast %109 : vector<1x32xf32> to vector<64x32xf32>
    %111 = arith.mulf %108, %110 : vector<64x32xf32>
    %c0_123 = arith.constant 0 : index
    %c0_124 = arith.constant 0 : index
    %112 = vector.load %arg7[%c0_123, %c0_124] : memref<1x32xf32, #tpu.memory_space<vmem>>, vector<1x32xf32>
    %113 = vector.broadcast %112 : vector<1x32xf32> to vector<64x32xf32>
    %114 = arith.addf %111, %113 : vector<64x32xf32>
    %cst_125 = arith.constant 0.000000e+00 : f32
    %115 = vector.broadcast %cst_125 : f32 to vector<64x32xf32>
    %116 = arith.maximumf %114, %115 : vector<64x32xf32>
    %cst_126 = arith.constant 0.000000e+00 : f32
    %117 = vector.broadcast %cst_126 : f32 to vector<10x10x32xf32>
    %c0_127 = arith.constant 0 : index
    %c0_128 = arith.constant 0 : index
    %c0_129 = arith.constant 0 : index
    %118 = vector.load %arg15[%c0_127, %c0_128, %c0_129] : memref<10x10x32xf32, #tpu.memory_space<vmem>>, vector<10x10x32xf32>
    tpu.vector_store %arg15[%c0_127, %c0_128, %c0_129], %117 {strides = array<i32>} : memref<10x10x32xf32, #tpu.memory_space<vmem>>, vector<10x10x32xf32>,
    %119 = vector.shape_cast %116 : vector<64x32xf32> to vector<8x8x32xf32>
    %c1_130 = arith.constant 1 : index
    %c1_131 = arith.constant 1 : index
    %c0_132 = arith.constant 0 : index
    %120 = vector.load %arg15[%c1_130, %c1_131, %c0_132] : memref<10x10x32xf32, #tpu.memory_space<vmem>>, vector<8x8x32xf32>
    tpu.vector_store %arg15[%c1_130, %c1_131, %c0_132], %119 {strides = array<i32>} : memref<10x10x32xf32, #tpu.memory_space<vmem>>, vector<8x8x32xf32>,
    %c0_133 = arith.constant 0 : index
    %c0_134 = arith.constant 0 : index
    %c0_135 = arith.constant 0 : index
    %121 = vector.load %arg15[%c0_133, %c0_134, %c0_135] : memref<10x10x32xf32, #tpu.memory_space<vmem>>, vector<10x10x32xf32>
    %122 = vector.shape_cast %121 : vector<10x10x32xf32> to vector<5x2x10x32xf32>
    %cst_136 = arith.constant dense<0xFF800000> : vector<5x10x32xf32>
    %123 = vector.multi_reduction <maximumf>, %122, %cst_136 [1] : vector<5x2x10x32xf32> to vector<5x10x32xf32>
    %124 = vector.extract_strided_slice %123 {offsets = [0, 0, 0], sizes = [4, 10, 32], strides = [1, 1, 1]} : vector<5x10x32xf32> to vector<4x10x32xf32>
    %125 = vector.extract_strided_slice %123 {offsets = [1, 0, 0], sizes = [4, 10, 32], strides = [1, 1, 1]} : vector<5x10x32xf32> to vector<4x10x32xf32>
    %126 = arith.maximumf %124, %125 : vector<4x10x32xf32>
    %127 = vector.shape_cast %126 : vector<4x10x32xf32> to vector<4x5x2x32xf32>
    %cst_137 = arith.constant dense<0xFF800000> : vector<4x5x32xf32>
    %128 = vector.multi_reduction <maximumf>, %127, %cst_137 [2] : vector<4x5x2x32xf32> to vector<4x5x32xf32>
    %129 = vector.extract_strided_slice %128 {offsets = [0, 0, 0], sizes = [4, 4, 32], strides = [1, 1, 1]} : vector<4x5x32xf32> to vector<4x4x32xf32>
    %130 = vector.extract_strided_slice %128 {offsets = [0, 1, 0], sizes = [4, 4, 32], strides = [1, 1, 1]} : vector<4x5x32xf32> to vector<4x4x32xf32>
    %131 = arith.maximumf %129, %130 : vector<4x4x32xf32>
    %cst_138 = arith.constant 0.000000e+00 : f32
    %132 = vector.broadcast %cst_138 : f32 to vector<8x4x160xf32>
    %c0_139 = arith.constant 0 : index
    %c0_140 = arith.constant 0 : index
    %c0_141 = arith.constant 0 : index
    %133 = vector.load %arg16[%c0_139, %c0_140, %c0_141] : memref<8x4x160xf32, #tpu.memory_space<vmem>>, vector<8x4x160xf32>
    tpu.vector_store %arg16[%c0_139, %c0_140, %c0_141], %132 {strides = array<i32>} : memref<8x4x160xf32, #tpu.memory_space<vmem>>, vector<8x4x160xf32>,
    %134 = vector.extract_strided_slice %131 {offsets = [0, 0, 0], sizes = [4, 2, 32], strides = [1, 1, 1]} : vector<4x4x32xf32> to vector<4x2x32xf32>
    %c2_142 = arith.constant 2 : index
    %c2_143 = arith.constant 2 : index
    %c0_144 = arith.constant 0 : index
    %135 = vector.load %arg16[%c2_142, %c2_143, %c0_144] : memref<8x4x160xf32, #tpu.memory_space<vmem>>, vector<4x2x32xf32>
    tpu.vector_store %arg16[%c2_142, %c2_143, %c0_144], %134 {strides = array<i32>} : memref<8x4x160xf32, #tpu.memory_space<vmem>>, vector<4x2x32xf32>,
    %136 = vector.extract_strided_slice %131 {offsets = [0, 0, 0], sizes = [4, 3, 32], strides = [1, 1, 1]} : vector<4x4x32xf32> to vector<4x3x32xf32>
    %c2_145 = arith.constant 2 : index
    %c1_146 = arith.constant 1 : index
    %c32_147 = arith.constant 32 : index
    %137 = vector.load %arg16[%c2_145, %c1_146, %c32_147] : memref<8x4x160xf32, #tpu.memory_space<vmem>>, vector<4x3x32xf32>
    tpu.vector_store %arg16[%c2_145, %c1_146, %c32_147], %136 {strides = array<i32>} : memref<8x4x160xf32, #tpu.memory_space<vmem>>, vector<4x3x32xf32>,
    %c2_148 = arith.constant 2 : index
    %c0_149 = arith.constant 0 : index
    %c64_150 = arith.constant 64 : index
    %138 = vector.load %arg16[%c2_148, %c0_149, %c64_150] : memref<8x4x160xf32, #tpu.memory_space<vmem>>, vector<4x4x32xf32>
    tpu.vector_store %arg16[%c2_148, %c0_149, %c64_150], %131 {strides = array<i32>} : memref<8x4x160xf32, #tpu.memory_space<vmem>>, vector<4x4x32xf32>,
    %139 = vector.extract_strided_slice %131 {offsets = [0, 1, 0], sizes = [4, 3, 32], strides = [1, 1, 1]} : vector<4x4x32xf32> to vector<4x3x32xf32>
    %c2_151 = arith.constant 2 : index
    %c0_152 = arith.constant 0 : index
    %c96 = arith.constant 96 : index
    %140 = vector.load %arg16[%c2_151, %c0_152, %c96] : memref<8x4x160xf32, #tpu.memory_space<vmem>>, vector<4x3x32xf32>
    tpu.vector_store %arg16[%c2_151, %c0_152, %c96], %139 {strides = array<i32>} : memref<8x4x160xf32, #tpu.memory_space<vmem>>, vector<4x3x32xf32>,
    %141 = vector.extract_strided_slice %131 {offsets = [0, 2, 0], sizes = [4, 2, 32], strides = [1, 1, 1]} : vector<4x4x32xf32> to vector<4x2x32xf32>
    %c2_153 = arith.constant 2 : index
    %c0_154 = arith.constant 0 : index
    %c128 = arith.constant 128 : index
    %142 = vector.load %arg16[%c2_153, %c0_154, %c128] : memref<8x4x160xf32, #tpu.memory_space<vmem>>, vector<4x2x32xf32>
    tpu.vector_store %arg16[%c2_153, %c0_154, %c128], %141 {strides = array<i32>} : memref<8x4x160xf32, #tpu.memory_space<vmem>>, vector<4x2x32xf32>,
    %cst_155 = arith.constant 0.000000e+00 : f32
    %143 = vector.broadcast %cst_155 : f32 to vector<16x64xf32>
    %c0_156 = arith.constant 0 : index
    %c0_157 = arith.constant 0 : index
    %c0_158 = arith.constant 0 : index
    %144 = vector.load %arg16[%c0_156, %c0_157, %c0_158] : memref<8x4x160xf32, #tpu.memory_space<vmem>>, vector<4x4x160xf32>
    %145 = vector.shape_cast %144 : vector<4x4x160xf32> to vector<16x160xf32>
    %c0_159 = arith.constant 0 : index
    %c0_160 = arith.constant 0 : index
    %c0_161 = arith.constant 0 : index
    %146 = vector.load %arg8[%c0_159, %c0_160, %c0_161] : memref<5x160x64xf32, #tpu.memory_space<vmem>>, vector<1x160x64xf32>
    %147 = vector.shape_cast %146 : vector<1x160x64xf32> to vector<160x64xf32>
    %cst_162 = arith.constant dense<0.000000e+00> : vector<16x64xf32>
    %148 = tpu.matmul %145, %147, %cst_162 {dimension_numbers = #tpu.dot_dimension_numbers<[1], [0], [0], [1], [0, 0, 1, 1], [], []>} : vector<16x160xf32>, vector<160x64xf32>, vector<16x64xf32> -> vector<16x64xf32>
    %149 = arith.addf %143, %148 : vector<16x64xf32>
    %c1_163 = arith.constant 1 : index
    %c0_164 = arith.constant 0 : index
    %c0_165 = arith.constant 0 : index
    %150 = vector.load %arg16[%c1_163, %c0_164, %c0_165] : memref<8x4x160xf32, #tpu.memory_space<vmem>>, vector<4x4x160xf32>
    %151 = vector.shape_cast %150 : vector<4x4x160xf32> to vector<16x160xf32>
    %c1_166 = arith.constant 1 : index
    %c0_167 = arith.constant 0 : index
    %c0_168 = arith.constant 0 : index
    %152 = vector.load %arg8[%c1_166, %c0_167, %c0_168] : memref<5x160x64xf32, #tpu.memory_space<vmem>>, vector<1x160x64xf32>
    %153 = vector.shape_cast %152 : vector<1x160x64xf32> to vector<160x64xf32>
    %cst_169 = arith.constant dense<0.000000e+00> : vector<16x64xf32>
    %154 = tpu.matmul %151, %153, %cst_169 {dimension_numbers = #tpu.dot_dimension_numbers<[1], [0], [0], [1], [0, 0, 1, 1], [], []>} : vector<16x160xf32>, vector<160x64xf32>, vector<16x64xf32> -> vector<16x64xf32>
    %155 = arith.addf %149, %154 : vector<16x64xf32>
    %c2_170 = arith.constant 2 : index
    %c0_171 = arith.constant 0 : index
    %c0_172 = arith.constant 0 : index
    %156 = vector.load %arg16[%c2_170, %c0_171, %c0_172] : memref<8x4x160xf32, #tpu.memory_space<vmem>>, vector<4x4x160xf32>
    %157 = vector.shape_cast %156 : vector<4x4x160xf32> to vector<16x160xf32>
    %c2_173 = arith.constant 2 : index
    %c0_174 = arith.constant 0 : index
    %c0_175 = arith.constant 0 : index
    %158 = vector.load %arg8[%c2_173, %c0_174, %c0_175] : memref<5x160x64xf32, #tpu.memory_space<vmem>>, vector<1x160x64xf32>
    %159 = vector.shape_cast %158 : vector<1x160x64xf32> to vector<160x64xf32>
    %cst_176 = arith.constant dense<0.000000e+00> : vector<16x64xf32>
    %160 = tpu.matmul %157, %159, %cst_176 {dimension_numbers = #tpu.dot_dimension_numbers<[1], [0], [0], [1], [0, 0, 1, 1], [], []>} : vector<16x160xf32>, vector<160x64xf32>, vector<16x64xf32> -> vector<16x64xf32>
    %161 = arith.addf %155, %160 : vector<16x64xf32>
    %c3_177 = arith.constant 3 : index
    %c0_178 = arith.constant 0 : index
    %c0_179 = arith.constant 0 : index
    %162 = vector.load %arg16[%c3_177, %c0_178, %c0_179] : memref<8x4x160xf32, #tpu.memory_space<vmem>>, vector<4x4x160xf32>
    %163 = vector.shape_cast %162 : vector<4x4x160xf32> to vector<16x160xf32>
    %c3_180 = arith.constant 3 : index
    %c0_181 = arith.constant 0 : index
    %c0_182 = arith.constant 0 : index
    %164 = vector.load %arg8[%c3_180, %c0_181, %c0_182] : memref<5x160x64xf32, #tpu.memory_space<vmem>>, vector<1x160x64xf32>
    %165 = vector.shape_cast %164 : vector<1x160x64xf32> to vector<160x64xf32>
    %cst_183 = arith.constant dense<0.000000e+00> : vector<16x64xf32>
    %166 = tpu.matmul %163, %165, %cst_183 {dimension_numbers = #tpu.dot_dimension_numbers<[1], [0], [0], [1], [0, 0, 1, 1], [], []>} : vector<16x160xf32>, vector<160x64xf32>, vector<16x64xf32> -> vector<16x64xf32>
    %167 = arith.addf %161, %166 : vector<16x64xf32>
    %c4_184 = arith.constant 4 : index
    %c0_185 = arith.constant 0 : index
    %c0_186 = arith.constant 0 : index
    %168 = vector.load %arg16[%c4_184, %c0_185, %c0_186] : memref<8x4x160xf32, #tpu.memory_space<vmem>>, vector<4x4x160xf32>
    %169 = vector.shape_cast %168 : vector<4x4x160xf32> to vector<16x160xf32>
    %c4_187 = arith.constant 4 : index
    %c0_188 = arith.constant 0 : index
    %c0_189 = arith.constant 0 : index
    %170 = vector.load %arg8[%c4_187, %c0_188, %c0_189] : memref<5x160x64xf32, #tpu.memory_space<vmem>>, vector<1x160x64xf32>
    %171 = vector.shape_cast %170 : vector<1x160x64xf32> to vector<160x64xf32>
    %cst_190 = arith.constant dense<0.000000e+00> : vector<16x64xf32>
    %172 = tpu.matmul %169, %171, %cst_190 {dimension_numbers = #tpu.dot_dimension_numbers<[1], [0], [0], [1], [0, 0, 1, 1], [], []>} : vector<16x160xf32>, vector<160x64xf32>, vector<16x64xf32> -> vector<16x64xf32>
    %173 = arith.addf %167, %172 : vector<16x64xf32>
    %c0_191 = arith.constant 0 : index
    %c0_192 = arith.constant 0 : index
    %174 = vector.load %arg9[%c0_191, %c0_192] : memref<1x64xf32, #tpu.memory_space<vmem>>, vector<1x64xf32>
    %175 = vector.broadcast %174 : vector<1x64xf32> to vector<16x64xf32>
    %176 = arith.mulf %173, %175 : vector<16x64xf32>
    %c0_193 = arith.constant 0 : index
    %c0_194 = arith.constant 0 : index
    %177 = vector.load %arg10[%c0_193, %c0_194] : memref<1x64xf32, #tpu.memory_space<vmem>>, vector<1x64xf32>
    %178 = vector.broadcast %177 : vector<1x64xf32> to vector<16x64xf32>
    %179 = arith.addf %176, %178 : vector<16x64xf32>
    %cst_195 = arith.constant 0.000000e+00 : f32
    %180 = vector.broadcast %cst_195 : f32 to vector<16x64xf32>
    %181 = arith.maximumf %179, %180 : vector<16x64xf32>
    %cst_196 = arith.constant 0.000000e+00 : f32
    %182 = vector.broadcast %cst_196 : f32 to vector<6x6x64xf32>
    %c0_197 = arith.constant 0 : index
    %c0_198 = arith.constant 0 : index
    %c0_199 = arith.constant 0 : index
    %183 = vector.load %arg17[%c0_197, %c0_198, %c0_199] : memref<6x6x64xf32, #tpu.memory_space<vmem>>, vector<6x6x64xf32>
    tpu.vector_store %arg17[%c0_197, %c0_198, %c0_199], %182 {strides = array<i32>} : memref<6x6x64xf32, #tpu.memory_space<vmem>>, vector<6x6x64xf32>,
    %184 = vector.shape_cast %181 : vector<16x64xf32> to vector<4x4x64xf32>
    %c1_200 = arith.constant 1 : index
    %c1_201 = arith.constant 1 : index
    %c0_202 = arith.constant 0 : index
    %185 = vector.load %arg17[%c1_200, %c1_201, %c0_202] : memref<6x6x64xf32, #tpu.memory_space<vmem>>, vector<4x4x64xf32>
    tpu.vector_store %arg17[%c1_200, %c1_201, %c0_202], %184 {strides = array<i32>} : memref<6x6x64xf32, #tpu.memory_space<vmem>>, vector<4x4x64xf32>,
    %c0_203 = arith.constant 0 : index
    %c0_204 = arith.constant 0 : index
    %c0_205 = arith.constant 0 : index
    %186 = vector.load %arg17[%c0_203, %c0_204, %c0_205] : memref<6x6x64xf32, #tpu.memory_space<vmem>>, vector<6x6x64xf32>
    %187 = vector.shape_cast %186 : vector<6x6x64xf32> to vector<3x2x6x64xf32>
    %cst_206 = arith.constant dense<0xFF800000> : vector<3x6x64xf32>
    %188 = vector.multi_reduction <maximumf>, %187, %cst_206 [1] : vector<3x2x6x64xf32> to vector<3x6x64xf32>
    %189 = vector.extract_strided_slice %188 {offsets = [0, 0, 0], sizes = [2, 6, 64], strides = [1, 1, 1]} : vector<3x6x64xf32> to vector<2x6x64xf32>
    %190 = vector.extract_strided_slice %188 {offsets = [1, 0, 0], sizes = [2, 6, 64], strides = [1, 1, 1]} : vector<3x6x64xf32> to vector<2x6x64xf32>
    %191 = arith.maximumf %189, %190 : vector<2x6x64xf32>
    %192 = vector.shape_cast %191 : vector<2x6x64xf32> to vector<2x3x2x64xf32>
    %cst_207 = arith.constant dense<0xFF800000> : vector<2x3x64xf32>
    %193 = vector.multi_reduction <maximumf>, %192, %cst_207 [2] : vector<2x3x2x64xf32> to vector<2x3x64xf32>
    %194 = vector.extract_strided_slice %193 {offsets = [0, 0, 0], sizes = [2, 2, 64], strides = [1, 1, 1]} : vector<2x3x64xf32> to vector<2x2x64xf32>
    %195 = vector.extract_strided_slice %193 {offsets = [0, 1, 0], sizes = [2, 2, 64], strides = [1, 1, 1]} : vector<2x3x64xf32> to vector<2x2x64xf32>
    %196 = arith.maximumf %194, %195 : vector<2x2x64xf32>
    %197 = vector.shape_cast %196 : vector<2x2x64xf32> to vector<1x4x64xf32>
    %c0_208 = arith.constant 0 : index
    %c0_209 = arith.constant 0 : index
    %c0_210 = arith.constant 0 : index
    %198 = vector.load %arg11[%c0_208, %c0_209, %c0_210] : memref<1x4x64xf32, #tpu.memory_space<vmem>>, vector<1x4x64xf32>
    tpu.vector_store %arg11[%c0_208, %c0_209, %c0_210], %197 {strides = array<i32>} : memref<1x4x64xf32, #tpu.memory_space<vmem>>, vector<1x4x64xf32>,
    return
  }
  func.func @transform_0(%arg0: i32) -> (i32, i32, i32, i32) {
    %c0_i32 = arith.constant 0 : i32
    %c0_i32_0 = arith.constant 0 : i32
    %c0_i32_1 = arith.constant 0 : i32
    %c0_i32_2 = arith.constant 0 : i32
    return %arg0, %c0_i32, %c0_i32_0, %c0_i32_1 : i32, i32, i32, i32
  }
  func.func @transform_1(%arg0: i32) -> (i32, i32, i32) {
    %c0_i32 = arith.constant 0 : i32
    %c0_i32_0 = arith.constant 0 : i32
    %c0_i32_1 = arith.constant 0 : i32
    %c0_i32_2 = arith.constant 0 : i32
    return %c0_i32, %c0_i32_0, %c0_i32_1 : i32, i32, i32
  }
  func.func @transform_2(%arg0: i32) -> (i32, i32) {
    %c0_i32 = arith.constant 0 : i32
    %c0_i32_0 = arith.constant 0 : i32
    %c0_i32_1 = arith.constant 0 : i32
    return %c0_i32, %c0_i32_0 : i32, i32
  }
  func.func @transform_3(%arg0: i32) -> (i32, i32) {
    %c0_i32 = arith.constant 0 : i32
    %c0_i32_0 = arith.constant 0 : i32
    %c0_i32_1 = arith.constant 0 : i32
    return %c0_i32, %c0_i32_0 : i32, i32
  }
  func.func @transform_4(%arg0: i32) -> (i32, i32, i32) {
    %c0_i32 = arith.constant 0 : i32
    %c0_i32_0 = arith.constant 0 : i32
    %c0_i32_1 = arith.constant 0 : i32
    %c0_i32_2 = arith.constant 0 : i32
    return %c0_i32, %c0_i32_0, %c0_i32_1 : i32, i32, i32
  }
  func.func @transform_5(%arg0: i32) -> (i32, i32) {
    %c0_i32 = arith.constant 0 : i32
    %c0_i32_0 = arith.constant 0 : i32
    %c0_i32_1 = arith.constant 0 : i32
    return %c0_i32, %c0_i32_0 : i32, i32
  }
  func.func @transform_6(%arg0: i32) -> (i32, i32) {
    %c0_i32 = arith.constant 0 : i32
    %c0_i32_0 = arith.constant 0 : i32
    %c0_i32_1 = arith.constant 0 : i32
    return %c0_i32, %c0_i32_0 : i32, i32
  }
  func.func @transform_7(%arg0: i32) -> (i32, i32, i32) {
    %c0_i32 = arith.constant 0 : i32
    %c0_i32_0 = arith.constant 0 : i32
    %c0_i32_1 = arith.constant 0 : i32
    %c0_i32_2 = arith.constant 0 : i32
    return %c0_i32, %c0_i32_0, %c0_i32_1 : i32, i32, i32
  }
  func.func @transform_8(%arg0: i32) -> (i32, i32) {
    %c0_i32 = arith.constant 0 : i32
    %c0_i32_0 = arith.constant 0 : i32
    %c0_i32_1 = arith.constant 0 : i32
    return %c0_i32, %c0_i32_0 : i32, i32
  }
  func.func @transform_9(%arg0: i32) -> (i32, i32) {
    %c0_i32 = arith.constant 0 : i32
    %c0_i32_0 = arith.constant 0 : i32
    %c0_i32_1 = arith.constant 0 : i32
    return %c0_i32, %c0_i32_0 : i32, i32
  }
  func.func @transform_10(%arg0: i32) -> (i32, i32, i32) {
    %c0_i32 = arith.constant 0 : i32
    %c0_i32_0 = arith.constant 0 : i32
    %c0_i32_1 = arith.constant 0 : i32
    return %arg0, %c0_i32, %c0_i32_0 : i32, i32, i32
  }
}

module attributes {stable_mosaic.version = 11 : i64} {
  func.func @_fc_kernel(%arg0: i32, %arg1: memref<2x256xf32, #tpu.memory_space<vmem>>, %arg2: memref<256x128xf32, #tpu.memory_space<vmem>>, %arg3: memref<1x128xf32, #tpu.memory_space<vmem>>, %arg4: memref<1x128xf32, #tpu.memory_space<vmem>>, %arg5: memref<128x64xf32, #tpu.memory_space<vmem>>, %arg6: memref<1x64xf32, #tpu.memory_space<vmem>>, %arg7: memref<1x64xf32, #tpu.memory_space<vmem>>, %arg8: memref<2x128xf32, #tpu.memory_space<vmem>>, %arg9: memref<2x64xf32, #tpu.memory_space<vmem>>) attributes {dimension_semantics = [#tpu.dimension_semantics<arbitrary>], iteration_bounds = array<i64: 1>, scalar_prefetch = 0 : i64, scratch_operands = 0 : i64, tpu.core_type = #tpu.core_type<tc>, window_params = [{pipeline_mode = #tpu.pipeline_mode<synchronous>, transform_indices = @transform_0, window_bounds = array<i64: 2, 256>}, {pipeline_mode = #tpu.pipeline_mode<synchronous>, transform_indices = @transform_1, window_bounds = array<i64: 256, 128>}, {pipeline_mode = #tpu.pipeline_mode<synchronous>, transform_indices = @transform_2, window_bounds = array<i64: 1, 128>}, {pipeline_mode = #tpu.pipeline_mode<synchronous>, transform_indices = @transform_3, window_bounds = array<i64: 1, 128>}, {pipeline_mode = #tpu.pipeline_mode<synchronous>, transform_indices = @transform_4, window_bounds = array<i64: 128, 64>}, {pipeline_mode = #tpu.pipeline_mode<synchronous>, transform_indices = @transform_5, window_bounds = array<i64: 1, 64>}, {pipeline_mode = #tpu.pipeline_mode<synchronous>, transform_indices = @transform_6, window_bounds = array<i64: 1, 64>}, {pipeline_mode = #tpu.pipeline_mode<synchronous>, transform_indices = @transform_7, window_bounds = array<i64: 2, 128>}, {pipeline_mode = #tpu.pipeline_mode<synchronous>, transform_indices = @transform_8, window_bounds = array<i64: 2, 64>}]} {
    %c0 = arith.constant 0 : index
    %c0_0 = arith.constant 0 : index
    %0 = vector.load %arg1[%c0, %c0_0] : memref<2x256xf32, #tpu.memory_space<vmem>>, vector<2x256xf32>
    %c0_1 = arith.constant 0 : index
    %c0_2 = arith.constant 0 : index
    %1 = vector.load %arg2[%c0_1, %c0_2] : memref<256x128xf32, #tpu.memory_space<vmem>>, vector<256x128xf32>
    %cst = arith.constant dense<0.000000e+00> : vector<2x128xf32>
    %2 = tpu.matmul %0, %1, %cst {dimension_numbers = #tpu.dot_dimension_numbers<[1], [0], [0], [1], [0, 0, 1, 1], [], []>} : vector<2x256xf32>, vector<256x128xf32>, vector<2x128xf32> -> vector<2x128xf32>
    %c0_3 = arith.constant 0 : index
    %c0_4 = arith.constant 0 : index
    %3 = vector.load %arg3[%c0_3, %c0_4] : memref<1x128xf32, #tpu.memory_space<vmem>>, vector<1x128xf32>
    %4 = vector.broadcast %3 : vector<1x128xf32> to vector<2x128xf32>
    %5 = arith.mulf %2, %4 : vector<2x128xf32>
    %c0_5 = arith.constant 0 : index
    %c0_6 = arith.constant 0 : index
    %6 = vector.load %arg4[%c0_5, %c0_6] : memref<1x128xf32, #tpu.memory_space<vmem>>, vector<1x128xf32>
    %7 = vector.broadcast %6 : vector<1x128xf32> to vector<2x128xf32>
    %8 = arith.addf %5, %7 : vector<2x128xf32>
    %cst_7 = arith.constant 0.000000e+00 : f32
    %9 = vector.broadcast %cst_7 : f32 to vector<2x128xf32>
    %10 = arith.maximumf %8, %9 : vector<2x128xf32>
    %c0_8 = arith.constant 0 : index
    %c0_9 = arith.constant 0 : index
    %11 = vector.load %arg8[%c0_8, %c0_9] : memref<2x128xf32, #tpu.memory_space<vmem>>, vector<2x128xf32>
    tpu.vector_store %arg8[%c0_8, %c0_9], %10 {strides = array<i32>} : memref<2x128xf32, #tpu.memory_space<vmem>>, vector<2x128xf32>,
    %c0_10 = arith.constant 0 : index
    %c0_11 = arith.constant 0 : index
    %12 = vector.load %arg5[%c0_10, %c0_11] : memref<128x64xf32, #tpu.memory_space<vmem>>, vector<128x64xf32>
    %cst_12 = arith.constant dense<0.000000e+00> : vector<2x64xf32>
    %13 = tpu.matmul %10, %12, %cst_12 {dimension_numbers = #tpu.dot_dimension_numbers<[1], [0], [0], [1], [0, 0, 1, 1], [], []>} : vector<2x128xf32>, vector<128x64xf32>, vector<2x64xf32> -> vector<2x64xf32>
    %c0_13 = arith.constant 0 : index
    %c0_14 = arith.constant 0 : index
    %14 = vector.load %arg6[%c0_13, %c0_14] : memref<1x64xf32, #tpu.memory_space<vmem>>, vector<1x64xf32>
    %15 = vector.broadcast %14 : vector<1x64xf32> to vector<2x64xf32>
    %16 = arith.mulf %13, %15 : vector<2x64xf32>
    %c0_15 = arith.constant 0 : index
    %c0_16 = arith.constant 0 : index
    %17 = vector.load %arg7[%c0_15, %c0_16] : memref<1x64xf32, #tpu.memory_space<vmem>>, vector<1x64xf32>
    %18 = vector.broadcast %17 : vector<1x64xf32> to vector<2x64xf32>
    %19 = arith.addf %16, %18 : vector<2x64xf32>
    %cst_17 = arith.constant 0.000000e+00 : f32
    %20 = vector.broadcast %cst_17 : f32 to vector<2x64xf32>
    %21 = arith.maximumf %19, %20 : vector<2x64xf32>
    %c0_18 = arith.constant 0 : index
    %c0_19 = arith.constant 0 : index
    %22 = vector.load %arg9[%c0_18, %c0_19] : memref<2x64xf32, #tpu.memory_space<vmem>>, vector<2x64xf32>
    tpu.vector_store %arg9[%c0_18, %c0_19], %21 {strides = array<i32>} : memref<2x64xf32, #tpu.memory_space<vmem>>, vector<2x64xf32>,
    return
  }
  func.func @transform_0(%arg0: i32) -> (i32, i32) {
    %c0_i32 = arith.constant 0 : i32
    %c0_i32_0 = arith.constant 0 : i32
    %c0_i32_1 = arith.constant 0 : i32
    return %c0_i32, %c0_i32_0 : i32, i32
  }
  func.func @transform_1(%arg0: i32) -> (i32, i32) {
    %c0_i32 = arith.constant 0 : i32
    %c0_i32_0 = arith.constant 0 : i32
    %c0_i32_1 = arith.constant 0 : i32
    return %c0_i32, %c0_i32_0 : i32, i32
  }
  func.func @transform_2(%arg0: i32) -> (i32, i32) {
    %c0_i32 = arith.constant 0 : i32
    %c0_i32_0 = arith.constant 0 : i32
    %c0_i32_1 = arith.constant 0 : i32
    return %c0_i32, %c0_i32_0 : i32, i32
  }
  func.func @transform_3(%arg0: i32) -> (i32, i32) {
    %c0_i32 = arith.constant 0 : i32
    %c0_i32_0 = arith.constant 0 : i32
    %c0_i32_1 = arith.constant 0 : i32
    return %c0_i32, %c0_i32_0 : i32, i32
  }
  func.func @transform_4(%arg0: i32) -> (i32, i32) {
    %c0_i32 = arith.constant 0 : i32
    %c0_i32_0 = arith.constant 0 : i32
    %c0_i32_1 = arith.constant 0 : i32
    return %c0_i32, %c0_i32_0 : i32, i32
  }
  func.func @transform_5(%arg0: i32) -> (i32, i32) {
    %c0_i32 = arith.constant 0 : i32
    %c0_i32_0 = arith.constant 0 : i32
    %c0_i32_1 = arith.constant 0 : i32
    return %c0_i32, %c0_i32_0 : i32, i32
  }
  func.func @transform_6(%arg0: i32) -> (i32, i32) {
    %c0_i32 = arith.constant 0 : i32
    %c0_i32_0 = arith.constant 0 : i32
    %c0_i32_1 = arith.constant 0 : i32
    return %c0_i32, %c0_i32_0 : i32, i32
  }
  func.func @transform_7(%arg0: i32) -> (i32, i32) {
    %c0_i32 = arith.constant 0 : i32
    %c0_i32_0 = arith.constant 0 : i32
    %c0_i32_1 = arith.constant 0 : i32
    return %c0_i32, %c0_i32_0 : i32, i32
  }
  func.func @transform_8(%arg0: i32) -> (i32, i32) {
    %c0_i32 = arith.constant 0 : i32
    %c0_i32_0 = arith.constant 0 : i32
    %c0_i32_1 = arith.constant 0 : i32
    return %c0_i32, %c0_i32_0 : i32, i32
  }
}

</mosaic_0001>

<bundles_post_ra>
// kernel: feature_forward.3
= control target key start
LH: loop header
LB: loop body
LE: loop exit
PB: predicated region body
PF: predicated region fallthrough
CT: control target
= control target key end

     0   :  { %14 = vsyncpa [#allocation3], 0  ;;  %v496_v7 = vmov 0.0|0.0   ;;  %s742_s0 = inlined_call_operand.vmem [shape: f32[2,256], index: 0, kind: input, shape index: {}]   ;;  %s743_s1 = inlined_call_operand.vmem [shape: f32[256,128], index: 1, kind: input, shape index: {}]   ;;  %s744_s2 = inlined_call_operand.vmem [shape: f32[1,128], index: 2, kind: input, shape index: {}]   ;;  %s745_s3 = inlined_call_operand.vmem [shape: f32[1,128], index: 3, kind: input, shape index: {}]   ;;  %s746_s4 = inlined_call_operand.vmem [shape: f32[128,64], index: 4, kind: input, shape index: {}]   ;;  %s747_s5 = inlined_call_operand.vmem [shape: f32[1,64], index: 5, kind: input, shape index: {}]   ;;  %s748_s6 = inlined_call_operand.vmem [shape: f32[1,64], index: 6, kind: input, shape index: {}]   ;;  %s749_s7 = inlined_call_operand.hbm [shape: f32[2,128], index: 7, kind: output, shape index: {0}]   ;;  %s750_s8 = inlined_call_operand.hbm [shape: f32[2,64], index: 8, kind: output, shape index: {1}]  }
   0x1   :  { %v47_v0 = vld [vmem:[%s743_s1 + $0x80] sm:$0xff]  ;;  %v48_v1 = vld [vmem:[%s743_s1 + $0x88] sm:$0xff]  ;;  %v49_v5 = vld [vmem:[%s743_s1 + $0x90] sm:$0xff]  ;;  %419 = vmatprep.subr.bf16.mxu1 %v496_v7 }
   0x2   :  { %v31_v2 = vld [vmem:[%s743_s1] sm:$0xff]  ;;  %v387_v3 = vpack.c.bf16 %v48_v1, %v47_v0  ;;  %v32_v4 = vld [vmem:[%s743_s1 + $0x8] sm:$0xff]  ;;  %v50_v6 = vld [vmem:[%s743_s1 + $0x98] sm:$0xff] }
   0x3   :  { %v389_v8 = vpack.c.bf16 %v32_v4, %v31_v2  ;;  %v391_v9 = vpack.c.bf16 %v50_v6, %v49_v5  ;;  %v33_v10 = vld [vmem:[%s743_s1 + $0x10] sm:$0xff]  ;;  %v34_v11 = vld [vmem:[%s743_s1 + $0x18] sm:$0xff]  ;;  %v51_v12 = vld [vmem:[%s743_s1 + $0xa0] sm:$0xff] }
   0x4   :  { %388 = vmatprep.subr.bf16.mxu0 %v387_v3  ;;  %v52_v13 = vld [vmem:[%s743_s1 + $0xa8] sm:$0xff]  ;;  %v393_v14 = vpack.c.bf16 %v34_v11, %v33_v10  ;;  %v35_v16 = vld [vmem:[%s743_s1 + $0x20] sm:$0xff]  ;;  %v53_v18 = vld [vmem:[%s743_s1 + $0xb0] sm:$0xff] }
   0x5   :  { %390 = vmatpush3.bf16.msra.mxu0 %v389_v8  ;;  %v395_v15 = vpack.c.bf16 %v52_v13, %v51_v12  ;;  %v36_v17 = vld [vmem:[%s743_s1 + $0x28] sm:$0xff]  ;;  %v54_v19 = vld [vmem:[%s743_s1 + $0xb8] sm:$0xff]  ;;  %v37_v22 = vld [vmem:[%s743_s1 + $0x30] sm:$0xff] }
   0x6   :  { %392 = vmatprep.subr.bf16.mxu0 %v391_v9  ;;  %v397_v20 = vpack.c.bf16 %v36_v17, %v35_v16  ;;  %v399_v21 = vpack.c.bf16 %v54_v19, %v53_v18  ;;  %v38_v23 = vld [vmem:[%s743_s1 + $0x38] sm:$0xff]  ;;  %v55_v24 = vld [vmem:[%s743_s1 + $0xc0] sm:$0xff]  ;;  %v56_v25 = vld [vmem:[%s743_s1 + $0xc8] sm:$0xff] }
   0x7   :  { %v604_v26 = vld.sshfl [vmem:[%s742_s0] sm:$0x33 pattern:$0x76325410]  ;;  %v163_v29 = vld [vmem:[%s746_s4 + $0x8] sm:$0xff]  ;;  %v164_v30 = vld [vmem:[%s746_s4 + $0x10] sm:$0xff]  ;;  %v401_v31 = vpack.c.bf16 %v38_v23, %v37_v22  ;;  %v403_v34 = vpack.c.bf16 %v56_v25, %v55_v24 }
   0x8   :  { %v71_v27 = vcombine.high %v604_v26, %v604_v26  ;;  %v162_v28 = vld [vmem:[%s746_s4] sm:$0xff]  ;;  %v165_v33 = vld [vmem:[%s746_s4 + $0x18] sm:$0xff]  ;;  %v40_v36 = vld [vmem:[%s743_s1 + $0x48] sm:$0xff] }
   0x9   :  { %394 = vmatpush3.bf16.msra.mxu0 %v393_v14  ;;  %v420_v32 = vpack.c.bf16 %v163_v29, %v162_v28  ;;  %v39_v35 = vld [vmem:[%s743_s1 + $0x40] sm:$0xff]  ;;  %v57_v37 = vld [vmem:[%s743_s1 + $0xd0] sm:$0xff]  ;;  %v58_v38 = vld [vmem:[%s743_s1 + $0xd8] sm:$0xff]  ;;  %v423_v39 = vpack.c.bf16 %v165_v33, %v164_v30 }
   0xa   :  { %396 = vmatprep.subr.bf16.mxu0 %v395_v15  ;;  %138 = vmatprep.mubr.f32.mxu0 %v71_v27  ;;  %v166_v40 = vld [vmem:[%s746_s4 + $0x20] sm:$0xff]  ;;  %v167_v41 = vld [vmem:[%s746_s4 + $0x28] sm:$0xff] }
   0xb   :  { %421 = vmatpush3.bf16.msra.mxu1 %v420_v32 }
   0xc   :  { %422 = vmatprep.subr.bf16.mxu1 %v496_v7 }
   0xd   :  { %398 = vmatpush3.bf16.msra.mxu0 %v397_v20 }
   0xe   :  { %400 = vmatprep.subr.bf16.mxu0 %v399_v21 }
   0xf   :  { %15 = vsyncpa [#allocation5], 0  ;;  %v405_v42 = vpack.c.bf16 %v40_v36, %v39_v35  ;;  %v407_v43 = vpack.c.bf16 %v58_v38, %v57_v37  ;;  %v41_v44 = vld [vmem:[%s743_s1 + $0x50] sm:$0xff]  ;;  %v42_v45 = vld [vmem:[%s743_s1 + $0x58] sm:$0xff]  ;;  %424 = vmatpush3.bf16.msra.mxu1 %v423_v39  ;;  %v426_v48 = vpack.c.bf16 %v167_v41, %v166_v40  ;;  %vm497_vm0 = vmmov 0  }
  0x10   :  { %v59_v46 = vld [vmem:[%s743_s1 + $0xe0] sm:$0xff]  ;;  %v60_v47 = vld [vmem:[%s743_s1 + $0xe8] sm:$0xff]  ;;  %425 = vmatprep.subr.bf16.mxu1 %v496_v7  ;;  %v168_v49 = vld [vmem:[%s746_s4 + $0x30] sm:$0xff]  ;;  %v409_v51 = vpack.c.bf16 %v42_v45, %v41_v44  ;;  %v498_v12 = vmov 0.0  }
  0x11   :  { %402 = vmatpush3.bf16.msra.mxu0 %v401_v31  ;;  %v169_v50 = vld [vmem:[%s746_s4 + $0x38] sm:$0xff]  ;;  %v411_v52 = vpack.c.bf16 %v60_v47, %v59_v46  ;;  %v43_v53 = vld [vmem:[%s743_s1 + $0x60] sm:$0xff]  ;;  %v44_v54 = vld [vmem:[%s743_s1 + $0x68] sm:$0xff]  ;;  %384 = vmatprep.mubr.msk.f32.mxu1 %vm497_vm0, %v498_v12 }
  0x12   :  { %404 = vmatprep.subr.bf16.mxu0 %v403_v34  ;;  %v61_v55 = vld [vmem:[%s743_s1 + $0xf0] sm:$0xff]  ;;  %v62_v56 = vld [vmem:[%s743_s1 + $0xf8] sm:$0xff]  ;;  %v429_v57 = vpack.c.bf16 %v169_v50, %v168_v49  ;;  %v170_v58 = vld [vmem:[%s746_s4 + $0x40] sm:$0xff]  ;;  %v413_v60 = vpack.c.bf16 %v44_v54, %v43_v53 }
  0x13   :  { %427 = vmatpush3.bf16.msra.mxu1 %v426_v48  ;;  %v171_v59 = vld [vmem:[%s746_s4 + $0x48] sm:$0xff]  ;;  %v415_v61 = vpack.c.bf16 %v62_v56, %v61_v55  ;;  %v45_v62 = vld [vmem:[%s743_s1 + $0x70] sm:$0xff]  ;;  %v46_v63 = vld [vmem:[%s743_s1 + $0x78] sm:$0xff] }
  0x14   :  { %428 = vmatprep.subr.bf16.mxu1 %v496_v7  ;;  %v432_v0 = vpack.c.bf16 %v171_v59, %v170_v58  ;;  %v172_v1 = vld [vmem:[%s746_s4 + $0x50] sm:$0xff]  ;;  %v173_v2 = vld [vmem:[%s746_s4 + $0x58] sm:$0xff]  ;;  %v417_v3 = vpack.c.bf16 %v46_v63, %v45_v62  ;;  %v174_v5 = vld [vmem:[%s746_s4 + $0x60] sm:$0xff] }
  0x15   :  { %406 = vmatpush3.bf16.msra.mxu0 %v405_v42  ;;  %v435_v4 = vpack.c.bf16 %v173_v2, %v172_v1  ;;  %v175_v6 = vld [vmem:[%s746_s4 + $0x68] sm:$0xff]  ;;  %v176_v9 = vld [vmem:[%s746_s4 + $0x70] sm:$0xff]  ;;  %v177_v10 = vld [vmem:[%s746_s4 + $0x78] sm:$0xff]  ;;  %s499_s4 = smov [#allocation2]  }
  0x16   :  { %408 = vmatprep.subr.bf16.mxu0 %v407_v43  ;;  %v438_v8 = vpack.c.bf16 %v175_v6, %v174_v5  ;;  %v441_v11 = vpack.c.bf16 %v177_v10, %v176_v9  ;;  %v296_v15 = vld [vmem:[%s744_s2] ss:$0 sm:$0xff]  ;;  %s273_s15 = sshll.u32 %s499_s4, 4  ;;  %s274_s15 = int_to_ptr.vmem [resolvable:$true] %s273_s15 }
  0x17   :  { %430 = vmatpush3.bf16.msra.mxu1 %v429_v57  ;;  %v297_v16 = vld [vmem:[%s745_s3] ss:$0 sm:$0xff]  ;;  %s448_s16 = scalar_lea.vmem %s274_s15, 32  ;;  %p453_p1 = scmp.lt.s32.totalorder %s274_s15, %s274_s15 }
  0x18   :  { %431 = vmatprep.subr.bf16.mxu1 %v496_v7  ;;  %p449_p0 = scmp.ne.s32.totalorder %s274_s15, %s448_s16  ;;  %p454_p2 = scmp.lt.s32.totalorder %s448_s16, %s448_s16 }
  0x19   :  { %410 = vmatpush3.bf16.msra.mxu0 %v409_v51 }
  0x1a   :  { %412 = vmatprep.subr.bf16.mxu0 %v411_v52  ;;  %p455_p3 = por %p454_p2, %p453_p1 }
  0x1b   :  { %433 = vmatpush3.bf16.msra.mxu1 %v432_v0 }
  0x1c   :  { %434 = vmatprep.subr.bf16.mxu1 %v496_v7  ;;  %p456_p4 = pnand %p455_p3, %p449_p0 }
  0x1d   :  { %414 = vmatpush3.bf16.msra.mxu0 %v413_v60 }
  0x1e   :  { %416 = vmatprep.subr.bf16.mxu0 %v415_v61 }
  0x1f   :  { %436 = vmatpush3.bf16.msra.mxu1 %v435_v4 }
  0x20   :  { %437 = vmatprep.subr.bf16.mxu1 %v496_v7 }
  0x21   :  { %418 = vmatpush3.bf16.msra.mxu0 %v417_v3 }
  0x23   :  { %439 = vmatpush3.bf16.msra.mxu1 %v438_v8 }
  0x24   :  { %139 = vmatmul.mubr.f32.vlgmr.msra.gmra.mrb[0].mxu0 %v604_v26  ;;  %440 = vmatprep.subr.bf16.mxu1 %v496_v7 }
  0x27   :  { %442 = vmatpush3.bf16.msra.mxu1 %v441_v11 }
  0xf7   :  { %v332_v13 = vpop.f32.mrb[0].mxu0 }
  0xf8   :  { %v333_v14 = vpop.f32.mrb[1].mxu0 }
  0xf9   :  { %v334_v7 = vadd.f32 %v333_v14, %v332_v13 }
  0xfb   :  { %v151_v17 = vmul.f32 %v334_v7, %v296_v15 }
  0xfd   :  { %v159_v18 = vadd.f32 %v297_v16, %v151_v17 }
  0xff   :  { %v160_v19 = vmax.f32 %v159_v18, 0.0 }
 0x101   :  { %385 = vmatmul.mubr.f32.vlgmr.msra.gmra.mrb[0].mxu1 %v160_v19  ;;  %161 = vst [vmem:[#allocation2] sm:$0x3] %v160_v19 }
 0x102   :  { %459 = shalt.err (!%p456_p4)
}
 0x103   :  { %s460_s18 = scalar_lea.hbm %s749_s7, 32 }
 0x104   :  { %p461_p5 = scmp.ne.s32.totalorder %s749_s7, %s460_s18  ;;  %p464_p6 = scmp.lt.u32.totalorder %s460_s18, %s749_s7 }
 0x106   :  { %p466_p7 = pnand %p464_p6, %p461_p5 }
 0x108   :  { %469 = shalt.err (!%p466_p7)
}
 0x109   :  { %276 = dma.vmem_to_hbm [thread:$0]  %s274_s15, 32, %s749_s7, [#allocation3]   ;;  %v298_v20 = vld [vmem:[%s747_s5] ss:$0 sm:$0xff]  ;;  %vm265_vm1 = vcmask 517120  }
 0x10a   :  { %v299_v22 = vld [vmem:[%s748_s6] ss:$0 sm:$0xff]  ;;  %s500_s0 = smov [#allocation4]  }
 0x10b   :  { %s283_s27 = sshll.u32 %s500_s0, 4  ;;  %s284_s27 = int_to_ptr.vmem [resolvable:$true] %s283_s27 }
 0x10c   :  { %s470_s28 = scalar_lea.vmem %s284_s27, 32  ;;  %p475_p9 = scmp.lt.s32.totalorder %s284_s27, %s284_s27 }
 0x10d   :  { %p471_p8 = scmp.ne.s32.totalorder %s284_s27, %s470_s28  ;;  %p476_p10 = scmp.lt.s32.totalorder %s470_s28, %s470_s28 }
 0x10f   :  { %p477_p11 = por %p476_p10, %p475_p9 }
 0x111   :  { %p478_p12 = pnand %p477_p11, %p471_p8 }
 0x1d4   :  { %v244_v21 = vpop.f32.mrb[0].mxu1 }
 0x1d5   :  { %v255_v23 = vmul.f32 %v298_v20, %v244_v21  ;;  %v386_v24 = vpop.f32.mrb[1].mxu1 }
 0x1d7   :  { %v263_v25 = vadd.f32 %v299_v22, %v255_v23 }
 0x1d9   :  { %v264_v26 = vmax.f32 %v263_v25, 0.0 }
 0x1db   :  { %266 = vst.msk [vmem:[#allocation4] sm:$0x3] %vm265_vm1, %v264_v26 }
 0x1dc   :  { %481 = shalt.err (!%p478_p12)
}
 0x1dd   :  { %s482_s6 = scalar_lea.hbm %s750_s8, 32 }
 0x1de   :  { %p483_p13 = scmp.ne.s32.totalorder %s750_s8, %s482_s6  ;;  %p486_p0 = scmp.lt.u32.totalorder %s482_s6, %s750_s8 }
 0x1e0   :  { %p488_p1 = pnand %p486_p0, %p483_p13 }
 0x1e2   :  { %491 = shalt.err (!%p488_p1)
}
 0x1e3   :  { %286 = dma.vmem_to_hbm [thread:$0]  %s284_s27, 32, %s750_s8, [#allocation5]  }
 0x1e4   :  { %492 = dma.done.wait [#allocation3], 32  }
 0x1e5   :  { %493 = vsyncadd [#allocation3], 4294967264 }
 0x1e6   :  { %494 = dma.done.wait [#allocation5], 32  }
 0x1e7   :  { %495 = vsyncadd [#allocation5], 4294967264 }
 0x1e8   :  { %293 = vsyncpa [#allocation3], 1 }
 0x1e9   :  { %294 = vsyncpa [#allocation5], 1 }

// kernel: feature_forward.2
= control target key start
LH: loop header
LB: loop body
LE: loop exit
PB: predicated region body
PF: predicated region fallthrough
CT: control target
= control target key end

     0   :  { %s8354_s13 = smov 0   ;;  %s11343_s0 = inlined_call_operand.vmem [shape: f32[2,16,16,1], index: 0, kind: input, shape index: {}]   ;;  %s11344_s1 = inlined_call_operand.vmem [shape: f32[5,5,16], index: 1, kind: input, shape index: {}]   ;;  %s11345_s2 = inlined_call_operand.vmem [shape: f32[1,16], index: 2, kind: input, shape index: {}]   ;;  %s11346_s3 = inlined_call_operand.vmem [shape: f32[1,16], index: 3, kind: input, shape index: {}]   ;;  %s11347_s4 = inlined_call_operand.vmem [shape: f32[5,80,32], index: 4, kind: input, shape index: {}]   ;;  %s11348_s5 = inlined_call_operand.vmem [shape: f32[1,32], index: 5, kind: input, shape index: {}]   ;;  %s11349_s6 = inlined_call_operand.vmem [shape: f32[1,32], index: 6, kind: input, shape index: {}]   ;;  %s11350_s7 = inlined_call_operand.vmem [shape: f32[5,160,64], index: 7, kind: input, shape index: {}]   ;;  %s11351_s8 = inlined_call_operand.vmem [shape: f32[1,64], index: 8, kind: input, shape index: {}]   ;;  %s11352_s9 = inlined_call_operand.vmem [shape: f32[1,64], index: 9, kind: input, shape index: {}]   ;;  %s11353_s10 = inlined_call_operand.vmem [shape: f32[2,4,64], index: 10, kind: output, shape index: {}]  }
   0x1 LB: > { %s6802_s14 = sadd.s32 4294967295, %s8285_s13   ;;  %p6806_p0 = scmp.ge.s32.totalorder %s8285_s13, 1  ;;  %s8285_s13 = sphi %s8354_s13, %s20_s13  }
   0x2   : > { %p312_p1 = scmp.lt.s32.totalorder %s8285_s13, 3 }
   0x4   : > { %p313_p2 = pnand %p6806_p0, %p312_p1 }
   0x5   : > { %p8364_p3 = scmp.lt.s32.totalorder (!%p313_p2), %s6802_s14, 1  ;;  %vm390_vm0 = vcmask (!%p313_p2), 39936   ;;  %v8287_v0 = vmov (!%p313_p2), 0.0   ;;  %vm432_vm1 = vcmask (!%p313_p2), 7168   ;;  %vm434_vm2 = vcmask (!%p313_p2), 5120   ;;  %s8288_s20 = smov (!%p313_p2), 2  }
   0x6   : > { %316 = sbr.rel (%p313_p2) target bundleno = 2044 (0x7fc), region = 60  ;;  %395 = vst.msk [vmem:[#allocation2 + $0x20] sm:$0xff] (!%p313_p2), %vm390_vm0, %v8287_v0  ;;  %396 = vst.msk [vmem:[#allocation2 + $0x28] sm:$0xff] (!%p313_p2), %vm390_vm0, %v8287_v0  ;;  %s8289_s21 = smov (!%p313_p2), 1   ;;  %vm1181_vm3 = vcmask (!%p313_p2), 1044480   ;;  %vm594_vm4 = vcmask (!%p313_p2), 15368  }
   0x7   : > { %391 = vst.msk [vmem:[#allocation2] sm:$0xff] (!%p313_p2), %vm390_vm0, %v8287_v0  ;;  %392 = vst.msk [vmem:[#allocation2 + $0x8] sm:$0xff] (!%p313_p2), %vm390_vm0, %v8287_v0  ;;  %v6810_v20 = vld [vmem:[%s11344_s1 + $0x8] sm:$0x1f] (!%p313_p2)  ;;  %s8290_s24 = smov (!%p313_p2), 3   ;;  %s8291_s25 = smov (!%p313_p2), 4  }
   0x8   : > { %393 = vst.msk [vmem:[#allocation2 + $0x10] sm:$0xff] (!%p313_p2), %vm390_vm0, %v8287_v0  ;;  %394 = vst.msk [vmem:[#allocation2 + $0x18] sm:$0xff] (!%p313_p2), %vm390_vm0, %v8287_v0  ;;  %7413 = vmatprep.subr.msk.mxu0 (!%p313_p2), %vm1181_vm3, %v6810_v20  ;;  %vm724_vm5 = vcmask (!%p313_p2), 23568   ;;  %vm596_vm6 = vcmask (!%p313_p2), 14344   ;;  %vm855_vm7 = vcmask (!%p313_p2), 31768   ;;  %vm853_vm8 = vcmask (!%p313_p2), 31769  }
   0x9   : > { %397 = vst.msk [vmem:[#allocation2 + $0x30] sm:$0xff] (!%p313_p2), %vm390_vm0, %v8287_v0  ;;  %398 = vst.msk [vmem:[#allocation2 + $0x38] sm:$0xff] (!%p313_p2), %vm390_vm0, %v8287_v0  ;;  %7414 = vmatpush3.msk.msra.mxu0 (!%p313_p2), %vm1181_vm3, %v6810_v20  ;;  %vm985_vm9 = vcmask (!%p313_p2), 39968   ;;  %vm983_vm10 = vcmask (!%p313_p2), 39970   ;;  %vm3016_vm11 = vcmask (!%p313_p2), 130048   ;;  %vm3019_vm12 = vcmask (!%p313_p2), 123904  }
   0xa   : > { %399 = vst.msk [vmem:[#allocation2 + $0x40] sm:$0xff] (!%p313_p2), %vm390_vm0, %v8287_v0  ;;  %400 = vst.msk [vmem:[#allocation2 + $0x48] sm:$0xff] (!%p313_p2), %vm390_vm0, %v8287_v0  ;;  %vm4319_vm13 = vcmask (!%p313_p2), 1042434   ;;  %vm4317_vm14 = vcmask (!%p313_p2), 1041409   ;;  %vm4321_vm15 = vcmask (!%p313_p2), 1043459   ;;  %s8295_s22 = smov (!%p313_p2), 32  }
   0xb   : > { %401 = vst.msk [vmem:[#allocation2 + $0x50] sm:$0xff] (!%p313_p2), %vm390_vm0, %v8287_v0  ;;  %402 = vst.msk [vmem:[#allocation2 + $0x58] sm:$0xff] (!%p313_p2), %vm390_vm0, %v8287_v0  ;;  %s8296_s23 = smov (!%p313_p2), 48   ;;  %s8298_s30 = smov (!%p313_p2), 96  }
   0xc   : > { %403 = vst.msk [vmem:[#allocation2 + $0x60] sm:$0xff] (!%p313_p2), %vm390_vm0, %v8287_v0  ;;  %404 = vst.msk [vmem:[#allocation2 + $0x68] sm:$0xff] (!%p313_p2), %vm390_vm0, %v8287_v0 }
   0xd   : > { %405 = vst.msk [vmem:[#allocation2 + $0x70] sm:$0xff] %vm390_vm0, %v8287_v0  ;;  %406 = vst.msk [vmem:[#allocation2 + $0x78] sm:$0xff] %vm390_vm0, %v8287_v0  ;;  %s11356_s14 = smov (!%p8364_p3, %s6802_s14), 1 }
   0xe   : > { %407 = vst.msk [vmem:[#allocation2 + $0x80] sm:$0xff] %vm390_vm0, %v8287_v0  ;;  %408 = vst.msk [vmem:[#allocation2 + $0x88] sm:$0xff] %vm390_vm0, %v8287_v0  ;;  %s7157_s16 = sshll.u32 %s11356_s14, 8  ;;  %s6809_s27 = sshll.u32 %s11356_s14, 2 }
   0xf   : > { %409 = vst.msk [vmem:[#allocation2 + $0x90] sm:$0xff] %vm390_vm0, %v8287_v0  ;;  %410 = vst.msk [vmem:[#allocation2 + $0x98] sm:$0xff] %vm390_vm0, %v8287_v0  ;;  %s8458_s19 = scalar_lea.vmem %s11343_s0, %s7157_s16  ;;  %v8531_v17 = vld [vmem:[#allocation2 + $0x10] sm:$0xff]  ;;  %v8553_v21 = vld [vmem:[#allocation2 + $0x18] sm:$0xff] }
  0x10   : > { %411 = vst.msk [vmem:[#allocation2 + $0xa0] sm:$0xff] %vm390_vm0, %v8287_v0  ;;  %412 = vst.msk [vmem:[#allocation2 + $0xa8] sm:$0xff] %vm390_vm0, %v8287_v0  ;;  %v358_v1 = vld [vmem:[%s8458_s19] sm:$0xff]  ;;  %v359_v2 = vld [vmem:[%s8458_s19 + $0x8] sm:$0xff]  ;;  %7415 = vmatprep.mubr.msk.f32.mxu0 %vm390_vm0, %v8531_v17 }
  0x11   : > { %413 = vst.msk [vmem:[#allocation2 + $0xb0] sm:$0xff] %vm390_vm0, %v8287_v0  ;;  %414 = vst.msk [vmem:[#allocation2 + $0xb8] sm:$0xff] %vm390_vm0, %v8287_v0  ;;  %v8463_v3 = vld [vmem:[%s8458_s19 + $0x18] sm:$0xff]  ;;  %628 = vrot.lane.b32.xlu1 %v358_v1, %s8288_s20  ;;  %498 = vrot.lane.b32.xlu0 %v358_v1, %s8289_s21  ;;  %v360_v4 = vld [vmem:[%s8458_s19 + $0x10] sm:$0xff] }
  0x12   : > { %415 = vst.msk [vmem:[#allocation2 + $0xc0] sm:$0xff] %vm390_vm0, %v8287_v0  ;;  %416 = vst.msk [vmem:[#allocation2 + $0xc8] sm:$0xff] %vm390_vm0, %v8287_v0  ;;  %v8469_v5 = vld [vmem:[%s8458_s19 + $0x28] sm:$0xff]  ;;  %v8476_v6 = vld [vmem:[%s8458_s19 + $0x20] sm:$0xff]  ;;  %7416 = vmatmul.mubr.msk.f32.vlgmr.msra.gmra.mrb[0].mxu0 %vm390_vm0, %v8553_v21 }
  0x13   : > { %417 = vst.msk [vmem:[#allocation2 + $0xd0] sm:$0xff] %vm390_vm0, %v8287_v0  ;;  %418 = vst.msk [vmem:[#allocation2 + $0xd8] sm:$0xff] %vm390_vm0, %v8287_v0  ;;  %v8479_v7 = vld [vmem:[%s8458_s19 + $0x38] sm:$0xff]  ;;  %v8482_v8 = vld [vmem:[%s8458_s19 + $0x30] sm:$0xff] }
  0x14   : > { %419 = vst.msk [vmem:[#allocation2 + $0xe0] sm:$0xff] %vm390_vm0, %v8287_v0  ;;  %420 = vst.msk [vmem:[#allocation2 + $0xe8] sm:$0xff] %vm390_vm0, %v8287_v0  ;;  %v8488_v9 = vld [vmem:[%s8458_s19 + $0x48] sm:$0xff]  ;;  %v8491_v10 = vld [vmem:[%s8458_s19 + $0x40] sm:$0xff] }
  0x15   : > { %421 = vst.msk [vmem:[#allocation2 + $0xf0] sm:$0xff] %vm390_vm0, %v8287_v0  ;;  %422 = vst.msk [vmem:[#allocation2 + $0xf8] sm:$0xff] %vm390_vm0, %v8287_v0  ;;  %v8494_v11 = vld [vmem:[%s8458_s19 + $0x58] sm:$0xff]  ;;  %v8503_v12 = vld [vmem:[%s8458_s19 + $0x50] sm:$0xff]  ;;  %630 = vrot.lane.b32.xlu1 %v359_v2, %s8288_s20  ;;  %500 = vrot.lane.b32.xlu0 %v359_v2, %s8289_s21 }
  0x16   : > { %423 = vst.msk [vmem:[#allocation2 + $0x100] sm:$0xff] %vm390_vm0, %v8287_v0  ;;  %424 = vst.msk [vmem:[#allocation2 + $0x108] sm:$0xff] %vm390_vm0, %v8287_v0  ;;  %v8506_v13 = vld [vmem:[%s8458_s19 + $0x68] sm:$0xff]  ;;  %v8509_v14 = vld [vmem:[%s8458_s19 + $0x60] sm:$0xff] }
  0x17   : > { %425 = vst.msk [vmem:[#allocation2 + $0x110] sm:$0xff] %vm390_vm0, %v8287_v0  ;;  %426 = vst.msk [vmem:[#allocation2 + $0x118] sm:$0xff] %vm390_vm0, %v8287_v0  ;;  %v8520_v15 = vld [vmem:[%s8458_s19 + $0x78] sm:$0xff]  ;;  %v8523_v16 = vld [vmem:[%s8458_s19 + $0x70] sm:$0xff] }
  0x18   : > { %427 = vst.msk [vmem:[#allocation2 + $0x120] sm:$0xff] %vm390_vm0, %v8287_v0  ;;  %428 = vst.msk [vmem:[#allocation2 + $0x128] sm:$0xff] %vm390_vm0, %v8287_v0  ;;  %v8538_v18 = vld [vmem:[%s8458_s19 + $0x88] sm:$0xff]  ;;  %v8541_v19 = vld [vmem:[%s8458_s19 + $0x80] sm:$0xff] }
  0x19   : > { %429 = vst.msk [vmem:[#allocation2 + $0x130] sm:$0xff] %vm390_vm0, %v8287_v0  ;;  %430 = vst.msk [vmem:[#allocation2 + $0x138] sm:$0xff] %vm390_vm0, %v8287_v0  ;;  %759 = vrot.lane.b32.xlu1 %v359_v2, %s8290_s24  ;;  %757 = vrot.lane.b32.xlu0 %v358_v1, %s8290_s24  ;;  %v8563_v22 = vld [vmem:[%s8458_s19 + $0x98] sm:$0xff]  ;;  %v8571_v23 = vld [vmem:[%s8458_s19 + $0x90] sm:$0xff] }
  0x1a   : > { %433 = vst.msk [vmem:[#allocation2 + $0x22] sm:$0xff] %vm432_vm1, %v358_v1  ;;  %436 = vst.msk [vmem:[#allocation2 + $0x32] sm:$0xff] %vm432_vm1, %v360_v4  ;;  %v8585_v24 = vld [vmem:[%s8458_s19 + $0xa8] sm:$0xff]  ;;  %v8594_v25 = vld [vmem:[%s8458_s19 + $0xa0] sm:$0xff] }
  0x1b   : > { %435 = vst.msk [vmem:[#allocation2 + $0x2a] sm:$0x3f] %vm434_vm2, %v359_v2  ;;  %437 = vst.msk [vmem:[#allocation2 + $0x3a] sm:$0x3f] %vm434_vm2, %v8463_v3  ;;  %v8611_v26 = vld [vmem:[%s8458_s19 + $0xb8] sm:$0xff]  ;;  %v8620_v27 = vld [vmem:[%s8458_s19 + $0xb0] sm:$0xff] }
  0x1c   : > { %439 = vst.msk [vmem:[#allocation2 + $0x4a] sm:$0x3f] %vm434_vm2, %v8469_v5  ;;  %441 = vst.msk [vmem:[#allocation2 + $0x5a] sm:$0x3f] %vm434_vm2, %v8479_v7  ;;  %v8637_v28 = vld [vmem:[%s8458_s19 + $0xc8] sm:$0xff]  ;;  %v8646_v29 = vld [vmem:[%s8458_s19 + $0xc0] sm:$0xff] }
  0x1d   : > { %438 = vst.msk [vmem:[#allocation2 + $0x42] sm:$0xff] %vm432_vm1, %v8476_v6  ;;  %440 = vst.msk [vmem:[#allocation2 + $0x52] sm:$0xff] %vm432_vm1, %v8482_v8  ;;  %889 = vrot.lane.b32.xlu1 %v359_v2, %s8291_s25  ;;  %887 = vrot.lane.b32.xlu0 %v358_v1, %s8291_s25  ;;  %v8663_v30 = vld [vmem:[%s8458_s19 + $0xd8] sm:$0xff]  ;;  %v8672_v31 = vld [vmem:[%s8458_s19 + $0xd0] sm:$0xff] }
  0x1e   : > { %442 = vst.msk [vmem:[#allocation2 + $0x62] sm:$0xff] %vm432_vm1, %v8491_v10  ;;  %444 = vst.msk [vmem:[#allocation2 + $0x72] sm:$0xff] %vm432_vm1, %v8503_v12  ;;  %v8689_v32 = vld [vmem:[%s8458_s19 + $0xe8] sm:$0xff]  ;;  %v8698_v33 = vld [vmem:[%s8458_s19 + $0xe0] sm:$0xff] }
  0x1f   : > { %443 = vst.msk [vmem:[#allocation2 + $0x6a] sm:$0x3f] %vm434_vm2, %v8488_v9  ;;  %445 = vst.msk [vmem:[#allocation2 + $0x7a] sm:$0x3f] %vm434_vm2, %v8494_v11 }
  0x20   : > { %446 = vst.msk [vmem:[#allocation2 + $0x82] sm:$0xff] %vm432_vm1, %v8509_v14  ;;  %448 = vst.msk [vmem:[#allocation2 + $0x92] sm:$0xff] %vm432_vm1, %v8523_v16 }
  0x21   : > { %447 = vst.msk [vmem:[#allocation2 + $0x8a] sm:$0x3f] %vm434_vm2, %v8506_v13  ;;  %449 = vst.msk [vmem:[#allocation2 + $0x9a] sm:$0x3f] %vm434_vm2, %v8520_v15  ;;  %504 = vrot.lane.b32.xlu1 %v8463_v3, %s8289_s21  ;;  %502 = vrot.lane.b32.xlu0 %v360_v4, %s8289_s21 }
  0x22   : > { %451 = vst.msk [vmem:[#allocation2 + $0xaa] sm:$0x3f] %vm434_vm2, %v8538_v18  ;;  %453 = vst.msk [vmem:[#allocation2 + $0xba] sm:$0x3f] %vm434_vm2, %v8563_v22 }
  0x23   : > { %450 = vst.msk [vmem:[#allocation2 + $0xa2] sm:$0xff] %vm432_vm1, %v8541_v19  ;;  %452 = vst.msk [vmem:[#allocation2 + $0xb2] sm:$0xff] %vm432_vm1, %v8571_v23 }
  0x24   : > { %455 = vst.msk [vmem:[#allocation2 + $0xca] sm:$0x3f] %vm434_vm2, %v8585_v24  ;;  %457 = vst.msk [vmem:[#allocation2 + $0xda] sm:$0x3f] %vm434_vm2, %v8611_v26 }
  0x25   : > { %634 = vrot.lane.b32.xlu1 %v8463_v3, %s8288_s20  ;;  %632 = vrot.lane.b32.xlu0 %v360_v4, %s8288_s20  ;;  %454 = vst.msk [vmem:[#allocation2 + $0xc2] sm:$0xff] %vm432_vm1, %v8594_v25  ;;  %456 = vst.msk [vmem:[#allocation2 + $0xd2] sm:$0xff] %vm432_vm1, %v8620_v27 }
  0x26   : > { %459 = vst.msk [vmem:[#allocation2 + $0xea] sm:$0x3f] %vm434_vm2, %v8637_v28  ;;  %461 = vst.msk [vmem:[#allocation2 + $0xfa] sm:$0x3f] %vm434_vm2, %v8663_v30 }
  0x27   : > { %458 = vst.msk [vmem:[#allocation2 + $0xe2] sm:$0xff] %vm432_vm1, %v8646_v29  ;;  %460 = vst.msk [vmem:[#allocation2 + $0xf2] sm:$0xff] %vm432_vm1, %v8672_v31 }
  0x28   : > { %463 = vst.msk [vmem:[#allocation2 + $0x10a] sm:$0x3f] %vm434_vm2, %v8689_v32 }
  0x29   : > { %763 = vrot.lane.b32.xlu1 %v8463_v3, %s8290_s24  ;;  %761 = vrot.lane.b32.xlu0 %v360_v4, %s8290_s24  ;;  %462 = vst.msk [vmem:[#allocation2 + $0x102] sm:$0xff] %vm432_vm1, %v8698_v33 }
  0x2a   : > { %3022 = vst.msk [vmem:[#allocation3 + $0x20] sm:$0xff] %vm3016_vm11, %v8287_v0  ;;  %3017 = vst.msk [vmem:[#allocation3] sm:$0xff] %vm3016_vm11, %v8287_v0 }
  0x2b   : > { %3023 = vst.msk [vmem:[#allocation3 + $0x28] sm:$0x3] %vm3019_vm12, %v8287_v0  ;;  %3020 = vst.msk [vmem:[#allocation3 + $0x10] sm:$0x3] %vm3019_vm12, %v8287_v0 }
  0x2c   : > { %3018 = vst.msk [vmem:[#allocation3 + $0x8] sm:$0xff] %vm3016_vm11, %v8287_v0  ;;  %3021 = vst.msk [vmem:[#allocation3 + $0x18] sm:$0xff] %vm3016_vm11, %v8287_v0 }
  0x2d   : > { %893 = vrot.lane.b32.xlu1 %v8463_v3, %s8291_s25  ;;  %891 = vrot.lane.b32.xlu0 %v360_v4, %s8291_s25  ;;  %3024 = vst.msk [vmem:[#allocation3 + $0x30] sm:$0xff] %vm3016_vm11, %v8287_v0  ;;  %3025 = vst.msk [vmem:[#allocation3 + $0x38] sm:$0xff] %vm3016_vm11, %v8287_v0 }
  0x2e   : > { %3026 = vst.msk [vmem:[#allocation3 + $0x40] sm:$0x3] %vm3019_vm12, %v8287_v0  ;;  %3029 = vst.msk [vmem:[#allocation3 + $0x58] sm:$0x3] %vm3019_vm12, %v8287_v0 }
  0x2f   : > { %3027 = vst.msk [vmem:[#allocation3 + $0x48] sm:$0xff] %vm3016_vm11, %v8287_v0  ;;  %3028 = vst.msk [vmem:[#allocation3 + $0x50] sm:$0xff] %vm3016_vm11, %v8287_v0 }
  0x30   : > { %3030 = vst.msk [vmem:[#allocation3 + $0x60] sm:$0xff] %vm3016_vm11, %v8287_v0  ;;  %3031 = vst.msk [vmem:[#allocation3 + $0x68] sm:$0xff] %vm3016_vm11, %v8287_v0 }
  0x31   : > { %508 = vrot.lane.b32.xlu1 %v8469_v5, %s8289_s21  ;;  %506 = vrot.lane.b32.xlu0 %v8476_v6, %s8289_s21  ;;  %3032 = vst.msk [vmem:[#allocation3 + $0x70] sm:$0x3] %vm3019_vm12, %v8287_v0  ;;  %3035 = vst.msk [vmem:[#allocation3 + $0x88] sm:$0x3] %vm3019_vm12, %v8287_v0 }
  0x32   : > { %3033 = vst.msk [vmem:[#allocation3 + $0x78] sm:$0xff] %vm3016_vm11, %v8287_v0  ;;  %3034 = vst.msk [vmem:[#allocation3 + $0x80] sm:$0xff] %vm3016_vm11, %v8287_v0 }
  0x33   : > { %3036 = vst.msk [vmem:[#allocation3 + $0x90] sm:$0xff] %vm3016_vm11, %v8287_v0  ;;  %3037 = vst.msk [vmem:[#allocation3 + $0x98] sm:$0xff] %vm3016_vm11, %v8287_v0 }
  0x34   : > { %3038 = vst.msk [vmem:[#allocation3 + $0xa0] sm:$0x3] %vm3019_vm12, %v8287_v0  ;;  %3041 = vst.msk [vmem:[#allocation3 + $0xb8] sm:$0x3] %vm3019_vm12, %v8287_v0 }
  0x35   : > { %638 = vrot.lane.b32.xlu1 %v8469_v5, %s8288_s20  ;;  %636 = vrot.lane.b32.xlu0 %v8476_v6, %s8288_s20  ;;  %3039 = vst.msk [vmem:[#allocation3 + $0xa8] sm:$0xff] %vm3016_vm11, %v8287_v0  ;;  %3040 = vst.msk [vmem:[#allocation3 + $0xb0] sm:$0xff] %vm3016_vm11, %v8287_v0 }
  0x36   : > { %3042 = vst.msk [vmem:[#allocation3 + $0xc0] sm:$0xff] %vm3016_vm11, %v8287_v0  ;;  %3043 = vst.msk [vmem:[#allocation3 + $0xc8] sm:$0xff] %vm3016_vm11, %v8287_v0 }
  0x37   : > { %3044 = vst.msk [vmem:[#allocation3 + $0xd0] sm:$0x3] %vm3019_vm12, %v8287_v0  ;;  %3047 = vst.msk [vmem:[#allocation3 + $0xe8] sm:$0x3] %vm3019_vm12, %v8287_v0 }
  0x38   : > { %3045 = vst.msk [vmem:[#allocation3 + $0xd8] sm:$0xff] %vm3016_vm11, %v8287_v0  ;;  %3046 = vst.msk [vmem:[#allocation3 + $0xe0] sm:$0xff] %vm3016_vm11, %v8287_v0 }
  0x39   : > { %767 = vrot.lane.b32.xlu1 %v8469_v5, %s8290_s24  ;;  %765 = vrot.lane.b32.xlu0 %v8476_v6, %s8290_s24  ;;  %3048 = vst.msk [vmem:[#allocation3 + $0xf0] sm:$0xff] %vm3016_vm11, %v8287_v0  ;;  %3049 = vst.msk [vmem:[#allocation3 + $0xf8] sm:$0xff] %vm3016_vm11, %v8287_v0 }
  0x3a   : > { %3050 = vst.msk [vmem:[#allocation3 + $0x100] sm:$0x3] %vm3019_vm12, %v8287_v0  ;;  %3053 = vst.msk [vmem:[#allocation3 + $0x118] sm:$0x3] %vm3019_vm12, %v8287_v0 }
  0x3b   : > { %3051 = vst.msk [vmem:[#allocation3 + $0x108] sm:$0xff] %vm3016_vm11, %v8287_v0  ;;  %3052 = vst.msk [vmem:[#allocation3 + $0x110] sm:$0xff] %vm3016_vm11, %v8287_v0 }
  0x3c   : > { %3054 = vst.msk [vmem:[#allocation3 + $0x120] sm:$0xff] %vm3016_vm11, %v8287_v0  ;;  %3055 = vst.msk [vmem:[#allocation3 + $0x128] sm:$0xff] %vm3016_vm11, %v8287_v0 }
  0x3d   : > { %897 = vrot.lane.b32.xlu1 %v8469_v5, %s8291_s25  ;;  %895 = vrot.lane.b32.xlu0 %v8476_v6, %s8291_s25  ;;  %3056 = vst.msk [vmem:[#allocation3 + $0x130] sm:$0x3] %vm3019_vm12, %v8287_v0  ;;  %3059 = vst.msk [vmem:[#allocation3 + $0x148] sm:$0x3] %vm3019_vm12, %v8287_v0 }
  0x3e   : > { %3057 = vst.msk [vmem:[#allocation3 + $0x138] sm:$0xff] %vm3016_vm11, %v8287_v0  ;;  %3058 = vst.msk [vmem:[#allocation3 + $0x140] sm:$0xff] %vm3016_vm11, %v8287_v0 }
  0x3f   : > { %3060 = vst.msk [vmem:[#allocation3 + $0x150] sm:$0xff] %vm3016_vm11, %v8287_v0  ;;  %3061 = vst.msk [vmem:[#allocation3 + $0x158] sm:$0xff] %vm3016_vm11, %v8287_v0 }
  0x40   : > { %3062 = vst.msk [vmem:[#allocation3 + $0x160] sm:$0x3] %vm3019_vm12, %v8287_v0  ;;  %3065 = vst.msk [vmem:[#allocation3 + $0x178] sm:$0x3] %vm3019_vm12, %v8287_v0 }
  0x41   : > { %512 = vrot.lane.b32.xlu1 %v8479_v7, %s8289_s21  ;;  %510 = vrot.lane.b32.xlu0 %v8482_v8, %s8289_s21  ;;  %3063 = vst.msk [vmem:[#allocation3 + $0x168] sm:$0xff] %vm3016_vm11, %v8287_v0  ;;  %3064 = vst.msk [vmem:[#allocation3 + $0x170] sm:$0xff] %vm3016_vm11, %v8287_v0 }
  0x42   : > { %3066 = vst.msk [vmem:[#allocation3 + $0x180] sm:$0xff] %vm3016_vm11, %v8287_v0  ;;  %3067 = vst.msk [vmem:[#allocation3 + $0x188] sm:$0xff] %vm3016_vm11, %v8287_v0 }
  0x43   : > { %3068 = vst.msk [vmem:[#allocation3 + $0x190] sm:$0x3] %vm3019_vm12, %v8287_v0  ;;  %3071 = vst.msk [vmem:[#allocation3 + $0x1a8] sm:$0x3] %vm3019_vm12, %v8287_v0 }
  0x44   : > { %3069 = vst.msk [vmem:[#allocation3 + $0x198] sm:$0xff] %vm3016_vm11, %v8287_v0  ;;  %3070 = vst.msk [vmem:[#allocation3 + $0x1a0] sm:$0xff] %vm3016_vm11, %v8287_v0 }
  0x45   : > { %642 = vrot.lane.b32.xlu1 %v8479_v7, %s8288_s20  ;;  %640 = vrot.lane.b32.xlu0 %v8482_v8, %s8288_s20 }
  0x49   : > { %771 = vrot.lane.b32.xlu1 %v8479_v7, %s8290_s24  ;;  %769 = vrot.lane.b32.xlu0 %v8482_v8, %s8290_s24 }
  0x4d   : > { %901 = vrot.lane.b32.xlu1 %v8479_v7, %s8291_s25  ;;  %899 = vrot.lane.b32.xlu0 %v8482_v8, %s8291_s25  ;;  %v1049_v7 = vld [vmem:[%s11344_s1] sm:$0x1f] }
  0x4e   : > { %7463 = vmatprep.subr.msk.mxu0 %vm1181_vm3, %v1049_v7 }
  0x4f   : > { %7464 = vmatpush3.msk.msra.mxu0 %vm1181_vm3, %v1049_v7 }
  0x51   : > { %516 = vrot.lane.b32.xlu1 %v8488_v9, %s8289_s21  ;;  %514 = vrot.lane.b32.xlu0 %v8491_v10, %s8289_s21 }
  0x55   : > { %646 = vrot.lane.b32.xlu1 %v8488_v9, %s8288_s20  ;;  %644 = vrot.lane.b32.xlu0 %v8491_v10, %s8288_s20 }
  0x59   : > { %775 = vrot.lane.b32.xlu1 %v8488_v9, %s8290_s24  ;;  %773 = vrot.lane.b32.xlu0 %v8491_v10, %s8290_s24 }
  0x5d   : > { %905 = vrot.lane.b32.xlu1 %v8488_v9, %s8291_s25  ;;  %903 = vrot.lane.b32.xlu0 %v8491_v10, %s8291_s25 }
  0x61   : > { %520 = vrot.lane.b32.xlu1 %v8494_v11, %s8289_s21  ;;  %518 = vrot.lane.b32.xlu0 %v8503_v12, %s8289_s21 }
  0x65   : > { %650 = vrot.lane.b32.xlu1 %v8494_v11, %s8288_s20  ;;  %648 = vrot.lane.b32.xlu0 %v8503_v12, %s8288_s20 }
  0x69   : > { %779 = vrot.lane.b32.xlu1 %v8494_v11, %s8290_s24  ;;  %777 = vrot.lane.b32.xlu0 %v8503_v12, %s8290_s24 }
  0x6d   : > { %909 = vrot.lane.b32.xlu1 %v8494_v11, %s8291_s25  ;;  %907 = vrot.lane.b32.xlu0 %v8503_v12, %s8291_s25 }
  0x71   : > { %524 = vrot.lane.b32.xlu1 %v8506_v13, %s8289_s21  ;;  %522 = vrot.lane.b32.xlu0 %v8509_v14, %s8289_s21 }
  0x75   : > { %654 = vrot.lane.b32.xlu1 %v8506_v13, %s8288_s20  ;;  %652 = vrot.lane.b32.xlu0 %v8509_v14, %s8288_s20 }
  0x79   : > { %783 = vrot.lane.b32.xlu1 %v8506_v13, %s8290_s24  ;;  %781 = vrot.lane.b32.xlu0 %v8509_v14, %s8290_s24 }
  0x7d   : > { %913 = vrot.lane.b32.xlu1 %v8506_v13, %s8291_s25  ;;  %911 = vrot.lane.b32.xlu0 %v8509_v14, %s8291_s25 }
  0x81   : > { %528 = vrot.lane.b32.xlu1 %v8520_v15, %s8289_s21  ;;  %526 = vrot.lane.b32.xlu0 %v8523_v16, %s8289_s21 }
  0x83   : > { %v629_v34 = vpop.permute.xlu1 %628  ;;  %v499_v35 = vpop.permute.xlu0 %498 }
  0x84   : > { %595 = vst.msk [vmem:[#allocation2 + $0x21] sm:$0xff] %vm594_vm4, %v499_v35 }
  0x85   : > { %658 = vrot.lane.b32.xlu1 %v8520_v15, %s8288_s20  ;;  %656 = vrot.lane.b32.xlu0 %v8523_v16, %s8288_s20  ;;  %725 = vst.msk [vmem:[#allocation2 + $0x20] sm:$0xff] %vm724_vm5, %v629_v34 }
  0x87   : > { %v631_v36 = vpop.permute.xlu1 %630  ;;  %v501_v37 = vpop.permute.xlu0 %500 }
  0x88   : > { %597 = vst.msk [vmem:[#allocation2 + $0x29] sm:$0x7f] %vm596_vm6, %v501_v37 }
  0x89   : > { %787 = vrot.lane.b32.xlu1 %v8520_v15, %s8290_s24  ;;  %785 = vrot.lane.b32.xlu0 %v8523_v16, %s8290_s24  ;;  %726 = vst.msk [vmem:[#allocation2 + $0x28] sm:$0xff] %vm724_vm5, %v631_v36 }
  0x8b   : > { %v760_v38 = vpop.permute.xlu1 %759  ;;  %v758_v39 = vpop.permute.xlu0 %757 }
  0x8c   : > { %856 = vst.msk [vmem:[#allocation2 + $0x27] sm:$0xff] %vm855_vm7, %v760_v38 }
  0x8d   : > { %854 = vst.msk [vmem:[#allocation2 + $0x1f] sm:$0xfe] %vm853_vm8, %v758_v39  ;;  %917 = vrot.lane.b32.xlu1 %v8520_v15, %s8291_s25  ;;  %915 = vrot.lane.b32.xlu0 %v8523_v16, %s8291_s25 }
  0x8f   : > { %v890_v40 = vpop.permute.xlu1 %889  ;;  %v888_v41 = vpop.permute.xlu0 %887 }
  0x90   : > { %986 = vst.msk [vmem:[#allocation2 + $0x26] sm:$0xff] %vm985_vm9, %v890_v40 }
  0x91   : > { %984 = vst.msk [vmem:[#allocation2 + $0x1e] sm:$0xfc] %vm983_vm10, %v888_v41  ;;  %532 = vrot.lane.b32.xlu1 %v8538_v18, %s8289_s21  ;;  %530 = vrot.lane.b32.xlu0 %v8541_v19, %s8289_s21 }
  0x93   : > { %v505_v42 = vpop.permute.xlu1 %504  ;;  %v503_v43 = vpop.permute.xlu0 %502 }
  0x94   : > { %599 = vst.msk [vmem:[#allocation2 + $0x39] sm:$0x7f] %vm596_vm6, %v505_v42  ;;  %v8922_v42 = vld [vmem:[%s8458_s19 + $0xf8] sm:$0xff] }
  0x95   : > { %598 = vst.msk [vmem:[#allocation2 + $0x31] sm:$0xff] %vm594_vm4, %v503_v43  ;;  %662 = vrot.lane.b32.xlu1 %v8538_v18, %s8288_s20  ;;  %660 = vrot.lane.b32.xlu0 %v8541_v19, %s8288_s20 }
  0x96   : > { %465 = vst.msk [vmem:[#allocation2 + $0x11a] sm:$0x3f] %vm434_vm2, %v8922_v42  ;;  %vm4388_vm2 = vcmask 1046534  }
  0x97   : > { %v635_v44 = vpop.permute.xlu1 %634  ;;  %v633_v45 = vpop.permute.xlu0 %632  ;;  %v8750_v47 = vld [vmem:[#allocation2 + $0x28] sm:$0xff] }
  0x98   : > { %v8748_v46 = vld [vmem:[#allocation2 + $0x20] sm:$0xff]  ;;  %728 = vst.msk [vmem:[#allocation2 + $0x38] sm:$0xff] %vm724_vm5, %v635_v44  ;;  %727 = vst.msk [vmem:[#allocation2 + $0x30] sm:$0xff] %vm724_vm5, %v633_v45  ;;  %v388_v45 = vld [vmem:[%s8458_s19 + $0xf0] sm:$0xff] }
  0x99   : > { %7418 = vmatprep.mubr.msk.f32.mxu0 %vm390_vm0, %v8748_v46  ;;  %791 = vrot.lane.b32.xlu1 %v8538_v18, %s8290_s24  ;;  %464 = vst.msk [vmem:[#allocation2 + $0x112] sm:$0xff] %vm432_vm1, %v388_v45  ;;  %vm4325_vm1 = vcmask 1045509  }
  0x9a   : > { %789 = vrot.lane.b32.xlu0 %v8541_v19, %s8290_s24  ;;  %7419 = vmatmul.mubr.msk.f32.gmra.mrb[2].mxu0 %vm390_vm0, %v8750_v47 }
  0x9b   : > { %v764_v48 = vpop.permute.xlu1 %763  ;;  %v762_v49 = vpop.permute.xlu0 %761 }
  0x9c   : > { %858 = vst.msk [vmem:[#allocation2 + $0x37] sm:$0xff] %vm855_vm7, %v764_v48 }
  0x9d   : > { %857 = vst.msk [vmem:[#allocation2 + $0x2f] sm:$0xfe] %vm853_vm8, %v762_v49  ;;  %921 = vrot.lane.b32.xlu1 %v8538_v18, %s8291_s25 }
  0x9e   : > { %919 = vrot.lane.b32.xlu0 %v8541_v19, %s8291_s25 }
  0x9f   : > { %v894_v50 = vpop.permute.xlu1 %893  ;;  %v892_v51 = vpop.permute.xlu0 %891 }
  0xa0   : > { %988 = vst.msk [vmem:[#allocation2 + $0x36] sm:$0xff] %vm985_vm9, %v894_v50 }
  0xa1   : > { %987 = vst.msk [vmem:[#allocation2 + $0x2e] sm:$0xfc] %vm983_vm10, %v892_v51  ;;  %536 = vrot.lane.b32.xlu1 %v8563_v22, %s8289_s21 }
  0xa2   : > { %534 = vrot.lane.b32.xlu0 %v8571_v23, %s8289_s21 }
  0xa3   : > { %v509_v52 = vpop.permute.xlu1 %508  ;;  %v507_v53 = vpop.permute.xlu0 %506 }
  0xa4   : > { %601 = vst.msk [vmem:[#allocation2 + $0x49] sm:$0x7f] %vm596_vm6, %v509_v52 }
  0xa5   : > { %600 = vst.msk [vmem:[#allocation2 + $0x41] sm:$0xff] %vm594_vm4, %v507_v53  ;;  %666 = vrot.lane.b32.xlu1 %v8563_v22, %s8288_s20 }
  0xa6   : > { %664 = vrot.lane.b32.xlu0 %v8571_v23, %s8288_s20 }
  0xa7   : > { %v639_v54 = vpop.permute.xlu1 %638  ;;  %v637_v55 = vpop.permute.xlu0 %636  ;;  %v8782_v57 = vld [vmem:[#allocation2 + $0x38] sm:$0xff] }
  0xa8   : > { %v8780_v56 = vld [vmem:[#allocation2 + $0x30] sm:$0xff]  ;;  %730 = vst.msk [vmem:[#allocation2 + $0x48] sm:$0xff] %vm724_vm5, %v639_v54  ;;  %729 = vst.msk [vmem:[#allocation2 + $0x40] sm:$0xff] %vm724_vm5, %v637_v55 }
  0xa9   : > { %7421 = vmatprep.mubr.msk.f32.mxu0 %vm390_vm0, %v8780_v56  ;;  %795 = vrot.lane.b32.xlu1 %v8563_v22, %s8290_s24  ;;  %v8969_v54 = vld [vmem:[%s11344_s1 + $0x10] sm:$0x1f] }
  0xaa   : > { %793 = vrot.lane.b32.xlu0 %v8571_v23, %s8290_s24  ;;  %7422 = vmatmul.mubr.msk.f32.gmra.mrb[4].mxu0 %vm390_vm0, %v8782_v57 }
  0xab   : > { %v768_v58 = vpop.permute.xlu1 %767  ;;  %v766_v59 = vpop.permute.xlu0 %765  ;;  %7513 = vmatprep.subr.msk.mxu0 %vm1181_vm3, %v8969_v54 }
  0xac   : > { %860 = vst.msk [vmem:[#allocation2 + $0x47] sm:$0xff] %vm855_vm7, %v768_v58 }
  0xad   : > { %859 = vst.msk [vmem:[#allocation2 + $0x3f] sm:$0xfe] %vm853_vm8, %v766_v59  ;;  %925 = vrot.lane.b32.xlu1 %v8563_v22, %s8291_s25 }
  0xae   : > { %923 = vrot.lane.b32.xlu0 %v8571_v23, %s8291_s25 }
  0xaf   : > { %v898_v60 = vpop.permute.xlu1 %897  ;;  %v896_v61 = vpop.permute.xlu0 %895 }
  0xb0   : > { %990 = vst.msk [vmem:[#allocation2 + $0x46] sm:$0xff] %vm985_vm9, %v898_v60 }
  0xb1   : > { %989 = vst.msk [vmem:[#allocation2 + $0x3e] sm:$0xfc] %vm983_vm10, %v896_v61  ;;  %540 = vrot.lane.b32.xlu1 %v8585_v24, %s8289_s21 }
  0xb2   : > { %538 = vrot.lane.b32.xlu0 %v8594_v25, %s8289_s21 }
  0xb3   : > { %v513_v62 = vpop.permute.xlu1 %512  ;;  %v511_v63 = vpop.permute.xlu0 %510 }
  0xb4   : > { %603 = vst.msk [vmem:[#allocation2 + $0x59] sm:$0x7f] %vm596_vm6, %v513_v62 }
  0xb5   : > { %602 = vst.msk [vmem:[#allocation2 + $0x51] sm:$0xff] %vm594_vm4, %v511_v63  ;;  %670 = vrot.lane.b32.xlu1 %v8585_v24, %s8288_s20 }
  0xb6   : > { %668 = vrot.lane.b32.xlu0 %v8594_v25, %s8288_s20 }
  0xb7   : > { %v643_v1 = vpop.permute.xlu1 %642  ;;  %v641_v2 = vpop.permute.xlu0 %640  ;;  %v8814_v4 = vld [vmem:[#allocation2 + $0x48] sm:$0xff] }
  0xb8   : > { %v8812_v3 = vld [vmem:[#allocation2 + $0x40] sm:$0xff]  ;;  %732 = vst.msk [vmem:[#allocation2 + $0x58] sm:$0xff] %vm724_vm5, %v643_v1  ;;  %731 = vst.msk [vmem:[#allocation2 + $0x50] sm:$0xff] %vm724_vm5, %v641_v2 }
  0xb9   : > { %7424 = vmatprep.mubr.msk.f32.mxu0 %vm390_vm0, %v8812_v3  ;;  %799 = vrot.lane.b32.xlu1 %v8585_v24, %s8290_s24 }
  0xba   : > { %797 = vrot.lane.b32.xlu0 %v8594_v25, %s8290_s24  ;;  %7425 = vmatmul.mubr.msk.f32.gmra.mrb[6].mxu0 %vm390_vm0, %v8814_v4 }
  0xbb   : > { %v772_v5 = vpop.permute.xlu1 %771  ;;  %v770_v6 = vpop.permute.xlu0 %769 }
  0xbc   : > { %862 = vst.msk [vmem:[#allocation2 + $0x57] sm:$0xff] %vm855_vm7, %v772_v5 }
  0xbd   : > { %861 = vst.msk [vmem:[#allocation2 + $0x4f] sm:$0xfe] %vm853_vm8, %v770_v6  ;;  %929 = vrot.lane.b32.xlu1 %v8585_v24, %s8291_s25 }
  0xbe   : > { %927 = vrot.lane.b32.xlu0 %v8594_v25, %s8291_s25 }
  0xbf   : > { %v902_v8 = vpop.permute.xlu1 %901  ;;  %v900_v9 = vpop.permute.xlu0 %899 }
  0xc0   : > { %992 = vst.msk [vmem:[#allocation2 + $0x56] sm:$0xff] %vm985_vm9, %v902_v8 }
  0xc1   : > { %991 = vst.msk [vmem:[#allocation2 + $0x4e] sm:$0xfc] %vm983_vm10, %v900_v9  ;;  %544 = vrot.lane.b32.xlu1 %v8611_v26, %s8289_s21 }
  0xc2   : > { %542 = vrot.lane.b32.xlu0 %v8620_v27, %s8289_s21 }
  0xc3   : > { %v517_v10 = vpop.permute.xlu1 %516  ;;  %v515_v11 = vpop.permute.xlu0 %514 }
  0xc4   : > { %605 = vst.msk [vmem:[#allocation2 + $0x69] sm:$0x7f] %vm596_vm6, %v517_v10 }
  0xc5   : > { %604 = vst.msk [vmem:[#allocation2 + $0x61] sm:$0xff] %vm594_vm4, %v515_v11  ;;  %674 = vrot.lane.b32.xlu1 %v8611_v26, %s8288_s20 }
  0xc6   : > { %672 = vrot.lane.b32.xlu0 %v8620_v27, %s8288_s20 }
  0xc7   : > { %v647_v12 = vpop.permute.xlu1 %646  ;;  %v645_v13 = vpop.permute.xlu0 %644  ;;  %v8851_v15 = vld [vmem:[#allocation2 + $0x58] sm:$0xff] }
  0xc8   : > { %v8849_v14 = vld [vmem:[#allocation2 + $0x50] sm:$0xff]  ;;  %734 = vst.msk [vmem:[#allocation2 + $0x68] sm:$0xff] %vm724_vm5, %v647_v12  ;;  %733 = vst.msk [vmem:[#allocation2 + $0x60] sm:$0xff] %vm724_vm5, %v645_v13 }
  0xc9   : > { %7427 = vmatprep.mubr.msk.f32.mxu0 %vm390_vm0, %v8849_v14  ;;  %803 = vrot.lane.b32.xlu1 %v8611_v26, %s8290_s24 }
  0xca   : > { %801 = vrot.lane.b32.xlu0 %v8620_v27, %s8290_s24  ;;  %7428 = vmatmul.mubr.msk.f32.gmra.mrb[8].mxu0 %vm390_vm0, %v8851_v15 }
  0xcb   : > { %v776_v16 = vpop.permute.xlu1 %775  ;;  %v774_v18 = vpop.permute.xlu0 %773 }
  0xcc   : > { %864 = vst.msk [vmem:[#allocation2 + $0x67] sm:$0xff] %vm855_vm7, %v776_v16 }
  0xcd   : > { %863 = vst.msk [vmem:[#allocation2 + $0x5f] sm:$0xfe] %vm853_vm8, %v774_v18  ;;  %933 = vrot.lane.b32.xlu1 %v8611_v26, %s8291_s25 }
  0xce   : > { %931 = vrot.lane.b32.xlu0 %v8620_v27, %s8291_s25 }
  0xcf   : > { %v906_v19 = vpop.permute.xlu1 %905  ;;  %v904_v20 = vpop.permute.xlu0 %903 }
  0xd0   : > { %994 = vst.msk [vmem:[#allocation2 + $0x66] sm:$0xff] %vm985_vm9, %v906_v19 }
  0xd1   : > { %993 = vst.msk [vmem:[#allocation2 + $0x5e] sm:$0xfc] %vm983_vm10, %v904_v20  ;;  %548 = vrot.lane.b32.xlu1 %v8637_v28, %s8289_s21 }
  0xd2   : > { %546 = vrot.lane.b32.xlu0 %v8646_v29, %s8289_s21 }
  0xd3   : > { %v521_v22 = vpop.permute.xlu1 %520  ;;  %v519_v23 = vpop.permute.xlu0 %518 }
  0xd4   : > { %607 = vst.msk [vmem:[#allocation2 + $0x79] sm:$0x7f] %vm596_vm6, %v521_v22 }
  0xd5   : > { %606 = vst.msk [vmem:[#allocation2 + $0x71] sm:$0xff] %vm594_vm4, %v519_v23  ;;  %678 = vrot.lane.b32.xlu1 %v8637_v28, %s8288_s20 }
  0xd6   : > { %676 = vrot.lane.b32.xlu0 %v8646_v29, %s8288_s20 }
  0xd7   : > { %v651_v24 = vpop.permute.xlu1 %650  ;;  %v649_v25 = vpop.permute.xlu0 %648  ;;  %v8883_v27 = vld [vmem:[#allocation2 + $0x68] sm:$0xff] }
  0xd8   : > { %v8881_v26 = vld [vmem:[#allocation2 + $0x60] sm:$0xff]  ;;  %736 = vst.msk [vmem:[#allocation2 + $0x78] sm:$0xff] %vm724_vm5, %v651_v24  ;;  %735 = vst.msk [vmem:[#allocation2 + $0x70] sm:$0xff] %vm724_vm5, %v649_v25 }
  0xd9   : > { %7430 = vmatprep.mubr.msk.f32.mxu0 %vm390_vm0, %v8881_v26  ;;  %807 = vrot.lane.b32.xlu1 %v8637_v28, %s8290_s24 }
  0xda   : > { %805 = vrot.lane.b32.xlu0 %v8646_v29, %s8290_s24  ;;  %7431 = vmatmul.mubr.msk.f32.gmra.mrb[10].mxu0 %vm390_vm0, %v8883_v27 }
  0xdb   : > { %v780_v34 = vpop.permute.xlu1 %779  ;;  %v778_v35 = vpop.permute.xlu0 %777 }
  0xdc   : > { %866 = vst.msk [vmem:[#allocation2 + $0x77] sm:$0xff] %vm855_vm7, %v780_v34 }
  0xdd   : > { %865 = vst.msk [vmem:[#allocation2 + $0x6f] sm:$0xfe] %vm853_vm8, %v778_v35  ;;  %937 = vrot.lane.b32.xlu1 %v8637_v28, %s8291_s25 }
  0xde   : > { %935 = vrot.lane.b32.xlu0 %v8646_v29, %s8291_s25 }
  0xdf   : > { %v910_v36 = vpop.permute.xlu1 %909  ;;  %v908_v37 = vpop.permute.xlu0 %907 }
  0xe0   : > { %996 = vst.msk [vmem:[#allocation2 + $0x76] sm:$0xff] %vm985_vm9, %v910_v36 }
  0xe1   : > { %995 = vst.msk [vmem:[#allocation2 + $0x6e] sm:$0xfc] %vm983_vm10, %v908_v37  ;;  %552 = vrot.lane.b32.xlu1 %v8663_v30, %s8289_s21 }
  0xe2   : > { %550 = vrot.lane.b32.xlu0 %v8672_v31, %s8289_s21 }
  0xe3   : > { %v525_v38 = vpop.permute.xlu1 %524  ;;  %v523_v39 = vpop.permute.xlu0 %522 }
  0xe4   : > { %609 = vst.msk [vmem:[#allocation2 + $0x89] sm:$0x7f] %vm596_vm6, %v525_v38 }
  0xe5   : > { %608 = vst.msk [vmem:[#allocation2 + $0x81] sm:$0xff] %vm594_vm4, %v523_v39  ;;  %682 = vrot.lane.b32.xlu1 %v8663_v30, %s8288_s20 }
  0xe6   : > { %680 = vrot.lane.b32.xlu0 %v8672_v31, %s8288_s20 }
  0xe7   : > { %v655_v28 = vpop.permute.xlu1 %654  ;;  %v653_v29 = vpop.permute.xlu0 %652  ;;  %v8915_v41 = vld [vmem:[#allocation2 + $0x78] sm:$0xff] }
  0xe8   : > { %v8913_v40 = vld [vmem:[#allocation2 + $0x70] sm:$0xff]  ;;  %738 = vst.msk [vmem:[#allocation2 + $0x88] sm:$0xff] %vm724_vm5, %v655_v28  ;;  %737 = vst.msk [vmem:[#allocation2 + $0x80] sm:$0xff] %vm724_vm5, %v653_v29 }
  0xe9   : > { %7433 = vmatprep.mubr.msk.f32.mxu0 %vm390_vm0, %v8913_v40  ;;  %811 = vrot.lane.b32.xlu1 %v8663_v30, %s8290_s24 }
  0xea   : > { %809 = vrot.lane.b32.xlu0 %v8672_v31, %s8290_s24  ;;  %7434 = vmatmul.mubr.msk.f32.gmra.mrb[12].mxu0 %vm390_vm0, %v8915_v41 }
  0xeb   : > { %v784_v43 = vpop.permute.xlu1 %783  ;;  %v782_v44 = vpop.permute.xlu0 %781 }
  0xec   : > { %868 = vst.msk [vmem:[#allocation2 + $0x87] sm:$0xff] %vm855_vm7, %v784_v43 }
  0xed   : > { %867 = vst.msk [vmem:[#allocation2 + $0x7f] sm:$0xfe] %vm853_vm8, %v782_v44  ;;  %941 = vrot.lane.b32.xlu1 %v8663_v30, %s8291_s25 }
  0xee   : > { %939 = vrot.lane.b32.xlu0 %v8672_v31, %s8291_s25 }
  0xef   : > { %v914_v48 = vpop.permute.xlu1 %913  ;;  %v912_v49 = vpop.permute.xlu0 %911 }
  0xf0   : > { %998 = vst.msk [vmem:[#allocation2 + $0x86] sm:$0xff] %vm985_vm9, %v914_v48 }
  0xf1   : > { %997 = vst.msk [vmem:[#allocation2 + $0x7e] sm:$0xfc] %vm983_vm10, %v912_v49  ;;  %556 = vrot.lane.b32.xlu1 %v8689_v32, %s8289_s21 }
  0xf2   : > { %554 = vrot.lane.b32.xlu0 %v8698_v33, %s8289_s21 }
  0xf3   : > { %v529_v50 = vpop.permute.xlu1 %528  ;;  %v527_v51 = vpop.permute.xlu0 %526 }
  0xf4   : > { %611 = vst.msk [vmem:[#allocation2 + $0x99] sm:$0x7f] %vm596_vm6, %v529_v50 }
  0xf5   : > { %610 = vst.msk [vmem:[#allocation2 + $0x91] sm:$0xff] %vm594_vm4, %v527_v51  ;;  %686 = vrot.lane.b32.xlu1 %v8689_v32, %s8288_s20 }
  0xf6   : > { %684 = vrot.lane.b32.xlu0 %v8698_v33, %s8288_s20 }
  0xf7   : > { %v659_v30 = vpop.permute.xlu1 %658  ;;  %v657_v31 = vpop.permute.xlu0 %656  ;;  %v8954_v53 = vld [vmem:[#allocation2 + $0x88] sm:$0xff] }
  0xf8   : > { %v8952_v52 = vld [vmem:[#allocation2 + $0x80] sm:$0xff]  ;;  %740 = vst.msk [vmem:[#allocation2 + $0x98] sm:$0xff] %vm724_vm5, %v659_v30  ;;  %739 = vst.msk [vmem:[#allocation2 + $0x90] sm:$0xff] %vm724_vm5, %v657_v31 }
  0xf9   : > { %7436 = vmatprep.mubr.msk.f32.mxu0 %vm390_vm0, %v8952_v52  ;;  %815 = vrot.lane.b32.xlu1 %v8689_v32, %s8290_s24 }
  0xfa   : > { %813 = vrot.lane.b32.xlu0 %v8698_v33, %s8290_s24  ;;  %7437 = vmatmul.mubr.msk.f32.gmra.mrb[14].mxu0 %vm390_vm0, %v8954_v53 }
  0xfb   : > { %v788_v55 = vpop.permute.xlu1 %787  ;;  %v786_v58 = vpop.permute.xlu0 %785 }
  0xfc   : > { %870 = vst.msk [vmem:[#allocation2 + $0x97] sm:$0xff] %vm855_vm7, %v788_v55 }
  0xfd   : > { %869 = vst.msk [vmem:[#allocation2 + $0x8f] sm:$0xfe] %vm853_vm8, %v786_v58  ;;  %945 = vrot.lane.b32.xlu1 %v8689_v32, %s8291_s25 }
  0xfe   : > { %943 = vrot.lane.b32.xlu0 %v8698_v33, %s8291_s25 }
  0xff   : > { %v918_v59 = vpop.permute.xlu1 %917  ;;  %v916_v60 = vpop.permute.xlu0 %915 }
 0x100   : > { %1000 = vst.msk [vmem:[#allocation2 + $0x96] sm:$0xff] %vm985_vm9, %v918_v59 }
 0x101   : > { %999 = vst.msk [vmem:[#allocation2 + $0x8e] sm:$0xfc] %vm983_vm10, %v916_v60  ;;  %560 = vrot.lane.b32.xlu1 %v8922_v42, %s8289_s21 }
 0x102   : > { %558 = vrot.lane.b32.xlu0 %v388_v45, %s8289_s21  ;;  %s8294_s21 = smov 16  }
 0x103   : > { %v533_v61 = vpop.permute.xlu1 %532  ;;  %v531_v62 = vpop.permute.xlu0 %530 }
 0x104   : > { %613 = vst.msk [vmem:[#allocation2 + $0xa9] sm:$0x7f] %vm596_vm6, %v533_v61 }
 0x105   : > { %612 = vst.msk [vmem:[#allocation2 + $0xa1] sm:$0xff] %vm594_vm4, %v531_v62  ;;  %690 = vrot.lane.b32.xlu1 %v8922_v42, %s8288_s20 }
 0x106   : > { %688 = vrot.lane.b32.xlu0 %v388_v45, %s8288_s20  ;;  %s8293_s20 = smov 64  }
 0x107   : > { %v663_v32 = vpop.permute.xlu1 %662  ;;  %v661_v33 = vpop.permute.xlu0 %660  ;;  %v8991_v1 = vld [vmem:[#allocation2 + $0x98] sm:$0xff] }
 0x108   : > { %v8989_v63 = vld [vmem:[#allocation2 + $0x90] sm:$0xff]  ;;  %742 = vst.msk [vmem:[#allocation2 + $0xa8] sm:$0xff] %vm724_vm5, %v663_v32  ;;  %741 = vst.msk [vmem:[#allocation2 + $0xa0] sm:$0xff] %vm724_vm5, %v661_v33 }
 0x109   : > { %7439 = vmatprep.mubr.msk.f32.mxu0 %vm390_vm0, %v8989_v63  ;;  %819 = vrot.lane.b32.xlu1 %v8922_v42, %s8290_s24 }
 0x10a   : > { %7440 = vmatmul.mubr.msk.f32.gmra.mrb[16].mxu0 %vm390_vm0, %v8991_v1  ;;  %817 = vrot.lane.b32.xlu0 %v388_v45, %s8290_s24 }
 0x10b   : > { %v792_v2 = vpop.permute.xlu1 %791 }
 0x10c   : > { %v790_v5 = vpop.permute.xlu0 %789  ;;  %872 = vst.msk [vmem:[#allocation2 + $0xa7] sm:$0xff] %vm855_vm7, %v792_v2 }
 0x10d   : > { %871 = vst.msk [vmem:[#allocation2 + $0x9f] sm:$0xfe] %vm853_vm8, %v790_v5  ;;  %949 = vrot.lane.b32.xlu1 %v8922_v42, %s8291_s25 }
 0x10e   : > { %947 = vrot.lane.b32.xlu0 %v388_v45, %s8291_s25 }
 0x10f   : > { %v922_v6 = vpop.permute.xlu1 %921 }
 0x110   : > { %v920_v7 = vpop.permute.xlu0 %919  ;;  %1002 = vst.msk [vmem:[#allocation2 + $0xa6] sm:$0xff] %vm985_vm9, %v922_v6 }
 0x111   : > { %1001 = vst.msk [vmem:[#allocation2 + $0x9e] sm:$0xfc] %vm983_vm10, %v920_v7 }
 0x113   : > { %v537_v8 = vpop.permute.xlu1 %536 }
 0x114   : > { %v535_v9 = vpop.permute.xlu0 %534  ;;  %615 = vst.msk [vmem:[#allocation2 + $0xb9] sm:$0x7f] %vm596_vm6, %v537_v8 }
 0x115   : > { %614 = vst.msk [vmem:[#allocation2 + $0xb1] sm:$0xff] %vm594_vm4, %v535_v9 }
 0x117   : > { %v667_v10 = vpop.permute.xlu1 %666  ;;  %v9013_v13 = vld [vmem:[#allocation2 + $0xa8] sm:$0xff] }
 0x118   : > { %v665_v11 = vpop.permute.xlu0 %664  ;;  %v9011_v12 = vld [vmem:[#allocation2 + $0xa0] sm:$0xff]  ;;  %744 = vst.msk [vmem:[#allocation2 + $0xb8] sm:$0xff] %vm724_vm5, %v667_v10 }
 0x119   : > { %743 = vst.msk [vmem:[#allocation2 + $0xb0] sm:$0xff] %vm724_vm5, %v665_v11  ;;  %7442 = vmatprep.mubr.msk.f32.mxu0 %vm390_vm0, %v9011_v12 }
 0x11a   : > { %7443 = vmatmul.mubr.msk.f32.gmra.mrb[18].mxu0 %vm390_vm0, %v9013_v13 }
 0x11b   : > { %v796_v16 = vpop.permute.xlu1 %795 }
 0x11c   : > { %v794_v18 = vpop.permute.xlu0 %793  ;;  %874 = vst.msk [vmem:[#allocation2 + $0xb7] sm:$0xff] %vm855_vm7, %v796_v16 }
 0x11d   : > { %873 = vst.msk [vmem:[#allocation2 + $0xaf] sm:$0xfe] %vm853_vm8, %v794_v18 }
 0x11f   : > { %v926_v19 = vpop.permute.xlu1 %925 }
 0x120   : > { %v924_v20 = vpop.permute.xlu0 %923  ;;  %1004 = vst.msk [vmem:[#allocation2 + $0xb6] sm:$0xff] %vm985_vm9, %v926_v19 }
 0x121   : > { %1003 = vst.msk [vmem:[#allocation2 + $0xae] sm:$0xfc] %vm983_vm10, %v924_v20 }
 0x123   : > { %v541_v22 = vpop.permute.xlu1 %540 }
 0x124   : > { %v539_v23 = vpop.permute.xlu0 %538  ;;  %617 = vst.msk [vmem:[#allocation2 + $0xc9] sm:$0x7f] %vm596_vm6, %v541_v22 }
 0x125   : > { %616 = vst.msk [vmem:[#allocation2 + $0xc1] sm:$0xff] %vm594_vm4, %v539_v23 }
 0x127   : > { %v671_v24 = vpop.permute.xlu1 %670  ;;  %v9029_v35 = vld [vmem:[#allocation2 + $0xb8] sm:$0xff] }
 0x128   : > { %v669_v25 = vpop.permute.xlu0 %668  ;;  %v9027_v34 = vld [vmem:[#allocation2 + $0xb0] sm:$0xff]  ;;  %746 = vst.msk [vmem:[#allocation2 + $0xc8] sm:$0xff] %vm724_vm5, %v671_v24 }
 0x129   : > { %745 = vst.msk [vmem:[#allocation2 + $0xc0] sm:$0xff] %vm724_vm5, %v669_v25  ;;  %7445 = vmatprep.mubr.msk.f32.mxu0 %vm390_vm0, %v9027_v34 }
 0x12a   : > { %7446 = vmatmul.mubr.msk.f32.gmra.mrb[20].mxu0 %vm390_vm0, %v9029_v35 }
 0x12b   : > { %v800_v36 = vpop.permute.xlu1 %799 }
 0x12c   : > { %v798_v37 = vpop.permute.xlu0 %797  ;;  %876 = vst.msk [vmem:[#allocation2 + $0xc7] sm:$0xff] %vm855_vm7, %v800_v36 }
 0x12d   : > { %875 = vst.msk [vmem:[#allocation2 + $0xbf] sm:$0xfe] %vm853_vm8, %v798_v37 }
 0x12f   : > { %v930_v38 = vpop.permute.xlu1 %929 }
 0x130   : > { %v928_v39 = vpop.permute.xlu0 %927  ;;  %1006 = vst.msk [vmem:[#allocation2 + $0xc6] sm:$0xff] %vm985_vm9, %v930_v38 }
 0x131   : > { %1005 = vst.msk [vmem:[#allocation2 + $0xbe] sm:$0xfc] %vm983_vm10, %v928_v39 }
 0x133   : > { %v545_v28 = vpop.permute.xlu1 %544 }
 0x134   : > { %v543_v29 = vpop.permute.xlu0 %542  ;;  %619 = vst.msk [vmem:[#allocation2 + $0xd9] sm:$0x7f] %vm596_vm6, %v545_v28 }
 0x135   : > { %618 = vst.msk [vmem:[#allocation2 + $0xd1] sm:$0xff] %vm594_vm4, %v543_v29 }
 0x137   : > { %v675_v42 = vpop.permute.xlu1 %674  ;;  %v9045_v45 = vld [vmem:[#allocation2 + $0xc8] sm:$0xff] }
 0x138   : > { %v673_v43 = vpop.permute.xlu0 %672  ;;  %v9043_v44 = vld [vmem:[#allocation2 + $0xc0] sm:$0xff]  ;;  %748 = vst.msk [vmem:[#allocation2 + $0xd8] sm:$0xff] %vm724_vm5, %v675_v42 }
 0x139   : > { %747 = vst.msk [vmem:[#allocation2 + $0xd0] sm:$0xff] %vm724_vm5, %v673_v43  ;;  %7448 = vmatprep.mubr.msk.f32.mxu0 %vm390_vm0, %v9043_v44 }
 0x13a   : > { %7449 = vmatmul.mubr.msk.f32.gmra.mrb[22].mxu0 %vm390_vm0, %v9045_v45 }
 0x13b   : > { %v804_v48 = vpop.permute.xlu1 %803 }
 0x13c   : > { %v802_v49 = vpop.permute.xlu0 %801  ;;  %878 = vst.msk [vmem:[#allocation2 + $0xd7] sm:$0xff] %vm855_vm7, %v804_v48  ;;  %v1017_v48 = vld [vmem:[#allocation2] sm:$0xff] }
 0x13d   : > { %877 = vst.msk [vmem:[#allocation2 + $0xcf] sm:$0xfe] %vm853_vm8, %v802_v49 }
 0x13f   : > { %v934_v50 = vpop.permute.xlu1 %933 }
 0x140   : > { %v932_v51 = vpop.permute.xlu0 %931  ;;  %1008 = vst.msk [vmem:[#allocation2 + $0xd6] sm:$0xff] %vm985_vm9, %v934_v50 }
 0x141   : > { %1007 = vst.msk [vmem:[#allocation2 + $0xce] sm:$0xfc] %vm983_vm10, %v932_v51  ;;  %v1018_v51 = vld [vmem:[#allocation2 + $0x8] sm:$0xff] }
 0x143   : > { %v549_v30 = vpop.permute.xlu1 %548 }
 0x144   : > { %v547_v31 = vpop.permute.xlu0 %546  ;;  %621 = vst.msk [vmem:[#allocation2 + $0xe9] sm:$0x7f] %vm596_vm6, %v549_v30 }
 0x145   : > { %620 = vst.msk [vmem:[#allocation2 + $0xe1] sm:$0xff] %vm594_vm4, %v547_v31  ;;  %v6911_v31 = vld [vmem:[%s11344_s1 + $0x18] sm:$0x1f] }
 0x147   : > { %v679_v55 = vpop.permute.xlu1 %678  ;;  %v9061_v60 = vld [vmem:[#allocation2 + $0xd8] sm:$0xff] }
 0x148   : > { %v677_v58 = vpop.permute.xlu0 %676  ;;  %v9059_v59 = vld [vmem:[#allocation2 + $0xd0] sm:$0xff]  ;;  %750 = vst.msk [vmem:[#allocation2 + $0xe8] sm:$0xff] %vm724_vm5, %v679_v55 }
 0x149   : > { %749 = vst.msk [vmem:[#allocation2 + $0xe0] sm:$0xff] %vm724_vm5, %v677_v58  ;;  %7451 = vmatprep.mubr.msk.f32.mxu0 %vm390_vm0, %v9059_v59 }
 0x14a   : > { %7452 = vmatmul.mubr.msk.f32.gmra.mrb[24].mxu0 %vm390_vm0, %v9061_v60 }
 0x14b   : > { %v808_v61 = vpop.permute.xlu1 %807 }
 0x14c   : > { %v806_v62 = vpop.permute.xlu0 %805  ;;  %880 = vst.msk [vmem:[#allocation2 + $0xe7] sm:$0xff] %vm855_vm7, %v808_v61 }
 0x14d   : > { %879 = vst.msk [vmem:[#allocation2 + $0xdf] sm:$0xfe] %vm853_vm8, %v806_v62 }
 0x14f   : > { %v938_v32 = vpop.permute.xlu1 %937 }
 0x150   : > { %v936_v33 = vpop.permute.xlu0 %935  ;;  %1010 = vst.msk [vmem:[#allocation2 + $0xe6] sm:$0xff] %vm985_vm9, %v938_v32 }
 0x151   : > { %1009 = vst.msk [vmem:[#allocation2 + $0xde] sm:$0xfc] %vm983_vm10, %v936_v33 }
 0x153   : > { %v553_v2 = vpop.permute.xlu1 %552 }
 0x154   : > { %v551_v5 = vpop.permute.xlu0 %550  ;;  %623 = vst.msk [vmem:[#allocation2 + $0xf9] sm:$0x7f] %vm596_vm6, %v553_v2 }
 0x155   : > { %622 = vst.msk [vmem:[#allocation2 + $0xf1] sm:$0xff] %vm594_vm4, %v551_v5 }
 0x157   : > { %v683_v6 = vpop.permute.xlu1 %682  ;;  %v9077_v9 = vld [vmem:[#allocation2 + $0xe8] sm:$0xff] }
 0x158   : > { %v681_v7 = vpop.permute.xlu0 %680  ;;  %v9075_v8 = vld [vmem:[#allocation2 + $0xe0] sm:$0xff]  ;;  %752 = vst.msk [vmem:[#allocation2 + $0xf8] sm:$0xff] %vm724_vm5, %v683_v6 }
 0x159   : > { %751 = vst.msk [vmem:[#allocation2 + $0xf0] sm:$0xff] %vm724_vm5, %v681_v7  ;;  %7454 = vmatprep.mubr.msk.f32.mxu0 %vm390_vm0, %v9075_v8 }
 0x15a   : > { %7455 = vmatmul.mubr.msk.f32.gmra.mrb[26].mxu0 %vm390_vm0, %v9077_v9 }
 0x15b   : > { %v812_v10 = vpop.permute.xlu1 %811 }
 0x15c   : > { %v810_v11 = vpop.permute.xlu0 %809  ;;  %882 = vst.msk [vmem:[#allocation2 + $0xf7] sm:$0xff] %vm855_vm7, %v812_v10  ;;  %v3292_v10 = vlaneseq }
 0x15d   : > { %881 = vst.msk [vmem:[#allocation2 + $0xef] sm:$0xfe] %vm853_vm8, %v810_v11 }
 0x15f   : > { %v942_v16 = vpop.permute.xlu1 %941 }
 0x160   : > { %v940_v18 = vpop.permute.xlu0 %939  ;;  %1012 = vst.msk [vmem:[#allocation2 + $0xf6] sm:$0xff] %vm985_vm9, %v942_v16 }
 0x161   : > { %1011 = vst.msk [vmem:[#allocation2 + $0xee] sm:$0xfc] %vm983_vm10, %v940_v18 }
 0x163   : > { %v557_v19 = vpop.permute.xlu1 %556 }
 0x164   : > { %v555_v20 = vpop.permute.xlu0 %554  ;;  %625 = vst.msk [vmem:[#allocation2 + $0x109] sm:$0x7f] %vm596_vm6, %v557_v19 }
 0x165   : > { %624 = vst.msk [vmem:[#allocation2 + $0x101] sm:$0xff] %vm594_vm4, %v555_v20 }
 0x167   : > { %v687_v22 = vpop.permute.xlu1 %686  ;;  %v9093_v25 = vld [vmem:[#allocation2 + $0xf8] sm:$0xff] }
 0x168   : > { %v685_v23 = vpop.permute.xlu0 %684  ;;  %v9091_v24 = vld [vmem:[#allocation2 + $0xf0] sm:$0xff]  ;;  %754 = vst.msk [vmem:[#allocation2 + $0x108] sm:$0xff] %vm724_vm5, %v687_v22  ;;  %v3105_v22 = vld [vmem:[#allocation3] sm:$0xff] }
 0x169   : > { %753 = vst.msk [vmem:[#allocation2 + $0x100] sm:$0xff] %vm724_vm5, %v685_v23  ;;  %7457 = vmatprep.mubr.msk.f32.mxu0 %vm390_vm0, %v9091_v24  ;;  %v3107_v23 = vld [vmem:[#allocation3 + $0x10] sm:$0x3] }
 0x16a   : > { %7458 = vmatmul.mubr.msk.f32.gmra.mrb[28].mxu0 %vm390_vm0, %v9093_v25 }
 0x16b   : > { %v816_v36 = vpop.permute.xlu1 %815 }
 0x16c   : > { %v814_v37 = vpop.permute.xlu0 %813  ;;  %884 = vst.msk [vmem:[#allocation2 + $0x107] sm:$0xff] %vm855_vm7, %v816_v36 }
 0x16d   : > { %883 = vst.msk [vmem:[#allocation2 + $0xff] sm:$0xfe] %vm853_vm8, %v814_v37 }
 0x16f   : > { %v946_v38 = vpop.permute.xlu1 %945 }
 0x170   : > { %v944_v39 = vpop.permute.xlu0 %943  ;;  %1014 = vst.msk [vmem:[#allocation2 + $0x106] sm:$0xff] %vm985_vm9, %v946_v38 }
 0x171   : > { %1013 = vst.msk [vmem:[#allocation2 + $0xfe] sm:$0xfc] %vm983_vm10, %v944_v39  ;;  %v3106_v39 = vld [vmem:[#allocation3 + $0x8] sm:$0xff] }
 0x173   : > { %v561_v28 = vpop.permute.xlu1 %560 }
 0x174   : > { %v559_v29 = vpop.permute.xlu0 %558  ;;  %627 = vst.msk [vmem:[#allocation2 + $0x119] sm:$0x7f] %vm596_vm6, %v561_v28  ;;  %vm4421_vm6 = vcmask 260224  }
 0x175   : > { %626 = vst.msk [vmem:[#allocation2 + $0x111] sm:$0xff] %vm594_vm4, %v559_v29  ;;  %vm4256_vm4 = vcmask 654336  }
 0x176   : > { %4259 = vst.msk [vmem:[#allocation4 + $0x10] sm:$0xff] %vm4256_vm4, %v8287_v0  ;;  %4257 = vst.msk [vmem:[#allocation4] sm:$0xff] %vm4256_vm4, %v8287_v0 }
 0x177   : > { %v9109_v43 = vld [vmem:[#allocation2 + $0x108] sm:$0xff]  ;;  %v691_v49 = vpop.permute.xlu1 %690  ;;  %4258 = vst.msk [vmem:[#allocation4 + $0x8] sm:$0xff] %vm4256_vm4, %v8287_v0  ;;  %4260 = vst.msk [vmem:[#allocation4 + $0x18] sm:$0xff] %vm4256_vm4, %v8287_v0 }
 0x178   : > { %v9107_v42 = vld [vmem:[#allocation2 + $0x100] sm:$0xff]  ;;  %v689_v50 = vpop.permute.xlu0 %688  ;;  %756 = vst.msk [vmem:[#allocation2 + $0x118] sm:$0xff] %vm724_vm5, %v691_v49 }
 0x179   : > { %7460 = vmatprep.mubr.msk.f32.mxu0 %vm390_vm0, %v9107_v42  ;;  %755 = vst.msk [vmem:[#allocation2 + $0x110] sm:$0xff] %vm724_vm5, %v689_v50  ;;  %v3159_v50 = vsel %vm3016_vm11, %v3105_v22, -inf  ;;  %vm4371_vm5 = vcmask 128000  }
 0x17a   : > { %7461 = vmatmul.mubr.msk.f32.gmra.mrb[30].mxu0 %vm390_vm0, %v9109_v43  ;;  %4261 = vst.msk [vmem:[#allocation4 + $0x20] sm:$0xff] %vm4256_vm4, %v8287_v0  ;;  %4262 = vst.msk [vmem:[#allocation4 + $0x28] sm:$0xff] %vm4256_vm4, %v8287_v0 }
 0x17b   : > { %7465 = vmatprep.mubr.msk.f32.mxu0 %vm390_vm0, %v1017_v48  ;;  %v820_v30 = vpop.permute.xlu1 %819  ;;  %4263 = vst.msk [vmem:[#allocation4 + $0x30] sm:$0xff] %vm4256_vm4, %v8287_v0  ;;  %4264 = vst.msk [vmem:[#allocation4 + $0x38] sm:$0xff] %vm4256_vm4, %v8287_v0 }
 0x17c   : > { %886 = vst.msk [vmem:[#allocation2 + $0x117] sm:$0xff] %vm855_vm7, %v820_v30  ;;  %v818_v55 = vpop.permute.xlu0 %817  ;;  %vm4471_vm7 = vcmask 392448  }
 0x17d   : > { %885 = vst.msk [vmem:[#allocation2 + $0x10f] sm:$0xfe] %vm853_vm8, %v818_v55  ;;  %vm4552_vm8 = vcmask 522624  }
 0x17e   : > { %7466 = vmatmul.mubr.msk.f32.vlgmr.msra.gmra.mrb[0].mxu0 %vm390_vm0, %v1018_v51  ;;  %v3165_v51 = vsel %vm3019_vm12, %v3107_v23, -inf  ;;  %4265 = vst.msk [vmem:[#allocation4 + $0x40] sm:$0xff] %vm4256_vm4, %v8287_v0  ;;  %4266 = vst.msk [vmem:[#allocation4 + $0x48] sm:$0xff] %vm4256_vm4, %v8287_v0 }
 0x17f   : > { %7514 = vmatpush3.msk.msra.mxu0 %vm1181_vm3, %v8969_v54  ;;  %7468 = vmatprep.mubr.msk.f32.mxu0 %vm390_vm0, %v8531_v17  ;;  %v950_v58 = vpop.permute.xlu1 %949  ;;  %v6945_v17 = vld [vmem:[%s11344_s1 + $0x20] sm:$0x1f]  ;;  %4267 = vst.msk [vmem:[#allocation4 + $0x50] sm:$0xff] %vm4256_vm4, %v8287_v0  ;;  %4268 = vst.msk [vmem:[#allocation4 + $0x58] sm:$0xff] %vm4256_vm4, %v8287_v0 }
 0x180   : > { %7563 = vmatprep.subr.msk.mxu0 %vm1181_vm3, %v6911_v31  ;;  %1016 = vst.msk [vmem:[#allocation2 + $0x116] sm:$0xff] %vm985_vm9, %v950_v58  ;;  %v948_v61 = vpop.permute.xlu0 %947  ;;  %vm4625_vm9 = vcmask 652800  }
 0x181   : > { %1015 = vst.msk [vmem:[#allocation2 + $0x10e] sm:$0xfc] %vm983_vm10, %v948_v61  ;;  %vm5438_vm10 = vcmask 261120  }
 0x182   : > { %7469 = vmatmul.mubr.msk.f32.gmra.mrb[2].mxu0 %vm390_vm0, %v8553_v21  ;;  %5444 = vst.msk [vmem:[#allocation5 + $0x20] sm:$0xff] %vm5438_vm10, %v8287_v0  ;;  %5439 = vst.msk [vmem:[#allocation5] sm:$0xff] %vm5438_vm10, %v8287_v0 }
 0x183   : > { %7471 = vmatprep.mubr.msk.f32.mxu0 %vm390_vm0, %v8748_v46  ;;  %5442 = vst.msk [vmem:[#allocation5 + $0x10] sm:$0xff] %vm5438_vm10, %v8287_v0  ;;  %5446 = vst.msk [vmem:[#allocation5 + $0x30] sm:$0xff] %vm5438_vm10, %v8287_v0 }
 0x184   : > { %5448 = vst.msk [vmem:[#allocation5 + $0x40] sm:$0xff] %vm5438_vm10, %v8287_v0  ;;  %5450 = vst.msk [vmem:[#allocation5 + $0x50] sm:$0xff] %vm5438_vm10, %v8287_v0 }
 0x185   : > { %5452 = vst.msk [vmem:[#allocation5 + $0x60] sm:$0xff] %vm5438_vm10, %v8287_v0  ;;  %5454 = vst.msk [vmem:[#allocation5 + $0x70] sm:$0xff] %vm5438_vm10, %v8287_v0 }
 0x186   : > { %7472 = vmatmul.mubr.msk.f32.gmra.mrb[4].mxu0 %vm390_vm0, %v8750_v47  ;;  %5456 = vst.msk [vmem:[#allocation5 + $0x80] sm:$0xff] %vm5438_vm10, %v8287_v0  ;;  %5458 = vst.msk [vmem:[#allocation5 + $0x90] sm:$0xff] %vm5438_vm10, %v8287_v0 }
 0x187   : > { %7474 = vmatprep.mubr.msk.f32.mxu0 %vm390_vm0, %v8780_v56 }
 0x188   : > { %v9252_v21 = vld [vmem:[#allocation2 + $0x110] sm:$0xff] }
 0x18a   : > { %7475 = vmatmul.mubr.msk.f32.gmra.mrb[6].mxu0 %vm390_vm0, %v8782_v57 }
 0x18b   : > { %7477 = vmatprep.mubr.msk.f32.mxu0 %vm390_vm0, %v8812_v3 }
 0x18e   : > { %7478 = vmatmul.mubr.msk.f32.gmra.mrb[8].mxu0 %vm390_vm0, %v8814_v4 }
 0x18f   : > { %7480 = vmatprep.mubr.msk.f32.mxu0 %vm390_vm0, %v8849_v14 }
 0x192   : > { %7481 = vmatmul.mubr.msk.f32.gmra.mrb[10].mxu0 %vm390_vm0, %v8851_v15 }
 0x193   : > { %7483 = vmatprep.mubr.msk.f32.mxu0 %vm390_vm0, %v8881_v26 }
 0x196   : > { %7484 = vmatmul.mubr.msk.f32.gmra.mrb[12].mxu0 %vm390_vm0, %v8883_v27 }
 0x197   : > { %7486 = vmatprep.mubr.msk.f32.mxu0 %vm390_vm0, %v8913_v40 }
 0x19a   : > { %7487 = vmatmul.mubr.msk.f32.gmra.mrb[14].mxu0 %vm390_vm0, %v8915_v41 }
 0x19b   : > { %7489 = vmatprep.mubr.msk.f32.mxu0 %vm390_vm0, %v8952_v52 }
 0x19e   : > { %7490 = vmatmul.mubr.msk.f32.gmra.mrb[16].mxu0 %vm390_vm0, %v8954_v53 }
 0x19f   : > { %7492 = vmatprep.mubr.msk.f32.mxu0 %vm390_vm0, %v8989_v63 }
 0x1a2   : > { %7493 = vmatmul.mubr.msk.f32.gmra.mrb[18].mxu0 %vm390_vm0, %v8991_v1 }
 0x1a3   : > { %7495 = vmatprep.mubr.msk.f32.mxu0 %vm390_vm0, %v9011_v12 }
 0x1a6   : > { %7496 = vmatmul.mubr.msk.f32.gmra.mrb[20].mxu0 %vm390_vm0, %v9013_v13 }
 0x1a7   : > { %7498 = vmatprep.mubr.msk.f32.mxu0 %vm390_vm0, %v9027_v34 }
 0x1aa   : > { %7499 = vmatmul.mubr.msk.f32.gmra.mrb[22].mxu0 %vm390_vm0, %v9029_v35 }
 0x1ab   : > { %7501 = vmatprep.mubr.msk.f32.mxu0 %vm390_vm0, %v9043_v44 }
 0x1ae   : > { %7502 = vmatmul.mubr.msk.f32.gmra.mrb[24].mxu0 %vm390_vm0, %v9045_v45 }
 0x1af   : > { %7504 = vmatprep.mubr.msk.f32.mxu0 %vm390_vm0, %v9059_v59 }
 0x1b2   : > { %7505 = vmatmul.mubr.msk.f32.gmra.mrb[26].mxu0 %vm390_vm0, %v9061_v60 }
 0x1b3   : > { %7507 = vmatprep.mubr.msk.f32.mxu0 %vm390_vm0, %v9075_v8 }
 0x1b6   : > { %7508 = vmatmul.mubr.msk.f32.gmra.mrb[28].mxu0 %vm390_vm0, %v9077_v9 }
 0x1b7   : > { %7510 = vmatprep.mubr.msk.f32.mxu0 %vm390_vm0, %v9091_v24 }
 0x1ba   : > { %7511 = vmatmul.mubr.msk.f32.gmra.mrb[30].mxu0 %vm390_vm0, %v9093_v25 }
 0x1bb   : > { %7515 = vmatprep.mubr.msk.f32.mxu0 %vm390_vm0, %v8748_v46  ;;  %v9258_v46 = vld [vmem:[#allocation2 + $0x118] sm:$0xff] }
 0x1be   : > { %7516 = vmatmul.mubr.msk.f32.vlgmr.msra.gmra.mrb[0].mxu0 %vm390_vm0, %v8750_v47  ;;  %v2155_v47 = vld [vmem:[#allocation2 + $0x120] sm:$0xff] }
 0x1bf   : > { %7564 = vmatpush3.msk.msra.mxu0 %vm1181_vm3, %v6911_v31  ;;  %7518 = vmatprep.mubr.msk.f32.mxu0 %vm390_vm0, %v8780_v56 }
 0x1c0   : > { %7613 = vmatprep.subr.msk.mxu0 %vm1181_vm3, %v6945_v17 }
 0x1c2   : > { %7519 = vmatmul.mubr.msk.f32.gmra.mrb[2].mxu0 %vm390_vm0, %v8782_v57 }
 0x1c3   : > { %7521 = vmatprep.mubr.msk.f32.mxu0 %vm390_vm0, %v8812_v3 }
 0x1c6   : > { %7522 = vmatmul.mubr.msk.f32.gmra.mrb[4].mxu0 %vm390_vm0, %v8814_v4 }
 0x1c7   : > { %7524 = vmatprep.mubr.msk.f32.mxu0 %vm390_vm0, %v8849_v14 }
 0x1ca   : > { %7525 = vmatmul.mubr.msk.f32.gmra.mrb[6].mxu0 %vm390_vm0, %v8851_v15 }
 0x1cb   : > { %7527 = vmatprep.mubr.msk.f32.mxu0 %vm390_vm0, %v8881_v26 }
 0x1ce   : > { %7528 = vmatmul.mubr.msk.f32.gmra.mrb[8].mxu0 %vm390_vm0, %v8883_v27 }
 0x1cf   : > { %7530 = vmatprep.mubr.msk.f32.mxu0 %vm390_vm0, %v8913_v40 }
 0x1d2   : > { %7531 = vmatmul.mubr.msk.f32.gmra.mrb[10].mxu0 %vm390_vm0, %v8915_v41 }
 0x1d3   : > { %7533 = vmatprep.mubr.msk.f32.mxu0 %vm390_vm0, %v8952_v52 }
 0x1d6   : > { %7534 = vmatmul.mubr.msk.f32.gmra.mrb[12].mxu0 %vm390_vm0, %v8954_v53 }
 0x1d7   : > { %7536 = vmatprep.mubr.msk.f32.mxu0 %vm390_vm0, %v8989_v63 }
 0x1da   : > { %7537 = vmatmul.mubr.msk.f32.gmra.mrb[14].mxu0 %vm390_vm0, %v8991_v1 }
 0x1db   : > { %7539 = vmatprep.mubr.msk.f32.mxu0 %vm390_vm0, %v9011_v12 }
 0x1de   : > { %7540 = vmatmul.mubr.msk.f32.gmra.mrb[16].mxu0 %vm390_vm0, %v9013_v13 }
 0x1df   : > { %7542 = vmatprep.mubr.msk.f32.mxu0 %vm390_vm0, %v9027_v34 }
 0x1e2   : > { %7543 = vmatmul.mubr.msk.f32.gmra.mrb[18].mxu0 %vm390_vm0, %v9029_v35 }
 0x1e3   : > { %7545 = vmatprep.mubr.msk.f32.mxu0 %vm390_vm0, %v9043_v44 }
 0x1e6   : > { %7546 = vmatmul.mubr.msk.f32.gmra.mrb[20].mxu0 %vm390_vm0, %v9045_v45 }
 0x1e7   : > { %7548 = vmatprep.mubr.msk.f32.mxu0 %vm390_vm0, %v9059_v59 }
 0x1ea   : > { %7549 = vmatmul.mubr.msk.f32.gmra.mrb[22].mxu0 %vm390_vm0, %v9061_v60 }
 0x1eb   : > { %7551 = vmatprep.mubr.msk.f32.mxu0 %vm390_vm0, %v9075_v8 }
 0x1ee   : > { %7552 = vmatmul.mubr.msk.f32.gmra.mrb[24].mxu0 %vm390_vm0, %v9077_v9 }
 0x1ef   : > { %7554 = vmatprep.mubr.msk.f32.mxu0 %vm390_vm0, %v9091_v24 }
 0x1f2   : > { %7555 = vmatmul.mubr.msk.f32.gmra.mrb[26].mxu0 %vm390_vm0, %v9093_v25 }
 0x1f3   : > { %7557 = vmatprep.mubr.msk.f32.mxu0 %vm390_vm0, %v9107_v42 }
 0x1f6   : > { %7558 = vmatmul.mubr.msk.f32.gmra.mrb[28].mxu0 %vm390_vm0, %v9109_v43 }
 0x1f7   : > { %7560 = vmatprep.mubr.msk.f32.mxu0 %vm390_vm0, %v9252_v21 }
 0x1fa   : > { %7561 = vmatmul.mubr.msk.f32.gmra.mrb[30].mxu0 %vm390_vm0, %v9258_v46 }
 0x1fb   : > { %7565 = vmatprep.mubr.msk.f32.mxu0 %vm390_vm0, %v8780_v56  ;;  %v2156_v56 = vld [vmem:[#allocation2 + $0x128] sm:$0xff] }
 0x1fe   : > { %7566 = vmatmul.mubr.msk.f32.vlgmr.msra.gmra.mrb[0].mxu0 %vm390_vm0, %v8782_v57  ;;  %v2516_v57 = vld [vmem:[#allocation2 + $0x40] sm:$0xff] }
 0x1ff   : > { %7614 = vmatpush3.msk.msra.mxu0 %vm1181_vm3, %v6945_v17  ;;  %7568 = vmatprep.mubr.msk.f32.mxu0 %vm390_vm0, %v8812_v3  ;;  %v2517_v3 = vld [vmem:[#allocation2 + $0x48] sm:$0xff]  ;;  %vm4438_vm3 = vcmask 1047559  }
 0x202   : > { %7569 = vmatmul.mubr.msk.f32.gmra.mrb[2].mxu0 %vm390_vm0, %v8814_v4  ;;  %v2546_v4 = vld [vmem:[#allocation2 + $0x130] sm:$0xff] }
 0x203   : > { %7571 = vmatprep.mubr.msk.f32.mxu0 %vm390_vm0, %v8849_v14 }
 0x206   : > { %7572 = vmatmul.mubr.msk.f32.gmra.mrb[4].mxu0 %vm390_vm0, %v8851_v15 }
 0x207   : > { %7574 = vmatprep.mubr.msk.f32.mxu0 %vm390_vm0, %v8881_v26 }
 0x20a   : > { %7575 = vmatmul.mubr.msk.f32.gmra.mrb[6].mxu0 %vm390_vm0, %v8883_v27 }
 0x20b   : > { %7577 = vmatprep.mubr.msk.f32.mxu0 %vm390_vm0, %v8913_v40 }
 0x20e   : > { %7578 = vmatmul.mubr.msk.f32.gmra.mrb[8].mxu0 %vm390_vm0, %v8915_v41 }
 0x20f   : > { %7580 = vmatprep.mubr.msk.f32.mxu0 %vm390_vm0, %v8952_v52 }
 0x212   : > { %7581 = vmatmul.mubr.msk.f32.gmra.mrb[10].mxu0 %vm390_vm0, %v8954_v53 }
 0x213   : > { %7583 = vmatprep.mubr.msk.f32.mxu0 %vm390_vm0, %v8989_v63 }
 0x216   : > { %7584 = vmatmul.mubr.msk.f32.gmra.mrb[12].mxu0 %vm390_vm0, %v8991_v1 }
 0x217   : > { %7586 = vmatprep.mubr.msk.f32.mxu0 %vm390_vm0, %v9011_v12 }
 0x21a   : > { %7587 = vmatmul.mubr.msk.f32.gmra.mrb[14].mxu0 %vm390_vm0, %v9013_v13 }
 0x21b   : > { %7589 = vmatprep.mubr.msk.f32.mxu0 %vm390_vm0, %v9027_v34 }
 0x21e   : > { %7590 = vmatmul.mubr.msk.f32.gmra.mrb[16].mxu0 %vm390_vm0, %v9029_v35 }
 0x21f   : > { %7592 = vmatprep.mubr.msk.f32.mxu0 %vm390_vm0, %v9043_v44 }
 0x222   : > { %7593 = vmatmul.mubr.msk.f32.gmra.mrb[18].mxu0 %vm390_vm0, %v9045_v45 }
 0x223   : > { %7595 = vmatprep.mubr.msk.f32.mxu0 %vm390_vm0, %v9059_v59 }
 0x226   : > { %7596 = vmatmul.mubr.msk.f32.gmra.mrb[20].mxu0 %vm390_vm0, %v9061_v60 }
 0x227   : > { %7598 = vmatprep.mubr.msk.f32.mxu0 %vm390_vm0, %v9075_v8 }
 0x22a   : > { %7599 = vmatmul.mubr.msk.f32.gmra.mrb[22].mxu0 %vm390_vm0, %v9077_v9 }
 0x22b   : > { %7601 = vmatprep.mubr.msk.f32.mxu0 %vm390_vm0, %v9091_v24 }
 0x22e   : > { %7602 = vmatmul.mubr.msk.f32.gmra.mrb[24].mxu0 %vm390_vm0, %v9093_v25 }
 0x22f   : > { %7604 = vmatprep.mubr.msk.f32.mxu0 %vm390_vm0, %v9107_v42 }
 0x232   : > { %7605 = vmatmul.mubr.msk.f32.gmra.mrb[26].mxu0 %vm390_vm0, %v9109_v43 }
 0x233   : > { %7607 = vmatprep.mubr.msk.f32.mxu0 %vm390_vm0, %v9252_v21 }
 0x236   : > { %7608 = vmatmul.mubr.msk.f32.gmra.mrb[28].mxu0 %vm390_vm0, %v9258_v46 }
 0x237   : > { %7610 = vmatprep.mubr.msk.f32.mxu0 %vm390_vm0, %v2155_v47 }
 0x23a   : > { %7611 = vmatmul.mubr.msk.f32.gmra.mrb[30].mxu0 %vm390_vm0, %v2156_v56 }
 0x23b   : > { %7615 = vmatprep.mubr.msk.f32.mxu0 %vm390_vm0, %v2516_v57 }
 0x23e   : > { %7616 = vmatmul.mubr.msk.f32.vlgmr.msra.gmra.mrb[0].mxu0 %vm390_vm0, %v2517_v3 }
 0x23f   : > { %7618 = vmatprep.mubr.msk.f32.mxu0 %vm390_vm0, %v8849_v14  ;;  %v2547_v14 = vld [vmem:[#allocation2 + $0x138] sm:$0xff] }
 0x242   : > { %7619 = vmatmul.mubr.msk.f32.gmra.mrb[2].mxu0 %vm390_vm0, %v8851_v15  ;;  %v9494_v15 = vld [vmem:[%s11345_s2] ss:$0 sm:$0xff] }
 0x243   : > { %7621 = vmatprep.mubr.msk.f32.mxu0 %vm390_vm0, %v8881_v26 }
 0x246   : > { %7622 = vmatmul.mubr.msk.f32.gmra.mrb[4].mxu0 %vm390_vm0, %v8883_v27  ;;  %v9499_v27 = vld [vmem:[%s11346_s3] ss:$0 sm:$0xff] }
 0x247   : > { %7624 = vmatprep.mubr.msk.f32.mxu0 %vm390_vm0, %v8913_v40 }
 0x24a   : > { %7625 = vmatmul.mubr.msk.f32.gmra.mrb[6].mxu0 %vm390_vm0, %v8915_v41 }
 0x24b   : > { %7627 = vmatprep.mubr.msk.f32.mxu0 %vm390_vm0, %v8952_v52 }
 0x24e   : > { %7628 = vmatmul.mubr.msk.f32.gmra.mrb[8].mxu0 %vm390_vm0, %v8954_v53 }
 0x24f   : > { %7630 = vmatprep.mubr.msk.f32.mxu0 %vm390_vm0, %v8989_v63 }
 0x252   : > { %7631 = vmatmul.mubr.msk.f32.gmra.mrb[10].mxu0 %vm390_vm0, %v8991_v1 }
 0x253   : > { %7633 = vmatprep.mubr.msk.f32.mxu0 %vm390_vm0, %v9011_v12 }
 0x256   : > { %7634 = vmatmul.mubr.msk.f32.gmra.mrb[12].mxu0 %vm390_vm0, %v9013_v13 }
 0x257   : > { %7636 = vmatprep.mubr.msk.f32.mxu0 %vm390_vm0, %v9027_v34 }
 0x25a   : > { %7637 = vmatmul.mubr.msk.f32.gmra.mrb[14].mxu0 %vm390_vm0, %v9029_v35 }
 0x25b   : > { %7639 = vmatprep.mubr.msk.f32.mxu0 %vm390_vm0, %v9043_v44 }
 0x25e   : > { %7640 = vmatmul.mubr.msk.f32.gmra.mrb[16].mxu0 %vm390_vm0, %v9045_v45 }
 0x25f   : > { %7642 = vmatprep.mubr.msk.f32.mxu0 %vm390_vm0, %v9059_v59 }
 0x262   : > { %7643 = vmatmul.mubr.msk.f32.gmra.mrb[18].mxu0 %vm390_vm0, %v9061_v60 }
 0x263   : > { %7645 = vmatprep.mubr.msk.f32.mxu0 %vm390_vm0, %v9075_v8  ;;  %v8292_v8 = vmov 1983009808  }
 0x266   : > { %7646 = vmatmul.mubr.msk.f32.gmra.mrb[20].mxu0 %vm390_vm0, %v9077_v9  ;;  %v3290_v9 = vunpack.c.l.s4 %v8292_v8 }
 0x267   : > { %7648 = vmatprep.mubr.msk.f32.mxu0 %vm390_vm0, %v9091_v24 }
 0x268   : > { %v3291_v29 = vunpack.c.0.s8 %v3290_v9 }
 0x26a   : > { %7649 = vmatmul.mubr.msk.f32.gmra.mrb[22].mxu0 %vm390_vm0, %v9093_v25 }
 0x26b   : > { %7651 = vmatprep.mubr.msk.f32.mxu0 %vm390_vm0, %v9107_v42  ;;  %v3293_v42 = vshrl.u32 %v3292_v10, 7 }
 0x26e   : > { %7652 = vmatmul.mubr.msk.f32.gmra.mrb[24].mxu0 %vm390_vm0, %v9109_v43 }
 0x26f   : > { %7654 = vmatprep.mubr.msk.f32.mxu0 %vm390_vm0, %v9252_v21  ;;  %v3162_v21 = vsel %vm3016_vm11, %v3106_v39, -inf }
 0x272   : > { %7655 = vmatmul.mubr.msk.f32.gmra.mrb[26].mxu0 %vm390_vm0, %v9258_v46 }
 0x273   : > { %7657 = vmatprep.mubr.msk.f32.mxu0 %vm390_vm0, %v2155_v47 }
 0x276   : > { %7658 = vmatmul.mubr.msk.f32.gmra.mrb[28].mxu0 %vm390_vm0, %v2156_v56 }
 0x277   : > { %7660 = vmatprep.mubr.msk.f32.mxu0 %vm390_vm0, %v2546_v4  ;;  %v9535_v4 = vsub.s32 %v3291_v29, %v3293_v42 }
 0x27a   : > { %7661 = vmatmul.mubr.msk.f32.gmra.mrb[30].mxu0 %vm390_vm0, %v2547_v14  ;;  %vm4323_vm0 = vcmask 1044484  }
 0x311   : > { %v7617_v26 = vpop.f32.mrb[0].mxu0 }
 0x312   : > { %v2914_v40 = vmul.f32 %v7617_v26, %v9494_v15  ;;  %v2715_v41 = vpop.f32.mrb[1].mxu0 }
 0x313   : > { %v2913_v52 = vmul.f32 %v9494_v15, %v2715_v41 }
 0x314   : > { %v2953_v53 = vadd.f32 %v9499_v27, %v2914_v40 }
 0x315   : > { %v2952_v54 = vadd.f32 %v9499_v27, %v2913_v52  ;;  %v7620_v63 = vpop.f32.mrb[2].mxu0 }
 0x316   : > { %v2985_v1 = vmax.f32 %v2953_v53, 0.0  ;;  %v2916_v12 = vmul.f32 %v7620_v63, %v9494_v15  ;;  %v2725_v13 = vpop.f32.mrb[3].mxu0 }
 0x317   : > { %v2984_v34 = vmax.f32 %v2952_v54, 0.0  ;;  %v2915_v35 = vmul.f32 %v9494_v15, %v2725_v13 }
 0x318   : > { %3074 = vst.msk [vmem:[#allocation3 + $0x21] sm:$0xff] %vm3016_vm11, %v2985_v1  ;;  %v2955_v44 = vadd.f32 %v9499_v27, %v2916_v12 }
 0x319   : > { %3073 = vst.msk [vmem:[#allocation3 + $0x19] sm:$0xff] %vm3016_vm11, %v2984_v34  ;;  %v2954_v45 = vadd.f32 %v9499_v27, %v2915_v35  ;;  %v7623_v59 = vpop.f32.mrb[4].mxu0 }
 0x31a   : > { %v2987_v60 = vmax.f32 %v2955_v44, 0.0  ;;  %v2918_v62 = vmul.f32 %v7623_v59, %v9494_v15  ;;  %v2735_v32 = vpop.f32.mrb[5].mxu0 }
 0x31b   : > { %v2986_v33 = vmax.f32 %v2954_v45, 0.0  ;;  %v2917_v2 = vmul.f32 %v9494_v15, %v2735_v32 }
 0x31c   : > { %3076 = vst.msk [vmem:[#allocation3 + $0x39] sm:$0xff] %vm3016_vm11, %v2987_v60  ;;  %v2957_v5 = vadd.f32 %v9499_v27, %v2918_v62 }
 0x31d   : > { %3075 = vst.msk [vmem:[#allocation3 + $0x31] sm:$0xff] %vm3016_vm11, %v2986_v33  ;;  %v2956_v6 = vadd.f32 %v9499_v27, %v2917_v2  ;;  %v7626_v7 = vpop.f32.mrb[6].mxu0 }
 0x31e   : > { %v2989_v11 = vmax.f32 %v2957_v5, 0.0  ;;  %v2920_v16 = vmul.f32 %v7626_v7, %v9494_v15  ;;  %v2745_v18 = vpop.f32.mrb[7].mxu0 }
 0x31f   : > { %v2988_v19 = vmax.f32 %v2956_v6, 0.0  ;;  %v2919_v20 = vmul.f32 %v9494_v15, %v2745_v18  ;;  %v3110_v36 = vld [vmem:[#allocation3 + $0x28] sm:$0x3] }
 0x320   : > { %3078 = vst.msk [vmem:[#allocation3 + $0x51] sm:$0xff] %vm3016_vm11, %v2989_v11  ;;  %v2959_v24 = vadd.f32 %v9499_v27, %v2920_v16  ;;  %v3108_v25 = vld [vmem:[#allocation3 + $0x18] sm:$0xff]  ;;  %v3109_v28 = vld [vmem:[#allocation3 + $0x20] sm:$0xff]  ;;  %v3166_v58 = vsel %vm3019_vm12, %v3110_v36, -inf }
 0x321   : > { %3077 = vst.msk [vmem:[#allocation3 + $0x49] sm:$0xff] %vm3016_vm11, %v2988_v19  ;;  %v2958_v37 = vadd.f32 %v9499_v27, %v2919_v20  ;;  %v7629_v38 = vpop.f32.mrb[8].mxu0  ;;  %v3160_v55 = vsel %vm3016_vm11, %v3108_v25, -inf  ;;  %v3163_v46 = vsel %vm3016_vm11, %v3109_v28, -inf  ;;  %v3167_v52 = vmax.f32 %v3165_v51, %v3166_v58 }
 0x322   : > { %v2991_v43 = vmax.f32 %v2959_v24, 0.0  ;;  %v2922_v48 = vmul.f32 %v7629_v38, %v9494_v15  ;;  %v2755_v49 = vpop.f32.mrb[9].mxu0  ;;  %v3161_v41 = vmax.f32 %v3159_v50, %v3160_v55  ;;  %v3164_v1 = vmax.f32 %v3162_v21, %v3163_v46 }
 0x323   : > { %v2990_v30 = vmax.f32 %v2958_v37, 0.0  ;;  %v2921_v31 = vmul.f32 %v9494_v15, %v2755_v49  ;;  %v3113_v17 = vld [vmem:[#allocation3 + $0x40] sm:$0x3] }
 0x324   : > { %3080 = vst.msk [vmem:[#allocation3 + $0x69] sm:$0xff] %vm3016_vm11, %v2991_v43  ;;  %v2961_v61 = vadd.f32 %v9499_v27, %v2922_v48  ;;  %v3111_v57 = vld [vmem:[#allocation3 + $0x30] sm:$0xff]  ;;  %v3112_v3 = vld [vmem:[#allocation3 + $0x38] sm:$0xff]  ;;  %v3174_v12 = vsel %vm3019_vm12, %v3113_v17, -inf }
 0x325   : > { %3079 = vst.msk [vmem:[#allocation3 + $0x61] sm:$0xff] %vm3016_vm11, %v2990_v30  ;;  %v2960_v47 = vadd.f32 %v9499_v27, %v2921_v31  ;;  %v7632_v56 = vpop.f32.mrb[10].mxu0  ;;  %v3168_v44 = vsel %vm3016_vm11, %v3111_v57, -inf  ;;  %v3171_v45 = vsel %vm3016_vm11, %v3112_v3, -inf }
 0x326   : > { %v2993_v14 = vmax.f32 %v2961_v61, 0.0  ;;  %v2924_v26 = vmul.f32 %v7632_v56, %v9494_v15  ;;  %v2765_v40 = vpop.f32.mrb[11].mxu0 }
 0x327   : > { %v2992_v53 = vmax.f32 %v2960_v47, 0.0  ;;  %v2923_v54 = vmul.f32 %v9494_v15, %v2765_v40  ;;  %v3116_v63 = vld [vmem:[#allocation3 + $0x58] sm:$0x3] }
 0x328   : > { %3082 = vst.msk [vmem:[#allocation3 + $0x81] sm:$0xff] %vm3016_vm11, %v2993_v14  ;;  %v2963_v13 = vadd.f32 %v9499_v27, %v2924_v26  ;;  %v3114_v34 = vld [vmem:[#allocation3 + $0x48] sm:$0xff]  ;;  %v3115_v35 = vld [vmem:[#allocation3 + $0x50] sm:$0xff]  ;;  %v3175_v59 = vsel %vm3019_vm12, %v3116_v63, -inf }
 0x329   : > { %3081 = vst.msk [vmem:[#allocation3 + $0x79] sm:$0xff] %vm3016_vm11, %v2992_v53  ;;  %v2962_v60 = vadd.f32 %v9499_v27, %v2923_v54  ;;  %v7635_v62 = vpop.f32.mrb[12].mxu0  ;;  %v3169_v32 = vsel %vm3016_vm11, %v3114_v34, -inf  ;;  %v3172_v33 = vsel %vm3016_vm11, %v3115_v35, -inf  ;;  %v9549_v2 = vmax.f32 %v3174_v12, %v3175_v59 }
 0x32a   : > { %v2995_v5 = vmax.f32 %v2963_v13, 0.0  ;;  %v2926_v6 = vmul.f32 %v7635_v62, %v9494_v15  ;;  %v2775_v7 = vpop.f32.mrb[13].mxu0  ;;  %v9552_v8 = vmax.f32 %v3168_v44, %v3169_v32  ;;  %v9554_v9 = vmax.f32 %v3171_v45, %v3172_v33 }
 0x32b   : > { %v2994_v10 = vmax.f32 %v2962_v60, 0.0  ;;  %v2925_v11 = vmul.f32 %v9494_v15, %v2775_v7  ;;  %v3242_v16 = vmax.f32 %v3167_v52, %v9549_v2  ;;  %v3119_v18 = vld [vmem:[#allocation3 + $0x70] sm:$0x3] }
 0x32c   : > { %3084 = vst.msk [vmem:[#allocation3 + $0x99] sm:$0xff] %vm3016_vm11, %v2995_v5  ;;  %v2965_v19 = vadd.f32 %v9499_v27, %v2926_v6  ;;  %v3240_v20 = vmax.f32 %v3161_v41, %v9552_v8  ;;  %v3241_v22 = vmax.f32 %v3164_v1, %v9554_v9  ;;  %v3117_v23 = vld [vmem:[#allocation3 + $0x60] sm:$0xff]  ;;  %v3118_v24 = vld [vmem:[#allocation3 + $0x68] sm:$0xff]  ;;  %v9563_v25 = vsel %vm3019_vm12, %v3119_v18, -inf }
 0x32d   : > { %3083 = vst.msk [vmem:[#allocation3 + $0x91] sm:$0xff] %vm3016_vm11, %v2994_v10  ;;  %v2964_v36 = vadd.f32 %v9499_v27, %v2925_v11  ;;  %v7638_v37 = vpop.f32.mrb[14].mxu0  ;;  %v3328_v38 = vrot.slane %v3242_v16, %v9535_v4  ;;  %v9569_v39 = vsel %vm3016_vm11, %v3117_v23, -inf  ;;  %v9572_v28 = vsel %vm3016_vm11, %v3118_v24, -inf }
 0x32e   : > { %v2997_v29 = vmax.f32 %v2965_v19, 0.0  ;;  %v2928_v42 = vmul.f32 %v7638_v37, %v9494_v15  ;;  %v2785_v43 = vpop.f32.mrb[15].mxu0  ;;  %v3288_v48 = vcombine.high %v3240_v20, %v3240_v20  ;;  %v3305_v49 = vcombine.high %v3241_v22, %v3241_v22 }
 0x32f   : > { %v2996_v50 = vmax.f32 %v2964_v36, 0.0  ;;  %v2927_v51 = vmul.f32 %v9494_v15, %v2785_v43  ;;  %v3312_v30 = vrot.slane %v3241_v22, %v9535_v4  ;;  %v9578_v31 = vsel %vm3019_vm12, %v3328_v38, -inf }
 0x330   : > { %3086 = vst.msk [vmem:[#allocation3 + $0xb1] sm:$0xff] %vm3016_vm11, %v2997_v29  ;;  %v2967_v55 = vadd.f32 %v9499_v27, %v2928_v42  ;;  %v3302_v58 = vrot.slane %v3288_v48, %v9535_v4  ;;  %v3319_v61 = vrot.slane %v3305_v49, %v9535_v4  ;;  %v3745_v17 = vrot.slane %v9578_v31, 4 }
 0x331   : > { %3085 = vst.msk [vmem:[#allocation3 + $0xa9] sm:$0xff] %vm3016_vm11, %v2996_v50  ;;  %v2966_v21 = vadd.f32 %v9499_v27, %v2927_v51  ;;  %v7641_v46 = vpop.f32.mrb[16].mxu0  ;;  %v3320_v47 = vcombine.high %v3312_v30, %v3312_v30  ;;  %v3716_v56 = vsel %vm3019_vm12, %v3312_v30, -inf  ;;  %v9589_v57 = vrot.slane %v3240_v20, %v9535_v4 }
 0x332   : > { %v2999_v3 = vmax.f32 %v2967_v55, 0.0  ;;  %v2930_v14 = vmul.f32 %v7641_v46, %v9494_v15  ;;  %v2795_v26 = vpop.f32.mrb[17].mxu0  ;;  %v3304_v40 = vcombine.high %v3302_v58, %v3302_v58  ;;  %v3321_v41 = vcombine.high %v3319_v61, %v3319_v61 }
 0x333   : > { %v2998_v52 = vmax.f32 %v2966_v21, 0.0  ;;  %v2929_v53 = vmul.f32 %v9494_v15, %v2795_v26  ;;  %v3702_v54 = vsel %vm3019_vm12, %v3302_v58, -inf  ;;  %v3717_v63 = vrot.slane %v3716_v56, 4 }
 0x334   : > { %3088 = vst.msk [vmem:[#allocation3 + $0xc9] sm:$0xff] %vm3016_vm11, %v2999_v3  ;;  %v2969_v1 = vadd.f32 %v9499_v27, %v2930_v14  ;;  %v3703_v12 = vrot.slane %v3702_v54, 4  ;;  %v3709_v13 = vsel %vm3019_vm12, %v3304_v40, -inf  ;;  %v3723_v34 = vsel %vm3019_vm12, %v3320_v47, -inf }
 0x335   : > { %3087 = vst.msk [vmem:[#allocation3 + $0xc1] sm:$0xff] %vm3016_vm11, %v2998_v52  ;;  %v2968_v35 = vadd.f32 %v9499_v27, %v2929_v53  ;;  %v7644_v44 = vpop.f32.mrb[18].mxu0  ;;  %v3710_v45 = vrot.slane %v3709_v13, 4  ;;  %v3718_v59 = vmax.f32 %v3716_v56, %v3717_v63  ;;  %v3724_v60 = vrot.slane %v3723_v34, 4 }
 0x336   : > { %v3001_v62 = vmax.f32 %v2969_v1, 0.0  ;;  %v2932_v32 = vmul.f32 %v7644_v44, %v9494_v15  ;;  %v2805_v33 = vpop.f32.mrb[19].mxu0  ;;  %v3704_v5 = vmax.f32 %v3702_v54, %v3703_v12  ;;  %v3730_v6 = vsel %vm3019_vm12, %v3319_v61, -inf }
 0x337   : > { %v3000_v7 = vmax.f32 %v2968_v35, 0.0  ;;  %v2931_v10 = vmul.f32 %v9494_v15, %v2805_v33  ;;  %v3711_v11 = vmax.f32 %v3709_v13, %v3710_v45  ;;  %v3719_v16 = vrot.slane %v3718_v59, 2 }
 0x338   : > { %3090 = vst.msk [vmem:[#allocation3 + $0xe1] sm:$0xff] %vm3016_vm11, %v3001_v62  ;;  %v2971_v18 = vadd.f32 %v9499_v27, %v2932_v32  ;;  %v3705_v19 = vrot.slane %v3704_v5, 2  ;;  %v3725_v20 = vmax.f32 %v3723_v34, %v3724_v60  ;;  %v3731_v22 = vrot.slane %v3730_v6, 4 }
 0x339   : > { %3089 = vst.msk [vmem:[#allocation3 + $0xd9] sm:$0xff] %vm3016_vm11, %v3000_v7  ;;  %v2970_v23 = vadd.f32 %v9499_v27, %v2931_v10  ;;  %v7647_v24 = vpop.f32.mrb[20].mxu0  ;;  %v3712_v36 = vrot.slane %v3711_v11, 2  ;;  %v3720_v37 = vmax.f32 %v3718_v59, %v3719_v16  ;;  %v3737_v38 = vsel %vm3019_vm12, %v3321_v41, -inf }
 0x33a   : > { %v3003_v29 = vmax.f32 %v2971_v18, 0.0  ;;  %v2934_v42 = vmul.f32 %v7647_v24, %v9494_v15  ;;  %v2815_v43 = vpop.f32.mrb[21].mxu0  ;;  %v3706_v48 = vmax.f32 %v3704_v5, %v3705_v19  ;;  %v3726_v49 = vrot.slane %v3725_v20, 2 }
 0x33b   : > { %v3002_v50 = vmax.f32 %v2970_v23, 0.0  ;;  %v2933_v51 = vmul.f32 %v9494_v15, %v2815_v43  ;;  %v3713_v30 = vmax.f32 %v3711_v11, %v3712_v36  ;;  %v3721_v55 = vrot.slane %v3720_v37, 1 }
 0x33c   : > { %3092 = vst.msk [vmem:[#allocation3 + $0xf9] sm:$0xff] %vm3016_vm11, %v3003_v29  ;;  %v2973_v58 = vadd.f32 %v9499_v27, %v2934_v42  ;;  %v3707_v61 = vrot.slane %v3706_v48, 1  ;;  %v3727_v21 = vmax.f32 %v3725_v20, %v3726_v49  ;;  %v3732_v46 = vmax.f32 %v3730_v6, %v3731_v22 }
 0x33d   : > { %3091 = vst.msk [vmem:[#allocation3 + $0xf1] sm:$0xff] %vm3016_vm11, %v3002_v50  ;;  %v2972_v47 = vadd.f32 %v9499_v27, %v2933_v51  ;;  %v7650_v56 = vpop.f32.mrb[22].mxu0  ;;  %v3714_v3 = vrot.slane %v3713_v30, 1  ;;  %v3722_v14 = vmax.f32 %v3720_v37, %v3721_v55  ;;  %v3738_v26 = vrot.slane %v3737_v38, 4  ;;  %v3120_v51 = vld [vmem:[#allocation3 + $0x78] sm:$0xff] }
 0x33e   : > { %v3005_v40 = vmax.f32 %v2973_v58, 0.0  ;;  %v2936_v41 = vmul.f32 %v7650_v56, %v9494_v15  ;;  %v2825_v52 = vpop.f32.mrb[23].mxu0  ;;  %v9615_v53 = vmax.f32 %v3706_v48, %v3707_v61  ;;  %v3728_v54 = vrot.slane %v3727_v21, 1 }
 0x33f   : > { %v3004_v63 = vmax.f32 %v2972_v47, 0.0  ;;  %v2935_v1 = vmul.f32 %v9494_v15, %v2825_v52  ;;  %v3715_v12 = vmax.f32 %v3713_v30, %v3714_v3  ;;  %v3733_v13 = vrot.slane %v3732_v46, 2 }
 0x340   : > { %3094 = vst.msk [vmem:[#allocation3 + $0x111] sm:$0xff] %vm3016_vm11, %v3005_v40  ;;  %v2975_v34 = vadd.f32 %v9499_v27, %v2936_v41  ;;  %v3729_v35 = vmax.f32 %v3727_v21, %v3728_v54  ;;  %v3739_v44 = vmax.f32 %v3737_v38, %v3738_v26  ;;  %v3746_v45 = vmax.f32 %v9578_v31, %v3745_v17  ;;  %v3121_v41 = vld [vmem:[#allocation3 + $0x80] sm:$0xff] }
 0x341   : > { %3093 = vst.msk [vmem:[#allocation3 + $0x109] sm:$0xff] %vm3016_vm11, %v3004_v63  ;;  %v2974_v59 = vadd.f32 %v9499_v27, %v2935_v1  ;;  %v7653_v60 = vpop.f32.mrb[24].mxu0  ;;  %v3734_v62 = vmax.f32 %v3732_v46, %v3733_v13  ;;  %v9626_v32 = vmax.f32 %v9615_v53, %v3715_v12  ;;  %v9628_v33 = vmax.f32 %v3715_v12, %v3722_v14 }
 0x342   : > { %v3007_v5 = vmax.f32 %v2975_v34, 0.0  ;;  %v2938_v6 = vmul.f32 %v7653_v60, %v9494_v15  ;;  %v2835_v7 = vpop.f32.mrb[25].mxu0  ;;  %v3740_v10 = vrot.slane %v3739_v44, 2  ;;  %v3747_v11 = vrot.slane %v3746_v45, 2 }
 0x343   : > { %v3006_v31 = vmax.f32 %v2974_v59, 0.0  ;;  %v2937_v17 = vmul.f32 %v9494_v15, %v2835_v7  ;;  %v3735_v16 = vrot.slane %v3734_v62, 1  ;;  %v9632_v18 = vmax.f32 %v3722_v14, %v3729_v35 }
 0x344   : > { %3096 = vst.msk [vmem:[#allocation3 + $0x129] sm:$0xff] %vm3016_vm11, %v3007_v5  ;;  %v2977_v19 = vadd.f32 %v9499_v27, %v2938_v6  ;;  %v3741_v20 = vmax.f32 %v3739_v44, %v3740_v10  ;;  %v3748_v22 = vmax.f32 %v3746_v45, %v3747_v11  ;;  %v4561_v23 = vsel %vm4317_vm14, %v9628_v33, %v9626_v32 }
 0x345   : > { %3095 = vst.msk [vmem:[#allocation3 + $0x121] sm:$0xff] %vm3016_vm11, %v3006_v31  ;;  %v2976_v24 = vadd.f32 %v9499_v27, %v2937_v17  ;;  %v7656_v36 = vpop.f32.mrb[26].mxu0  ;;  %v3736_v37 = vmax.f32 %v3734_v62, %v3735_v16  ;;  %v4562_v38 = vsel %vm4319_vm13, %v9632_v18, %v4561_v23  ;;  %v3303_v29 = vcombine.high %v9589_v57, %v9589_v57 }
 0x346   : > { %v3009_v42 = vmax.f32 %v2977_v19, 0.0  ;;  %v2940_v43 = vmul.f32 %v7656_v36, %v9494_v15  ;;  %v2845_v48 = vpop.f32.mrb[27].mxu0  ;;  %v3742_v49 = vrot.slane %v3741_v20, 1  ;;  %v3749_v50 = vrot.slane %v3748_v22, 1 }
 0x347   : > { %v3008_v30 = vmax.f32 %v2976_v24, 0.0  ;;  %v2939_v55 = vmul.f32 %v9494_v15, %v2845_v48  ;;  %v9647_v58 = vmax.f32 %v3729_v35, %v3736_v37  ;;  %v3688_v61 = vsel %vm3019_vm12, %v9589_v57, -inf }
 0x348   : > { %3098 = vst.msk [vmem:[#allocation3 + $0x141] sm:$0xff] %vm3016_vm11, %v3009_v42  ;;  %v2979_v21 = vadd.f32 %v9499_v27, %v2940_v43  ;;  %v3743_v46 = vmax.f32 %v3741_v20, %v3742_v49  ;;  %v3750_v47 = vmax.f32 %v3748_v22, %v3749_v50  ;;  %v3689_v56 = vrot.slane %v3688_v61, 4  ;;  %v3122_v20 = vld [vmem:[#allocation3 + $0x88] sm:$0x3] }
 0x349   : > { %3097 = vst.msk [vmem:[#allocation3 + $0x139] sm:$0xff] %vm3016_vm11, %v3008_v30  ;;  %v2978_v3 = vadd.f32 %v9499_v27, %v2939_v55  ;;  %v4563_v14 = vsel %vm4321_vm15, %v9647_v58, %v4562_v38  ;;  %v3695_v26 = vsel %vm3019_vm12, %v3303_v29, -inf  ;;  %v7659_v40 = vpop.f32.mrb[28].mxu0  ;;  %v3178_v57 = vsel %vm3016_vm11, %v3120_v51, -inf }
 0x34a   : > { %v3011_v52 = vmax.f32 %v2979_v21, 0.0  ;;  %v9659_v54 = vmax.f32 %v3736_v37, %v3743_v46  ;;  %v9661_v63 = vmax.f32 %v3743_v46, %v3750_v47  ;;  %v3690_v1 = vmax.f32 %v3688_v61, %v3689_v56  ;;  %v2855_v12 = vpop.f32.mrb[29].mxu0 }
 0x34b   : > { %v3010_v13 = vmax.f32 %v2978_v3, 0.0  ;;  %v3696_v34 = vrot.slane %v3695_v26, 4  ;;  %v2942_v35 = vmul.f32 %v7659_v40, %v9494_v15  ;;  %v2941_v44 = vmul.f32 %v9494_v15, %v2855_v12 }
 0x34c   : > { %3100 = vst.msk [vmem:[#allocation3 + $0x159] sm:$0xff] %vm3016_vm11, %v3011_v52  ;;  %v4564_v45 = vsel %vm4323_vm0, %v9659_v54, %v4563_v14  ;;  %v3691_v59 = vrot.slane %v3690_v1, 2  ;;  %v9669_v60 = vmax.f32 %v9569_v39, %v3178_v57  ;;  %v3181_v62 = vsel %vm3016_vm11, %v3121_v41, -inf }
 0x34d   : > { %3099 = vst.msk [vmem:[#allocation3 + $0x151] sm:$0xff] %vm3016_vm11, %v3010_v13  ;;  %v4565_v5 = vsel %vm4325_vm1, %v9661_v63, %v4564_v45  ;;  %v3697_v6 = vmax.f32 %v3695_v26, %v3696_v34  ;;  %v2981_v7 = vadd.f32 %v9499_v27, %v2942_v35  ;;  %v2980_v10 = vadd.f32 %v9499_v27, %v2941_v44  ;;  %v7662_v11 = vpop.f32.mrb[30].mxu0 }
 0x34e   : > { %4601 = vrot.lane.b32.xlu1 %v4565_v5, %s8293_s20  ;;  %v3692_v31 = vmax.f32 %v3690_v1, %v3691_v59  ;;  %v2944_v39 = vmul.f32 %v7662_v11, %v9494_v15  ;;  %v2865_v17 = vpop.f32.mrb[31].mxu0  ;;  %v9680_v16 = vmax.f32 %v9572_v28, %v3181_v62  ;;  %v3243_v19 = vmax.f32 %v9552_v8, %v9669_v60 }
 0x34f   : > { %v3698_v22 = vrot.slane %v3697_v6, 2  ;;  %v3013_v23 = vmax.f32 %v2981_v7, 0.0  ;;  %v3012_v24 = vmax.f32 %v2980_v10, 0.0  ;;  %v2943_v36 = vmul.f32 %v9494_v15, %v2865_v17 }
 0x350   : > { %v3693_v37 = vrot.slane %v3692_v31, 1  ;;  %v2983_v38 = vadd.f32 %v9499_v27, %v2944_v39  ;;  %v3244_v29 = vmax.f32 %v9554_v9, %v9680_v16  ;;  %v3329_v42 = vcombine.high %v3243_v19, %v3243_v19 }
 0x351   : > { %v3699_v43 = vmax.f32 %v3697_v6, %v3698_v22  ;;  %3102 = vst.msk [vmem:[#allocation3 + $0x171] sm:$0xff] %vm3016_vm11, %v3013_v23  ;;  %3101 = vst.msk [vmem:[#allocation3 + $0x169] sm:$0xff] %vm3016_vm11, %v3012_v24  ;;  %v2982_v8 = vadd.f32 %v9499_v27, %v2943_v36  ;;  %v3336_v28 = vrot.slane %v3243_v19, %v9535_v4  ;;  %v9693_v48 = vsel %vm3019_vm12, %v3122_v20, -inf }
 0x352   : > { %v3694_v15 = vmax.f32 %v3692_v31, %v3693_v37  ;;  %v3015_v49 = vmax.f32 %v2983_v38, 0.0  ;;  %v3343_v50 = vrot.slane %v3329_v42, %v9535_v4  ;;  %v3346_v51 = vcombine.high %v3244_v29, %v3244_v29 }
 0x353   : > { %v3700_v30 = vrot.slane %v3699_v43, 1  ;;  %v3014_v9 = vmax.f32 %v2982_v8, 0.0  ;;  %v3344_v55 = vcombine.high %v3336_v28, %v3336_v28  ;;  %v3353_v61 = vrot.slane %v3244_v29, %v9535_v4 }
 0x354   : > { %3104 = vst.msk [vmem:[#allocation3 + $0x189] sm:$0xff] %vm3016_vm11, %v3015_v49  ;;  %v3345_v27 = vcombine.high %v3343_v50, %v3343_v50  ;;  %v3360_v21 = vrot.slane %v3346_v51, %v9535_v4  ;;  %v3751_v46 = vsel %vm3019_vm12, %v3336_v28, -inf  ;;  %v3765_v47 = vsel %vm3019_vm12, %v3343_v50, -inf }
 0x355   : > { %v3701_v56 = vmax.f32 %v3699_v43, %v3700_v30  ;;  %3103 = vst.msk [vmem:[#allocation3 + $0x181] sm:$0xff] %vm3016_vm11, %v3014_v9  ;;  %v3361_v3 = vcombine.high %v3353_v61, %v3353_v61  ;;  %v3752_v14 = vrot.slane %v3751_v46, 4  ;;  %v3758_v26 = vsel %vm3019_vm12, %v3344_v55, -inf }
 0x356   : > { %v3362_v40 = vcombine.high %v3360_v21, %v3360_v21  ;;  %v3759_v41 = vrot.slane %v3758_v26, 4  ;;  %v3766_v57 = vrot.slane %v3765_v47, 4  ;;  %v3772_v52 = vsel %vm3019_vm12, %v3345_v27, -inf  ;;  %v3123_v27 = vld [vmem:[#allocation3 + $0x90] sm:$0xff] }
 0x357   : > { %v4192_v1 = vmax.f32 %v3694_v15, %v3701_v56  ;;  %v4193_v12 = vmax.f32 %v3701_v56, %v9615_v53  ;;  %v3753_v13 = vmax.f32 %v3751_v46, %v3752_v14  ;;  %v3773_v34 = vrot.slane %v3772_v52, 4 }
 0x358   : > { %v3760_v35 = vmax.f32 %v3758_v26, %v3759_v41  ;;  %v3767_v44 = vmax.f32 %v3765_v47, %v3766_v57  ;;  %v3779_v45 = vsel %vm3019_vm12, %v3353_v61, -inf  ;;  %v3786_v59 = vsel %vm3019_vm12, %v3361_v3, -inf  ;;  %v3126_v57 = vld [vmem:[#allocation3 + $0xa8] sm:$0xff] }
 0x359   : > { %v4318_v62 = vsel %vm4317_vm14, %v4193_v12, %v4192_v1  ;;  %v4480_v5 = vsel %vm4317_vm14, %v9626_v32, %v4193_v12  ;;  %v3754_v6 = vrot.slane %v3753_v13, 2  ;;  %v3774_v7 = vmax.f32 %v3772_v52, %v3773_v34 }
 0x35a   : > { %v4320_v10 = vsel %vm4319_vm13, %v9626_v32, %v4318_v62  ;;  %v4481_v53 = vsel %vm4319_vm13, %v9628_v33, %v4480_v5  ;;  %v3761_v11 = vrot.slane %v3760_v35, 2  ;;  %v3768_v31 = vrot.slane %v3767_v44, 2 }
 0x35b   : > { %v4322_v39 = vsel %vm4321_vm15, %v9628_v33, %v4320_v10  ;;  %v4482_v17 = vsel %vm4321_vm15, %v9632_v18, %v4481_v53  ;;  %v3755_v19 = vmax.f32 %v3753_v13, %v3754_v6  ;;  %v3775_v20 = vrot.slane %v3774_v7, 2 }
 0x35c   : > { %v4324_v22 = vsel %vm4323_vm0, %v9632_v18, %v4322_v39  ;;  %v4483_v23 = vsel %vm4323_vm0, %v9647_v58, %v4482_v17  ;;  %v3762_v32 = vmax.f32 %v3760_v35, %v3761_v11  ;;  %v3769_v24 = vmax.f32 %v3767_v44, %v3768_v31 }
 0x35d   : > { %v9724_v36 = vsel %vm4325_vm1, %v9647_v58, %v4324_v22  ;;  %v4484_v33 = vsel %vm4325_vm1, %v9659_v54, %v4483_v23  ;;  %v3756_v37 = vrot.slane %v3755_v19, 1  ;;  %v3776_v38 = vmax.f32 %v3774_v7, %v3775_v20 }
 0x35e   : > { %v4389_v29 = vsel %vm4388_vm2, %v9659_v54, %v9724_v36  ;;  %v4485_v18 = vsel %vm4388_vm2, %v9661_v63, %v4484_v33  ;;  %v3763_v42 = vrot.slane %v3762_v32, 1  ;;  %v3770_v43 = vrot.slane %v3769_v24, 1  ;;  %4372 = vst.msk [vmem:[#allocation4 + $0x12] sm:$0x3f] %vm4371_vm5, %v9724_v36 }
 0x35f   : > { %4397 = vrot.lane.b32.xlu0 %v4389_v29, %s8294_s21  ;;  %v4439_v58 = vsel %vm4438_vm3, %v9661_v63, %v4389_v29  ;;  %v3757_v8 = vmax.f32 %v3755_v19, %v3756_v37  ;;  %v3777_v28 = vrot.slane %v3776_v38, 1  ;;  %v3780_v15 = vrot.slane %v3779_v45, 4 }
 0x360   : > { %4447 = vrot.lane.b32.xlu1 %v4439_v58, %s8295_s22  ;;  %v3764_v49 = vmax.f32 %v3762_v32, %v3763_v42  ;;  %v3771_v50 = vmax.f32 %v3769_v24, %v3770_v43  ;;  %v3787_v54 = vrot.slane %v3786_v59, 4  ;;  %v3793_v51 = vsel %vm3019_vm12, %v3360_v21, -inf  ;;  %v3124_v21 = vld [vmem:[#allocation3 + $0x98] sm:$0xff] }
 0x361   : > { %v3778_v30 = vmax.f32 %v3776_v38, %v3777_v28  ;;  %v3781_v9 = vmax.f32 %v3779_v45, %v3780_v15  ;;  %v3794_v55 = vrot.slane %v3793_v51, 4  ;;  %v3800_v61 = vsel %vm3019_vm12, %v3362_v40, -inf  ;;  %v3127_v45 = vld [vmem:[#allocation3 + $0xb0] sm:$0xff] }
 0x362   : > { %v3788_v46 = vmax.f32 %v3786_v59, %v3787_v54  ;;  %v3801_v47 = vrot.slane %v3800_v61, 4  ;;  %v4200_v63 = vmax.f32 %v3757_v8, %v3764_v49  ;;  %v4201_v56 = vmax.f32 %v3764_v49, %v3771_v50 }
 0x363   : > { %4528 = vrot.lane.b32.xlu0 %v4485_v18, %s8296_s23  ;;  %v3782_v3 = vrot.slane %v3781_v9, 2  ;;  %v3795_v14 = vmax.f32 %v3793_v51, %v3794_v55  ;;  %v4202_v26 = vmax.f32 %v3771_v50, %v3778_v30  ;;  %v9742_v41 = vmax.f32 %v9563_v25, %v9693_v48 }
 0x364   : > { %v3789_v52 = vrot.slane %v3788_v46, 2  ;;  %v3802_v1 = vmax.f32 %v3800_v61, %v3801_v47  ;;  %v4327_v40 = vsel %vm4317_vm14, %v4201_v56, %v4200_v63  ;;  %v3186_v12 = vsel %vm3016_vm11, %v3123_v27, -inf }
 0x365   : > { %v3783_v13 = vmax.f32 %v3781_v9, %v3782_v3  ;;  %v3796_v34 = vrot.slane %v3795_v14, 2  ;;  %v4328_v35 = vsel %vm4319_vm13, %v4202_v26, %v4327_v40  ;;  %v3245_v44 = vmax.f32 %v9549_v2, %v9742_v41  ;;  %v3125_v2 = vld [vmem:[#allocation3 + $0xa0] sm:$0x3] }
 0x366   : > { %v3790_v59 = vmax.f32 %v3788_v46, %v3789_v52  ;;  %v3803_v62 = vrot.slane %v3802_v1, 2  ;;  %v3187_v25 = vsel %vm3016_vm11, %v3126_v57, -inf  ;;  %v3189_v48 = vsel %vm3016_vm11, %v3124_v21, -inf }
 0x367   : > { %v3784_v5 = vrot.slane %v3783_v13, 1  ;;  %v3797_v6 = vmax.f32 %v3795_v14, %v3796_v34  ;;  %v3369_v7 = vrot.slane %v3245_v44, %v9535_v4  ;;  %v9752_v10 = vmax.f32 %v3186_v12, %v3187_v25 }
 0x368   : > { %v3791_v53 = vrot.slane %v3790_v59, 1  ;;  %v3804_v11 = vmax.f32 %v3802_v1, %v3803_v62  ;;  %v3190_v31 = vsel %vm3016_vm11, %v3127_v45, -inf  ;;  %v9756_v39 = vsel %vm4317_vm14, %v4202_v26, %v4201_v56 }
 0x369   : > { %v3785_v17 = vmax.f32 %v3783_v13, %v3784_v5  ;;  %v3798_v19 = vrot.slane %v3797_v6, 1  ;;  %v3807_v20 = vsel %vm3019_vm12, %v3369_v7, -inf  ;;  %v9759_v22 = vmax.f32 %v3189_v48, %v3190_v31 }
 0x36a   : > { %v3792_v23 = vmax.f32 %v3790_v59, %v3791_v53  ;;  %v3805_v32 = vrot.slane %v3804_v11, 1  ;;  %v3808_v24 = vrot.slane %v3807_v20, 4  ;;  %v3246_v33 = vmax.f32 %v9669_v60, %v9752_v10 }
 0x36b   : > { %v3799_v37 = vmax.f32 %v3797_v6, %v3798_v19  ;;  %v9763_v38 = vmax.f32 %v3778_v30, %v3785_v17  ;;  %v3247_v29 = vmax.f32 %v9680_v16, %v9759_v22  ;;  %v9768_v18 = vsel %vm3019_vm12, %v3125_v2, -inf }
 0x36c   : > { %v3806_v42 = vmax.f32 %v3804_v11, %v3805_v32  ;;  %v9770_v43 = vmax.f32 %v3785_v17, %v3792_v23  ;;  %v3809_v58 = vmax.f32 %v3807_v20, %v3808_v24  ;;  %v3370_v8 = vcombine.high %v3246_v33, %v3246_v33 }
 0x36d   : > { %v9772_v28 = vmax.f32 %v3792_v23, %v3799_v37  ;;  %v4329_v15 = vsel %vm4321_vm15, %v9763_v38, %v4328_v35  ;;  %v4566_v60 = vsel %vm4317_vm14, %v9763_v38, %v4202_v26  ;;  %v3377_v49 = vrot.slane %v3246_v33, %v9535_v4 }
 0x36e   : > { %v9779_v50 = vmax.f32 %v3799_v37, %v3806_v42  ;;  %v4330_v16 = vsel %vm4323_vm0, %v9770_v43, %v4329_v15  ;;  %v3810_v54 = vrot.slane %v3809_v58, 2  ;;  %v4567_v51 = vsel %vm4319_vm13, %v9770_v43, %v4566_v60 }
 0x36f   : > { %v9787_v30 = vsel %vm4325_vm1, %v9772_v28, %v4330_v16  ;;  %v4568_v9 = vsel %vm4321_vm15, %v9772_v28, %v4567_v51  ;;  %v3384_v55 = vrot.slane %v3370_v8, %v9535_v4  ;;  %v3385_v61 = vcombine.high %v3377_v49, %v3377_v49 }
 0x370   : > { %v4390_v27 = vsel %vm4388_vm2, %v9779_v50, %v9787_v30  ;;  %v3811_v46 = vmax.f32 %v3809_v58, %v3810_v54  ;;  %v4569_v47 = vsel %vm4323_vm0, %v9779_v50, %v4568_v9  ;;  %v3387_v63 = vcombine.high %v3247_v29, %v3247_v29  ;;  %4373 = vst.msk [vmem:[#allocation4 + $0x1a] sm:$0x3f] %vm4371_vm5, %v9787_v30 }
 0x371   : > { %4399 = vrot.lane.b32.xlu0 %v4390_v27, %s8294_s21  ;;  %v3386_v56 = vcombine.high %v3384_v55, %v3384_v55  ;;  %v3394_v3 = vrot.slane %v3247_v29, %v9535_v4  ;;  %v3814_v14 = vsel %vm3019_vm12, %v3377_v49, -inf  ;;  %v3821_v26 = vsel %vm3019_vm12, %v3385_v61, -inf }
 0x372   : > { %v3812_v21 = vrot.slane %v3811_v46, 1  ;;  %v3401_v57 = vrot.slane %v3387_v63, %v9535_v4  ;;  %v3815_v52 = vrot.slane %v3814_v14, 4  ;;  %v3822_v1 = vrot.slane %v3821_v26, 4 }
 0x373   : > { %v3402_v40 = vcombine.high %v3394_v3, %v3394_v3  ;;  %v3828_v12 = vsel %vm3019_vm12, %v3384_v55, -inf  ;;  %v3835_v13 = vsel %vm3019_vm12, %v3386_v56, -inf  ;;  %v3842_v34 = vsel %vm3019_vm12, %v3394_v3, -inf  ;;  %v3128_v3 = vld [vmem:[#allocation3 + $0xb8] sm:$0x3] }
 0x374   : > { %v3813_v35 = vmax.f32 %v3811_v46, %v3812_v21  ;;  %v3403_v44 = vcombine.high %v3401_v57, %v3401_v57  ;;  %v3816_v45 = vmax.f32 %v3814_v14, %v3815_v52  ;;  %v3823_v59 = vmax.f32 %v3821_v26, %v3822_v1 }
 0x375   : > { %v3829_v62 = vrot.slane %v3828_v12, 4  ;;  %v3836_v25 = vrot.slane %v3835_v13, 4  ;;  %v3843_v48 = vrot.slane %v3842_v34, 4  ;;  %v3849_v5 = vsel %vm3019_vm12, %v3402_v40, -inf }
 0x376   : > { %v9806_v6 = vmax.f32 %v3806_v42, %v3813_v35  ;;  %v3817_v7 = vrot.slane %v3816_v45, 2  ;;  %v3824_v53 = vrot.slane %v3823_v59, 2  ;;  %v3850_v11 = vrot.slane %v3849_v5, 4 }
 0x377   : > { %v3830_v31 = vmax.f32 %v3828_v12, %v3829_v62  ;;  %v3837_v2 = vmax.f32 %v3835_v13, %v3836_v25  ;;  %v3844_v17 = vmax.f32 %v3842_v34, %v3843_v48  ;;  %v3856_v19 = vsel %vm3019_vm12, %v3401_v57, -inf }
 0x378   : > { %v4570_v20 = vsel %vm4325_vm1, %v9806_v6, %v4569_v47  ;;  %v4440_v23 = vsel %vm4438_vm3, %v9806_v6, %v4390_v27  ;;  %v3818_v32 = vmax.f32 %v3816_v45, %v3817_v7  ;;  %v3825_v24 = vmax.f32 %v3823_v59, %v3824_v53 }
 0x379   : > { %4603 = vrot.lane.b32.xlu0 %v4570_v20, %s8293_s20  ;;  %v3831_v33 = vrot.slane %v3830_v31, 2  ;;  %v3838_v37 = vrot.slane %v3837_v2, 2  ;;  %v3845_v29 = vrot.slane %v3844_v17, 2  ;;  %v3851_v42 = vmax.f32 %v3849_v5, %v3850_v11  ;;  %v3129_v20 = vld [vmem:[#allocation3 + $0xc0] sm:$0xff] }
 0x37a   : > { %v3819_v58 = vrot.slane %v3818_v32, 1  ;;  %v3826_v8 = vrot.slane %v3825_v24, 1  ;;  %v3857_v15 = vrot.slane %v3856_v19, 4  ;;  %v3863_v60 = vsel %vm3019_vm12, %v3403_v44, -inf }
 0x37b   : > { %v3832_v49 = vmax.f32 %v3830_v31, %v3831_v33  ;;  %v3839_v16 = vmax.f32 %v3837_v2, %v3838_v37  ;;  %v3846_v54 = vmax.f32 %v3844_v17, %v3845_v29  ;;  %v3852_v51 = vrot.slane %v3851_v42, 2  ;;  %v3130_v29 = vld [vmem:[#allocation3 + $0xc8] sm:$0xff] }
 0x37c   : > { %v3820_v9 = vmax.f32 %v3818_v32, %v3819_v58  ;;  %v3827_v55 = vmax.f32 %v3825_v24, %v3826_v8  ;;  %v3858_v61 = vmax.f32 %v3856_v19, %v3857_v15  ;;  %v3864_v27 = vrot.slane %v3863_v60, 4 }
 0x37d   : > { %4449 = vrot.lane.b32.xlu0 %v4440_v23, %s8295_s22  ;;  %v3833_v46 = vrot.slane %v3832_v49, 1  ;;  %v3840_v47 = vrot.slane %v3839_v16, 1  ;;  %v3847_v63 = vrot.slane %v3846_v54, 1  ;;  %v3853_v56 = vmax.f32 %v3851_v42, %v3852_v51  ;;  %v3133_v42 = vld [vmem:[#allocation3 + $0xe0] sm:$0xff]  ;;  %v3131_v51 = vld [vmem:[#allocation3 + $0xd0] sm:$0x3] }
 0x37e   : > { %v3859_v14 = vrot.slane %v3858_v61, 2  ;;  %v3865_v26 = vmax.f32 %v3863_v60, %v3864_v27  ;;  %v4208_v21 = vmax.f32 %v3820_v9, %v3827_v55  ;;  %v4487_v57 = vsel %vm4319_vm13, %v9763_v38, %v9756_v39  ;;  %v3134_v9 = vld [vmem:[#allocation3 + $0xe8] sm:$0x3] }
 0x37f   : > { %v3834_v52 = vmax.f32 %v3832_v49, %v3833_v46  ;;  %v3841_v1 = vmax.f32 %v3839_v16, %v3840_v47  ;;  %v3848_v40 = vmax.f32 %v3846_v54, %v3847_v63  ;;  %v3854_v12 = vrot.slane %v3853_v56, 1  ;;  %v3135_v47 = vld [vmem:[#allocation3 + $0xf0] sm:$0xff]  ;;  %v3138_v63 = vld [vmem:[#allocation3 + $0x108] sm:$0xff] }
 0x380   : > { %v3860_v13 = vmax.f32 %v3858_v61, %v3859_v14  ;;  %v3866_v34 = vrot.slane %v3865_v26, 2  ;;  %v4488_v35 = vsel %vm4321_vm15, %v9770_v43, %v4487_v57  ;;  %v3193_v44 = vsel %vm3019_vm12, %v3128_v3, -inf }
 0x381   : > { %v3855_v45 = vmax.f32 %v3853_v56, %v3854_v12  ;;  %v4209_v59 = vmax.f32 %v3827_v55, %v3834_v52  ;;  %v4210_v62 = vmax.f32 %v3834_v52, %v3841_v1  ;;  %v4211_v25 = vmax.f32 %v3841_v1, %v3848_v40  ;;  %v3139_v12 = vld [vmem:[#allocation3 + $0x110] sm:$0xff] }
 0x382   : > { %v3861_v48 = vrot.slane %v3860_v13, 1  ;;  %v3867_v5 = vmax.f32 %v3865_v26, %v3866_v34  ;;  %v4489_v39 = vsel %vm4323_vm0, %v9772_v28, %v4488_v35  ;;  %v9825_v38 = vmax.f32 %v9768_v18, %v3193_v44  ;;  %v3132_v28 = vld [vmem:[#allocation3 + $0xd8] sm:$0xff] }
 0x383   : > { %v4212_v7 = vmax.f32 %v3848_v40, %v3855_v45  ;;  %v4332_v53 = vsel %vm4317_vm14, %v4209_v59, %v4208_v21  ;;  %v4490_v43 = vsel %vm4325_vm1, %v9779_v50, %v4489_v39  ;;  %v4571_v11 = vsel %vm4317_vm14, %v4211_v25, %v4210_v62  ;;  %v3136_v40 = vld [vmem:[#allocation3 + $0xf8] sm:$0xff] }
 0x384   : > { %v3862_v31 = vmax.f32 %v3860_v13, %v3861_v48  ;;  %v3868_v2 = vrot.slane %v3867_v5, 1  ;;  %v4333_v17 = vsel %vm4319_vm13, %v4210_v62, %v4332_v53  ;;  %v4491_v19 = vsel %vm4388_vm2, %v9806_v6, %v4490_v43 }
 0x385   : > { %v4334_v18 = vsel %vm4321_vm15, %v4211_v25, %v4333_v17  ;;  %4530 = vrot.lane.b32.xlu0 %v4491_v19, %s8296_s23  ;;  %v3248_v23 = vmax.f32 %v9742_v41, %v9825_v38  ;;  %v4572_v50 = vsel %vm4319_vm13, %v4212_v7, %v4571_v11  ;;  %v4492_v32 = vsel %vm4317_vm14, %v4210_v62, %v4209_v59 }
 0x386   : > { %v9840_v24 = vmax.f32 %v3867_v5, %v3868_v2  ;;  %v4213_v33 = vmax.f32 %v3855_v45, %v3862_v31  ;;  %v4335_v37 = vsel %vm4323_vm0, %v4212_v7, %v4334_v18  ;;  %v4493_v6 = vsel %vm4319_vm13, %v4211_v25, %v4492_v32 }
 0x387   : > { %v3410_v58 = vrot.slane %v3248_v23, %v9535_v4  ;;  %v4494_v8 = vsel %vm4321_vm15, %v4212_v7, %v4493_v6  ;;  %v3195_v15 = vsel %vm3016_vm11, %v3129_v20, -inf  ;;  %v3196_v41 = vsel %vm3016_vm11, %v3132_v28, -inf }
 0x388   : > { %v4214_v60 = vmax.f32 %v3862_v31, %v9840_v24  ;;  %v9850_v49 = vsel %vm4325_vm1, %v4213_v33, %v4335_v37  ;;  %v4573_v16 = vsel %vm4321_vm15, %v4213_v33, %v4572_v50  ;;  %v4495_v54 = vsel %vm4323_vm0, %v4213_v33, %v4494_v8 }
 0x389   : > { %v3870_v55 = vsel %vm3019_vm12, %v3410_v58, -inf  ;;  %v9855_v61 = vmax.f32 %v3195_v15, %v3196_v41  ;;  %v3198_v27 = vsel %vm3016_vm11, %v3130_v29, -inf  ;;  %v3199_v46 = vsel %vm3016_vm11, %v3133_v42, -inf  ;;  %4374 = vst.msk [vmem:[#allocation4 + $0x22] sm:$0x3f] %vm4371_vm5, %v9850_v49 }
 0x38a   : > { %v4391_v56 = vsel %vm4388_vm2, %v4214_v60, %v9850_v49  ;;  %v3871_v3 = vrot.slane %v3870_v55, 4  ;;  %v4574_v14 = vsel %vm4323_vm0, %v4214_v60, %v4573_v16  ;;  %v4496_v26 = vsel %vm4325_vm1, %v4214_v60, %v4495_v54 }
 0x38b   : > { %4401 = vrot.lane.b32.xlu1 %v4391_v56, %s8294_s21  ;;  %v9864_v21 = vmax.f32 %v3198_v27, %v3199_v46  ;;  %v3201_v57 = vsel %vm3019_vm12, %v3131_v51, -inf  ;;  %v3202_v52 = vsel %vm3019_vm12, %v3134_v9, -inf  ;;  %v3249_v1 = vmax.f32 %v9752_v10, %v9855_v61 }
 0x38c   : > { %v3872_v13 = vmax.f32 %v3870_v55, %v3871_v3  ;;  %v9870_v34 = vmax.f32 %v3201_v57, %v3202_v52  ;;  %v3204_v35 = vsel %vm3016_vm11, %v3135_v47, -inf  ;;  %v3205_v44 = vsel %vm3016_vm11, %v3138_v63, -inf }
 0x38d   : > { %v3250_v45 = vmax.f32 %v9759_v22, %v9864_v21  ;;  %v3411_v59 = vcombine.high %v3249_v1, %v3249_v1  ;;  %v9877_v62 = vrot.slane %v3249_v1, %v9535_v4  ;;  %v9879_v25 = vmax.f32 %v3204_v35, %v3205_v44 }
 0x38e   : > { %v3873_v48 = vrot.slane %v3872_v13, 2  ;;  %v3251_v10 = vmax.f32 %v9825_v38, %v9870_v34  ;;  %v3207_v5 = vsel %vm3016_vm11, %v3136_v40, -inf  ;;  %v3208_v39 = vsel %vm3016_vm11, %v3139_v12, -inf }
 0x38f   : > { %v3425_v7 = vrot.slane %v3411_v59, %v9535_v4  ;;  %v3428_v53 = vcombine.high %v3250_v45, %v3250_v45  ;;  %v3435_v43 = vrot.slane %v3250_v45, %v9535_v4  ;;  %v3426_v22 = vcombine.high %v9877_v62, %v9877_v62 }
 0x390   : > { %v3874_v11 = vmax.f32 %v3872_v13, %v3873_v48  ;;  %v3451_v31 = vrot.slane %v3251_v10, %v9535_v4  ;;  %v3877_v2 = vsel %vm3019_vm12, %v9877_v62, -inf  ;;  %v9892_v17 = vmax.f32 %v3207_v5, %v3208_v39 }
 0x391   : > { %v3427_v38 = vcombine.high %v3425_v7, %v3425_v7  ;;  %v3442_v19 = vrot.slane %v3428_v53, %v9535_v4  ;;  %v3443_v20 = vcombine.high %v3435_v43, %v3435_v43  ;;  %v3891_v28 = vsel %vm3019_vm12, %v3425_v7, -inf }
 0x392   : > { %v3875_v18 = vrot.slane %v3874_v11, 1  ;;  %v3892_v23 = vrot.slane %v3891_v28, 4  ;;  %v3905_v50 = vsel %vm3019_vm12, %v3435_v43, -inf  ;;  %v3933_v32 = vsel %vm3019_vm12, %v3451_v31, -inf }
 0x393   : > { %v3444_v33 = vcombine.high %v3442_v19, %v3442_v19  ;;  %v3898_v37 = vsel %vm3019_vm12, %v3427_v38, -inf  ;;  %v3906_v6 = vrot.slane %v3905_v50, 4  ;;  %v3912_v29 = vsel %vm3019_vm12, %v3443_v20, -inf }
 0x394   : > { %v3876_v42 = vmax.f32 %v3874_v11, %v3875_v18  ;;  %v3893_v58 = vmax.f32 %v3891_v28, %v3892_v23  ;;  %v3899_v8 = vrot.slane %v3898_v37, 4  ;;  %v3913_v15 = vrot.slane %v3912_v29, 4 }
 0x395   : > { %v3907_v41 = vmax.f32 %v3905_v50, %v3906_v6  ;;  %v3919_v60 = vsel %vm3019_vm12, %v3442_v19, -inf  ;;  %v3926_v16 = vsel %vm3019_vm12, %v3444_v33, -inf  ;;  %v3934_v54 = vrot.slane %v3933_v32, 4 }
 0x396   : > { %v4215_v51 = vmax.f32 %v9840_v24, %v3876_v42  ;;  %v3894_v9 = vrot.slane %v3893_v58, 2  ;;  %v3900_v55 = vmax.f32 %v3898_v37, %v3899_v8  ;;  %v3914_v27 = vmax.f32 %v3912_v29, %v3913_v15 }
 0x397   : > { %v3908_v46 = vrot.slane %v3907_v41, 2  ;;  %v3920_v47 = vrot.slane %v3919_v60, 4  ;;  %v3927_v63 = vrot.slane %v3926_v16, 4  ;;  %v3935_v3 = vmax.f32 %v3933_v32, %v3934_v54 }
 0x398   : > { %v4441_v57 = vsel %vm4438_vm3, %v4215_v51, %v4391_v56  ;;  %v4575_v52 = vsel %vm4325_vm1, %v4215_v51, %v4574_v14  ;;  %v4497_v1 = vsel %vm4388_vm2, %v4215_v51, %v4496_v26  ;;  %v3895_v40 = vmax.f32 %v3893_v58, %v3894_v9 }
 0x399   : > { %4451 = vrot.lane.b32.xlu1 %v4441_v57, %s8295_s22  ;;  %4605 = vrot.lane.b32.xlu0 %v4575_v52, %s8293_s20  ;;  %v3901_v12 = vrot.slane %v3900_v55, 2  ;;  %v3909_v24 = vmax.f32 %v3907_v41, %v3908_v46  ;;  %v3915_v13 = vrot.slane %v3914_v27, 2  ;;  %v3921_v35 = vmax.f32 %v3919_v60, %v3920_v47 }
 0x39a   : > { %v3896_v44 = vrot.slane %v3895_v40, 1  ;;  %v3928_v45 = vmax.f32 %v3926_v16, %v3927_v63  ;;  %v3936_v59 = vrot.slane %v3935_v3, 2  ;;  %v3878_v48 = vrot.slane %v3877_v2, 4 }
 0x39b   : > { %v3902_v10 = vmax.f32 %v3900_v55, %v3901_v12  ;;  %v3910_v5 = vrot.slane %v3909_v24, 1  ;;  %v3916_v56 = vmax.f32 %v3914_v27, %v3915_v13  ;;  %v3922_v39 = vrot.slane %v3921_v35, 2 }
 0x39c   : > { %v9908_v14 = vmax.f32 %v3895_v40, %v3896_v44  ;;  %v3929_v26 = vrot.slane %v3928_v45, 2  ;;  %v3937_v7 = vmax.f32 %v3935_v3, %v3936_v59  ;;  %v3879_v53 = vmax.f32 %v3877_v2, %v3878_v48 }
 0x39d   : > { %4532 = vrot.lane.b32.xlu1 %v4497_v1, %s8296_s23  ;;  %v3903_v43 = vrot.slane %v3902_v10, 1  ;;  %v3911_v11 = vmax.f32 %v3909_v24, %v3910_v5  ;;  %v3917_v31 = vrot.slane %v3916_v56, 1  ;;  %v3923_v38 = vmax.f32 %v3921_v35, %v3922_v39 }
 0x39e   : > { %v3930_v19 = vmax.f32 %v3928_v45, %v3929_v26  ;;  %v3938_v20 = vrot.slane %v3937_v7, 1  ;;  %v3880_v28 = vrot.slane %v3879_v53, 2  ;;  %v3884_v18 = vsel %vm3019_vm12, %v3426_v22, -inf }
 0x39f   : > { %v3904_v23 = vmax.f32 %v3902_v10, %v3903_v43  ;;  %v3918_v50 = vmax.f32 %v3916_v56, %v3917_v31  ;;  %v3924_v32 = vrot.slane %v3923_v38, 1  ;;  %v3885_v33 = vrot.slane %v3884_v18, 4 }
 0x3a0   : > { %v3931_v37 = vrot.slane %v3930_v19, 1  ;;  %v3939_v2 = vmax.f32 %v3937_v7, %v3938_v20  ;;  %v3881_v6 = vmax.f32 %v3879_v53, %v3880_v28  ;;  %v3252_v29 = vmax.f32 %v9855_v61, %v9879_v25 }
 0x3a1   : > { %v3925_v42 = vmax.f32 %v3923_v38, %v3924_v32  ;;  %v9918_v58 = vmax.f32 %v9908_v14, %v3904_v23  ;;  %v9920_v8 = vmax.f32 %v3904_v23, %v3911_v11  ;;  %v9922_v15 = vmax.f32 %v3911_v11, %v3918_v50 }
 0x3a2   : > { %v3932_v62 = vmax.f32 %v3930_v19, %v3931_v37  ;;  %v3882_v22 = vrot.slane %v3881_v6, 1  ;;  %v3886_v41 = vmax.f32 %v3884_v18, %v3885_v33  ;;  %v3253_v60 = vmax.f32 %v9864_v21, %v9892_v17 }
 0x3a3   : > { %v9926_v16 = vmax.f32 %v3918_v50, %v3925_v42  ;;  %v4576_v61 = vsel %vm4317_vm14, %v9920_v8, %v9918_v58  ;;  %v3452_v54 = vcombine.high %v3252_v29, %v3252_v29  ;;  %v3459_v51 = vrot.slane %v3252_v29, %v9535_v4 }
 0x3a4   : > { %v9932_v9 = vmax.f32 %v3925_v42, %v3932_v62  ;;  %v9934_v55 = vmax.f32 %v3932_v62, %v3939_v2  ;;  %v4577_v27 = vsel %vm4319_vm13, %v9922_v15, %v4576_v61  ;;  %v3883_v46 = vmax.f32 %v3881_v6, %v3882_v22 }
 0x3a5   : > { %v4578_v21 = vsel %vm4321_vm15, %v9926_v16, %v4577_v27  ;;  %v3887_v47 = vrot.slane %v3886_v41, 2  ;;  %v3466_v63 = vrot.slane %v3452_v54, %v9535_v4  ;;  %v3467_v3 = vcombine.high %v3459_v51, %v3459_v51 }
 0x3a6   : > { %v4579_v57 = vsel %vm4323_vm0, %v9932_v9, %v4578_v21  ;;  %v3469_v52 = vcombine.high %v3253_v60, %v3253_v60  ;;  %v3476_v1 = vrot.slane %v3253_v60, %v9535_v4  ;;  %v3940_v40 = vsel %vm3019_vm12, %v3459_v51, -inf }
 0x3a7   : > { %v4580_v12 = vsel %vm4325_vm1, %v9934_v55, %v4579_v57  ;;  %v3888_v24 = vmax.f32 %v3886_v41, %v3887_v47  ;;  %v3468_v13 = vcombine.high %v3466_v63, %v3466_v63  ;;  %v3941_v35 = vrot.slane %v3940_v40, 4 }
 0x3a8   : > { %4607 = vrot.lane.b32.xlu0 %v4580_v12, %s8293_s20  ;;  %v3483_v44 = vrot.slane %v3469_v52, %v9535_v4  ;;  %v3484_v45 = vcombine.high %v3476_v1, %v3476_v1  ;;  %v3947_v59 = vsel %vm3019_vm12, %v3467_v3, -inf  ;;  %v3954_v48 = vsel %vm3019_vm12, %v3466_v63, -inf }
 0x3a9   : > { %v3889_v10 = vrot.slane %v3888_v24, 1  ;;  %v3942_v5 = vmax.f32 %v3940_v40, %v3941_v35  ;;  %v3948_v56 = vrot.slane %v3947_v59, 4  ;;  %v3955_v39 = vrot.slane %v3954_v48, 4 }
 0x3aa   : > { %v3485_v26 = vcombine.high %v3483_v44, %v3483_v44  ;;  %v3961_v7 = vsel %vm3019_vm12, %v3468_v13, -inf  ;;  %v3968_v53 = vsel %vm3019_vm12, %v3476_v1, -inf  ;;  %v3975_v43 = vsel %vm3019_vm12, %v3484_v45, -inf }
 0x3ab   : > { %v3890_v11 = vmax.f32 %v3888_v24, %v3889_v10  ;;  %v3943_v31 = vrot.slane %v3942_v5, 2  ;;  %v3949_v38 = vmax.f32 %v3947_v59, %v3948_v56  ;;  %v3956_v19 = vmax.f32 %v3954_v48, %v3955_v39 }
 0x3ac   : > { %v3962_v20 = vrot.slane %v3961_v7, 4  ;;  %v3969_v28 = vrot.slane %v3968_v53, 4  ;;  %v3976_v18 = vrot.slane %v3975_v43, 4  ;;  %v3982_v23 = vsel %vm3019_vm12, %v3483_v44, -inf }
 0x3ad   : > { %v4216_v50 = vmax.f32 %v3883_v46, %v3890_v11  ;;  %v4217_v32 = vmax.f32 %v3890_v11, %v9908_v14  ;;  %v3944_v33 = vmax.f32 %v3942_v5, %v3943_v31  ;;  %v3950_v37 = vrot.slane %v3949_v38, 2 }
 0x3ae   : > { %v3957_v2 = vrot.slane %v3956_v19, 2  ;;  %v3963_v6 = vmax.f32 %v3961_v7, %v3962_v20  ;;  %v3970_v29 = vmax.f32 %v3968_v53, %v3969_v28  ;;  %v3977_v42 = vmax.f32 %v3975_v43, %v3976_v18 }
 0x3af   : > { %v4337_v62 = vsel %vm4317_vm14, %v4217_v32, %v4216_v50  ;;  %v3945_v22 = vrot.slane %v3944_v33, 1  ;;  %v3951_v41 = vmax.f32 %v3949_v38, %v3950_v37  ;;  %v3983_v60 = vrot.slane %v3982_v23, 4 }
 0x3b0   : > { %v4338_v61 = vsel %vm4319_vm13, %v9918_v58, %v4337_v62  ;;  %v3958_v54 = vmax.f32 %v3956_v19, %v3957_v2  ;;  %v3964_v51 = vrot.slane %v3963_v6, 2  ;;  %v3971_v27 = vrot.slane %v3970_v29, 2  ;;  %v3137_v19 = vld [vmem:[#allocation3 + $0x100] sm:$0x3] }
 0x3b1   : > { %v4339_v14 = vsel %vm4321_vm15, %v9920_v8, %v4338_v61  ;;  %v3946_v46 = vmax.f32 %v3944_v33, %v3945_v22  ;;  %v3952_v21 = vrot.slane %v3951_v41, 1  ;;  %v3978_v47 = vrot.slane %v3977_v42, 2 }
 0x3b2   : > { %v4340_v63 = vsel %vm4323_vm0, %v9922_v15, %v4339_v14  ;;  %v3959_v3 = vrot.slane %v3958_v54, 1  ;;  %v3965_v57 = vmax.f32 %v3963_v6, %v3964_v51  ;;  %v3972_v52 = vmax.f32 %v3970_v29, %v3971_v27 }
 0x3b3   : > { %v9965_v1 = vsel %vm4325_vm1, %v9926_v16, %v4340_v63  ;;  %v3953_v40 = vmax.f32 %v3951_v41, %v3952_v21  ;;  %v3979_v12 = vmax.f32 %v3977_v42, %v3978_v47  ;;  %v3984_v24 = vmax.f32 %v3982_v23, %v3983_v60  ;;  %v3141_v42 = vld [vmem:[#allocation3 + $0x120] sm:$0xff] }
 0x3b4   : > { %v4392_v13 = vsel %vm4388_vm2, %v9932_v9, %v9965_v1  ;;  %v3960_v35 = vmax.f32 %v3958_v54, %v3959_v3  ;;  %v3966_v44 = vrot.slane %v3965_v57, 1  ;;  %v3973_v45 = vrot.slane %v3972_v52, 1  ;;  %v3142_v3 = vld [vmem:[#allocation3 + $0x128] sm:$0xff]  ;;  %4375 = vst.msk [vmem:[#allocation4 + $0x2a] sm:$0x3f] %vm4371_vm5, %v9965_v1 }
 0x3b5   : > { %4403 = vrot.lane.b32.xlu1 %v4392_v13, %s8294_s21  ;;  %v4442_v59 = vsel %vm4438_vm3, %v9934_v55, %v4392_v13  ;;  %v3980_v48 = vrot.slane %v3979_v12, 1  ;;  %v3985_v10 = vrot.slane %v3984_v24, 2  ;;  %v3989_v5 = vsel %vm3019_vm12, %v3485_v26, -inf  ;;  %v3140_v26 = vld [vmem:[#allocation3 + $0x118] sm:$0x3] }
 0x3b6   : > { %4453 = vrot.lane.b32.xlu0 %v4442_v59, %s8295_s22  ;;  %v3967_v56 = vmax.f32 %v3965_v57, %v3966_v44  ;;  %v3974_v39 = vmax.f32 %v3972_v52, %v3973_v45  ;;  %v3990_v7 = vrot.slane %v3989_v5, 4  ;;  %v4224_v53 = vmax.f32 %v3946_v46, %v3953_v40  ;;  %v3143_v46 = vld [vmem:[#allocation3 + $0x130] sm:$0x3]  ;;  %v3145_v57 = vld [vmem:[#allocation3 + $0x140] sm:$0xff]  ;;  %v3146_v52 = vld [vmem:[#allocation3 + $0x148] sm:$0x3] }
 0x3b7   : > { %v3981_v43 = vmax.f32 %v3979_v12, %v3980_v48  ;;  %v3986_v11 = vmax.f32 %v3984_v24, %v3985_v10  ;;  %v4225_v31 = vmax.f32 %v3953_v40, %v3960_v35  ;;  %v4498_v38 = vsel %vm4317_vm14, %v9918_v58, %v4217_v32  ;;  %v3147_v59 = vld [vmem:[#allocation3 + $0x150] sm:$0xff]  ;;  %v3150_v48 = vld [vmem:[#allocation3 + $0x168] sm:$0xff] }
 0x3b8   : > { %v3991_v20 = vmax.f32 %v3989_v5, %v3990_v7  ;;  %v4226_v28 = vmax.f32 %v3960_v35, %v3967_v56  ;;  %v4227_v18 = vmax.f32 %v3967_v56, %v3974_v39  ;;  %v4499_v23 = vsel %vm4319_vm13, %v9920_v8, %v4498_v38 }
 0x3b9   : > { %v3987_v50 = vrot.slane %v3986_v11, 1  ;;  %v4228_v33 = vmax.f32 %v3974_v39, %v3981_v43  ;;  %v4342_v37 = vsel %vm4317_vm14, %v4225_v31, %v4224_v53  ;;  %v4500_v2 = vsel %vm4321_vm15, %v9922_v15, %v4499_v23 }
 0x3ba   : > { %v3992_v6 = vrot.slane %v3991_v20, 2  ;;  %v4343_v29 = vsel %vm4319_vm13, %v4226_v28, %v4342_v37  ;;  %v4501_v58 = vsel %vm4323_vm0, %v9926_v16, %v4500_v2  ;;  %v3210_v32 = vsel %vm3019_vm12, %v3137_v19, -inf  ;;  %v3144_v16 = vld [vmem:[#allocation3 + $0x138] sm:$0xff] }
 0x3bb   : > { %v3988_v62 = vmax.f32 %v3986_v11, %v3987_v50  ;;  %v4344_v8 = vsel %vm4321_vm15, %v4227_v18, %v4343_v29  ;;  %v4502_v22 = vsel %vm4325_vm1, %v9932_v9, %v4501_v58  ;;  %v3211_v41 = vsel %vm3019_vm12, %v3140_v26, -inf  ;;  %v3148_v19 = vld [vmem:[#allocation3 + $0x158] sm:$0xff] }
 0x3bc   : > { %v3993_v60 = vmax.f32 %v3991_v20, %v3992_v6  ;;  %v4345_v15 = vsel %vm4323_vm0, %v4228_v33, %v4344_v8  ;;  %v4503_v61 = vsel %vm4388_vm2, %v9934_v55, %v4502_v22  ;;  %v9993_v54 = vmax.f32 %v3210_v32, %v3211_v41 }
 0x3bd   : > { %v4229_v51 = vmax.f32 %v3981_v43, %v3988_v62  ;;  %4534 = vrot.lane.b32.xlu0 %v4503_v61, %s8296_s23  ;;  %v4581_v27 = vsel %vm4317_vm14, %v4227_v18, %v4226_v28  ;;  %v4504_v14 = vsel %vm4317_vm14, %v4226_v28, %v4225_v31  ;;  %v3213_v9 = vsel %vm3016_vm11, %v3141_v42, -inf }
 0x3be   : > { %v3994_v21 = vrot.slane %v3993_v60, 1  ;;  %v3254_v47 = vmax.f32 %v9870_v34, %v9993_v54  ;;  %v4582_v63 = vsel %vm4319_vm13, %v4228_v33, %v4581_v27  ;;  %v4505_v55 = vsel %vm4319_vm13, %v4227_v18, %v4504_v14 }
 0x3bf   : > { %v10004_v40 = vsel %vm4325_vm1, %v4229_v51, %v4345_v15  ;;  %v4583_v12 = vsel %vm4321_vm15, %v4229_v51, %v4582_v63  ;;  %v4506_v24 = vsel %vm4321_vm15, %v4228_v33, %v4505_v55  ;;  %v3214_v13 = vsel %vm3016_vm11, %v3144_v16, -inf }
 0x3c0   : > { %v10009_v35 = vmax.f32 %v3993_v60, %v3994_v21  ;;  %v3492_v34 = vrot.slane %v3254_v47, %v9535_v4  ;;  %v4507_v44 = vsel %vm4323_vm0, %v4229_v51, %v4506_v24  ;;  %v10013_v45 = vmax.f32 %v3213_v9, %v3214_v13  ;;  %4376 = vst.msk [vmem:[#allocation4 + $0x32] sm:$0x3f] %vm4371_vm5, %v10004_v40 }
 0x3c1   : > { %v3216_v10 = vsel %vm3016_vm11, %v3142_v3, -inf  ;;  %v3217_v5 = vsel %vm3016_vm11, %v3145_v57, -inf  ;;  %v3219_v56 = vsel %vm3019_vm12, %v3143_v46, -inf  ;;  %v3220_v39 = vsel %vm3019_vm12, %v3146_v52, -inf }
 0x3c2   : > { %v4230_v7 = vmax.f32 %v3988_v62, %v10009_v35  ;;  %v3996_v53 = vsel %vm3019_vm12, %v3492_v34, -inf  ;;  %v10021_v43 = vmax.f32 %v3216_v10, %v3217_v5  ;;  %v3255_v11 = vmax.f32 %v9879_v25, %v10013_v45 }
 0x3c3   : > { %v3997_v31 = vrot.slane %v3996_v53, 4  ;;  %v10025_v38 = vmax.f32 %v3219_v56, %v3220_v39  ;;  %v3222_v20 = vsel %vm3016_vm11, %v3147_v59, -inf  ;;  %v3223_v28 = vsel %vm3016_vm11, %v3150_v48, -inf }
 0x3c4   : > { %v4393_v18 = vsel %vm4388_vm2, %v4230_v7, %v10004_v40  ;;  %v4584_v23 = vsel %vm4323_vm0, %v4230_v7, %v4583_v12  ;;  %v4508_v26 = vsel %vm4325_vm1, %v4230_v7, %v4507_v44  ;;  %v3256_v50 = vmax.f32 %v9892_v17, %v10021_v43 }
 0x3c5   : > { %4405 = vrot.lane.b32.xlu1 %v4393_v18, %s8294_s21  ;;  %v3998_v25 = vmax.f32 %v3996_v53, %v3997_v31  ;;  %v3493_v33 = vcombine.high %v3255_v11, %v3255_v11  ;;  %v3500_v37 = vrot.slane %v3255_v11, %v9535_v4  ;;  %v3257_v2 = vmax.f32 %v9993_v54, %v10025_v38 }
 0x3c6   : > { %v3510_v6 = vcombine.high %v3256_v50, %v3256_v50  ;;  %v3517_v29 = vrot.slane %v3256_v50, %v9535_v4  ;;  %v10040_v58 = vmax.f32 %v3222_v20, %v3223_v28  ;;  %v10043_v32 = vsel %vm3016_vm11, %v3148_v19, -inf }
 0x3c7   : > { %v3999_v42 = vrot.slane %v3998_v25, 2  ;;  %v3507_v17 = vrot.slane %v3493_v33, %v9535_v4  ;;  %v3508_v62 = vcombine.high %v3500_v37, %v3500_v37  ;;  %v4003_v8 = vsel %vm3019_vm12, %v3500_v37, -inf }
 0x3c8   : > { %v3524_v22 = vrot.slane %v3510_v6, %v9535_v4  ;;  %v3525_v41 = vcombine.high %v3517_v29, %v3517_v29  ;;  %v4004_v60 = vrot.slane %v4003_v8, 4  ;;  %v4031_v15 = vsel %vm3019_vm12, %v3517_v29, -inf }
 0x3c9   : > { %v4000_v61 = vmax.f32 %v3998_v25, %v3999_v42  ;;  %v3509_v16 = vcombine.high %v3507_v17, %v3507_v17  ;;  %v4010_v51 = vsel %vm3019_vm12, %v3508_v62, -inf  ;;  %v4017_v27 = vsel %vm3019_vm12, %v3507_v17, -inf }
 0x3ca   : > { %v3526_v14 = vcombine.high %v3524_v22, %v3524_v22  ;;  %v4005_v9 = vmax.f32 %v4003_v8, %v4004_v60  ;;  %v4011_v46 = vrot.slane %v4010_v51, 4  ;;  %v4018_v21 = vrot.slane %v4017_v27, 4 }
 0x3cb   : > { %v4001_v47 = vrot.slane %v4000_v61, 1  ;;  %v4024_v63 = vsel %vm3019_vm12, %v3509_v16, -inf  ;;  %v4032_v55 = vrot.slane %v4031_v15, 4  ;;  %v4038_v3 = vsel %vm3019_vm12, %v3525_v41, -inf }
 0x3cc   : > { %v4006_v57 = vrot.slane %v4005_v9, 2  ;;  %v4012_v52 = vmax.f32 %v4010_v51, %v4011_v46  ;;  %v4019_v12 = vmax.f32 %v4017_v27, %v4018_v21  ;;  %v4025_v24 = vrot.slane %v4024_v63, 4 }
 0x3cd   : > { %v4002_v13 = vmax.f32 %v4000_v61, %v4001_v47  ;;  %v4033_v34 = vmax.f32 %v4031_v15, %v4032_v55  ;;  %v4039_v44 = vrot.slane %v4038_v3, 4  ;;  %v4045_v59 = vsel %vm3019_vm12, %v3524_v22, -inf  ;;  %v3151_v15 = vld [vmem:[#allocation3 + $0x170] sm:$0xff] }
 0x3ce   : > { %v4007_v48 = vmax.f32 %v4005_v9, %v4006_v57  ;;  %v4013_v10 = vrot.slane %v4012_v52, 2  ;;  %v4020_v5 = vrot.slane %v4019_v12, 2  ;;  %v4026_v56 = vmax.f32 %v4024_v63, %v4025_v24 }
 0x3cf   : > { %v4231_v39 = vmax.f32 %v10009_v35, %v4002_v13  ;;  %v4034_v7 = vrot.slane %v4033_v34, 2  ;;  %v4040_v53 = vmax.f32 %v4038_v3, %v4039_v44  ;;  %v4046_v11 = vrot.slane %v4045_v59, 4 }
 0x3d0   : > { %v4008_v31 = vrot.slane %v4007_v48, 1  ;;  %v4014_v19 = vmax.f32 %v4012_v52, %v4013_v10  ;;  %v4021_v20 = vmax.f32 %v4019_v12, %v4020_v5  ;;  %v4027_v28 = vrot.slane %v4026_v56, 2 }
 0x3d1   : > { %v4443_v50 = vsel %vm4438_vm3, %v4231_v39, %v4393_v18  ;;  %v4585_v25 = vsel %vm4325_vm1, %v4231_v39, %v4584_v23  ;;  %v4509_v33 = vsel %vm4388_vm2, %v4231_v39, %v4508_v26  ;;  %v4035_v37 = vmax.f32 %v4033_v34, %v4034_v7 }
 0x3d2   : > { %4455 = vrot.lane.b32.xlu1 %v4443_v50, %s8295_s22  ;;  %4609 = vrot.lane.b32.xlu0 %v4585_v25, %s8293_s20  ;;  %v4009_v6 = vmax.f32 %v4007_v48, %v4008_v31  ;;  %v4015_v35 = vrot.slane %v4014_v19, 1  ;;  %v4022_v29 = vrot.slane %v4021_v20, 1  ;;  %v4028_v42 = vmax.f32 %v4026_v56, %v4027_v28 }
 0x3d3   : > { %v4036_v17 = vrot.slane %v4035_v37, 1  ;;  %v4041_v62 = vrot.slane %v4040_v53, 2  ;;  %v4047_v8 = vmax.f32 %v4045_v59, %v4046_v11  ;;  %v4052_v22 = vsel %vm3019_vm12, %v3526_v14, -inf }
 0x3d4   : > { %v4016_v41 = vmax.f32 %v4014_v19, %v4015_v35  ;;  %v4023_v18 = vmax.f32 %v4021_v20, %v4022_v29  ;;  %v4029_v60 = vrot.slane %v4028_v42, 1  ;;  %v4053_v23 = vrot.slane %v4052_v22, 4 }
 0x3d5   : > { %v4037_v26 = vmax.f32 %v4035_v37, %v4036_v17  ;;  %v4042_v61 = vmax.f32 %v4040_v53, %v4041_v62  ;;  %v4048_v16 = vrot.slane %v4047_v8, 2  ;;  %v3533_v51 = vrot.slane %v3257_v2, %v9535_v4 }
 0x3d6   : > { %4536 = vrot.lane.b32.xlu1 %v4509_v33, %s8296_s23  ;;  %v4030_v27 = vmax.f32 %v4028_v42, %v4029_v60  ;;  %v4054_v9 = vmax.f32 %v4052_v22, %v4053_v23  ;;  %v4232_v46 = vmax.f32 %v4009_v6, %v4016_v41  ;;  %v4233_v21 = vmax.f32 %v4016_v41, %v4023_v18 }
 0x3d7   : > { %v4043_v14 = vrot.slane %v4042_v61, 1  ;;  %v4049_v47 = vmax.f32 %v4047_v8, %v4048_v16  ;;  %v4059_v63 = vsel %vm3019_vm12, %v3533_v51, -inf  ;;  %v3226_v55 = vsel %vm3016_vm11, %v3151_v15, -inf }
 0x3d8   : > { %v4055_v3 = vrot.slane %v4054_v9, 2  ;;  %v10068_v57 = vmax.f32 %v4023_v18, %v4030_v27  ;;  %v10070_v52 = vmax.f32 %v4030_v27, %v4037_v26  ;;  %v4347_v54 = vsel %vm4317_vm14, %v4233_v21, %v4232_v46 }
 0x3d9   : > { %v4044_v2 = vmax.f32 %v4042_v61, %v4043_v14  ;;  %v4050_v12 = vrot.slane %v4049_v47, 1  ;;  %v4060_v24 = vrot.slane %v4059_v63, 4  ;;  %v10074_v13 = vmax.f32 %v10043_v32, %v3226_v55 }
 0x3da   : > { %v4056_v34 = vmax.f32 %v4054_v9, %v4055_v3  ;;  %v4348_v44 = vsel %vm4319_vm13, %v10068_v57, %v4347_v54  ;;  %v4510_v59 = vsel %vm4317_vm14, %v10068_v57, %v4233_v21  ;;  %v3258_v48 = vmax.f32 %v10013_v45, %v10040_v58 }
 0x3db   : > { %v4051_v10 = vmax.f32 %v4049_v47, %v4050_v12  ;;  %v10082_v5 = vmax.f32 %v4037_v26, %v4044_v2  ;;  %v4349_v56 = vsel %vm4321_vm15, %v10070_v52, %v4348_v44  ;;  %v4061_v39 = vmax.f32 %v4059_v63, %v4060_v24 }
 0x3dc   : > { %v4057_v7 = vrot.slane %v4056_v34, 1  ;;  %v4511_v32 = vsel %vm4319_vm13, %v10070_v52, %v4510_v59  ;;  %v3259_v53 = vmax.f32 %v10021_v43, %v10074_v13  ;;  %v3534_v11 = vcombine.high %v3258_v48, %v3258_v48 }
 0x3dd   : > { %v10090_v31 = vmax.f32 %v4044_v2, %v4051_v10  ;;  %v4350_v45 = vsel %vm4323_vm0, %v10082_v5, %v4349_v56  ;;  %v4062_v19 = vrot.slane %v4061_v39, 2  ;;  %v4512_v20 = vsel %vm4321_vm15, %v10082_v5, %v4511_v32 }
 0x3de   : > { %v4058_v28 = vmax.f32 %v4056_v34, %v4057_v7  ;;  %v3541_v50 = vrot.slane %v3258_v48, %v9535_v4  ;;  %v3548_v25 = vrot.slane %v3534_v11, %v9535_v4  ;;  %v3551_v33 = vcombine.high %v3259_v53, %v3259_v53 }
 0x3df   : > { %v10100_v37 = vsel %vm4325_vm1, %v10090_v31, %v4350_v45  ;;  %v4063_v43 = vmax.f32 %v4061_v39, %v4062_v19  ;;  %v4513_v6 = vsel %vm4323_vm0, %v10090_v31, %v4512_v20  ;;  %v3558_v35 = vrot.slane %v3259_v53, %v9535_v4 }
 0x3e0   : > { %v10105_v29 = vmax.f32 %v4051_v10, %v4058_v28  ;;  %v3549_v42 = vcombine.high %v3541_v50, %v3541_v50  ;;  %v3550_v17 = vcombine.high %v3548_v25, %v3548_v25  ;;  %v3565_v62 = vrot.slane %v3551_v33, %v9535_v4  ;;  %4377 = vst.msk [vmem:[#allocation4 + $0x3a] sm:$0x3f] %vm4371_vm5, %v10100_v37 }
 0x3e1   : > { %v4064_v8 = vrot.slane %v4063_v43, 1  ;;  %v3566_v22 = vcombine.high %v3558_v35, %v3558_v35  ;;  %v4066_v41 = vsel %vm3019_vm12, %v3541_v50, -inf  ;;  %v4080_v18 = vsel %vm3019_vm12, %v3548_v25, -inf }
 0x3e2   : > { %v4394_v60 = vsel %vm4388_vm2, %v10105_v29, %v10100_v37  ;;  %v4514_v23 = vsel %vm4325_vm1, %v10105_v29, %v4513_v6  ;;  %v3567_v15 = vcombine.high %v3565_v62, %v3565_v62  ;;  %v4067_v26 = vrot.slane %v4066_v41, 4 }
 0x3e3   : > { %4407 = vrot.lane.b32.xlu1 %v4394_v60, %s8294_s21  ;;  %v4065_v61 = vmax.f32 %v4063_v43, %v4064_v8  ;;  %v4073_v16 = vsel %vm3019_vm12, %v3549_v42, -inf  ;;  %v4081_v51 = vrot.slane %v4080_v18, 4  ;;  %v4087_v27 = vsel %vm3019_vm12, %v3550_v17, -inf }
 0x3e4   : > { %v4068_v9 = vmax.f32 %v4066_v41, %v4067_v26  ;;  %v4074_v46 = vrot.slane %v4073_v16, 4  ;;  %v4088_v21 = vrot.slane %v4087_v27, 4  ;;  %v4094_v14 = vsel %vm3019_vm12, %v3558_v35, -inf }
 0x3e5   : > { %v10119_v47 = vmax.f32 %v4058_v28, %v4065_v61  ;;  %v4082_v63 = vmax.f32 %v4080_v18, %v4081_v51  ;;  %v4095_v55 = vrot.slane %v4094_v14, 4  ;;  %v4101_v3 = vsel %vm3019_vm12, %v3566_v22, -inf }
 0x3e6   : > { %v4069_v54 = vrot.slane %v4068_v9, 2  ;;  %v4075_v2 = vmax.f32 %v4073_v16, %v4074_v46  ;;  %v4089_v12 = vmax.f32 %v4087_v27, %v4088_v21  ;;  %v4102_v24 = vrot.slane %v4101_v3, 4 }
 0x3e7   : > { %v4444_v34 = vsel %vm4438_vm3, %v10119_v47, %v4394_v60  ;;  %v4515_v44 = vsel %vm4388_vm2, %v10119_v47, %v4514_v23  ;;  %v4083_v59 = vrot.slane %v4082_v63, 2  ;;  %v4096_v48 = vmax.f32 %v4094_v14, %v4095_v55 }
 0x3e8   : > { %4457 = vrot.lane.b32.xlu0 %v4444_v34, %s8295_s22  ;;  %v4070_v10 = vmax.f32 %v4068_v9, %v4069_v54  ;;  %v4076_v56 = vrot.slane %v4075_v2, 2  ;;  %v4090_v39 = vrot.slane %v4089_v12, 2  ;;  %v4103_v7 = vmax.f32 %v4101_v3, %v4102_v24  ;;  %v3149_v9 = vld [vmem:[#allocation3 + $0x160] sm:$0x3] }
 0x3e9   : > { %v4084_v32 = vmax.f32 %v4082_v63, %v4083_v59  ;;  %v4097_v53 = vrot.slane %v4096_v48, 2  ;;  %v4108_v11 = vsel %vm3019_vm12, %v3565_v62, -inf  ;;  %v4115_v45 = vsel %vm3019_vm12, %v3567_v15, -inf  ;;  %v3153_v24 = vld [vmem:[#allocation3 + $0x180] sm:$0xff] }
 0x3ea   : > { %v4071_v19 = vrot.slane %v4070_v10, 1  ;;  %v4077_v20 = vmax.f32 %v4075_v2, %v4076_v56  ;;  %v4091_v28 = vmax.f32 %v4089_v12, %v4090_v39  ;;  %v4104_v50 = vrot.slane %v4103_v7, 2  ;;  %v3152_v12 = vld [vmem:[#allocation3 + $0x178] sm:$0x3] }
 0x3eb   : > { %v4085_v25 = vrot.slane %v4084_v32, 1  ;;  %v4098_v33 = vmax.f32 %v4096_v48, %v4097_v53  ;;  %v4109_v43 = vrot.slane %v4108_v11, 4  ;;  %v4116_v6 = vrot.slane %v4115_v45, 4  ;;  %v3156_v39 = vld [vmem:[#allocation3 + $0x198] sm:$0xff] }
 0x3ec   : > { %4538 = vrot.lane.b32.xlu0 %v4515_v44, %s8296_s23  ;;  %v4072_v35 = vmax.f32 %v4070_v10, %v4071_v19  ;;  %v4078_v42 = vrot.slane %v4077_v20, 1  ;;  %v4092_v17 = vrot.slane %v4091_v28, 1  ;;  %v4105_v8 = vmax.f32 %v4103_v7, %v4104_v50  ;;  %v3157_v7 = vld [vmem:[#allocation3 + $0x1a0] sm:$0xff] }
 0x3ed   : > { %v4086_v22 = vmax.f32 %v4084_v32, %v4085_v25  ;;  %v4099_v41 = vrot.slane %v4098_v33, 1  ;;  %v4110_v18 = vmax.f32 %v4108_v11, %v4109_v43  ;;  %v4117_v62 = vmax.f32 %v4115_v45, %v4116_v6 }
 0x3ee   : > { %v4079_v60 = vmax.f32 %v4077_v20, %v4078_v42  ;;  %v4093_v23 = vmax.f32 %v4091_v28, %v4092_v17  ;;  %v4106_v15 = vrot.slane %v4105_v8, 1  ;;  %v4586_v26 = vsel %vm4317_vm14, %v10070_v52, %v10068_v57  ;;  %v10137_v57 = vpop.permute.xlu0 %4397  ;;  %v3155_v42 = vld [vmem:[#allocation3 + $0x190] sm:$0x3] }
 0x3ef   : > { %v4100_v61 = vmax.f32 %v4098_v33, %v4099_v41  ;;  %v4111_v16 = vrot.slane %v4110_v18, 2  ;;  %v4118_v51 = vrot.slane %v4117_v62, 2  ;;  %v4587_v27 = vsel %vm4319_vm13, %v10082_v5, %v4586_v26  ;;  %4422 = vst.msk [vmem:[#allocation4 + $0x11] sm:$0x7f] %vm4421_vm6, %v10137_v57  ;;  %v6987_v57 = vld [vmem:[%s11347_s4 + $0x80] sm:$0xff] }
 0x3f0   : > { %v4107_v46 = vmax.f32 %v4105_v8, %v4106_v15  ;;  %v4240_v21 = vmax.f32 %v4072_v35, %v4079_v60  ;;  %v4241_v14 = vmax.f32 %v4079_v60, %v4086_v22  ;;  %v4242_v63 = vmax.f32 %v4086_v22, %v4093_v23  ;;  %v6981_v60 = vld [vmem:[%s11347_s4 + $0x50] sm:$0xff] }
 0x3f1   : > { %v4112_v55 = vmax.f32 %v4110_v18, %v4111_v16  ;;  %v4119_v3 = vmax.f32 %v4117_v62, %v4118_v51  ;;  %v4243_v54 = vmax.f32 %v4093_v23, %v4100_v61  ;;  %v4588_v2 = vsel %vm4321_vm15, %v10090_v31, %v4587_v27  ;;  %v3154_v31 = vld [vmem:[#allocation3 + $0x188] sm:$0xff] }
 0x3f2   : > { %v4244_v52 = vmax.f32 %v4100_v61, %v4107_v46  ;;  %v4352_v34 = vsel %vm4317_vm14, %v4241_v14, %v4240_v21  ;;  %v4589_v5 = vsel %vm4323_vm0, %v10105_v29, %v4588_v2  ;;  %v3228_v44 = vsel %vm3019_vm12, %v3149_v9, -inf  ;;  %v10163_v17 = vpop.permute.xlu0 %4528  ;;  %v3158_v62 = vld [vmem:[#allocation3 + $0x1a8] sm:$0x3]  ;;  %v6983_v9 = vld [vmem:[%s11347_s4 + $0x60] sm:$0xff] }
 0x3f3   : > { %v4113_v59 = vrot.slane %v4112_v55, 1  ;;  %v4120_v48 = vrot.slane %v4119_v3, 1  ;;  %v4353_v10 = vsel %vm4319_vm13, %v4242_v63, %v4352_v34  ;;  %v4590_v56 = vsel %vm4325_vm1, %v10119_v47, %v4589_v5 }
 0x3f4   : > { %v4354_v32 = vsel %vm4321_vm15, %v4243_v54, %v4353_v10  ;;  %4611 = vrot.lane.b32.xlu0 %v4590_v56, %s8293_s20  ;;  %v3229_v53 = vsel %vm3019_vm12, %v3152_v12, -inf  ;;  %v4516_v29 = vsel %vm4317_vm14, %v4242_v63, %v4241_v14  ;;  %v3231_v11 = vsel %vm3016_vm11, %v3153_v24, -inf  ;;  %v10218_v10 = vpop.permute.xlu1 %4601 }
 0x3f5   : > { %v4114_v45 = vmax.f32 %v4112_v55, %v4113_v59  ;;  %v10151_v19 = vmax.f32 %v4119_v3, %v4120_v48  ;;  %v4355_v20 = vsel %vm4323_vm0, %v4244_v52, %v4354_v32  ;;  %v10154_v28 = vmax.f32 %v3228_v44, %v3229_v53 }
 0x3f6   : > { %v4517_v47 = vsel %vm4319_vm13, %v4243_v54, %v4516_v29  ;;  %v3232_v50 = vsel %vm3016_vm11, %v3156_v39, -inf  ;;  %v3234_v25 = vsel %vm3016_vm11, %v3154_v31, -inf  ;;  %v3235_v33 = vsel %vm3016_vm11, %v3157_v7, -inf  ;;  %v10212_v34 = vpop.permute.xlu0 %4399 }
 0x3f7   : > { %v4245_v43 = vmax.f32 %v4107_v46, %v4114_v45  ;;  %v3260_v6 = vmax.f32 %v10025_v38, %v10154_v28  ;;  %v4518_v35 = vsel %vm4321_vm15, %v4244_v52, %v4517_v47  ;;  %v10166_v8 = vmax.f32 %v4114_v45, %v10151_v19  ;;  %v6982_v38 = vld [vmem:[%s11347_s4 + $0x58] sm:$0xff]  ;;  %v6984_v46 = vld [vmem:[%s11347_s4 + $0x68] sm:$0xff]  ;;  %4423 = vst.msk [vmem:[#allocation4 + $0x19] sm:$0x7f] %vm4421_vm6, %v10212_v34 }
 0x3f8   : > { %v3233_v22 = vmax.f32 %v3231_v11, %v3232_v50  ;;  %v3236_v41 = vmax.f32 %v3234_v25, %v3235_v33  ;;  %v4591_v18 = vsel %vm4317_vm14, %v4243_v54, %v4242_v63  ;;  %v10198_v14 = vsel %vm3019_vm12, %v3155_v42, -inf }
 0x3f9   : > { %v10176_v23 = vsel %vm4325_vm1, %v4245_v43, %v4355_v20  ;;  %v3574_v15 = vrot.slane %v3260_v6, %v9535_v4  ;;  %v4519_v26 = vsel %vm4323_vm0, %v4245_v43, %v4518_v35  ;;  %v4592_v27 = vsel %vm4319_vm13, %v4244_v52, %v4591_v18 }
 0x3fa   : > { %v10183_v61 = vsel %vm4388_vm2, %v10166_v8, %v10176_v23  ;;  %v3261_v16 = vmax.f32 %v10040_v58, %v3233_v22  ;;  %v3262_v51 = vmax.f32 %v10074_v13, %v3236_v41  ;;  %v10201_v58 = vsel %vm3019_vm12, %v3158_v62, -inf  ;;  %v10232_v18 = vpop.permute.xlu0 %4603  ;;  %4378 = vst.msk [vmem:[#allocation4 + $0x42] sm:$0x3f] %vm4371_vm5, %v10176_v23 }
 0x3fb   : > { %4409 = vrot.lane.b32.xlu1 %v10183_v61, %s8294_s21  ;;  %v4122_v21 = vsel %vm3019_vm12, %v3574_v15, -inf  ;;  %v7823_v13 = vpack.c.bf16 %v6982_v38, %v6981_v60  ;;  %v10206_v2 = vsel %vm4325_vm1, %v10166_v8, %v4519_v26  ;;  %v10210_v24 = vsel %vm4321_vm15, %v4245_v43, %v4592_v27  ;;  %v10234_v26 = vpop.permute.xlu1 %4447 }
 0x3fc   : > { %v4123_v63 = vrot.slane %v4122_v21, 4  ;;  %v3575_v55 = vcombine.high %v3261_v16, %v3261_v16  ;;  %v3582_v3 = vrot.slane %v3261_v16, %v9535_v4  ;;  %v3592_v54 = vcombine.high %v3262_v51, %v3262_v51  ;;  %4472 = vst.msk [vmem:[#allocation4 + $0x10] sm:$0xff] %vm4471_vm7, %v10234_v26  ;;  %v6988_v26 = vld [vmem:[%s11347_s4 + $0x88] sm:$0xff] }
 0x3fd   : > { %v3599_v12 = vrot.slane %v3262_v51, %v9535_v4  ;;  %7824 = vmatprep.subr.bf16.mxu1 %v7823_v13  ;;  %v7827_v52 = vpack.c.bf16 %v6984_v46, %v6983_v9  ;;  %v3239_v7 = vmax.f32 %v10198_v14, %v10201_v58  ;;  %4553 = vst.msk [vmem:[#allocation4 + $0x10] sm:$0x7f] %vm4552_vm8, %v10163_v17  ;;  %v4642_v17 = vld [vmem:[%s11347_s4] sm:$0xff]  ;;  %vm5440_vm11 = vcmask 254976  }
 0x3fe   : > { %v4124_v5 = vmax.f32 %v4122_v21, %v4123_v63  ;;  %v3589_v44 = vrot.slane %v3575_v55, %v9535_v4  ;;  %v3590_v59 = vcombine.high %v3582_v3, %v3582_v3  ;;  %v10216_v48 = vrot.slane %v3592_v54, %v9535_v4  ;;  %7826 = vmatpush3.bf16.msra.mxu1 %v7823_v13 }
 0x3ff   : > { %v3607_v56 = vcombine.high %v3599_v12, %v3599_v12  ;;  %v4129_v31 = vsel %vm3019_vm12, %v3582_v3, -inf  ;;  %v4157_v39 = vsel %vm3019_vm12, %v3599_v12, -inf  ;;  %7828 = vmatprep.subr.bf16.mxu1 %v7827_v52  ;;  %4626 = vst.msk [vmem:[#allocation4 + $0x10] sm:$0x3f] %vm4625_vm9, %v10218_v10 }
 0x400   : > { %v4125_v32 = vrot.slane %v4124_v5, 2  ;;  %v3591_v53 = vcombine.high %v3589_v44, %v3589_v44  ;;  %v3608_v29 = vcombine.high %v10216_v48, %v10216_v48  ;;  %v4130_v11 = vrot.slane %v4129_v31, 4  ;;  %5445 = vst.msk [vmem:[#allocation5 + $0x28] sm:$0x3] %vm5440_vm11, %v8287_v0  ;;  %5441 = vst.msk [vmem:[#allocation5 + $0x8] sm:$0x3] %vm5440_vm11, %v8287_v0 }
 0x401   : > { %v4136_v45 = vsel %vm3019_vm12, %v3590_v59, -inf  ;;  %v4143_v20 = vsel %vm3019_vm12, %v3589_v44, -inf  ;;  %v4158_v47 = vrot.slane %v4157_v39, 4  ;;  %v4164_v50 = vsel %vm3019_vm12, %v3607_v56, -inf  ;;  %v10239_v44 = vpop.permute.xlu1 %4401  ;;  %5443 = vst.msk [vmem:[#allocation5 + $0x18] sm:$0x3] %vm5440_vm11, %v8287_v0 }
 0x402   : > { %v4126_v25 = vmax.f32 %v4124_v5, %v4125_v32  ;;  %v4131_v33 = vmax.f32 %v4129_v31, %v4130_v11  ;;  %v4137_v43 = vrot.slane %v4136_v45, 4  ;;  %v4144_v6 = vrot.slane %v4143_v20, 4  ;;  %7830 = vmatpush3.bf16.msra.mxu1 %v7827_v52  ;;  %4424 = vst.msk [vmem:[#allocation4 + $0x21] sm:$0x7f] %vm4421_vm6, %v10239_v44 }
 0x403   : > { %v4150_v35 = vsel %vm3019_vm12, %v3591_v53, -inf  ;;  %v4159_v42 = vmax.f32 %v4157_v39, %v4158_v47  ;;  %v4165_v22 = vrot.slane %v4164_v50, 4  ;;  %v4171_v41 = vsel %vm3019_vm12, %v10216_v48, -inf  ;;  %v10241_v39 = vpop.permute.xlu0 %4449  ;;  %5447 = vst.msk [vmem:[#allocation5 + $0x38] sm:$0x3] %vm5440_vm11, %v8287_v0 }
 0x404   : > { %v4127_v62 = vrot.slane %v4126_v25, 1  ;;  %v4132_v60 = vrot.slane %v4131_v33, 2  ;;  %v4138_v38 = vmax.f32 %v4136_v45, %v4137_v43  ;;  %v4145_v15 = vmax.f32 %v4143_v20, %v4144_v6  ;;  %4473 = vst.msk [vmem:[#allocation4 + $0x18] sm:$0xff] %vm4471_vm7, %v10241_v39 }
 0x405   : > { %v4151_v16 = vrot.slane %v4150_v35, 4  ;;  %v4160_v51 = vrot.slane %v4159_v42, 2  ;;  %v4166_v27 = vmax.f32 %v4164_v50, %v4165_v22  ;;  %v4172_v9 = vrot.slane %v4171_v41, 4  ;;  %5449 = vst.msk [vmem:[#allocation5 + $0x48] sm:$0x3] %vm5440_vm11, %v8287_v0 }
 0x406   : > { %v4128_v46 = vmax.f32 %v4126_v25, %v4127_v62  ;;  %v4133_v21 = vmax.f32 %v4131_v33, %v4132_v60  ;;  %v4139_v14 = vrot.slane %v4138_v38, 2  ;;  %v4146_v58 = vrot.slane %v4145_v15, 2  ;;  %5451 = vst.msk [vmem:[#allocation5 + $0x58] sm:$0x3] %vm5440_vm11, %v8287_v0  ;;  %5453 = vst.msk [vmem:[#allocation5 + $0x68] sm:$0x3] %vm5440_vm11, %v8287_v0 }
 0x407   : > { %v4152_v13 = vmax.f32 %v4150_v35, %v4151_v16  ;;  %v4161_v63 = vmax.f32 %v4159_v42, %v4160_v51  ;;  %v4167_v55 = vrot.slane %v4166_v27, 2  ;;  %v4173_v3 = vmax.f32 %v4171_v41, %v4172_v9  ;;  %5455 = vst.msk [vmem:[#allocation5 + $0x78] sm:$0x3] %vm5440_vm11, %v8287_v0  ;;  %5457 = vst.msk [vmem:[#allocation5 + $0x88] sm:$0x3] %vm5440_vm11, %v8287_v0 }
 0x408   : > { %v10237_v54 = vmax.f32 %v10151_v19, %v4128_v46  ;;  %v4134_v12 = vrot.slane %v4133_v21, 1  ;;  %v4140_v52 = vmax.f32 %v4138_v38, %v4139_v14  ;;  %v4147_v5 = vmax.f32 %v4145_v15, %v4146_v58  ;;  %v6986_v38 = vld [vmem:[%s11347_s4 + $0x78] sm:$0xff]  ;;  %v4531_v15 = vpop.permute.xlu0 %4530  ;;  %5459 = vst.msk [vmem:[#allocation5 + $0x98] sm:$0x3] %vm5440_vm11, %v8287_v0 }
 0x409   : > { %v4153_v59 = vrot.slane %v4152_v13, 2  ;;  %v4162_v48 = vrot.slane %v4161_v63, 1  ;;  %v4168_v56 = vmax.f32 %v4166_v27, %v4167_v55  ;;  %v4174_v31 = vrot.slane %v4173_v3, 2  ;;  %v6990_v55 = vld [vmem:[%s11347_s4 + $0x98] sm:$0xff]  ;;  %4554 = vst.msk [vmem:[#allocation4 + $0x18] sm:$0x7f] %vm4552_vm8, %v4531_v15 }
 0x40a   : > { %v4445_v32 = vsel %vm4438_vm3, %v10237_v54, %v10183_v61  ;;  %v4141_v53 = vrot.slane %v4140_v52, 1  ;;  %v4594_v19 = vsel %vm4323_vm0, %v10166_v8, %v10210_v24  ;;  %v3263_v11 = vmax.f32 %v10154_v28, %v3239_v7  ;;  %4627 = vst.msk [vmem:[#allocation4 + $0x18] sm:$0x3f] %vm4625_vm9, %v10232_v18  ;;  %v4649_v15 = vld [vmem:[%s11347_s4 + $0x38] sm:$0xff] }
 0x40b   : > { %4459 = vrot.lane.b32.xlu1 %v4445_v32, %s8295_s22  ;;  %v4521_v45 = vsel %vm4388_vm2, %v10237_v54, %v10206_v2  ;;  %v4148_v20 = vrot.slane %v4147_v5, 1  ;;  %v4154_v47 = vmax.f32 %v4152_v13, %v4153_v59  ;;  %v4169_v50 = vrot.slane %v4168_v56, 1  ;;  %v4452_v22 = vpop.permute.xlu1 %4451 }
 0x40c   : > { %v4135_v25 = vmax.f32 %v4133_v21, %v4134_v12  ;;  %v4142_v33 = vmax.f32 %v4140_v52, %v4141_v53  ;;  %v4175_v43 = vmax.f32 %v4173_v3, %v4174_v31  ;;  %v4178_v61 = vsel %vm3019_vm12, %v3608_v29, -inf  ;;  %v6985_v29 = vld [vmem:[%s11347_s4 + $0x70] sm:$0xff]  ;;  %4474 = vst.msk [vmem:[#allocation4 + $0x20] sm:$0xff] %vm4471_vm7, %v4452_v22  ;;  %v4606_v52 = vpop.permute.xlu0 %4605  ;;  %v4646_v22 = vld [vmem:[%s11347_s4 + $0x20] sm:$0xff] }
 0x40d   : > { %v4149_v6 = vmax.f32 %v4147_v5, %v4148_v20  ;;  %v4155_v35 = vrot.slane %v4154_v47, 1  ;;  %v4163_v42 = vmax.f32 %v4161_v63, %v4162_v48  ;;  %v4179_v8 = vrot.slane %v4178_v61, 4  ;;  %v6989_v63 = vld [vmem:[%s11347_s4 + $0x90] sm:$0xff]  ;;  %v10339_v48 = vld [vmem:[#allocation4 + $0x8] sm:$0xff] }
 0x40e   : > { %v4176_v24 = vrot.slane %v4175_v43, 1  ;;  %v4248_v28 = vmax.f32 %v4135_v25, %v4142_v33  ;;  %v3615_v7 = vrot.slane %v3263_v11, %v9535_v4  ;;  %v4170_v41 = vmax.f32 %v4168_v56, %v4169_v50  ;;  %7683 = vmatprep.mubr.msk.f32.mxu1 %vm4256_vm4, %v10339_v48 }
 0x40f   : > { %4540 = vrot.lane.b32.xlu1 %v4521_v45, %s8296_s23  ;;  %v4156_v2 = vmax.f32 %v4154_v47, %v4155_v35  ;;  %v4180_v62 = vmax.f32 %v4178_v61, %v4179_v8  ;;  %v4249_v60 = vmax.f32 %v4142_v33, %v4149_v6  ;;  %v4595_v36 = vsel %vm4325_vm1, %v10237_v54, %v4594_v19  ;;  %v4533_v3 = vpop.permute.xlu1 %4532  ;;  %v4643_v19 = vld [vmem:[%s11347_s4 + $0x8] sm:$0xff]  ;;  %v4644_v33 = vld [vmem:[%s11347_s4 + $0x10] sm:$0xff]  ;;  %v10373_v35 = vld [vmem:[#allocation4 + $0x10] sm:$0xff] }
 0x410   : > { %v10287_v16 = vmax.f32 %v4175_v43, %v4176_v24  ;;  %v4185_v51 = vsel %vm3019_vm12, %v3615_v7, -inf  ;;  %v7831_v30 = vpack.c.bf16 %v6986_v38, %v6985_v29  ;;  %v4252_v1 = vmax.f32 %v4163_v42, %v4170_v41  ;;  %4555 = vst.msk [vmem:[#allocation4 + $0x20] sm:$0x7f] %vm4552_vm8, %v4533_v3  ;;  %v4645_v43 = vld [vmem:[%s11347_s4 + $0x18] sm:$0xff]  ;;  %v4648_v38 = vld [vmem:[%s11347_s4 + $0x30] sm:$0xff] }
 0x411   : > { %v4181_v27 = vrot.slane %v4180_v62, 2  ;;  %v4250_v9 = vmax.f32 %v4149_v6, %v4156_v2  ;;  %v4251_v46 = vmax.f32 %v4156_v2, %v4163_v42  ;;  %v4357_v21 = vsel %vm4317_vm14, %v4249_v60, %v4248_v28  ;;  %4628 = vst.msk [vmem:[#allocation4 + $0x20] sm:$0x3f] %vm4625_vm9, %v4606_v52  ;;  %v10377_v24 = vld [vmem:[#allocation4 + $0x18] sm:$0xff] }
 0x412   : > { %v4186_v14 = vrot.slane %v4185_v51, 4  ;;  %v4253_v23 = vmax.f32 %v4170_v41, %v10287_v16  ;;  %7832 = vmatprep.subr.bf16.mxu1 %v7831_v30  ;;  %v7835_v31 = vpack.c.bf16 %v6988_v26, %v6987_v57  ;;  %v7839_v39 = vpack.c.bf16 %v6990_v55, %v6989_v63  ;;  %v4647_v2 = vld [vmem:[%s11347_s4 + $0x28] sm:$0xff] }
 0x413   : > { %v4182_v49 = vmax.f32 %v4180_v62, %v4181_v27  ;;  %v4358_v40 = vsel %vm4319_vm13, %v4250_v9, %v4357_v21  ;;  %4613 = vrot.lane.b32.xlu1 %v4595_v36, %s8293_s20  ;;  %v4522_v37 = vsel %vm4317_vm14, %v4250_v9, %v4249_v60  ;;  %7834 = vmatpush3.bf16.msra.mxu1 %v7831_v30  ;;  %v7007_v36 = vld [vmem:[%s11347_s4 + $0xa0] sm:$0xff]  ;;  %vm5807_vm12 = vcmask 1043456  }
 0x414   : > { %v4359_v34 = vsel %vm4321_vm15, %v4251_v46, %v4358_v40  ;;  %v4187_v58 = vmax.f32 %v4185_v51, %v4186_v14  ;;  %v4523_v13 = vsel %vm4319_vm13, %v4251_v46, %v4522_v37  ;;  %v4596_v53 = vsel %vm4317_vm14, %v4251_v46, %v4250_v9  ;;  %7836 = vmatprep.subr.bf16.mxu1 %v7835_v31  ;;  %v4650_v9 = vld [vmem:[%s11347_s4 + $0x40] sm:$0xff]  ;;  %v4651_v46 = vld [vmem:[%s11347_s4 + $0x48] sm:$0xff] }
 0x415   : > { %v4183_v54 = vrot.slane %v4182_v49, 1  ;;  %v4360_v12 = vsel %vm4323_vm0, %v4252_v1, %v4359_v34  ;;  %v4524_v59 = vsel %vm4321_vm15, %v4252_v1, %v4523_v13  ;;  %v4597_v18 = vsel %vm4319_vm13, %v4252_v1, %v4596_v53  ;;  %v7008_v14 = vld [vmem:[%s11347_s4 + $0xa8] sm:$0xff] }
 0x416   : > { %v4361_v5 = vsel %vm4325_vm1, %v4253_v23, %v4360_v12  ;;  %v4188_v44 = vrot.slane %v4187_v58, 2  ;;  %v4525_v20 = vsel %vm4323_vm0, %v4253_v23, %v4524_v59  ;;  %v7843_v47 = vpack.c.bf16 %v4643_v19, %v4642_v17  ;;  %v7009_v59 = vld [vmem:[%s11347_s4 + $0xb0] sm:$0xff]  ;;  %v7012_v53 = vld [vmem:[%s11347_s4 + $0xc8] sm:$0xff] }
 0x417   : > { %v4184_v56 = vmax.f32 %v4182_v49, %v4183_v54  ;;  %4379 = vst.msk [vmem:[#allocation4 + $0x4a] sm:$0x3f] %vm4371_vm5, %v4361_v5  ;;  %7838 = vmatpush3.bf16.msra.mxu1 %v7835_v31  ;;  %v4598_v6 = vsel %vm4321_vm15, %v4253_v23, %v4597_v18  ;;  %v7847_v28 = vpack.c.bf16 %v4645_v43, %v4644_v33  ;;  %v7015_v18 = vld [vmem:[%s11347_s4 + $0xe0] sm:$0xff]  ;;  %v7026_v33 = vld [vmem:[%s11347_s4 + $0xf8] sm:$0xff]  ;;  %vm5847_vm5 = vcmask 257026  }
 0x418   : > { %v4189_v32 = vmax.f32 %v4187_v58, %v4188_v44  ;;  %7840 = vmatprep.subr.bf16.mxu1 %v7839_v39  ;;  %v10392_v62 = vld [vmem:[#allocation4 + $0x20] sm:$0xff]  ;;  %v7851_v29 = vpack.c.bf16 %v4647_v2, %v4646_v22  ;;  %v7855_v27 = vpack.c.bf16 %v4649_v15, %v4648_v38  ;;  %v7859_v21 = vpack.c.bf16 %v4651_v46, %v4650_v9  ;;  %v7032_v22 = vld [vmem:[%s11347_s4 + $0x128] sm:$0xff]  ;;  %v7043_v15 = vld [vmem:[%s11347_s4 + $0x140] sm:$0xff] }
 0x419   : > { %v4254_v11 = vmax.f32 %v10287_v16, %v4184_v56  ;;  %v7863_v49 = vpack.c.bf16 %v7008_v14, %v7007_v36  ;;  %v7046_v9 = vld [vmem:[%s11347_s4 + $0x158] sm:$0xff]  ;;  %v7049_v14 = vld [vmem:[%s11347_s4 + $0x170] sm:$0xff] }
 0x41a   : > { %v4190_v45 = vrot.slane %v4189_v32, 1  ;;  %v4608_v41 = vpop.permute.xlu0 %4607 }
 0x41b   : > { %v4396_v10 = vsel %vm4388_vm2, %v4254_v11, %v4361_v5  ;;  %v4526_v25 = vsel %vm4325_vm1, %v4254_v11, %v4525_v20  ;;  %7842 = vmatpush3.bf16.msra.mxu1 %v7839_v39  ;;  %v4599_v7 = vsel %vm4323_vm0, %v4254_v11, %v4598_v6  ;;  %v4634_v5 = vld [vmem:[#allocation4] sm:$0xff]  ;;  %v7028_v6 = vld [vmem:[%s11347_s4 + $0x108] sm:$0xff]  ;;  %vm5808_vm0 = vcmask 261124  }
 0x41c   : > { %4411 = vrot.lane.b32.xlu0 %v4396_v10, %s8294_s21  ;;  %v4191_v50 = vmax.f32 %v4189_v32, %v4190_v45  ;;  %7844 = vmatprep.subr.bf16.mxu1 %v7843_v47  ;;  %v7011_v32 = vld [vmem:[%s11347_s4 + $0xc0] sm:$0xff]  ;;  %v7013_v45 = vld [vmem:[%s11347_s4 + $0xd0] sm:$0xff] }
 0x41d   : > { %v7871_v11 = vpack.c.bf16 %v7012_v53, %v7011_v32  ;;  %v7074_v32 = vld [vmem:[%s11350_s7 + $0xf8] sm:$0xff]  ;;  %v7061_v53 = vld [vmem:[%s11348_s5] ss:$0 sm:$0xff] }
 0x41e   : > { %v4255_v61 = vmax.f32 %v4184_v56, %v4191_v50  ;;  %7684 = vmatmul.mubr.msk.f32.vlgmr.msra.gmra.mrb[0].mxu1 %vm4256_vm4, %v10373_v35  ;;  %v7010_v56 = vld [vmem:[%s11347_s4 + $0xb8] sm:$0xff] }
 0x41f   : > { %7686 = vmatprep.mubr.msk.f32.mxu1 %vm4256_vm4, %v10377_v24  ;;  %7846 = vmatpush3.bf16.msra.mxu1 %v7843_v47  ;;  %v7867_v39 = vpack.c.bf16 %v7010_v56, %v7009_v59  ;;  %v7016_v47 = vld [vmem:[%s11347_s4 + $0xe8] sm:$0xff]  ;;  %v7071_v59 = vld [vmem:[%s11350_s7 + $0xe0] sm:$0xff] }
 0x420   : > { %v4527_v42 = vsel %vm4388_vm2, %v4255_v61, %v4526_v25  ;;  %v4446_v8 = vsel %vm4438_vm3, %v4255_v61, %v4396_v10  ;;  %v4600_v60 = vsel %vm4325_vm1, %v4255_v61, %v4599_v7  ;;  %7848 = vmatprep.subr.bf16.mxu1 %v7847_v28  ;;  %v7879_v50 = vpack.c.bf16 %v7016_v47, %v7015_v18  ;;  %v7025_v25 = vld [vmem:[%s11347_s4 + $0xf0] sm:$0xff]  ;;  %v7027_v61 = vld [vmem:[%s11347_s4 + $0x100] sm:$0xff]  ;;  %v7072_v56 = vld [vmem:[%s11350_s7 + $0xe8] sm:$0xff] }
 0x421   : > { %4542 = vrot.lane.b32.xlu0 %v4527_v42, %s8296_s23  ;;  %4461 = vrot.lane.b32.xlu1 %v4446_v8, %s8295_s22  ;;  %v7883_v43 = vpack.c.bf16 %v7026_v33, %v7025_v25  ;;  %v7887_v42 = vpack.c.bf16 %v7028_v6, %v7027_v61  ;;  %v7029_v8 = vld [vmem:[%s11347_s4 + $0x110] sm:$0xff]  ;;  %v7031_v7 = vld [vmem:[%s11347_s4 + $0x120] sm:$0xff] }
 0x422   : > { %7687 = vmatmul.mubr.msk.f32.gmra.mrb[2].mxu1 %vm4256_vm4, %v10392_v62  ;;  %v7895_v2 = vpack.c.bf16 %v7032_v22, %v7031_v7 }
 0x423   : > { %7850 = vmatpush3.bf16.msra.mxu1 %v7847_v28 }
 0x424   : > { %7852 = vmatprep.subr.bf16.mxu1 %v7851_v29 }
 0x425   : > { %4615 = vrot.lane.b32.xlu1 %v4600_v60, %s8293_s20  ;;  %v7034_v60 = vld [vmem:[%s11347_s4 + $0x138] sm:$0xff] }
 0x427   : > { %v4404_v16 = vpop.permute.xlu1 %4403  ;;  %7854 = vmatpush3.bf16.msra.mxu1 %v7851_v29 }
 0x428   : > { %4425 = vst.msk [vmem:[#allocation4 + $0x29] sm:$0x7f] %vm4421_vm6, %v4404_v16  ;;  %v4454_v51 = vpop.permute.xlu0 %4453  ;;  %7856 = vmatprep.subr.bf16.mxu1 %v7855_v27  ;;  %v7044_v16 = vld [vmem:[%s11347_s4 + $0x148] sm:$0xff] }
 0x429   : > { %4475 = vst.msk [vmem:[#allocation4 + $0x28] sm:$0xff] %vm4471_vm7, %v4454_v51  ;;  %v7903_v51 = vpack.c.bf16 %v7044_v16, %v7043_v15 }
 0x42b   : > { %7858 = vmatpush3.bf16.msra.mxu1 %v7855_v27  ;;  %v7045_v27 = vld [vmem:[%s11347_s4 + $0x150] sm:$0xff] }
 0x42c   : > { %7860 = vmatprep.subr.bf16.mxu1 %v7859_v21  ;;  %v7907_v46 = vpack.c.bf16 %v7046_v9, %v7045_v27 }
 0x42f   : > { %v4535_v30 = vpop.permute.xlu0 %4534  ;;  %7862 = vmatpush3.bf16.msra.mxu1 %v7859_v21  ;;  %v7047_v21 = vld [vmem:[%s11347_s4 + $0x160] sm:$0xff] }
 0x430   : > { %4556 = vst.msk [vmem:[#allocation4 + $0x28] sm:$0x7f] %vm4552_vm8, %v4535_v30  ;;  %7864 = vmatprep.subr.bf16.mxu1 %v7863_v49  ;;  %v7050_v30 = vld [vmem:[%s11347_s4 + $0x178] sm:$0xff] }
 0x431   : > { %4629 = vst.msk [vmem:[#allocation4 + $0x28] sm:$0x3f] %vm4625_vm9, %v4608_v41  ;;  %v7033_v41 = vld [vmem:[%s11347_s4 + $0x130] sm:$0xff] }
 0x432   : > { %v7899_v29 = vpack.c.bf16 %v7034_v60, %v7033_v41 }
 0x437   : > { %v4406_v1 = vpop.permute.xlu1 %4405 }
 0x438   : > { %4426 = vst.msk [vmem:[#allocation4 + $0x31] sm:$0x7f] %vm4421_vm6, %v4406_v1  ;;  %v10421_v40 = vld [vmem:[#allocation4 + $0x28] sm:$0xff]  ;;  %v7051_v1 = vld [vmem:[%s11347_s4 + $0x180] sm:$0xff] }
 0x439   : > { %7689 = vmatprep.mubr.msk.f32.mxu1 %vm4256_vm4, %v10421_v40 }
 0x444   : > { %v4456_v37 = vpop.permute.xlu1 %4455  ;;  %v4610_v57 = vpop.permute.xlu0 %4609 }
 0x445   : > { %4476 = vst.msk [vmem:[#allocation4 + $0x30] sm:$0xff] %vm4471_vm7, %v4456_v37  ;;  %v7052_v37 = vld [vmem:[%s11347_s4 + $0x188] sm:$0xff] }
 0x448   : > { %v4537_v23 = vpop.permute.xlu1 %4536 }
 0x449   : > { %4557 = vst.msk [vmem:[#allocation4 + $0x30] sm:$0x7f] %vm4552_vm8, %v4537_v23  ;;  %v7919_v23 = vpack.c.bf16 %v7052_v37, %v7051_v1 }
 0x44a   : > { %4630 = vst.msk [vmem:[#allocation4 + $0x30] sm:$0x3f] %vm4625_vm9, %v4610_v57  ;;  %v5094_v57 = vld [vmem:[#allocation4 + $0x50] sm:$0xff] }
 0x451   : > { %v10428_v34 = vld [vmem:[#allocation4 + $0x30] sm:$0xff] }
 0x452   : > { %7690 = vmatmul.mubr.msk.f32.gmra.mrb[4].mxu1 %vm4256_vm4, %v10428_v34 }
 0x455   : > { %v4408_v58 = vpop.permute.xlu1 %4407 }
 0x456   : > { %4427 = vst.msk [vmem:[#allocation4 + $0x39] sm:$0x7f] %vm4421_vm6, %v4408_v58  ;;  %v5251_v58 = vld [vmem:[#allocation4 + $0x58] sm:$0xff] }
 0x45a   : > { %v4458_v13 = vpop.permute.xlu0 %4457 }
 0x45b   : > { %4477 = vst.msk [vmem:[#allocation4 + $0x38] sm:$0xff] %vm4471_vm7, %v4458_v13  ;;  %v8297_v13 = vmov 0.0|0.0  }
 0x45e   : > { %v4539_v26 = vpop.permute.xlu0 %4538 }
 0x45f   : > { %4558 = vst.msk [vmem:[#allocation4 + $0x38] sm:$0x7f] %vm4552_vm8, %v4539_v26 }
 0x466   : > { %v4612_v63 = vpop.permute.xlu0 %4611 }
 0x467   : > { %4631 = vst.msk [vmem:[#allocation4 + $0x38] sm:$0x3f] %vm4625_vm9, %v4612_v63  ;;  %v7066_v63 = vld [vmem:[%s11350_s7 + $0xb8] sm:$0xff] }
 0x46d   : > { %v4410_v55 = vpop.permute.xlu1 %4409 }
 0x46e   : > { %4428 = vst.msk [vmem:[#allocation4 + $0x41] sm:$0x7f] %vm4421_vm6, %v4410_v55  ;;  %v10437_v3 = vld [vmem:[#allocation4 + $0x38] sm:$0xff] }
 0x46f   : > { %7692 = vmatprep.mubr.msk.f32.mxu1 %vm4256_vm4, %v10437_v3 }
 0x47d   : > { %v4460_v54 = vpop.permute.xlu1 %4459 }
 0x47e   : > { %4478 = vst.msk [vmem:[#allocation4 + $0x40] sm:$0xff] %vm4471_vm7, %v4460_v54  ;;  %v7068_v54 = vld [vmem:[%s11350_s7 + $0xc8] sm:$0xff] }
 0x481   : > { %v4541_v12 = vpop.permute.xlu1 %4540 }
 0x482   : > { %4559 = vst.msk [vmem:[#allocation4 + $0x40] sm:$0x7f] %vm4552_vm8, %v4541_v12 }
 0x485   : > { %v4614_v52 = vpop.permute.xlu1 %4613 }
 0x486   : > { %4632 = vst.msk [vmem:[#allocation4 + $0x40] sm:$0x3f] %vm4625_vm9, %v4614_v52  ;;  %v7069_v52 = vld [vmem:[%s11350_s7 + $0xd0] sm:$0xff] }
 0x48d   : > { %v10444_v44 = vld [vmem:[#allocation4 + $0x40] sm:$0xff] }
 0x48e   : > { %v4412_v31 = vpop.permute.xlu0 %4411  ;;  %7693 = vmatmul.mubr.msk.f32.gmra.mrb[6].mxu1 %vm4256_vm4, %v10444_v44 }
 0x48f   : > { %4429 = vst.msk [vmem:[#allocation4 + $0x49] sm:$0x7f] %vm4421_vm6, %v4412_v31  ;;  %7715 = vmatprep.mubr.msk.f32.mxu1 %vm4256_vm4, %v4634_v5  ;;  %v7070_v5 = vld [vmem:[%s11350_s7 + $0xd8] sm:$0xff]  ;;  %v7936_v31 = vpack.c.bf16 %v7072_v56, %v7071_v59  ;;  %vm5896_vm6 = vcmask 519425  }
 0x492   : > { %7716 = vmatmul.mubr.msk.f32.vlgmr.msra.gmra.mrb[0].mxu1 %vm4256_vm4, %v10339_v48  ;;  %v7014_v48 = vld [vmem:[%s11347_s4 + $0xd8] sm:$0xff] }
 0x493   : > { %v4462_v17 = vpop.permute.xlu1 %4461  ;;  %7866 = vmatpush3.bf16.msra.mxu1 %v7863_v49  ;;  %7718 = vmatprep.mubr.msk.f32.mxu1 %vm4256_vm4, %v10373_v35  ;;  %v4543_v19 = vpop.permute.xlu0 %4542  ;;  %v7875_v10 = vpack.c.bf16 %v7014_v48, %v7013_v45  ;;  %v7915_v49 = vpack.c.bf16 %v7050_v30, %v7049_v14  ;;  %v5470_v30 = vld [vmem:[#allocation5 + $0x8] sm:$0x3] }
 0x494   : > { %4479 = vst.msk [vmem:[#allocation4 + $0x48] sm:$0xff] %vm4471_vm7, %v4462_v17  ;;  %7868 = vmatprep.subr.bf16.mxu1 %v7867_v39  ;;  %vm5953_vm7 = vcmask 781824  }
 0x495   : > { %4560 = vst.msk [vmem:[#allocation4 + $0x48] sm:$0x7f] %vm4552_vm8, %v4543_v19  ;;  %v7062_v19 = vld [vmem:[%s11349_s6] ss:$0 sm:$0xff]  ;;  %vm5994_vm8 = vcmask 1043200  }
 0x496   : > { %7719 = vmatmul.mubr.msk.f32.gmra.mrb[2].mxu1 %vm4256_vm4, %v10377_v24 }
 0x497   : > { %v4616_v20 = vpop.permute.xlu1 %4615  ;;  %7870 = vmatpush3.bf16.msra.mxu1 %v7867_v39  ;;  %7721 = vmatprep.mubr.msk.f32.mxu1 %vm4256_vm4, %v10392_v62  ;;  %v7073_v39 = vld [vmem:[%s11350_s7 + $0xf0] sm:$0xff] }
 0x498   : > { %4633 = vst.msk [vmem:[#allocation4 + $0x48] sm:$0x3f] %vm4625_vm9, %v4616_v20  ;;  %7872 = vmatprep.subr.bf16.mxu1 %v7871_v11  ;;  %v7075_v20 = vld [vmem:[%s11350_s7 + $0x100] sm:$0xff] }
 0x49a   : > { %7722 = vmatmul.mubr.msk.f32.gmra.mrb[4].mxu1 %vm4256_vm4, %v10421_v40 }
 0x49b   : > { %7874 = vmatpush3.bf16.msra.mxu1 %v7871_v11  ;;  %7724 = vmatprep.mubr.msk.f32.mxu1 %vm4256_vm4, %v10428_v34  ;;  %v7939_v11 = vpack.c.bf16 %v7074_v32, %v7073_v39 }
 0x49c   : > { %7876 = vmatprep.subr.bf16.mxu1 %v7875_v10 }
 0x49e   : > { %7725 = vmatmul.mubr.msk.f32.gmra.mrb[6].mxu1 %vm4256_vm4, %v10437_v3 }
 0x49f   : > { %7878 = vmatpush3.bf16.msra.mxu1 %v7875_v10  ;;  %7747 = vmatprep.mubr.msk.f32.mxu1 %vm4256_vm4, %v10373_v35  ;;  %v7030_v35 = vld [vmem:[%s11347_s4 + $0x118] sm:$0xff]  ;;  %v7076_v10 = vld [vmem:[%s11350_s7 + $0x108] sm:$0xff] }
 0x4a0   : > { %7880 = vmatprep.subr.bf16.mxu1 %v7879_v50  ;;  %v7891_v28 = vpack.c.bf16 %v7030_v35, %v7029_v8  ;;  %v4937_v38 = vld [vmem:[#allocation4 + $0x48] sm:$0xff]  ;;  %v7942_v33 = vpack.c.bf16 %v7076_v10, %v7075_v20 }
 0x4a3   : > { %7882 = vmatpush3.bf16.msra.mxu1 %v7879_v50 }
 0x4a4   : > { %7884 = vmatprep.subr.bf16.mxu1 %v7883_v43 }
 0x4a6   : > { %7748 = vmatmul.mubr.msk.f32.vlgmr.msra.gmra.mrb[0].mxu1 %vm4256_vm4, %v10377_v24 }
 0x4a7   : > { %7750 = vmatprep.mubr.msk.f32.mxu1 %vm4256_vm4, %v10392_v62  ;;  %7886 = vmatpush3.bf16.msra.mxu1 %v7883_v43 }
 0x4a8   : > { %7888 = vmatprep.subr.bf16.mxu1 %v7887_v42 }
 0x4aa   : > { %7751 = vmatmul.mubr.msk.f32.gmra.mrb[2].mxu1 %vm4256_vm4, %v10421_v40 }
 0x4ab   : > { %7753 = vmatprep.mubr.msk.f32.mxu1 %vm4256_vm4, %v10428_v34  ;;  %7890 = vmatpush3.bf16.msra.mxu1 %v7887_v42 }
 0x4ac   : > { %7892 = vmatprep.subr.bf16.mxu1 %v7891_v28 }
 0x4ae   : > { %7754 = vmatmul.mubr.msk.f32.gmra.mrb[4].mxu1 %vm4256_vm4, %v10437_v3 }
 0x4af   : > { %7756 = vmatprep.mubr.msk.f32.mxu1 %vm4256_vm4, %v10444_v44  ;;  %7894 = vmatpush3.bf16.msra.mxu1 %v7891_v28 }
 0x4b0   : > { %7896 = vmatprep.subr.bf16.mxu1 %v7895_v2 }
 0x4b2   : > { %7757 = vmatmul.mubr.msk.f32.gmra.mrb[6].mxu1 %vm4256_vm4, %v4937_v38 }
 0x4b3   : > { %7898 = vmatpush3.bf16.msra.mxu1 %v7895_v2  ;;  %7779 = vmatprep.mubr.msk.f32.mxu1 %vm4256_vm4, %v10377_v24  ;;  %v7048_v24 = vld [vmem:[%s11347_s4 + $0x168] sm:$0xff] }
 0x4b4   : > { %7900 = vmatprep.subr.bf16.mxu1 %v7899_v29  ;;  %v7911_v36 = vpack.c.bf16 %v7048_v24, %v7047_v21  ;;  %v5469_v24 = vld [vmem:[#allocation5] sm:$0xff] }
 0x4b7   : > { %7902 = vmatpush3.bf16.msra.mxu1 %v7899_v29 }
 0x4b8   : > { %7904 = vmatprep.subr.bf16.mxu1 %v7903_v51 }
 0x4ba   : > { %7780 = vmatmul.mubr.msk.f32.vlgmr.msra.gmra.mrb[0].mxu1 %vm4256_vm4, %v10392_v62 }
 0x4bb   : > { %7782 = vmatprep.mubr.msk.f32.mxu1 %vm4256_vm4, %v10421_v40  ;;  %7906 = vmatpush3.bf16.msra.mxu1 %v7903_v51 }
 0x4bc   : > { %7908 = vmatprep.subr.bf16.mxu1 %v7907_v46 }
 0x4be   : > { %7783 = vmatmul.mubr.msk.f32.gmra.mrb[2].mxu1 %vm4256_vm4, %v10428_v34 }
 0x4bf   : > { %7785 = vmatprep.mubr.msk.f32.mxu1 %vm4256_vm4, %v10437_v3  ;;  %7910 = vmatpush3.bf16.msra.mxu1 %v7907_v46 }
 0x4c0   : > { %7912 = vmatprep.subr.bf16.mxu1 %v7911_v36 }
 0x4c2   : > { %7786 = vmatmul.mubr.msk.f32.gmra.mrb[4].mxu1 %vm4256_vm4, %v10444_v44 }
 0x4c3   : > { %7788 = vmatprep.mubr.msk.f32.mxu1 %vm4256_vm4, %v4937_v38  ;;  %7914 = vmatpush3.bf16.msra.mxu1 %v7911_v36 }
 0x4c4   : > { %7916 = vmatprep.subr.bf16.mxu1 %v7915_v49 }
 0x4c6   : > { %7789 = vmatmul.mubr.msk.f32.gmra.mrb[6].mxu1 %vm4256_vm4, %v5094_v57 }
 0x4c7   : > { %7918 = vmatpush3.bf16.msra.mxu1 %v7915_v49  ;;  %7811 = vmatprep.mubr.msk.f32.mxu1 %vm4256_vm4, %v10392_v62  ;;  %v7063_v62 = vld [vmem:[%s11350_s7 + $0xa0] sm:$0xff] }
 0x4c8   : > { %7920 = vmatprep.subr.bf16.mxu1 %v7919_v23 }
 0x4cb   : > { %7922 = vmatpush3.bf16.msra.mxu1 %v7919_v23  ;;  %v5489_v23 = vsel %vm5438_vm10, %v5469_v24, -inf }
 0x4cc   : > { %7923 = vmatprep.subr.bf16.mxu1 %v8297_v13 }
 0x4ce   : > { %7812 = vmatmul.mubr.msk.f32.vlgmr.msra.gmra.mrb[0].mxu1 %vm4256_vm4, %v10421_v40  ;;  %v7064_v40 = vld [vmem:[%s11350_s7 + $0xa8] sm:$0xff] }
 0x4cf   : > { %7814 = vmatprep.mubr.msk.f32.mxu1 %vm4256_vm4, %v10428_v34  ;;  %v7065_v34 = vld [vmem:[%s11350_s7 + $0xb0] sm:$0xff]  ;;  %v7924_v26 = vpack.c.bf16 %v7064_v40, %v7063_v62 }
 0x4d0   : > { %v7927_v55 = vpack.c.bf16 %v7066_v63, %v7065_v34  ;;  %v5492_v34 = vsel %vm5440_vm11, %v5470_v30, -inf }
 0x4d1   : > { %7925 = vmatpush1.bf16.msra.mxu1 %v7924_v26 }
 0x4d2   : > { %7815 = vmatmul.mubr.msk.f32.gmra.mrb[2].mxu1 %vm4256_vm4, %v10437_v3  ;;  %7926 = vmatprep.subr.bf16.mxu1 %v8297_v13  ;;  %v7067_v3 = vld [vmem:[%s11350_s7 + $0xc0] sm:$0xff] }
 0x4d3   : > { %7817 = vmatprep.mubr.msk.f32.mxu1 %vm4256_vm4, %v10444_v44  ;;  %v7930_v12 = vpack.c.bf16 %v7068_v54, %v7067_v3  ;;  %v7933_v44 = vpack.c.bf16 %v7070_v5, %v7069_v52 }
 0x4d5   : > { %7928 = vmatpush1.bf16.msra.mxu1 %v7927_v55 }
 0x4d6   : > { %7818 = vmatmul.mubr.msk.f32.gmra.mrb[4].mxu1 %vm4256_vm4, %v4937_v38  ;;  %7929 = vmatprep.subr.bf16.mxu1 %v8297_v13 }
 0x4d7   : > { %7820 = vmatprep.mubr.msk.f32.mxu1 %vm4256_vm4, %v5094_v57 }
 0x4d9   : > { %7931 = vmatpush1.bf16.msra.mxu1 %v7930_v12 }
 0x4da   : > { %7821 = vmatmul.mubr.msk.f32.gmra.mrb[6].mxu1 %vm4256_vm4, %v5251_v58  ;;  %vm5809_vm4 = vmor %vm5808_vm0, %vm5807_vm12  ;;  %7932 = vmatprep.subr.bf16.mxu1 %v8297_v13 }
 0x4db   : > { %5812 = vst.msk [vmem:[#allocation6 + $0x10] sm:$0xff] %vm5809_vm4, %v8287_v0  ;;  %5810 = vst.msk [vmem:[#allocation6] sm:$0xff] %vm5809_vm4, %v8287_v0 }
 0x4dc   : > { %5811 = vst.msk [vmem:[#allocation6 + $0x8] sm:$0xff] %vm5809_vm4, %v8287_v0  ;;  %5813 = vst.msk [vmem:[#allocation6 + $0x18] sm:$0xff] %vm5809_vm4, %v8287_v0 }
 0x4dd   : > { %5814 = vst.msk [vmem:[#allocation6 + $0x20] sm:$0xff] %vm5809_vm4, %v8287_v0  ;;  %5815 = vst.msk [vmem:[#allocation6 + $0x28] sm:$0xff] %vm5809_vm4, %v8287_v0  ;;  %7934 = vmatpush1.bf16.msra.mxu1 %v7933_v44 }
 0x4de   : > { %5816 = vst.msk [vmem:[#allocation6 + $0x30] sm:$0xff] %vm5809_vm4, %v8287_v0  ;;  %5817 = vst.msk [vmem:[#allocation6 + $0x38] sm:$0xff] %vm5809_vm4, %v8287_v0  ;;  %7935 = vmatprep.subr.bf16.mxu1 %v8297_v13 }
 0x4e1   : > { %7937 = vmatpush1.bf16.msra.mxu1 %v7936_v31 }
 0x4e2   : > { %7938 = vmatprep.subr.bf16.mxu1 %v8297_v13 }
 0x4e5   : > { %7940 = vmatpush1.bf16.msra.mxu1 %v7939_v11 }
 0x4e6   : > { %7941 = vmatprep.subr.bf16.mxu1 %v8297_v13 }
 0x4e9   : > { %7943 = vmatpush1.bf16.msra.mxu1 %v7942_v33 }
 0x4ea   : > { %7944 = vmatprep.subr.bf16.mxu1 %v8297_v13 }
 0x5a1   : > { %v7813_v17 = vpop.f32.mrb[0].mxu1 }
 0x5a2   : > { %v5408_v45 = vmul.f32 %v7813_v17, %v7061_v53  ;;  %v5353_v48 = vpop.f32.mrb[1].mxu1 }
 0x5a3   : > { %v5407_v18 = vmul.f32 %v7061_v53, %v5353_v48 }
 0x5a4   : > { %v5423_v47 = vadd.f32 %v7062_v19, %v5408_v45 }
 0x5a5   : > { %v5422_v50 = vadd.f32 %v7062_v19, %v5407_v18  ;;  %v7816_v25 = vpop.f32.mrb[2].mxu1 }
 0x5a6   : > { %v5431_v43 = vmax.f32 %v5423_v47, 0.0  ;;  %v5410_v61 = vmul.f32 %v7816_v25, %v7061_v53  ;;  %v5363_v6 = vpop.f32.mrb[3].mxu1 }
 0x5a7   : > { %v5430_v42 = vmax.f32 %v5422_v50, 0.0  ;;  %v5409_v8 = vmul.f32 %v7061_v53, %v5363_v6 }
 0x5a8   : > { %5462 = vst.msk [vmem:[#allocation5 + $0x21] sm:$0xff] %vm5438_vm10, %v5431_v43  ;;  %v5425_v35 = vadd.f32 %v7062_v19, %v5410_v61 }
 0x5a9   : > { %5461 = vst.msk [vmem:[#allocation5 + $0x11] sm:$0xff] %vm5438_vm10, %v5430_v42  ;;  %v5424_v28 = vadd.f32 %v7062_v19, %v5409_v8  ;;  %v7819_v7 = vpop.f32.mrb[4].mxu1 }
 0x5aa   : > { %v5433_v22 = vmax.f32 %v5425_v35, 0.0  ;;  %v5412_v2 = vmul.f32 %v7819_v7, %v7061_v53  ;;  %v5373_v41 = vpop.f32.mrb[5].mxu1 }
 0x5ab   : > { %v5432_v60 = vmax.f32 %v5424_v28, 0.0  ;;  %v5411_v29 = vmul.f32 %v7061_v53, %v5373_v41 }
 0x5ac   : > { %5464 = vst.msk [vmem:[#allocation5 + $0x41] sm:$0xff] %vm5438_vm10, %v5433_v22  ;;  %v5427_v38 = vadd.f32 %v7062_v19, %v5412_v2 }
 0x5ad   : > { %5463 = vst.msk [vmem:[#allocation5 + $0x31] sm:$0xff] %vm5438_vm10, %v5432_v60  ;;  %v5426_v15 = vadd.f32 %v7062_v19, %v5411_v29  ;;  %v7822_v16 = vpop.f32.mrb[6].mxu1 }
 0x5ae   : > { %v5435_v51 = vmax.f32 %v5427_v38, 0.0  ;;  %v5414_v27 = vmul.f32 %v7822_v16, %v7061_v53  ;;  %v5383_v9 = vpop.f32.mrb[7].mxu1 }
 0x5af   : > { %v5434_v46 = vmax.f32 %v5426_v15, 0.0  ;;  %v5413_v21 = vmul.f32 %v7061_v53, %v5383_v9  ;;  %v5473_v57 = vld [vmem:[#allocation5 + $0x20] sm:$0xff]  ;;  %v5474_v58 = vld [vmem:[#allocation5 + $0x28] sm:$0x3]  ;;  %v5487_v53 = vld [vmem:[#allocation5 + $0x90] sm:$0xff] }
 0x5b0   : > { %5466 = vst.msk [vmem:[#allocation5 + $0x61] sm:$0xff] %vm5438_vm10, %v5435_v51  ;;  %v5429_v36 = vadd.f32 %v7062_v19, %v5414_v27  ;;  %v5471_v14 = vld [vmem:[#allocation5 + $0x10] sm:$0xff]  ;;  %v5472_v49 = vld [vmem:[#allocation5 + $0x18] sm:$0x3]  ;;  %v5495_v3 = vsel %vm5438_vm10, %v5473_v57, -inf  ;;  %v5498_v12 = vsel %vm5440_vm11, %v5474_v58, -inf }
 0x5b1   : > { %5465 = vst.msk [vmem:[#allocation5 + $0x51] sm:$0xff] %vm5438_vm10, %v5434_v46  ;;  %v5428_v1 = vadd.f32 %v7062_v19, %v5413_v21  ;;  %v5490_v40 = vsel %vm5438_vm10, %v5471_v14, -inf  ;;  %v5493_v26 = vsel %vm5440_vm11, %v5472_v49, -inf  ;;  %v10729_v8 = vsel %vm5438_vm10, %v5487_v53, -inf }
 0x5b2   : > { %v5437_v37 = vmax.f32 %v5429_v36, 0.0  ;;  %v5491_v5 = vmax.f32 %v5489_v23, %v5490_v40  ;;  %v5494_v59 = vmax.f32 %v5492_v34, %v5493_v26 }
 0x5b3   : > { %v5436_v62 = vmax.f32 %v5428_v1, 0.0  ;;  %v5477_v31 = vld [vmem:[#allocation5 + $0x40] sm:$0xff]  ;;  %v5478_v39 = vld [vmem:[#allocation5 + $0x48] sm:$0x3] }
 0x5b4   : > { %5468 = vst.msk [vmem:[#allocation5 + $0x81] sm:$0xff] %vm5438_vm10, %v5437_v37  ;;  %v5475_v63 = vld [vmem:[#allocation5 + $0x30] sm:$0xff]  ;;  %v5476_v55 = vld [vmem:[#allocation5 + $0x38] sm:$0x3]  ;;  %v5501_v20 = vsel %vm5438_vm10, %v5477_v31, -inf  ;;  %v5504_v18 = vsel %vm5440_vm11, %v5478_v39, -inf }
 0x5b5   : > { %5467 = vst.msk [vmem:[#allocation5 + $0x71] sm:$0xff] %vm5438_vm10, %v5436_v62  ;;  %v5496_v54 = vsel %vm5438_vm10, %v5475_v63, -inf  ;;  %v5499_v52 = vsel %vm5440_vm11, %v5476_v55, -inf }
 0x5b6   : > { %v5497_v44 = vmax.f32 %v5495_v3, %v5496_v54  ;;  %v10713_v56 = vmax.f32 %v5498_v12, %v5499_v52 }
 0x5b7   : > { %v5481_v32 = vld [vmem:[#allocation5 + $0x60] sm:$0xff]  ;;  %v5482_v48 = vld [vmem:[#allocation5 + $0x68] sm:$0x3] }
 0x5b8   : > { %v5519_v17 = vmax.f32 %v5491_v5, %v5497_v44  ;;  %v5520_v19 = vmax.f32 %v5494_v59, %v10713_v56  ;;  %v5479_v11 = vld [vmem:[#allocation5 + $0x50] sm:$0xff]  ;;  %v5480_v45 = vld [vmem:[#allocation5 + $0x58] sm:$0x3]  ;;  %v5507_v61 = vsel %vm5438_vm10, %v5481_v32, -inf  ;;  %v10726_v42 = vsel %vm5440_vm11, %v5482_v48, -inf }
 0x5b9   : > { %v5502_v10 = vsel %vm5438_vm10, %v5479_v11, -inf  ;;  %v5505_v47 = vsel %vm5440_vm11, %v5480_v45, -inf }
 0x5ba   : > { %v5535_v50 = vcombine.high %v5519_v17, %v5519_v17  ;;  %v5542_v25 = vrot.slane %v5519_v17, %v9535_v4  ;;  %v5558_v33 = vrot.slane %v5520_v19, %v9535_v4  ;;  %v5503_v43 = vmax.f32 %v5501_v20, %v5502_v10 }
 0x5bb   : > { %v10723_v6 = vmax.f32 %v5504_v18, %v5505_v47 }
 0x5bc   : > { %v5549_v35 = vrot.slane %v5535_v50, %v9535_v4  ;;  %v5550_v28 = vcombine.high %v5542_v25, %v5542_v25  ;;  %v5651_v7 = vsel %vm5440_vm11, %v5542_v25, -inf  ;;  %v5679_v22 = vsel %vm5440_vm11, %v5558_v33, -inf  ;;  %v5483_v2 = vld [vmem:[#allocation5 + $0x70] sm:$0xff] }
 0x5bd   : > { %v5652_v41 = vrot.slane %v5651_v7, 4  ;;  %v5680_v60 = vrot.slane %v5679_v22, 4  ;;  %v5521_v29 = vmax.f32 %v5497_v44, %v5503_v43  ;;  %v5508_v38 = vsel %vm5438_vm10, %v5483_v2, -inf }
 0x5be   : > { %v5551_v15 = vcombine.high %v5549_v35, %v5549_v35  ;;  %v5658_v16 = vsel %vm5440_vm11, %v5550_v28, -inf  ;;  %v5665_v51 = vsel %vm5440_vm11, %v5549_v35, -inf  ;;  %v10737_v27 = vmax.f32 %v5507_v61, %v5508_v38 }
 0x5bf   : > { %v5653_v9 = vmax.f32 %v5651_v7, %v5652_v41  ;;  %v5659_v46 = vrot.slane %v5658_v16, 4  ;;  %v5666_v21 = vrot.slane %v5665_v51, 4  ;;  %v5681_v24 = vmax.f32 %v5679_v22, %v5680_v60 }
 0x5c0   : > { %v5672_v36 = vsel %vm5440_vm11, %v5551_v15, -inf  ;;  %v5559_v14 = vcombine.high %v5521_v29, %v5521_v29  ;;  %v5566_v30 = vrot.slane %v5521_v29, %v9535_v4  ;;  %v10742_v49 = vmax.f32 %v5503_v43, %v10737_v27 }
 0x5c1   : > { %v5654_v1 = vrot.slane %v5653_v9, 2  ;;  %v5660_v37 = vmax.f32 %v5658_v16, %v5659_v46  ;;  %v5667_v57 = vmax.f32 %v5665_v51, %v5666_v21  ;;  %v5673_v23 = vrot.slane %v5672_v36, 4 }
 0x5c2   : > { %v5682_v58 = vrot.slane %v5681_v24, 2  ;;  %v5573_v62 = vrot.slane %v5559_v14, %v9535_v4  ;;  %v5574_v40 = vcombine.high %v5566_v30, %v5566_v30  ;;  %v5686_v34 = vsel %vm5440_vm11, %v5566_v30, -inf }
 0x5c3   : > { %v5655_v26 = vmax.f32 %v5653_v9, %v5654_v1  ;;  %v5661_v63 = vrot.slane %v5660_v37, 2  ;;  %v5668_v55 = vrot.slane %v5667_v57, 2  ;;  %v5674_v3 = vmax.f32 %v5672_v36, %v5673_v23 }
 0x5c4   : > { %v5683_v54 = vmax.f32 %v5681_v24, %v5682_v58  ;;  %v5575_v12 = vcombine.high %v5573_v62, %v5573_v62  ;;  %v5687_v52 = vrot.slane %v5686_v34, 4  ;;  %v5693_v5 = vsel %vm5440_vm11, %v5574_v40, -inf }
 0x5c5   : > { %v5656_v44 = vrot.slane %v5655_v26, 1  ;;  %v5662_v59 = vmax.f32 %v5660_v37, %v5661_v63  ;;  %v5669_v31 = vmax.f32 %v5667_v57, %v5668_v55  ;;  %v5675_v39 = vrot.slane %v5674_v3, 2 }
 0x5c6   : > { %v5684_v32 = vrot.slane %v5683_v54, 1  ;;  %v5688_v53 = vmax.f32 %v5686_v34, %v5687_v52  ;;  %v5694_v17 = vrot.slane %v5693_v5, 4  ;;  %v5700_v19 = vsel %vm5440_vm11, %v5573_v62, -inf }
 0x5c7   : > { %v5657_v11 = vmax.f32 %v5655_v26, %v5656_v44  ;;  %v5663_v45 = vrot.slane %v5662_v59, 1  ;;  %v5670_v48 = vrot.slane %v5669_v31, 1  ;;  %v5676_v20 = vmax.f32 %v5674_v3, %v5675_v39 }
 0x5c8   : > { %v5685_v10 = vmax.f32 %v5683_v54, %v5684_v32  ;;  %v5689_v18 = vrot.slane %v5688_v53, 2  ;;  %v5695_v47 = vmax.f32 %v5693_v5, %v5694_v17  ;;  %v5701_v50 = vrot.slane %v5700_v19, 4 }
 0x5c9   : > { %v5664_v25 = vmax.f32 %v5662_v59, %v5663_v45  ;;  %v5671_v33 = vmax.f32 %v5669_v31, %v5670_v48  ;;  %v5677_v43 = vrot.slane %v5676_v20, 1  ;;  %v5707_v61 = vsel %vm5440_vm11, %v5575_v12, -inf  ;;  %v5484_v45 = vld [vmem:[#allocation5 + $0x78] sm:$0x3] }
 0x5ca   : > { %v5690_v35 = vmax.f32 %v5688_v53, %v5689_v18  ;;  %v5696_v28 = vrot.slane %v5695_v47, 2  ;;  %v5702_v7 = vmax.f32 %v5700_v19, %v5701_v50  ;;  %v5708_v22 = vrot.slane %v5707_v61, 4 }
 0x5cb   : > { %v5678_v2 = vmax.f32 %v5676_v20, %v5677_v43  ;;  %v10749_v41 = vmax.f32 %v5657_v11, %v5664_v25  ;;  %v10751_v60 = vmax.f32 %v5664_v25, %v5671_v33  ;;  %v5583_v29 = vcombine.high %v10742_v49, %v10742_v49 }
 0x5cc   : > { %v5691_v38 = vrot.slane %v5690_v35, 1  ;;  %v5697_v15 = vmax.f32 %v5695_v47, %v5696_v28  ;;  %v5703_v16 = vrot.slane %v5702_v7, 2  ;;  %v5709_v51 = vmax.f32 %v5707_v61, %v5708_v22 }
 0x5cd   : > { %v5793_v9 = vmax.f32 %v5671_v33, %v5678_v2  ;;  %v5856_v46 = vrot.slane %v10749_v41, 7  ;;  %v5857_v21 = vrot.slane %v10751_v60, 6  ;;  %v5794_v24 = vmax.f32 %v5678_v2, %v5685_v10 }
 0x5ce   : > { %v5905_v36 = vrot.slane %v10751_v60, 7  ;;  %v5692_v14 = vmax.f32 %v5690_v35, %v5691_v38  ;;  %v5698_v30 = vrot.slane %v5697_v15, 1  ;;  %v5704_v1 = vmax.f32 %v5702_v7, %v5703_v16 }
 0x5cf   : > { %v5858_v37 = vsel %vm4319_vm13, %v5857_v21, %v5856_v46  ;;  %v5860_v57 = vrot.slane %v5793_v9, 5  ;;  %v5908_v23 = vrot.slane %v5793_v9, 6  ;;  %v5911_v58 = vrot.slane %v5794_v24, 5 }
 0x5d0   : > { %v5859_v62 = vsel %vm4388_vm2, %v5857_v21, %v5858_v37  ;;  %v5906_v40 = vsel %vm4317_vm14, %v5905_v36, %v10749_v41  ;;  %v5999_v34 = vrot.slane %v5794_v24, 7  ;;  %v5958_v26 = vrot.slane %v5793_v9, 7 }
 0x5d1   : > { %v5861_v63 = vsel %vm4321_vm15, %v5860_v57, %v5859_v62  ;;  %v5907_v55 = vsel %vm4325_vm1, %v5905_v36, %v5906_v40  ;;  %v5961_v3 = vrot.slane %v5794_v24, 6  ;;  %v5699_v54 = vmax.f32 %v5697_v15, %v5698_v30 }
 0x5d2   : > { %v5862_v12 = vsel %vm4438_vm3, %v5860_v57, %v5861_v63  ;;  %v5909_v52 = vsel %vm4319_vm13, %v5908_v23, %v5907_v55  ;;  %v6000_v5 = vsel %vm4317_vm14, %v5999_v34, %v5793_v9  ;;  %v5959_v44 = vsel %vm4317_vm14, %v5958_v26, %v10751_v60 }
 0x5d3   : > { %5884 = vrot.lane.b32.xlu0 %v5862_v12, %s8295_s22  ;;  %v5910_v59 = vsel %vm4388_vm2, %v5908_v23, %v5909_v52  ;;  %v6001_v31 = vsel %vm4325_vm1, %v5999_v34, %v6000_v5  ;;  %v5960_v39 = vsel %vm4325_vm1, %v5958_v26, %v5959_v44  ;;  %v5705_v32 = vrot.slane %v5704_v1, 1  ;;  %v5488_v5 = vld [vmem:[#allocation5 + $0x98] sm:$0x3] }
 0x5d4   : > { %v5912_v53 = vsel %vm4321_vm15, %v5911_v58, %v5910_v59  ;;  %v5962_v17 = vsel %vm4319_vm13, %v5961_v3, %v5960_v39  ;;  %v5710_v19 = vrot.slane %v5709_v51, 2  ;;  %v10775_v11 = vmax.f32 %v5692_v14, %v5699_v54  ;;  %6015 = vst.msk [vmem:[#allocation6 + $0x14] sm:$0x3] %vm5440_vm11, %v6001_v31 }
 0x5d5   : > { %v5913_v48 = vsel %vm4438_vm3, %v5911_v58, %v5912_v53  ;;  %v5963_v20 = vsel %vm4388_vm2, %v5961_v3, %v5962_v17  ;;  %v5706_v10 = vmax.f32 %v5704_v1, %v5705_v32  ;;  %v5590_v18 = vrot.slane %v10742_v49, %v9535_v4 }
 0x5d6   : > { %5941 = vrot.lane.b32.xlu1 %v5913_v48, %s8293_s20  ;;  %v5711_v47 = vmax.f32 %v5709_v51, %v5710_v19  ;;  %v5863_v50 = vrot.slane %v10775_v11, 7  ;;  %v5597_v25 = vrot.slane %v5583_v29, %v9535_v4  ;;  %v5522_v33 = vmax.f32 %v10713_v56, %v10723_v6 }
 0x5d7   : > { %5982 = vrot.lane.b32.xlu0 %v5963_v20, %s8298_s30  ;;  %v10788_v43 = vmax.f32 %v5699_v54, %v5706_v10  ;;  %v5598_v61 = vcombine.high %v5590_v18, %v5590_v18  ;;  %v5721_v35 = vsel %vm5440_vm11, %v5590_v18, -inf  ;;  %v5511_v49 = vsel %vm5440_vm11, %v5484_v45, -inf  ;;  %v5485_v45 = vld [vmem:[#allocation5 + $0x80] sm:$0xff] }
 0x5d8   : > { %v5712_v28 = vrot.slane %v5711_v47, 1  ;;  %v5599_v7 = vcombine.high %v5597_v25, %v5597_v25  ;;  %v5722_v22 = vrot.slane %v5721_v35, 4  ;;  %v5735_v2 = vsel %vm5440_vm11, %v5597_v25, -inf }
 0x5d9   : > { %v5864_v29 = vrot.slane %v10788_v43, 6  ;;  %v5728_v38 = vsel %vm5440_vm11, %v5598_v61, -inf  ;;  %v5736_v56 = vrot.slane %v5735_v2, 4  ;;  %v5582_v15 = vrot.slane %v5522_v33, %v9535_v4 }
 0x5da   : > { %v10796_v16 = vmax.f32 %v5711_v47, %v5712_v28  ;;  %v5723_v51 = vmax.f32 %v5721_v35, %v5722_v22  ;;  %v5729_v9 = vrot.slane %v5728_v38, 4  ;;  %v5742_v46 = vsel %vm5440_vm11, %v5599_v7, -inf  ;;  %v5486_v22 = vld [vmem:[#allocation5 + $0x88] sm:$0x3] }
 0x5db   : > { %v5865_v21 = vsel %vm4319_vm13, %v5864_v29, %v5863_v50  ;;  %v5737_v24 = vmax.f32 %v5735_v2, %v5736_v56  ;;  %v5743_v36 = vrot.slane %v5742_v46, 4  ;;  %v5714_v14 = vsel %vm5440_vm11, %v5582_v15, -inf }
 0x5dc   : > { %v10802_v30 = vmax.f32 %v5706_v10, %v10796_v16  ;;  %v5866_v1 = vsel %vm4388_vm2, %v5864_v29, %v5865_v21  ;;  %v5724_v37 = vrot.slane %v5723_v51, 2  ;;  %v5730_v57 = vmax.f32 %v5728_v38, %v5729_v9 }
 0x5dd   : > { %v5738_v23 = vrot.slane %v5737_v24, 2  ;;  %v5744_v58 = vmax.f32 %v5742_v46, %v5743_v36  ;;  %v5715_v62 = vrot.slane %v5714_v14, 4  ;;  %v5914_v40 = vrot.slane %v10788_v43, 7 }
 0x5de   : > { %v5867_v34 = vrot.slane %v10802_v30, 5  ;;  %v5725_v26 = vmax.f32 %v5723_v51, %v5724_v37  ;;  %v5731_v63 = vrot.slane %v5730_v57, 2  ;;  %v5917_v55 = vrot.slane %v10802_v30, 6 }
 0x5df   : > { %v5739_v3 = vmax.f32 %v5737_v24, %v5738_v23  ;;  %v5745_v54 = vrot.slane %v5744_v58, 2  ;;  %v5716_v12 = vmax.f32 %v5714_v14, %v5715_v62  ;;  %v5915_v52 = vsel %vm4317_vm14, %v5914_v40, %v10775_v11 }
 0x5e0   : > { %v5868_v44 = vsel %vm4321_vm15, %v5867_v34, %v5866_v1  ;;  %v5726_v59 = vrot.slane %v5725_v26, 1  ;;  %v5732_v31 = vmax.f32 %v5730_v57, %v5731_v63  ;;  %v5916_v39 = vsel %vm4325_vm1, %v5914_v40, %v5915_v52 }
 0x5e1   : > { %v5869_v32 = vsel %vm4438_vm3, %v5867_v34, %v5868_v44  ;;  %v5740_v53 = vrot.slane %v5739_v3, 1  ;;  %v5746_v17 = vmax.f32 %v5744_v58, %v5745_v54  ;;  %v5717_v19 = vrot.slane %v5716_v12, 2 }
 0x5e2   : > { %5886 = vrot.lane.b32.xlu1 %v5869_v32, %s8295_s22  ;;  %v5733_v48 = vrot.slane %v5732_v31, 1  ;;  %v5918_v20 = vsel %vm4319_vm13, %v5917_v55, %v5916_v39  ;;  %v10816_v10 = vmax.f32 %v10726_v42, %v5511_v49  ;;  %v10819_v18 = vsel %vm5440_vm11, %v5488_v5, -inf }
 0x5e3   : > { %v5727_v47 = vmax.f32 %v5725_v26, %v5726_v59  ;;  %v5741_v50 = vmax.f32 %v5739_v3, %v5740_v53  ;;  %v5747_v25 = vrot.slane %v5746_v17, 1  ;;  %v5718_v33 = vmax.f32 %v5716_v12, %v5717_v19  ;;  %v7077_v53 = vld [vmem:[%s11350_s7 + $0x110] sm:$0xff] }
 0x5e4   : > { %v5734_v61 = vmax.f32 %v5732_v31, %v5733_v48  ;;  %v5524_v35 = vmax.f32 %v10723_v6, %v10816_v10  ;;  %v5964_v28 = vrot.slane %v10802_v30, 7  ;;  %v5513_v7 = vsel %vm5438_vm10, %v5485_v45, -inf }
 0x5e5   : > { %v10825_v2 = vmax.f32 %v5746_v17, %v5747_v25  ;;  %v5719_v42 = vrot.slane %v5718_v33, 1  ;;  %v5919_v49 = vsel %vm4388_vm2, %v5917_v55, %v5918_v20  ;;  %v5515_v29 = vmax.f32 %v5513_v7, %v10729_v8  ;;  %v7078_v17 = vld [vmem:[%s11350_s7 + $0x118] sm:$0xff] }
 0x5e6   : > { %v10829_v38 = vmax.f32 %v5727_v47, %v5734_v61  ;;  %v10831_v56 = vmax.f32 %v5734_v61, %v5741_v50  ;;  %v5606_v15 = vrot.slane %v5524_v35, %v9535_v4  ;;  %v5965_v6 = vsel %vm4317_vm14, %v5964_v28, %v10788_v43 }
 0x5e7   : > { %v10837_v51 = vmax.f32 %v5741_v50, %v10825_v2  ;;  %v5720_v9 = vmax.f32 %v5718_v33, %v5719_v42  ;;  %v5525_v46 = vmax.f32 %v10737_v27, %v5515_v29  ;;  %v5516_v21 = vsel %vm5440_vm11, %v5486_v22, -inf }
 0x5e8   : > { %v5870_v24 = vrot.slane %v10829_v38, 7  ;;  %v5871_v8 = vrot.slane %v10831_v56, 6  ;;  %v5749_v36 = vsel %vm5440_vm11, %v5606_v15, -inf  ;;  %v5923_v14 = vrot.slane %v10831_v56, 7 }
 0x5e9   : > { %v5874_v1 = vrot.slane %v10837_v51, 5  ;;  %v5798_v37 = vmax.f32 %v10796_v16, %v5720_v9  ;;  %v5750_v57 = vrot.slane %v5749_v36, 4  ;;  %v5966_v23 = vsel %vm4325_vm1, %v5964_v28, %v5965_v6 }
 0x5ea   : > { %v5872_v58 = vsel %vm4319_vm13, %v5871_v8, %v5870_v24  ;;  %v5924_v27 = vsel %vm4317_vm14, %v5923_v14, %v10829_v38  ;;  %v5926_v62 = vrot.slane %v10837_v51, 6  ;;  %v5970_v40 = vrot.slane %v10837_v51, 7 }
 0x5eb   : > { %v5873_v34 = vsel %vm4388_vm2, %v5871_v8, %v5872_v58  ;;  %v5920_v26 = vrot.slane %v5798_v37, 5  ;;  %v6002_v63 = vrot.slane %v5798_v37, 7  ;;  %v5751_v55 = vmax.f32 %v5749_v36, %v5750_v57 }
 0x5ec   : > { %v5875_v3 = vsel %vm4321_vm15, %v5874_v1, %v5873_v34  ;;  %v5925_v16 = vsel %vm4325_vm1, %v5923_v14, %v5924_v27  ;;  %v5967_v54 = vrot.slane %v5798_v37, 6  ;;  %v5607_v12 = vcombine.high %v5525_v46, %v5525_v46 }
 0x5ed   : > { %v5876_v52 = vsel %vm4438_vm3, %v5874_v1, %v5875_v3  ;;  %v5921_v5 = vsel %vm4321_vm15, %v5920_v26, %v5919_v49  ;;  %v6003_v44 = vsel %vm4317_vm14, %v6002_v63, %v10802_v30  ;;  %v5752_v59 = vrot.slane %v5751_v55, 2  ;;  %v7079_v3 = vld [vmem:[%s11350_s7 + $0x120] sm:$0xff] }
 0x5ee   : > { %5888 = vrot.lane.b32.xlu0 %v5876_v52, %s8295_s22  ;;  %v5922_v31 = vsel %vm4438_vm3, %v5920_v26, %v5921_v5  ;;  %v6004_v39 = vsel %vm4325_vm1, %v6002_v63, %v6003_v44  ;;  %v5968_v32 = vsel %vm4319_vm13, %v5967_v54, %v5966_v23  ;;  %v5927_v19 = vsel %vm4319_vm13, %v5926_v62, %v5925_v16  ;;  %v7080_v16 = vld [vmem:[%s11350_s7 + $0x128] sm:$0xff] }
 0x5ef   : > { %5943 = vrot.lane.b32.xlu1 %v5922_v31, %s8293_s20  ;;  %v5753_v30 = vmax.f32 %v5751_v55, %v5752_v59  ;;  %v5971_v45 = vsel %vm4317_vm14, %v5970_v40, %v10831_v56  ;;  %6016 = vst.msk [vmem:[#allocation6 + $0x1c] sm:$0x3] %vm5440_vm11, %v6004_v39  ;;  %v5614_v48 = vrot.slane %v5525_v46, %v9535_v4  ;;  %v5826_v50 = vrot.slane %v10749_v41, 6  ;;  %v7081_v31 = vld [vmem:[%s11350_s7 + $0x130] sm:$0xff]  ;;  %v7082_v39 = vld [vmem:[%s11350_s7 + $0x138] sm:$0xff] }
 0x5f0   : > { %v5621_v20 = vrot.slane %v5607_v12, %v9535_v4  ;;  %v5518_v47 = vmax.f32 %v5516_v21, %v10819_v18  ;;  %v5969_v33 = vsel %vm4388_vm2, %v5967_v54, %v5968_v32  ;;  %v5827_v61 = vrot.slane %v10751_v60, 5 }
 0x5f1   : > { %v5754_v25 = vrot.slane %v5753_v30, 1  ;;  %v7945_v35 = vpack.c.bf16 %v7078_v17, %v7077_v53  ;;  %v5622_v28 = vcombine.high %v5614_v48, %v5614_v48  ;;  %v5756_v22 = vsel %vm5440_vm11, %v5614_v48, -inf }
 0x5f2   : > { %v5623_v7 = vcombine.high %v5621_v20, %v5621_v20  ;;  %v5770_v42 = vsel %vm5440_vm11, %v5621_v20, -inf  ;;  %v5757_v29 = vrot.slane %v5756_v22, 4  ;;  %v5526_v18 = vmax.f32 %v10816_v10, %v5518_v47 }
 0x5f3   : > { %v5755_v49 = vmax.f32 %v5753_v30, %v5754_v25  ;;  %5984 = vrot.lane.b32.xlu1 %v5969_v33, %s8298_s30  ;;  %v5771_v15 = vrot.slane %v5770_v42, 4  ;;  %7946 = vmatpush1.bf16.msra.mxu1 %v7945_v35  ;;  %v5928_v41 = vsel %vm4388_vm2, %v5926_v62, %v5927_v19  ;;  %v5763_v6 = vsel %vm5440_vm11, %v5622_v28, -inf }
 0x5f4   : > { %v5777_v60 = vsel %vm5440_vm11, %v5623_v7, -inf  ;;  %v5828_v9 = vsel %vm4321_vm15, %v5827_v61, %v5826_v50  ;;  %7947 = vmatprep.subr.bf16.mxu1 %v8297_v13  ;;  %v5758_v21 = vmax.f32 %v5756_v22, %v5757_v29  ;;  %v5764_v24 = vrot.slane %v5763_v6, 4 }
 0x5f5   : > { %v5802_v46 = vmax.f32 %v10825_v2, %v5755_v49  ;;  %v5772_v8 = vmax.f32 %v5770_v42, %v5771_v15  ;;  %v5972_v36 = vsel %vm4325_vm1, %v5970_v40, %v5971_v45  ;;  %v5778_v14 = vrot.slane %v5777_v60, 4 }
 0x5f6   : > { %v5630_v10 = vrot.slane %v5526_v18, %v9535_v4  ;;  %v5829_v1 = vsel %vm4438_vm3, %v5827_v61, %v5828_v9  ;;  %v5759_v58 = vrot.slane %v5758_v21, 2  ;;  %v5765_v27 = vmax.f32 %v5763_v6, %v5764_v24 }
 0x5f7   : > { %v5929_v37 = vrot.slane %v5802_v46, 5  ;;  %v6005_v57 = vrot.slane %v5802_v46, 7  ;;  %v5973_v23 = vrot.slane %v5802_v46, 6  ;;  %5848 = vst.msk [vmem:[#allocation6 + $0x10] sm:$0xc] %vm5847_vm5, %v5829_v1  ;;  %v5773_v62 = vrot.slane %v5772_v8, 2 }
 0x5f8   : > { %v5779_v34 = vmax.f32 %v5777_v60, %v5778_v14  ;;  %v5784_v2 = vsel %vm5440_vm11, %v5630_v10, -inf  ;;  %v5760_v63 = vmax.f32 %v5758_v21, %v5759_v58  ;;  %v5830_v55 = vrot.slane %v10775_v11, 6 }
 0x5f9   : > { %v5930_v26 = vsel %vm4321_vm15, %v5929_v37, %v5928_v41  ;;  %v6006_v40 = vsel %vm4317_vm14, %v6005_v57, %v10837_v51  ;;  %v5974_v52 = vsel %vm4319_vm13, %v5973_v23, %v5972_v36  ;;  %v5766_v5 = vrot.slane %v5765_v27, 2 }
 0x5fa   : > { %v5931_v54 = vsel %vm4438_vm3, %v5929_v37, %v5930_v26  ;;  %v6007_v12 = vsel %vm4325_vm1, %v6005_v57, %v6006_v40  ;;  %v5761_v51 = vrot.slane %v5760_v63, 1  ;;  %v5774_v44 = vmax.f32 %v5772_v8, %v5773_v62 }
 0x5fb   : > { %5945 = vrot.lane.b32.xlu0 %v5931_v54, %s8293_s20  ;;  %v5780_v11 = vrot.slane %v5779_v34, 2  ;;  %v5785_v59 = vrot.slane %v5784_v2, 4  ;;  %6017 = vst.msk [vmem:[#allocation6 + $0x24] sm:$0x3] %vm5440_vm11, %v6007_v12  ;;  %v5767_v32 = vmax.f32 %v5765_v27, %v5766_v5  ;;  %v5831_v53 = vrot.slane %v10788_v43, 5 }
 0x5fc   : > { %v7948_v17 = vpack.c.bf16 %v7080_v16, %v7079_v3  ;;  %v5834_v30 = vrot.slane %v10829_v38, 6  ;;  %v5975_v19 = vsel %vm4388_vm2, %v5973_v23, %v5974_v52  ;;  %v5775_v45 = vrot.slane %v5774_v44, 1 }
 0x5fd   : > { %v5781_v48 = vmax.f32 %v5779_v34, %v5780_v11  ;;  %v5786_v20 = vmax.f32 %v5784_v2, %v5785_v59  ;;  %v5768_v47 = vrot.slane %v5767_v32, 1  ;;  %v5832_v50 = vsel %vm4321_vm15, %v5831_v53, %v5830_v55 }
 0x5fe   : > { %7949 = vmatpush1.bf16.msra.mxu1 %v7948_v17  ;;  %v5835_v25 = vrot.slane %v10831_v56, 5  ;;  %v7951_v33 = vpack.c.bf16 %v7082_v39, %v7081_v31  ;;  %v5776_v61 = vmax.f32 %v5774_v44, %v5775_v45  ;;  %v5833_v28 = vsel %vm4438_vm3, %v5831_v53, %v5832_v50  ;;  %v10956_v39 = vld [vmem:[#allocation6 + $0x8] sm:$0xff]  ;;  %v6024_v53 = vld [vmem:[%s11350_s7 + $0x8] sm:$0xff] }
 0x5ff   : > { %5986 = vrot.lane.b32.xlu0 %v5975_v19, %s8298_s30  ;;  %v5782_v35 = vrot.slane %v5781_v48, 1  ;;  %v5787_v43 = vrot.slane %v5786_v20, 2  ;;  %7950 = vmatprep.subr.bf16.mxu1 %v8297_v13  ;;  %v5762_v38 = vmax.f32 %v5760_v63, %v5761_v51  ;;  %v5769_v7 = vmax.f32 %v5767_v32, %v5768_v47  ;;  %5849 = vst.msk [vmem:[#allocation6 + $0x18] sm:$0xc] %vm5847_vm5, %v5833_v28  ;;  %v6023_v32 = vld [vmem:[%s11350_s7] sm:$0xff] }
 0x600   : > { %v5836_v22 = vsel %vm4321_vm15, %v5835_v25, %v5834_v30  ;;  %v7954_v45 = vpack.c.bf16 %v6024_v53, %v6023_v32  ;;  %v7094_v32 = vld [vmem:[%s11350_s7 + $0x178] sm:$0xff] }
 0x601   : > { %v5783_v42 = vmax.f32 %v5781_v48, %v5782_v35  ;;  %v5788_v49 = vmax.f32 %v5786_v20, %v5787_v43  ;;  %v5837_v56 = vsel %vm4438_vm3, %v5835_v25, %v5836_v22  ;;  %v5803_v29 = vmax.f32 %v5762_v38, %v5769_v7  ;;  %v6025_v48 = vld [vmem:[%s11350_s7 + $0x10] sm:$0xff]  ;;  %v6026_v20 = vld [vmem:[%s11350_s7 + $0x18] sm:$0xff]  ;;  %v6027_v25 = vld [vmem:[%s11350_s7 + $0x20] sm:$0xff] }
 0x602   : > { %v5804_v15 = vmax.f32 %v5769_v7, %v5776_v61  ;;  %5850 = vst.msk [vmem:[#allocation6 + $0x20] sm:$0xc] %vm5847_vm5, %v5837_v56  ;;  %7952 = vmatpush1.bf16.msra.mxu1 %v7951_v33  ;;  %v7957_v50 = vpack.c.bf16 %v6026_v20, %v6025_v48  ;;  %v6028_v33 = vld [vmem:[%s11350_s7 + $0x28] sm:$0xff]  ;;  %v6029_v35 = vld [vmem:[%s11350_s7 + $0x30] sm:$0xff]  ;;  %v6030_v43 = vld [vmem:[%s11350_s7 + $0x38] sm:$0xff] }
 0x603   : > { %v5805_v18 = vmax.f32 %v5776_v61, %v5783_v42  ;;  %v5789_v41 = vrot.slane %v5788_v49, 1  ;;  %7953 = vmatprep.subr.bf16.mxu1 %v8297_v13  ;;  %v5877_v6 = vrot.slane %v5803_v29, 7  ;;  %v5838_v46 = vrot.slane %v5803_v29, 6  ;;  %v6031_v38 = vld [vmem:[%s11350_s7 + $0x40] sm:$0xff]  ;;  %v6032_v7 = vld [vmem:[%s11350_s7 + $0x48] sm:$0xff]  ;;  %v6033_v56 = vld [vmem:[%s11350_s7 + $0x50] sm:$0xff] }
 0x604   : > { %v5878_v60 = vrot.slane %v5804_v15, 6  ;;  %v5932_v9 = vrot.slane %v5804_v15, 7  ;;  %v5839_v1 = vrot.slane %v5804_v15, 5  ;;  %v7960_v61 = vpack.c.bf16 %v6028_v33, %v6027_v25  ;;  %v7098_v48 = vld [vmem:[%s11350_s7 + $0x198] sm:$0xff]  ;;  %v7101_v33 = vld [vmem:[%s11350_s7 + $0x1b0] sm:$0xff] }
 0x605   : > { %v5881_v21 = vrot.slane %v5805_v18, 5  ;;  %v5790_v24 = vmax.f32 %v5788_v49, %v5789_v41  ;;  %v5935_v8 = vrot.slane %v5805_v18, 6  ;;  %v5976_v36 = vrot.slane %v5805_v18, 7  ;;  %v6035_v41 = vld [vmem:[%s11350_s7 + $0x60] sm:$0xff] }
 0x606   : > { %v5879_v14 = vsel %vm4319_vm13, %v5878_v60, %v5877_v6  ;;  %v5933_v10 = vsel %vm4317_vm14, %v5932_v9, %v5803_v29  ;;  %v5840_v2 = vsel %vm4321_vm15, %v5839_v1, %v5838_v46  ;;  %v7963_v28 = vpack.c.bf16 %v6030_v43, %v6029_v35  ;;  %v6034_v29 = vld [vmem:[%s11350_s7 + $0x58] sm:$0xff]  ;;  %v6036_v6 = vld [vmem:[%s11350_s7 + $0x68] sm:$0xff]  ;;  %v7103_v43 = vld [vmem:[%s11350_s7 + $0x1c0] sm:$0xff] }
 0x607   : > { %v5880_v37 = vsel %vm4388_vm2, %v5878_v60, %v5879_v14  ;;  %v5806_v57 = vmax.f32 %v5783_v42, %v5790_v24  ;;  %v5934_v23 = vsel %vm4325_vm1, %v5932_v9, %v5933_v10  ;;  %v5977_v58 = vsel %vm4317_vm14, %v5976_v36, %v5804_v15  ;;  %v6037_v9 = vld [vmem:[%s11350_s7 + $0x70] sm:$0xff]  ;;  %v6038_v46 = vld [vmem:[%s11350_s7 + $0x78] sm:$0xff] }
 0x608   : > { %v5882_v27 = vsel %vm4321_vm15, %v5881_v21, %v5880_v37  ;;  %v5936_v62 = vsel %vm4319_vm13, %v5935_v8, %v5934_v23  ;;  %v5978_v34 = vsel %vm4325_vm1, %v5976_v36, %v5977_v58  ;;  %v5841_v16 = vsel %vm4438_vm3, %v5839_v1, %v5840_v2  ;;  %v6040_v36 = vld [vmem:[%s11350_s7 + $0x88] sm:$0xff]  ;;  %v6041_v1 = vld [vmem:[%s11350_s7 + $0x90] sm:$0xff]  ;;  %v6042_v37 = vld [vmem:[%s11350_s7 + $0x98] sm:$0xff] }
 0x609   : > { %v5883_v26 = vsel %vm4438_vm3, %v5881_v21, %v5882_v27  ;;  %v5937_v40 = vsel %vm4388_vm2, %v5935_v8, %v5936_v62  ;;  %v5938_v63 = vrot.slane %v5806_v57, 5  ;;  %v6008_v55 = vrot.slane %v5806_v57, 7  ;;  %5851 = vst.msk [vmem:[#allocation6 + $0x28] sm:$0xc] %vm5847_vm5, %v5841_v16  ;;  %v6039_v8 = vld [vmem:[%s11350_s7 + $0x80] sm:$0xff]  ;;  %v6019_v23 = vld [vmem:[#allocation6] sm:$0xff] }
 0x60a   : > { %5890 = vrot.lane.b32.xlu1 %v5883_v26, %s8295_s22  ;;  %v5979_v3 = vrot.slane %v5806_v57, 6  ;;  %v7966_v49 = vpack.c.bf16 %v6032_v7, %v6031_v38  ;;  %v7972_v60 = vpack.c.bf16 %v6036_v6, %v6035_v41  ;;  %v7975_v24 = vpack.c.bf16 %v6038_v46, %v6037_v9  ;;  %v7087_v26 = vld [vmem:[%s11350_s7 + $0x140] sm:$0xff]  ;;  %v7105_v7 = vld [vmem:[%s11350_s7 + $0x1d0] sm:$0xff]  ;;  %v7112_v41 = vld [vmem:[%s11350_s7 + $0x1f8] sm:$0xff] }
 0x60b   : > { %v5939_v54 = vsel %vm4321_vm15, %v5938_v63, %v5937_v40  ;;  %v6009_v12 = vsel %vm4317_vm14, %v6008_v55, %v5805_v18  ;;  %v7969_v18 = vpack.c.bf16 %v6034_v29, %v6033_v56  ;;  %v7978_v10 = vpack.c.bf16 %v6040_v36, %v6039_v8  ;;  %v7088_v40 = vld [vmem:[%s11350_s7 + $0x148] sm:$0xff]  ;;  %v7113_v46 = vld [vmem:[%s11350_s7 + $0x200] sm:$0xff]  ;;  %v7115_v8 = vld [vmem:[%s11350_s7 + $0x210] sm:$0xff] }
 0x60c   : > { %v5940_v52 = vsel %vm4438_vm3, %v5938_v63, %v5939_v54  ;;  %v6010_v5 = vsel %vm4325_vm1, %v6008_v55, %v6009_v12  ;;  %v5980_v51 = vsel %vm4319_vm13, %v5979_v3, %v5978_v34  ;;  %v7981_v57 = vpack.c.bf16 %v6042_v37, %v6041_v1  ;;  %v7089_v54 = vld [vmem:[%s11350_s7 + $0x150] sm:$0xff]  ;;  %v7090_v12 = vld [vmem:[%s11350_s7 + $0x158] sm:$0xff]  ;;  %v7110_v56 = vld [vmem:[%s11350_s7 + $0x1e8] sm:$0xff] }
 0x60d   : > { %5947 = vrot.lane.b32.xlu0 %v5940_v52, %s8293_s20  ;;  %v5981_v44 = vsel %vm4388_vm2, %v5979_v3, %v5980_v51  ;;  %6018 = vst.msk [vmem:[#allocation6 + $0x2c] sm:$0x3] %vm5440_vm11, %v6010_v5  ;;  %v6163_v2 = vcombine.high %v6019_v23, %v10956_v39  ;;  %v6162_v55 = vcombine.low %v6019_v23, %v10956_v39  ;;  %v7116_v36 = vld [vmem:[%s11350_s7 + $0x218] sm:$0xff]  ;;  %v7118_v1 = vld [vmem:[%s11350_s7 + $0x228] sm:$0xff]  ;;  %vm6617_vm1 = vcmask 521216  }
 0x60e   : > { %5988 = vrot.lane.b32.xlu1 %v5981_v44, %s8298_s30  ;;  %v7984_v3 = vpack.c.bf16 %v7088_v40, %v7087_v26  ;;  %v7987_v51 = vpack.c.bf16 %v7090_v12, %v7089_v54  ;;  %v7120_v23 = vld [vmem:[%s11350_s7 + $0x238] sm:$0xff]  ;;  %v7123_v26 = vld [vmem:[%s11350_s7 + $0x250] sm:$0xff]  ;;  %6618 = vst.msk [vmem:[#allocation7] sm:$0x3f] %vm6617_vm1, %v8287_v0  ;;  %6619 = vst.msk [vmem:[#allocation7 + $0x8] sm:$0x3f] %vm6617_vm1, %v8287_v0  ;;  %s357_s30 = scalar_lea.vmem %s11353_s10, %s6809_s27 }
 0x60f   : > { %v7124_v40 = vld [vmem:[%s11350_s7 + $0x258] sm:$0xff]  ;;  %v7127_v54 = vld [vmem:[%s11350_s7 + $0x270] sm:$0xff]  ;;  %6620 = vst.msk [vmem:[#allocation7 + $0x10] sm:$0x3f] %vm6617_vm1, %v8287_v0  ;;  %6621 = vst.msk [vmem:[#allocation7 + $0x18] sm:$0x3f] %vm6617_vm1, %v8287_v0 }
 0x610   : > { %v7128_v12 = vld [vmem:[%s11350_s7 + $0x278] sm:$0xff]  ;;  %6622 = vst.msk [vmem:[#allocation7 + $0x20] sm:$0x3f] %vm6617_vm1, %v8287_v0  ;;  %6623 = vst.msk [vmem:[#allocation7 + $0x28] sm:$0x3f] %vm6617_vm1, %v8287_v0  ;;  %vm6631_vm2 = vcmask 519168  }
 0x611   : > { %vm6693_vm3 = vcmask 517120  }
 0x645   : > { %v5885_v11 = vpop.permute.xlu0 %5884 }
 0x646   : > { %5897 = vst.msk [vmem:[#allocation6 + $0x10] sm:$0xe] %vm5896_vm6, %v5885_v11  ;;  %v7091_v11 = vld [vmem:[%s11350_s7 + $0x160] sm:$0xff] }
 0x648   : > { %v5942_v59 = vpop.permute.xlu1 %5941 }
 0x649   : > { %5954 = vst.msk [vmem:[#allocation6 + $0x10] sm:$0xf] %vm5953_vm7, %v5942_v59  ;;  %v5983_v31 = vpop.permute.xlu0 %5982  ;;  %v7092_v59 = vld [vmem:[%s11350_s7 + $0x168] sm:$0xff] }
 0x64a   : > { %5995 = vst.msk [vmem:[#allocation6 + $0x10] sm:$0x7] %vm5994_vm8, %v5983_v31  ;;  %v7990_v31 = vpack.c.bf16 %v7092_v59, %v7091_v11  ;;  %v7133_v59 = vld [vmem:[%s11350_s7 + $0x290] sm:$0xff] }
 0x651   : > { %v10964_v17 = vld [vmem:[#allocation6 + $0x10] sm:$0xff] }
 0x652   : > { %v6073_v30 = vcombine.low %v10956_v39, %v10964_v17  ;;  %v6074_v19 = vcombine.high %v10956_v39, %v10964_v17  ;;  %v7093_v39 = vld [vmem:[%s11350_s7 + $0x170] sm:$0xff] }
 0x653   : > { %v7993_v53 = vpack.c.bf16 %v7094_v32, %v7093_v39 }
 0x654   : > { %v5887_v47 = vpop.permute.xlu1 %5886  ;;  %7083 = vmatprep.mubr.msk.f32.mxu1 %vm5438_vm10, %v6074_v19 }
 0x655   : > { %5898 = vst.msk [vmem:[#allocation6 + $0x18] sm:$0xe] %vm5896_vm6, %v5887_v47  ;;  %6148 = vmatmul.mubr.f32.vlgmr.msra.gmra.mrb[8].mxu1 %v6073_v30  ;;  %v7096_v30 = vld [vmem:[%s11350_s7 + $0x188] sm:$0xff]  ;;  %v7099_v47 = vld [vmem:[%s11350_s7 + $0x1a0] sm:$0xff] }
 0x656   : > { %7955 = vmatpush1.bf16.msra.mxu1 %v7954_v45  ;;  %v7097_v45 = vld [vmem:[%s11350_s7 + $0x190] sm:$0xff] }
 0x657   : > { %7956 = vmatprep.subr.bf16.mxu1 %v8297_v13  ;;  %v7999_v20 = vpack.c.bf16 %v7098_v48, %v7097_v45  ;;  %v7138_v45 = vld [vmem:[%s11350_s7 + $0x2b8] sm:$0xff] }
 0x65a   : > { %7958 = vmatpush1.bf16.msra.mxu1 %v7957_v50  ;;  %v7100_v50 = vld [vmem:[%s11350_s7 + $0x1a8] sm:$0xff] }
 0x65b   : > { %7959 = vmatprep.subr.bf16.mxu1 %v8297_v13  ;;  %v8002_v25 = vpack.c.bf16 %v7100_v50, %v7099_v47  ;;  %v7140_v47 = vld [vmem:[%s11350_s7 + $0x2c8] sm:$0xff] }
 0x65e   : > { %7961 = vmatpush1.bf16.msra.mxu1 %v7960_v61  ;;  %v7102_v61 = vld [vmem:[%s11350_s7 + $0x1b8] sm:$0xff] }
 0x65f   : > { %7962 = vmatprep.subr.bf16.mxu1 %v8297_v13  ;;  %v8005_v35 = vpack.c.bf16 %v7102_v61, %v7101_v33  ;;  %v7142_v33 = vld [vmem:[%s11350_s7 + $0x2d8] sm:$0xff] }
 0x660   : > { %v5889_v22 = vpop.permute.xlu0 %5888 }
 0x661   : > { %5899 = vst.msk [vmem:[#allocation6 + $0x20] sm:$0xe] %vm5896_vm6, %v5889_v22  ;;  %v5944_v42 = vpop.permute.xlu1 %5943  ;;  %v7106_v22 = vld [vmem:[%s11350_s7 + $0x1d8] sm:$0xff] }
 0x662   : > { %5955 = vst.msk [vmem:[#allocation6 + $0x18] sm:$0xf] %vm5953_vm7, %v5944_v42  ;;  %7964 = vmatpush1.bf16.msra.mxu1 %v7963_v28  ;;  %v7104_v28 = vld [vmem:[%s11350_s7 + $0x1c8] sm:$0xff]  ;;  %v8011_v42 = vpack.c.bf16 %v7106_v22, %v7105_v7  ;;  %v7146_v7 = vld [vmem:[%s11350_s7 + $0x2f8] sm:$0xff] }
 0x663   : > { %7965 = vmatprep.subr.bf16.mxu1 %v8297_v13  ;;  %v8008_v38 = vpack.c.bf16 %v7104_v28, %v7103_v43  ;;  %v7144_v43 = vld [vmem:[%s11350_s7 + $0x2e8] sm:$0xff] }
 0x665   : > { %v5985_v15 = vpop.permute.xlu1 %5984 }
 0x666   : > { %5996 = vst.msk [vmem:[#allocation6 + $0x18] sm:$0x7] %vm5994_vm8, %v5985_v15  ;;  %7967 = vmatpush1.bf16.msra.mxu1 %v7966_v49  ;;  %v7109_v49 = vld [vmem:[%s11350_s7 + $0x1e0] sm:$0xff] }
 0x667   : > { %7968 = vmatprep.subr.bf16.mxu1 %v8297_v13  ;;  %v8014_v15 = vpack.c.bf16 %v7110_v56, %v7109_v49  ;;  %v7148_v49 = vld [vmem:[%s11350_s7 + $0x308] sm:$0xff] }
 0x66a   : > { %7970 = vmatpush1.bf16.msra.mxu1 %v7969_v18  ;;  %v7111_v18 = vld [vmem:[%s11350_s7 + $0x1f0] sm:$0xff] }
 0x66b   : > { %7971 = vmatprep.subr.bf16.mxu1 %v8297_v13 }
 0x66d   : > { %v5946_v21 = vpop.permute.xlu0 %5945  ;;  %v6046_v58 = vld [vmem:[#allocation6 + $0x18] sm:$0xff] }
 0x66e   : > { %5956 = vst.msk [vmem:[#allocation6 + $0x20] sm:$0xf] %vm5953_vm7, %v5946_v21  ;;  %7973 = vmatpush1.bf16.msra.mxu1 %v7972_v60  ;;  %v6165_v5 = vcombine.high %v10964_v17, %v6046_v58  ;;  %v6164_v44 = vcombine.low %v10964_v17, %v6046_v58  ;;  %v7095_v17 = vld [vmem:[%s11350_s7 + $0x180] sm:$0xff]  ;;  %v8017_v60 = vpack.c.bf16 %v7112_v41, %v7111_v18  ;;  %v7114_v21 = vld [vmem:[%s11350_s7 + $0x208] sm:$0xff] }
 0x66f   : > { %7974 = vmatprep.subr.bf16.mxu1 %v8297_v13  ;;  %v7996_v19 = vpack.c.bf16 %v7096_v30, %v7095_v17  ;;  %v7135_v17 = vld [vmem:[%s11350_s7 + $0x2a0] sm:$0xff]  ;;  %v7136_v30 = vld [vmem:[%s11350_s7 + $0x2a8] sm:$0xff] }
 0x670   : > { %v6484_v41 = vld [vmem:[#allocation6 + $0x38] sm:$0xff] }
 0x671   : > { %v5987_v14 = vpop.permute.xlu0 %5986 }
 0x672   : > { %5997 = vst.msk [vmem:[#allocation6 + $0x20] sm:$0x7] %vm5994_vm8, %v5987_v14  ;;  %7976 = vmatpush1.bf16.msra.mxu1 %v7975_v24  ;;  %v8020_v24 = vpack.c.bf16 %v7114_v21, %v7113_v46  ;;  %v8023_v14 = vpack.c.bf16 %v7116_v36, %v7115_v8  ;;  %v7154_v46 = vld [vmem:[%s11352_s9] ss:$0 sm:$0xff] }
 0x673   : > { %7977 = vmatprep.subr.bf16.mxu1 %v8297_v13 }
 0x676   : > { %7979 = vmatpush1.bf16.msra.mxu1 %v7978_v10  ;;  %v7117_v10 = vld [vmem:[%s11350_s7 + $0x220] sm:$0xff] }
 0x677   : > { %7980 = vmatprep.subr.bf16.mxu1 %v8297_v13  ;;  %v8026_v37 = vpack.c.bf16 %v7118_v1, %v7117_v10 }
 0x679   : > { %v11040_v27 = vld [vmem:[#allocation6 + $0x20] sm:$0xff] }
 0x67a   : > { %v11043_v62 = vcombine.high %v6046_v58, %v11040_v27  ;;  %v11046_v34 = vcombine.low %v6046_v58, %v11040_v27  ;;  %7982 = vmatpush1.bf16.msra.mxu1 %v7981_v57  ;;  %v7119_v57 = vld [vmem:[%s11350_s7 + $0x230] sm:$0xff] }
 0x67b   : > { %7983 = vmatprep.subr.bf16.mxu1 %v8297_v13  ;;  %v8029_v58 = vpack.c.bf16 %v7120_v23, %v7119_v57 }
 0x67c   : > { %v5891_v63 = vpop.permute.xlu1 %5890  ;;  %7084 = vmatprep.mubr.msk.f32.mxu1 %vm5438_vm10, %v11043_v62 }
 0x67d   : > { %5900 = vst.msk [vmem:[#allocation6 + $0x28] sm:$0xe] %vm5896_vm6, %v5891_v63  ;;  %6153 = vmatmul.mubr.f32.gmra.mrb[10].mxu1 %v11046_v34  ;;  %v8035_v63 = vpack.c.bf16 %v7124_v40, %v7123_v26 }
 0x67e   : > { %7085 = vmatprep.mubr.msk.f32.mxu1 %vm5438_vm10, %v6163_v2 }
 0x67f   : > { %v5948_v16 = vpop.permute.xlu0 %5947 }
 0x680   : > { %5957 = vst.msk [vmem:[#allocation6 + $0x28] sm:$0xf] %vm5953_vm7, %v5948_v16  ;;  %v5989_v52 = vpop.permute.xlu1 %5988 }
 0x681   : > { %5998 = vst.msk [vmem:[#allocation6 + $0x28] sm:$0x7] %vm5994_vm8, %v5989_v52  ;;  %6237 = vmatmul.mubr.f32.vlgmr.msra.gmra.mrb[8].mxu1 %v6162_v55  ;;  %v7125_v55 = vld [vmem:[%s11350_s7 + $0x260] sm:$0xff]  ;;  %v8041_v52 = vpack.c.bf16 %v7128_v12, %v7127_v54 }
 0x682   : > { %7086 = vmatprep.mubr.msk.f32.mxu1 %vm5438_vm10, %v6165_v5  ;;  %7985 = vmatpush1.bf16.msra.mxu1 %v7984_v3  ;;  %v7126_v3 = vld [vmem:[%s11350_s7 + $0x268] sm:$0xff] }
 0x683   : > { %7986 = vmatprep.subr.bf16.mxu1 %v8297_v13  ;;  %v8038_v16 = vpack.c.bf16 %v7126_v3, %v7125_v55 }
 0x685   : > { %6242 = vmatmul.mubr.f32.gmra.mrb[10].mxu1 %v6164_v44 }
 0x686   : > { %7988 = vmatpush1.bf16.msra.mxu1 %v7987_v51  ;;  %7107 = vmatprep.mubr.msk.f32.mxu1 %vm5438_vm10, %v6165_v5  ;;  %v7131_v5 = vld [vmem:[%s11350_s7 + $0x280] sm:$0xff]  ;;  %v7132_v51 = vld [vmem:[%s11350_s7 + $0x288] sm:$0xff] }
 0x687   : > { %7989 = vmatprep.subr.bf16.mxu1 %v8297_v13  ;;  %v8044_v11 = vpack.c.bf16 %v7132_v51, %v7131_v5 }
 0x688   : > { %v11137_v29 = vld [vmem:[#allocation6 + $0x28] sm:$0xff] }
 0x689   : > { %v11148_v6 = vcombine.high %v11040_v27, %v11137_v29  ;;  %v11154_v9 = vcombine.low %v11040_v27, %v11137_v29  ;;  %v7121_v27 = vld [vmem:[%s11350_s7 + $0x240] sm:$0xff] }
 0x68a   : > { %7991 = vmatpush1.bf16.msra.mxu1 %v7990_v31  ;;  %v7134_v31 = vld [vmem:[%s11350_s7 + $0x298] sm:$0xff] }
 0x68b   : > { %7992 = vmatprep.subr.bf16.mxu1 %v8297_v13  ;;  %v8047_v32 = vpack.c.bf16 %v7134_v31, %v7133_v59 }
 0x68e   : > { %7994 = vmatpush1.bf16.msra.mxu1 %v7993_v53 }
 0x68f   : > { %7995 = vmatprep.subr.bf16.mxu1 %v8297_v13 }
 0x692   : > { %7997 = vmatpush1.bf16.msra.mxu1 %v7996_v19  ;;  %v7137_v19 = vld [vmem:[%s11350_s7 + $0x2b0] sm:$0xff] }
 0x693   : > { %7998 = vmatprep.subr.bf16.mxu1 %v8297_v13  ;;  %v8053_v48 = vpack.c.bf16 %v7138_v45, %v7137_v19 }
 0x696   : > { %8000 = vmatpush1.bf16.msra.mxu1 %v7999_v20  ;;  %v7139_v20 = vld [vmem:[%s11350_s7 + $0x2c0] sm:$0xff] }
 0x697   : > { %8001 = vmatprep.subr.bf16.mxu1 %v8297_v13  ;;  %v8056_v50 = vpack.c.bf16 %v7140_v47, %v7139_v20 }
 0x69a   : > { %8003 = vmatpush1.bf16.msra.mxu1 %v8002_v25  ;;  %v7141_v25 = vld [vmem:[%s11350_s7 + $0x2d0] sm:$0xff] }
 0x69b   : > { %8004 = vmatprep.subr.bf16.mxu1 %v8297_v13  ;;  %v8059_v61 = vpack.c.bf16 %v7142_v33, %v7141_v25 }
 0x69e   : > { %8006 = vmatpush1.bf16.msra.mxu1 %v8005_v35  ;;  %v7143_v35 = vld [vmem:[%s11350_s7 + $0x2e0] sm:$0xff] }
 0x69f   : > { %8007 = vmatprep.subr.bf16.mxu1 %v8297_v13  ;;  %v8062_v28 = vpack.c.bf16 %v7144_v43, %v7143_v35 }
 0x6a2   : > { %8009 = vmatpush1.bf16.msra.mxu1 %v8008_v38  ;;  %v7145_v38 = vld [vmem:[%s11350_s7 + $0x2f0] sm:$0xff] }
 0x6a3   : > { %8010 = vmatprep.subr.bf16.mxu1 %v8297_v13  ;;  %v8065_v22 = vpack.c.bf16 %v7146_v7, %v7145_v38 }
 0x6a6   : > { %8012 = vmatpush1.bf16.msra.mxu1 %v8011_v42  ;;  %v7147_v42 = vld [vmem:[%s11350_s7 + $0x300] sm:$0xff] }
 0x6a7   : > { %8013 = vmatprep.subr.bf16.mxu1 %v8297_v13  ;;  %v8068_v56 = vpack.c.bf16 %v7148_v49, %v7147_v42 }
 0x6a9   : > { %6351 = vmatmul.mubr.f32.vlgmr.msra.gmra.mrb[8].mxu1 %v6164_v44  ;;  %v6367_v44 = vld [vmem:[#allocation6 + $0x30] sm:$0xff] }
 0x6aa   : > { %7108 = vmatprep.mubr.msk.f32.mxu1 %vm5438_vm10, %v11148_v6  ;;  %8015 = vmatpush1.bf16.msra.mxu1 %v8014_v15  ;;  %v6396_v39 = vcombine.high %v11137_v29, %v6367_v44  ;;  %v6395_v53 = vcombine.low %v11137_v29, %v6367_v44  ;;  %v7149_v29 = vld [vmem:[%s11350_s7 + $0x310] sm:$0xff]  ;;  %v7150_v15 = vld [vmem:[%s11350_s7 + $0x318] sm:$0xff] }
 0x6ab   : > { %8016 = vmatprep.subr.bf16.mxu1 %v8297_v13  ;;  %v8071_v18 = vpack.c.bf16 %v7150_v15, %v7149_v29 }
 0x6ad   : > { %6356 = vmatmul.mubr.f32.gmra.mrb[10].mxu1 %v11154_v9 }
 0x6ae   : > { %8018 = vmatpush1.bf16.msra.mxu1 %v8017_v60  ;;  %7129 = vmatprep.mubr.msk.f32.mxu1 %vm5438_vm10, %v11043_v62  ;;  %v7122_v62 = vld [vmem:[%s11350_s7 + $0x248] sm:$0xff]  ;;  %v6512_v60 = vcombine.low %v6367_v44, %v6484_v41 }
 0x6af   : > { %8019 = vmatprep.subr.bf16.mxu1 %v8297_v13  ;;  %v8032_v2 = vpack.c.bf16 %v7122_v62, %v7121_v27 }
 0x6b2   : > { %8021 = vmatpush1.bf16.msra.mxu1 %v8020_v24 }
 0x6b3   : > { %8022 = vmatprep.subr.bf16.mxu1 %v8297_v13 }
 0x6b6   : > { %8024 = vmatpush1.bf16.msra.mxu1 %v8023_v14 }
 0x6b7   : > { %8025 = vmatprep.subr.bf16.mxu1 %v8297_v13 }
 0x6ba   : > { %8027 = vmatpush1.bf16.msra.mxu1 %v8026_v37 }
 0x6bb   : > { %8028 = vmatprep.subr.bf16.mxu1 %v8297_v13 }
 0x6be   : > { %8030 = vmatpush1.bf16.msra.mxu1 %v8029_v58  ;;  %v6636_v58 = vld [vmem:[#allocation7] sm:$0x3f] }
 0x6bf   : > { %8031 = vmatprep.subr.bf16.mxu1 %v8297_v13  ;;  %v6642_v26 = vsel %vm6617_vm1, %v6636_v58, -inf }
 0x6c2   : > { %8033 = vmatpush1.bf16.msra.mxu1 %v8032_v2  ;;  %v6641_v2 = vld [vmem:[#allocation7 + $0x28] sm:$0x3f] }
 0x6c3   : > { %8034 = vmatprep.subr.bf16.mxu1 %v8297_v13 }
 0x6c6   : > { %8036 = vmatpush1.bf16.msra.mxu1 %v8035_v63 }
 0x6c7   : > { %8037 = vmatprep.subr.bf16.mxu1 %v8297_v13 }
 0x6ca   : > { %8039 = vmatpush1.bf16.msra.mxu1 %v8038_v16  ;;  %v6649_v16 = vsel %vm6617_vm1, %v6641_v2, -inf }
 0x6cb   : > { %8040 = vmatprep.subr.bf16.mxu1 %v8297_v13 }
 0x6ce   : > { %8042 = vmatpush1.bf16.msra.mxu1 %v8041_v52 }
 0x6cf   : > { %8043 = vmatprep.subr.bf16.mxu1 %v8297_v13 }
 0x6d1   : > { %6468 = vmatmul.mubr.f32.vlgmr.msra.gmra.mrb[8].mxu1 %v11046_v34  ;;  %v8050_v34 = vpack.c.bf16 %v7136_v30, %v7135_v17 }
 0x6d2   : > { %7130 = vmatprep.mubr.msk.f32.mxu1 %vm5438_vm10, %v6396_v39  ;;  %8045 = vmatpush1.bf16.msra.mxu1 %v8044_v11 }
 0x6d3   : > { %8046 = vmatprep.subr.bf16.mxu1 %v8297_v13 }
 0x6d5   : > { %6473 = vmatmul.mubr.f32.gmra.mrb[10].mxu1 %v6395_v53 }
 0x6d6   : > { %8048 = vmatpush1.bf16.msra.mxu1 %v8047_v32  ;;  %7151 = vmatprep.mubr.msk.f32.mxu1 %vm5438_vm10, %v11148_v6  ;;  %v6513_v6 = vcombine.high %v6367_v44, %v6484_v41 }
 0x6d7   : > { %8049 = vmatprep.subr.bf16.mxu1 %v8297_v13 }
 0x6da   : > { %8051 = vmatpush1.bf16.msra.mxu1 %v8050_v34 }
 0x6db   : > { %8052 = vmatprep.subr.bf16.mxu1 %v8297_v13 }
 0x6de   : > { %8054 = vmatpush1.bf16.msra.mxu1 %v8053_v48 }
 0x6df   : > { %8055 = vmatprep.subr.bf16.mxu1 %v8297_v13 }
 0x6e2   : > { %8057 = vmatpush1.bf16.msra.mxu1 %v8056_v50 }
 0x6e3   : > { %8058 = vmatprep.subr.bf16.mxu1 %v8297_v13 }
 0x6e6   : > { %8060 = vmatpush1.bf16.msra.mxu1 %v8059_v61 }
 0x6e7   : > { %8061 = vmatprep.subr.bf16.mxu1 %v8297_v13 }
 0x6ea   : > { %8063 = vmatpush1.bf16.msra.mxu1 %v8062_v28 }
 0x6eb   : > { %8064 = vmatprep.subr.bf16.mxu1 %v8297_v13 }
 0x6ee   : > { %8066 = vmatpush1.bf16.msra.mxu1 %v8065_v22 }
 0x6ef   : > { %8067 = vmatprep.subr.bf16.mxu1 %v8297_v13 }
 0x6f2   : > { %8069 = vmatpush1.bf16.msra.mxu1 %v8068_v56 }
 0x6f3   : > { %8070 = vmatprep.subr.bf16.mxu1 %v8297_v13  ;;  %v7153_v13 = vld [vmem:[%s11351_s8] ss:$0 sm:$0xff] }
 0x6f6   : > { %8072 = vmatpush1.bf16.msra.mxu1 %v8071_v18 }
 0x6f9   : > { %6585 = vmatmul.mubr.f32.vlgmr.msra.gmra.mrb[8].mxu1 %v11154_v9 }
 0x6fa   : > { %7152 = vmatprep.mubr.msk.f32.mxu1 %vm5438_vm10, %v6513_v6 }
 0x6fd   : > { %6590 = vmatmul.mubr.f32.gmra.mrb[10].mxu1 %v6512_v60 }
 0x7cc   : > { %v6586_v9 = vpop.f32.mrb[8].mxu1 }
 0x7cd   : > { %v6604_v21 = vmul.f32 %v7153_v13, %v6586_v9  ;;  %v6588_v24 = vpop.f32.mrb[9].mxu1 }
 0x7cf   : > { %v6613_v8 = vadd.f32 %v7154_v46, %v6604_v21 }
 0x7d0   : > { %v6591_v36 = vpop.f32.mrb[10].mxu1 }
 0x7d1   : > { %v6615_v14 = vmax.f32 %v6613_v8, 0.0  ;;  %v6605_v10 = vmul.f32 %v7153_v13, %v6591_v36  ;;  %v6593_v1 = vpop.f32.mrb[11].mxu1 }
 0x7d3   : > { %v6626_v37 = vcombine.high %v6615_v14, %v6615_v14  ;;  %6632 = vst.msk [vmem:[#allocation7 + $0x9] sm:$0xf] %vm6631_vm2, %v6615_v14  ;;  %v6614_v0 = vadd.f32 %v7154_v46, %v6605_v10 }
 0x7d5   : > { %6633 = vst.msk [vmem:[#allocation7 + $0x11] sm:$0xf] %vm6631_vm2, %v6626_v37  ;;  %v6616_v57 = vmax.f32 %v6614_v0, 0.0 }
 0x7d7   : > { %v6627_v23 = vcombine.high %v6616_v57, %v6616_v57  ;;  %6634 = vst.msk [vmem:[#allocation7 + $0x19] sm:$0xf] %vm6631_vm2, %v6616_v57 }
 0x7d9   : > { %6635 = vst.msk [vmem:[#allocation7 + $0x21] sm:$0xf] %vm6631_vm2, %v6627_v23 }
 0x7da   : > { %v6637_v27 = vld [vmem:[#allocation7 + $0x8] sm:$0x3f] }
 0x7db   : > { %v6643_v40 = vsel %vm6617_vm1, %v6637_v27, -inf }
 0x7dc   : > { %v6638_v62 = vld [vmem:[#allocation7 + $0x10] sm:$0x3f]  ;;  %v6644_v54 = vmax.f32 %v6642_v26, %v6643_v40 }
 0x7dd   : > { %v6645_v55 = vsel %vm6617_vm1, %v6638_v62, -inf }
 0x7de   : > { %v6639_v63 = vld [vmem:[#allocation7 + $0x18] sm:$0x3f] }
 0x7df   : > { %v6646_v3 = vsel %vm6617_vm1, %v6639_v63, -inf }
 0x7e0   : > { %v6640_v12 = vld [vmem:[#allocation7 + $0x20] sm:$0x3f]  ;;  %v6647_v52 = vmax.f32 %v6645_v55, %v6646_v3 }
 0x7e1   : > { %v6648_v5 = vsel %vm6617_vm1, %v6640_v12, -inf }
 0x7e2   : > { %v6650_v51 = vmax.f32 %v6648_v5, %v6649_v16  ;;  %v6651_v44 = vmax.f32 %v6644_v54, %v6647_v52 }
 0x7e4   : > { %v6652_v11 = vmax.f32 %v6647_v52, %v6650_v51  ;;  %v6655_v59 = vcombine.high %v6651_v44, %v6651_v44  ;;  %v6662_v31 = vrot.slane %v6651_v44, %v9535_v4 }
 0x7e6   : > { %v6669_v39 = vrot.slane %v6655_v59, %v9535_v4  ;;  %v6670_v32 = vcombine.high %v6662_v31, %v6662_v31  ;;  %v6671_v53 = vcombine.high %v6652_v11, %v6652_v11  ;;  %v6678_v17 = vrot.slane %v6652_v11, %v9535_v4 }
 0x7e7   : > { %v6694_v30 = vsel %vm6693_vm3, %v6662_v31, -inf }
 0x7e8   : > { %v6685_v34 = vrot.slane %v6671_v53, %v9535_v4  ;;  %v6686_v19 = vcombine.high %v6678_v17, %v6678_v17  ;;  %v6695_v45 = vrot.slane %v6694_v30, 4  ;;  %v6701_v48 = vsel %vm6693_vm3, %v6670_v32, -inf }
 0x7e9   : > { %v6702_v20 = vrot.slane %v6701_v48, 4  ;;  %v6708_v47 = vsel %vm6693_vm3, %v6669_v39, -inf  ;;  %v6715_v50 = vsel %vm6693_vm3, %v6678_v17, -inf }
 0x7ea   : > { %v6696_v25 = vmax.f32 %v6694_v30, %v6695_v45  ;;  %v6709_v33 = vrot.slane %v6708_v47, 4  ;;  %v6716_v61 = vrot.slane %v6715_v50, 4  ;;  %v6722_v35 = vsel %vm6693_vm3, %v6686_v19, -inf }
 0x7eb   : > { %v6703_v43 = vmax.f32 %v6701_v48, %v6702_v20  ;;  %v6723_v28 = vrot.slane %v6722_v35, 4  ;;  %v6729_v38 = vsel %vm6693_vm3, %v6685_v34, -inf }
 0x7ec   : > { %v6697_v7 = vrot.slane %v6696_v25, 2  ;;  %v6710_v4 = vmax.f32 %v6708_v47, %v6709_v33  ;;  %v6717_v22 = vmax.f32 %v6715_v50, %v6716_v61  ;;  %v6730_v42 = vrot.slane %v6729_v38, 4 }
 0x7ed   : > { %v6704_v49 = vrot.slane %v6703_v43, 2  ;;  %v6724_v56 = vmax.f32 %v6722_v35, %v6723_v28 }
 0x7ee   : > { %v6698_v29 = vmax.f32 %v6696_v25, %v6697_v7  ;;  %v6711_v15 = vrot.slane %v6710_v4, 2  ;;  %v6718_v18 = vrot.slane %v6717_v22, 2  ;;  %v6731_v41 = vmax.f32 %v6729_v38, %v6730_v42 }
 0x7ef   : > { %v6705_v6 = vmax.f32 %v6703_v43, %v6704_v49  ;;  %v6725_v60 = vrot.slane %v6724_v56, 2 }
 0x7f0   : > { %v6699_v13 = vrot.slane %v6698_v29, 1  ;;  %v6712_v9 = vmax.f32 %v6710_v4, %v6711_v15  ;;  %v6719_v46 = vmax.f32 %v6717_v22, %v6718_v18  ;;  %v6732_v21 = vrot.slane %v6731_v41, 2 }
 0x7f1   : > { %v6706_v24 = vrot.slane %v6705_v6, 1  ;;  %v6726_v8 = vmax.f32 %v6724_v56, %v6725_v60 }
 0x7f2   : > { %v6713_v36 = vrot.slane %v6712_v9, 1  ;;  %v6720_v14 = vrot.slane %v6719_v46, 1  ;;  %v6733_v10 = vmax.f32 %v6731_v41, %v6732_v21  ;;  %v6700_v1 = vmax.f32 %v6698_v29, %v6699_v13 }
 0x7f3   : > { %v6707_v37 = vmax.f32 %v6705_v6, %v6706_v24  ;;  %v6727_v0 = vrot.slane %v6726_v8, 1 }
 0x7f4   : > { %v6714_v57 = vmax.f32 %v6712_v9, %v6713_v36  ;;  %v6734_v23 = vrot.slane %v6733_v10, 1  ;;  %v6721_v58 = vmax.f32 %v6719_v46, %v6720_v14 }
 0x7f5   : > { %v6728_v27 = vmax.f32 %v6726_v8, %v6727_v0  ;;  %v6736_v62 = vmax.f32 %v6700_v1, %v6707_v37 }
 0x7f6   : > { %v6735_v2 = vmax.f32 %v6733_v10, %v6734_v23  ;;  %v6737_v26 = vmax.f32 %v6707_v37, %v6714_v57 }
 0x7f7   : > { %v6738_v40 = vmax.f32 %v6721_v58, %v6728_v27 }
 0x7f8   : > { %v6739_v63 = vmax.f32 %v6728_v27, %v6735_v2  ;;  %v6744_v55 = vsel %vm4317_vm14, %v6737_v26, %v6736_v62 }
 0x7f9   : > { %v6745_v3 = vsel %vm4319_vm13, %v6738_v40, %v6744_v55 }
 0x7fa   : > { %v6746_v16 = vsel %vm4321_vm15, %v6739_v63, %v6745_v3 }
 0x7fb   : > { %6748 = vst.msk [vmem:[%s357_s30] sm:$0xf] %vm6631_vm2, %v6746_v16 }
 0x7fc PF: > { %s20_s13 = sadd.s32 1, %s8285_s13  }
 0x7fd   : > { %p17_p4 = scmp.ge.s32.totalorder %s20_s13, 4  }
 0x7ff   :  { %19 = sbr.rel (!%p17_p4) target bundleno = 1 (0x1), region = 117 }

</bundles_post_ra>
